<compile_context>
chip_gen: v7x
topology: tpu7x:2x2x1
jax: 0.10.0
libtpu: 0.0.40
codegen_flags: <defaults>
</compile_context>

<pallas_src>
import functools
import math

import jax
import jax.numpy as jnp
from jax.experimental import pallas as pl
from jax.experimental.pallas import tpu as pltpu


# MXU-native input dtype; activations also live in HBM at this dtype. Accumulation stays f32.
MXU_DTYPE = jnp.bfloat16
ACT_DTYPE = jnp.bfloat16


def _round_up(x, m):
    return (x + m - 1) // m * m


def _tile_dim(dim, tmax):
    """Pick a tile for one dim. tmax must be hardware aligned (mult of 8/128)."""
    if dim <= tmax:
        return dim, dim                 # full-dim block (exempt from (8,128) rule)
    return tmax, _round_up(dim, tmax)   # tiled, array padded to a multiple


# ---------------------------------------------------------------------------
# Pallas kernels
# ---------------------------------------------------------------------------
def _linear_kernel(x_ref, w_ref, b_ref, o_ref, acc_ref, *, activation, transpose_rhs):
    # K-axis accumulation: zero at k==0, write-out at k==last.
    @pl.when(pl.program_id(2) == 0)
    def _():
        acc_ref[...] = jnp.zeros_like(acc_ref)

    x = x_ref[...]
    w = w_ref[...]
    if x.dtype != MXU_DTYPE:
        x = x.astype(MXU_DTYPE)
    if w.dtype != MXU_DTYPE:
        w = w.astype(MXU_DTYPE)
    if transpose_rhs:
        # w tile is (tn, tk): contract on its dim 1 (no HBM-side .T materialization).
        acc_ref[...] += jax.lax.dot_general(
            x, w, (((1,), (1,)), ((), ())), preferred_element_type=jnp.float32)
    else:
        acc_ref[...] += jnp.dot(x, w, preferred_element_type=jnp.float32)

    @pl.when(pl.program_id(2) == pl.num_programs(2) - 1)
    def _():
        y = acc_ref[...] + b_ref[...]
        if activation == "relu":
            y = jnp.maximum(y, 0.0)
        o_ref[...] = y.astype(o_ref.dtype)


def _ln_res_kernel(x_ref, r_ref, g_ref, b_ref, o_ref, *, eps):
    # Fused residual-add + LayerNorm (memory-bound; one HBM round trip instead of two).
    x = x_ref[...].astype(jnp.float32) + r_ref[...].astype(jnp.float32)
    mu = jnp.mean(x, axis=-1, keepdims=True)
    xc = x - mu
    var = jnp.mean(xc * xc, axis=-1, keepdims=True)
    y = xc * jax.lax.rsqrt(var + eps)
    o_ref[...] = (y * g_ref[...] + b_ref[...]).astype(o_ref.dtype)


def _rel_attn_kernel(q_ref, k_ref, v_ref, rel_ref, mask_ref, o_ref,
                     *, num_heads, head_dim, window):
    # One batch per grid step, all heads processed here -> lane-dense (Sq, D) output block.
    Sq = q_ref.shape[1]
    Sk = k_ref.shape[1]
    H, dh, w = num_heads, head_dim, window
    C = 2 * w + 1

    q = q_ref[0].astype(jnp.float32)          # (Sq, D) f32 for the q*rel products
    k = k_ref[0]                              # (Sk, D) bf16 MXU operand (edge buckets)
    kf = k.astype(jnp.float32)                # f32 copy for the diagonal band
    v = v_ref[0]                              # (Sk, D) bf16
    rel = rel_ref[...].astype(jnp.float32)    # (C, dh), 1/sqrt(dh) pre-folded on the host
    mask = mask_ref[0] != 0                   # (mSq, Sk) bool straight from int8 (no upcast)

    # ---- head-independent relative-distance machinery (hoisted out of the head loop) ----
    qi = jax.lax.broadcasted_iota(jnp.int32, (Sq, Sk), 0)
    kj = jax.lax.broadcasted_iota(jnp.int32, (Sq, Sk), 1)
    dist = qi - kj
    lo_edge = dist <= -w                      # bucket 0       (clipped far-negative distances)
    hi_edge = dist >= w                       # bucket 2w      (clipped far-positive distances)

    # Interior buckets |i-j| < w are single diagonals: pre-roll K once per shift (shared by all
    # heads). roll(x, s)[i] = x[(i-s) mod n], so row i holds K[i-s]; wrapped rows are never
    # selected because the (dist == s) mask only fires for valid key columns.
    Smax = max(Sq, Sk)
    if Smax > Sk:
        kf_pad = jnp.concatenate(
            [kf, jnp.zeros((Smax - Sk, kf.shape[1]), jnp.float32)], axis=0)
    else:
        kf_pad = kf
    shifts = list(range(-(w - 1), w))         # interior shift s; bucket index = s + w
    k_shift = []
    diag_mask = []
    for s in shifts:
        sh = s % Smax
        kr = kf_pad if sh == 0 else pltpu.roll(kf_pad, shift=sh, axis=0)
        if Smax != Sq:
            kr = kr[:Sq]
        k_shift.append(kr)                    # (Sq, D)
        diag_mask.append(dist == s)

    neg = jnp.float32(-1e30)
    # TODO(synk): for realistic H>=8 / window>=16 replace these Python-unrolled loops with
    #             lax.fori_loop and flash-style Sq/Sk tiling (v7x 64 MiB VMEM); at moderate
    #             sizes whole-sequence blocks + static unroll are fine.
    for h in range(H):
        sl = slice(h * dh, (h + 1) * dh)
        qh = q[:, sl]                         # (Sq, dh) f32
        kh = k[:, sl]                         # (Sk, dh) bf16
        vh = v[:, sl]                         # (Sk, dh) bf16

        # Edge buckets: two full MXU matmuls cover both clipped triangles.
        s_lo = jax.lax.dot_general((qh * rel[0]).astype(MXU_DTYPE), kh,
                                   (((1,), (1,)), ((), ())),
                                   preferred_element_type=jnp.float32)
        s_hi = jax.lax.dot_general((qh * rel[C - 1]).astype(MXU_DTYPE), kh,
                                   (((1,), (1,)), ((), ())),
                                   preferred_element_type=jnp.float32)
        scores = jnp.where(hi_edge, s_hi, jnp.where(lo_edge, s_lo, 0.0))

        # Interior buckets: O(Sq*dh) per diagonal (VPU mul + reduce), no wasted MXU work.
        for idx, s in enumerate(shifts):
            dvals = jnp.sum((qh * rel[s + w]) * k_shift[idx][:, sl],
                            axis=-1, keepdims=True)            # (Sq, 1)
            scores = jnp.where(diag_mask[idx], dvals, scores)

        # Masked softmax in f32 (finite large-negative fill avoids NaNs on fully-masked rows).
        scores = jnp.where(mask, scores, neg)
        m = jnp.max(scores, axis=-1, keepdims=True)
        p = jnp.exp(scores - m)
        denom = jnp.sum(p, axis=-1, keepdims=True)
        attn = (p * pl.reciprocal(denom, approx=True)).astype(MXU_DTYPE)  # EUP slot

        o_ref[0, :, sl] = jnp.dot(attn, vh,
                                  preferred_element_type=jnp.float32).astype(o_ref.dtype)


# ---------------------------------------------------------------------------
# Pallas wrappers
# ---------------------------------------------------------------------------
def pallas_linear(x2d, w, b, activation="none", transpose_rhs=False,
                  out_dtype=ACT_DTYPE, tm_max=512, tn_max=512, tk_max=1024):
    """y = act(x @ w + b) (or x @ w.T if transpose_rhs), tiled (M,N,K), f32 accumulator.

    bf16 x/w tiles at 512x512x1024 double-buffered stay well inside the default scoped VMEM
    on v5e/v6e and v7x's 64 MiB physical VMEM.
    """
    M, K = x2d.shape
    N = w.shape[0] if transpose_rhs else w.shape[1]

    tm, Mp = _tile_dim(M, tm_max)
    tn, Np = _tile_dim(N, tn_max)
    tk, Kp = _tile_dim(K, tk_max)

    # TODO(synk): for non-tile-aligned dims (e.g. odd vocab sizes) pre-pad the weight once
    #             outside the layer loop instead of per call; aligned model dims make these no-ops.
    if (Mp, Kp) != (M, K):
        x2d = jnp.pad(x2d, ((0, Mp - M), (0, Kp - K)))
    if transpose_rhs:
        if (Np, Kp) != w.shape:
            w = jnp.pad(w, ((0, Np - N), (0, Kp - K)))
        w_spec = pl.BlockSpec((tn, tk), lambda i, j, k: (j, k))
    else:
        if (Kp, Np) != w.shape:
            w = jnp.pad(w, ((0, Kp - K), (0, Np - N)))
        w_spec = pl.BlockSpec((tk, tn), lambda i, j, k: (k, j))
    b2 = b.reshape(1, N)
    if Np != N:
        b2 = jnp.pad(b2, ((0, 0), (0, Np - N)))

    grid = (Mp // tm, Np // tn, Kp // tk)
    kern = functools.partial(_linear_kernel, activation=activation,
                             transpose_rhs=transpose_rhs)
    out = pl.pallas_call(
        kern,
        out_shape=jax.ShapeDtypeStruct((Mp, Np), out_dtype),
        grid=grid,
        in_specs=[
            pl.BlockSpec((tm, tk), lambda i, j, k: (i, k)),
            w_spec,
            pl.BlockSpec((1, tn), lambda i, j, k: (0, j)),
        ],
        out_specs=pl.BlockSpec((tm, tn), lambda i, j, k: (i, j)),
        scratch_shapes=[pltpu.VMEM((tm, tn), jnp.float32)],
        compiler_params=pltpu.CompilerParams(
            dimension_semantics=("parallel", "parallel", "arbitrary")),
    )(x2d, w, b2)

    if (Mp, Np) != (M, N):
        out = out[:M, :N]
    return out


def pallas_layernorm_residual(x2d, r2d, gamma, beta, eps=1e-5, tm_max=512):
    """LayerNorm(x + r), row-tiled. bf16 in/out, f32 math. tm=512 fits v5e's 16 MiB scoped VMEM."""
    M, D = x2d.shape
    tm, Mp = _tile_dim(M, tm_max)
    if Mp != M:
        x2d = jnp.pad(x2d, ((0, Mp - M), (0, 0)))
        r2d = jnp.pad(r2d, ((0, Mp - M), (0, 0)))
    kern = functools.partial(_ln_res_kernel, eps=eps)
    out = pl.pallas_call(
        kern,
        out_shape=jax.ShapeDtypeStruct((Mp, D), ACT_DTYPE),
        grid=(Mp // tm,),
        in_specs=[
            pl.BlockSpec((tm, D), lambda i: (i, 0)),
            pl.BlockSpec((tm, D), lambda i: (i, 0)),
            pl.BlockSpec((1, D), lambda i: (0, 0)),
            pl.BlockSpec((1, D), lambda i: (0, 0)),
        ],
        out_specs=pl.BlockSpec((tm, D), lambda i: (i, 0)),
        compiler_params=pltpu.CompilerParams(dimension_semantics=("parallel",)),
    )(x2d, r2d, gamma.reshape(1, D), beta.reshape(1, D))
    if Mp != M:
        out = out[:M]
    return out


def pallas_rel_attention(q_arr, kv_arr, rel_table, mask_i8, num_heads, window,
                         d_model, q_col, k_col, out_dtype=ACT_DTYPE):
    """Relative-position MHA.

    q/k/v are read straight out of the fused projection arrays via column-offset index maps
    (q at block-column q_col of q_arr; k/v at block-columns k_col/k_col+1 of kv_arr) — no XLA
    slice materialization of q/k/v in HBM.
    """
    B, Sq = q_arr.shape[0], q_arr.shape[1]
    Sk = kv_arr.shape[1]
    mSq = mask_i8.shape[1]
    dh = d_model // num_heads
    C = 2 * window + 1
    kern = functools.partial(_rel_attn_kernel, num_heads=num_heads,
                             head_dim=dh, window=window)
    # TODO(synk): for long sequences on v7x (64 MiB VMEM) add flash-style Sq/Sk tiling with
    #             online-softmax accumulators; whole-sequence blocks per batch are fine here.
    return pl.pallas_call(
        kern,
        out_shape=jax.ShapeDtypeStruct((B, Sq, d_model), out_dtype),
        grid=(B,),
        in_specs=[
            pl.BlockSpec((1, Sq, d_model), lambda b: (b, 0, q_col)),
            pl.BlockSpec((1, Sk, d_model), lambda b: (b, 0, k_col)),
            pl.BlockSpec((1, Sk, d_model), lambda b: (b, 0, k_col + 1)),
            pl.BlockSpec((C, dh), lambda b: (0, 0)),
            pl.BlockSpec((1, mSq, Sk), lambda b: (b, 0, 0)),
        ],
        out_specs=pl.BlockSpec((1, Sq, d_model), lambda b: (b, 0, 0)),
        compiler_params=pltpu.CompilerParams(dimension_semantics=("parallel",)),
    )(q_arr, kv_arr, kv_arr, rel_table, mask_i8)


# ---------------------------------------------------------------------------
# Model pieces (glue in plain JAX, compute via the kernels above)
# ---------------------------------------------------------------------------
def embed(emb_table, ids):
    dim = emb_table.shape[1]
    # InvertibleEmbedding.embed: table lookup scaled by sqrt(dim) (tied-embedding convention).
    return (emb_table[ids].astype(jnp.float32) * jnp.sqrt(jnp.float32(dim))).astype(ACT_DTYPE)


def invert(emb_table, x):
    # InvertibleEmbedding.invert: project onto the transposed embedding matrix -> logits (f32).
    B, S, D = x.shape
    V = emb_table.shape[0]
    logits = pallas_linear(x.reshape(B * S, D), emb_table,
                           jnp.zeros((V,), jnp.float32),
                           transpose_rhs=True, out_dtype=jnp.float32)
    return logits.reshape(B, S, V)


def self_mha(p, x, mask_i8, rel_table, num_heads, window):
    # Fused QKV projection; q/k/v split happens inside the attention BlockSpecs.
    B, S, D = x.shape
    qkv = pallas_linear(x.reshape(B * S, D), p["wqkv"], p["bqkv"]).reshape(B, S, 3 * D)
    o = pallas_rel_attention(qkv, qkv, rel_table, mask_i8, num_heads, window,
                             d_model=D, q_col=0, k_col=1)
    return pallas_linear(o.reshape(B * S, D), p["wo"], p["bo"]).reshape(B, S, D)


def cross_mha(p, x_q, x_kv, mask_i8, rel_table, num_heads, window):
    B, Sq, D = x_q.shape
    Sk = x_kv.shape[1]
    q = pallas_linear(x_q.reshape(B * Sq, D), p["wq"], p["bq"]).reshape(B, Sq, D)
    kv = pallas_linear(x_kv.reshape(B * Sk, D), p["wkv"], p["bkv"]).reshape(B, Sk, 2 * D)
    o = pallas_rel_attention(q, kv, rel_table, mask_i8, num_heads, window,
                             d_model=D, q_col=0, k_col=0)
    return pallas_linear(o.reshape(B * Sq, D), p["wo"], p["bo"]).reshape(B, Sq, D)


def ffn(p, x):
    B, S, D = x.shape
    h = pallas_linear(x.reshape(B * S, D), p["w1"], p["b1"], activation="relu")
    return pallas_linear(h, p["w2"], p["b2"]).reshape(B, S, D)


def add_ln(p, x, sub):
    B, S, D = x.shape
    y = pallas_layernorm_residual(x.reshape(B * S, D), sub.reshape(B * S, D),
                                  p["g"], p["b"])
    return y.reshape(B, S, D)


def encoder_layer(p, x, src_mask_i8, rel_table, num_heads, window):
    x = add_ln(p["ln1"], x, self_mha(p["self"], x, src_mask_i8, rel_table, num_heads, window))
    x = add_ln(p["ln2"], x, ffn(p["ffn"], x))
    return x


def decoder_layer(p, x, enc, dec_mask_i8, cross_mask_i8, rel_table, num_heads, window):
    x = add_ln(p["ln1"], x, self_mha(p["self"], x, dec_mask_i8, rel_table, num_heads, window))
    x = add_ln(p["ln2"], x, cross_mha(p["cross"], x, enc, cross_mask_i8, rel_table,
                                      num_heads, window))
    x = add_ln(p["ln3"], x, ffn(p["ffn"], x))
    return x


def forward_train(params, source_ids, source_mask, target_ids, target_mask,
                  num_heads, window_size):
    """MTRelative.forward_train -> logits over vocab of shape (B, St, V)."""
    src = embed(params["emb"], source_ids)
    tgt = embed(params["emb"], target_ids)

    # Only the (2w+1, dh) bucket table is passed; distances/buckets are rebuilt in-kernel from
    # iota (no O(L^2 * dh) mediator tensor is ever materialized).
    rel_table = params["rel"]

    src_mask_i8 = (source_mask != 0).astype(jnp.int8)     # (B, 1, Ss)
    tgt_mask_i8 = (target_mask != 0).astype(jnp.int8)     # (B, St, St)

    x = src
    for lp in params["enc_layers"]:
        x = encoder_layer(lp, x, src_mask_i8, rel_table, num_heads, window_size)
    enc_out = x

    y = tgt
    for lp in params["dec_layers"]:
        y = decoder_layer(lp, y, enc_out, tgt_mask_i8, src_mask_i8,
                          rel_table, num_heads, window_size)

    return invert(params["emb"], y)
    # TODO(synk): Base.get_loss (label-smoothed cross-entropy) is not shown in the reference
    #             module; only the network forward is kernelized.
    # TODO(synk): forward_dev beam search is a data-dependent Python while-loop (host control
    #             flow) and is not translated to a Pallas kernel.
    # TODO(synk): Relative.adjust_attention's exact scaling is not shown; score is assumed to be
    #             sum_d q*med*k with 1/sqrt(dh) scaling.


# ---------------------------------------------------------------------------
# Parameter init + one-time host-side prep (bf16 weight casts, scale folding)
# ---------------------------------------------------------------------------
def init_params(key, vocab_size, dim, num_heads, num_layers, window_size):
    dh = dim // num_heads
    hidden = 4 * dim  # TODO(synk): exact FFN expansion/activation of APE not shown; using 4x + ReLU.
    keys = iter(jax.random.split(key, 1024))

    def w(shape, scale=0.02):
        return jax.random.normal(next(keys), shape, jnp.float32) * scale

    def self_attn_params():
        return {"wqkv": w((dim, 3 * dim)), "bqkv": jnp.zeros((3 * dim,), jnp.float32),
                "wo": w((dim, dim)), "bo": jnp.zeros((dim,), jnp.float32)}

    def cross_attn_params():
        return {"wq": w((dim, dim)), "bq": jnp.zeros((dim,), jnp.float32),
                "wkv": w((dim, 2 * dim)), "bkv": jnp.zeros((2 * dim,), jnp.float32),
                "wo": w((dim, dim)), "bo": jnp.zeros((dim,), jnp.float32)}

    def ffn_params():
        return {"w1": w((dim, hidden)), "b1": jnp.zeros((hidden,), jnp.float32),
                "w2": w((hidden, dim)), "b2": jnp.zeros((dim,), jnp.float32)}

    def ln_params():
        return {"g": jnp.ones((dim,), jnp.float32), "b": jnp.zeros((dim,), jnp.float32)}

    enc_layers = [{"self": self_attn_params(), "ffn": ffn_params(),
                   "ln1": ln_params(), "ln2": ln_params()}
                  for _ in range(num_layers[0])]
    dec_layers = [{"self": self_attn_params(), "cross": cross_attn_params(),
                   "ffn": ffn_params(),
                   "ln1": ln_params(), "ln2": ln_params(), "ln3": ln_params()}
                  for _ in range(num_layers[1])]

    return {
        "emb": w((vocab_size, dim), scale=1.0 / math.sqrt(dim)),
        "rel": w((2 * window_size + 1, dh), scale=1.0 / math.sqrt(dh)) + 1.0,
        "enc_layers": enc_layers,
        "dec_layers": dec_layers,
    }


def prepare_params(params):
    """One-time prep: cast matmul weights/embedding to bf16, fold 1/sqrt(dh) into the rel table.
    Biases and LayerNorm affine stay f32 (added to f32 accumulators / used in f32 LN math)."""
    dh = params["rel"].shape[1]

    def cast(pd, wkeys):
        out = dict(pd)
        for kk in wkeys:
            out[kk] = pd[kk].astype(MXU_DTYPE)
        return out

    enc = [{"self": cast(l["self"], ("wqkv", "wo")),
            "ffn": cast(l["ffn"], ("w1", "w2")),
            "ln1": l["ln1"], "ln2": l["ln2"]} for l in params["enc_layers"]]
    dec = [{"self": cast(l["self"], ("wqkv", "wo")),
            "cross": cast(l["cross"], ("wq", "wkv", "wo")),
            "ffn": cast(l["ffn"], ("w1", "w2")),
            "ln1": l["ln1"], "ln2": l["ln2"], "ln3": l["ln3"]}
           for l in params["dec_layers"]]
    return {
        "emb": params["emb"].astype(MXU_DTYPE),
        "rel": (params["rel"] * (1.0 / math.sqrt(dh))).astype(jnp.float32),
        "enc_layers": enc,
        "dec_layers": dec,
    }


# ---------------------------------------------------------------------------
if __name__ == "__main__":
    vocab_size = 50
    dim = 128            # multiple of 128 -> lane-aligned q/k/v column blocks in the attention kernel
    num_heads = 4
    num_layers = (2, 2)
    window_size = 4
    sos_token_id, eos_token_id = 1, 2

    B, Ss, St = 2, 8, 8

    key = jax.random.PRNGKey(0)
    pkey, k_src, k_tgt = jax.random.split(key, 3)
    params = prepare_params(
        init_params(pkey, vocab_size, dim, num_heads, num_layers, window_size))

    source_ids = jax.random.randint(k_src, (B, Ss), 0, vocab_size, dtype=jnp.int32)
    target_ids = jax.random.randint(k_tgt, (B, St), 0, vocab_size, dtype=jnp.int32)

    # source padding mask (B, 1, Ss): sample 1 has its last two source tokens padded.
    source_mask = jnp.ones((B, 1, Ss), jnp.float32).at[1, 0, Ss - 2:].set(0.0)
    # causal target mask (B, St, St)
    causal_mask = jnp.broadcast_to(
        jnp.tril(jnp.ones((St, St), jnp.float32))[None], (B, St, St))

    fwd = jax.jit(functools.partial(forward_train,
                                    num_heads=num_heads, window_size=window_size))
    logits = fwd(params, source_ids, source_mask, target_ids, causal_mask)
    jax.block_until_ready(logits)

    assert logits.shape == (B, St, vocab_size)
    assert bool(jnp.all(jnp.isfinite(logits)))
    print("KERNEL_OK")
</pallas_src>

<mosaic_0001>
module attributes {stable_mosaic.version = 11 : i64} {
  func.func @_linear_kernel(%arg0: i32, %arg1: i32, %arg2: i32, %arg3: memref<16x128xbf16, #tpu.memory_space<vmem>>, %arg4: memref<128x384xbf16, #tpu.memory_space<vmem>>, %arg5: memref<1x384xf32, #tpu.memory_space<vmem>>, %arg6: memref<16x384xbf16, #tpu.memory_space<vmem>>, %arg7: memref<16x384xf32, #tpu.memory_space<vmem>>) attributes {dimension_semantics = [#tpu.dimension_semantics<parallel>, #tpu.dimension_semantics<parallel>, #tpu.dimension_semantics<arbitrary>], iteration_bounds = array<i64: 1, 1, 1>, scalar_prefetch = 0 : i64, scratch_operands = 1 : i64, tpu.core_type = #tpu.core_type<tc>, window_params = [{transform_indices = @transform_0, window_bounds = array<i64: 16, 128>}, {transform_indices = @transform_1, window_bounds = array<i64: 128, 384>}, {transform_indices = @transform_2, window_bounds = array<i64: 1, 384>}, {transform_indices = @transform_3, window_bounds = array<i64: 16, 384>}]} {
    %c0_i32 = arith.constant 0 : i32
    %0 = arith.cmpi eq, %arg2, %c0_i32 : i32
    %1 = arith.extui %0 : i1 to i32
    %c0_i32_0 = arith.constant 0 : i32
    %2 = arith.cmpi ne, %1, %c0_i32_0 : i32
    scf.if %2 {
      %cst_10 = arith.constant 0.000000e+00 : f32
      %12 = vector.broadcast %cst_10 : f32 to vector<16x384xf32>
      %c0_11 = arith.constant 0 : index
      %c0_12 = arith.constant 0 : index
      %13 = vector.load %arg7[%c0_11, %c0_12] : memref<16x384xf32, #tpu.memory_space<vmem>>, vector<16x384xf32>
      tpu.vector_store %arg7[%c0_11, %c0_12], %12 {strides = array<i32>} : memref<16x384xf32, #tpu.memory_space<vmem>>, vector<16x384xf32>,
    } else {
    }
    %c0 = arith.constant 0 : index
    %c0_1 = arith.constant 0 : index
    %3 = vector.load %arg3[%c0, %c0_1] : memref<16x128xbf16, #tpu.memory_space<vmem>>, vector<16x128xbf16>
    %c0_2 = arith.constant 0 : index
    %c0_3 = arith.constant 0 : index
    %4 = vector.load %arg4[%c0_2, %c0_3] : memref<128x384xbf16, #tpu.memory_space<vmem>>, vector<128x384xbf16>
    %c0_4 = arith.constant 0 : index
    %c0_5 = arith.constant 0 : index
    %5 = vector.load %arg7[%c0_4, %c0_5] : memref<16x384xf32, #tpu.memory_space<vmem>>, vector<16x384xf32>
    %cst = arith.constant dense<0.000000e+00> : vector<16x384xf32>
    %6 = tpu.matmul %3, %4, %cst {dimension_numbers = #tpu.dot_dimension_numbers<[1], [0], [0], [1], [0, 0, 1, 1], [], []>} : vector<16x128xbf16>, vector<128x384xbf16>, vector<16x384xf32> -> vector<16x384xf32>
    %7 = arith.addf %5, %6 : vector<16x384xf32>
    %c0_6 = arith.constant 0 : index
    %c0_7 = arith.constant 0 : index
    %8 = vector.load %arg7[%c0_6, %c0_7] : memref<16x384xf32, #tpu.memory_space<vmem>>, vector<16x384xf32>
    tpu.vector_store %arg7[%c0_6, %c0_7], %7 {strides = array<i32>} : memref<16x384xf32, #tpu.memory_space<vmem>>, vector<16x384xf32>,
    %c0_i32_8 = arith.constant 0 : i32
    %9 = arith.cmpi eq, %arg2, %c0_i32_8 : i32
    %10 = arith.extui %9 : i1 to i32
    %c0_i32_9 = arith.constant 0 : i32
    %11 = arith.cmpi ne, %10, %c0_i32_9 : i32
    scf.if %11 {
      %c0_10 = arith.constant 0 : index
      %c0_11 = arith.constant 0 : index
      %12 = vector.load %arg7[%c0_10, %c0_11] : memref<16x384xf32, #tpu.memory_space<vmem>>, vector<16x384xf32>
      %c0_12 = arith.constant 0 : index
      %c0_13 = arith.constant 0 : index
      %13 = vector.load %arg5[%c0_12, %c0_13] : memref<1x384xf32, #tpu.memory_space<vmem>>, vector<1x384xf32>
      %14 = vector.broadcast %13 : vector<1x384xf32> to vector<16x384xf32>
      %15 = arith.addf %12, %14 : vector<16x384xf32>
      %16 = arith.truncf %15 : vector<16x384xf32> to vector<16x384xbf16>
      %c0_14 = arith.constant 0 : index
      %c0_15 = arith.constant 0 : index
      %17 = vector.load %arg6[%c0_14, %c0_15] : memref<16x384xbf16, #tpu.memory_space<vmem>>, vector<16x384xbf16>
      tpu.vector_store %arg6[%c0_14, %c0_15], %16 {strides = array<i32>} : memref<16x384xbf16, #tpu.memory_space<vmem>>, vector<16x384xbf16>,
    } else {
    }
    return
  }
  func.func @transform_0(%arg0: i32, %arg1: i32, %arg2: i32) -> (i32, i32) {
    %c0_i32 = arith.constant 0 : i32
    return %arg0, %arg2 : i32, i32
  }
  func.func @transform_1(%arg0: i32, %arg1: i32, %arg2: i32) -> (i32, i32) {
    %c0_i32 = arith.constant 0 : i32
    return %arg2, %arg1 : i32, i32
  }
  func.func @transform_2(%arg0: i32, %arg1: i32, %arg2: i32) -> (i32, i32) {
    %c0_i32 = arith.constant 0 : i32
    %c0_i32_0 = arith.constant 0 : i32
    return %c0_i32, %arg1 : i32, i32
  }
  func.func @transform_3(%arg0: i32, %arg1: i32, %arg2: i32) -> (i32, i32) {
    %c0_i32 = arith.constant 0 : i32
    return %arg0, %arg1 : i32, i32
  }
}

module attributes {stable_mosaic.version = 11 : i64} {
  func.func @_linear_kernel(%arg0: i32, %arg1: i32, %arg2: i32, %arg3: memref<16x128xbf16, #tpu.memory_space<vmem>>, %arg4: memref<128x128xbf16, #tpu.memory_space<vmem>>, %arg5: memref<1x128xf32, #tpu.memory_space<vmem>>, %arg6: memref<16x128xbf16, #tpu.memory_space<vmem>>, %arg7: memref<16x128xf32, #tpu.memory_space<vmem>>) attributes {dimension_semantics = [#tpu.dimension_semantics<parallel>, #tpu.dimension_semantics<parallel>, #tpu.dimension_semantics<arbitrary>], iteration_bounds = array<i64: 1, 1, 1>, scalar_prefetch = 0 : i64, scratch_operands = 1 : i64, tpu.core_type = #tpu.core_type<tc>, window_params = [{transform_indices = @transform_0, window_bounds = array<i64: 16, 128>}, {transform_indices = @transform_1, window_bounds = array<i64: 128, 128>}, {transform_indices = @transform_2, window_bounds = array<i64: 1, 128>}, {transform_indices = @transform_3, window_bounds = array<i64: 16, 128>}]} {
    %c0_i32 = arith.constant 0 : i32
    %0 = arith.cmpi eq, %arg2, %c0_i32 : i32
    %1 = arith.extui %0 : i1 to i32
    %c0_i32_0 = arith.constant 0 : i32
    %2 = arith.cmpi ne, %1, %c0_i32_0 : i32
    scf.if %2 {
      %cst_10 = arith.constant 0.000000e+00 : f32
      %12 = vector.broadcast %cst_10 : f32 to vector<16x128xf32>
      %c0_11 = arith.constant 0 : index
      %c0_12 = arith.constant 0 : index
      %13 = vector.load %arg7[%c0_11, %c0_12] : memref<16x128xf32, #tpu.memory_space<vmem>>, vector<16x128xf32>
      tpu.vector_store %arg7[%c0_11, %c0_12], %12 {strides = array<i32>} : memref<16x128xf32, #tpu.memory_space<vmem>>, vector<16x128xf32>,
    } else {
    }
    %c0 = arith.constant 0 : index
    %c0_1 = arith.constant 0 : index
    %3 = vector.load %arg3[%c0, %c0_1] : memref<16x128xbf16, #tpu.memory_space<vmem>>, vector<16x128xbf16>
    %c0_2 = arith.constant 0 : index
    %c0_3 = arith.constant 0 : index
    %4 = vector.load %arg4[%c0_2, %c0_3] : memref<128x128xbf16, #tpu.memory_space<vmem>>, vector<128x128xbf16>
    %c0_4 = arith.constant 0 : index
    %c0_5 = arith.constant 0 : index
    %5 = vector.load %arg7[%c0_4, %c0_5] : memref<16x128xf32, #tpu.memory_space<vmem>>, vector<16x128xf32>
    %cst = arith.constant dense<0.000000e+00> : vector<16x128xf32>
    %6 = tpu.matmul %3, %4, %cst {dimension_numbers = #tpu.dot_dimension_numbers<[1], [0], [0], [1], [0, 0, 1, 1], [], []>} : vector<16x128xbf16>, vector<128x128xbf16>, vector<16x128xf32> -> vector<16x128xf32>
    %7 = arith.addf %5, %6 : vector<16x128xf32>
    %c0_6 = arith.constant 0 : index
    %c0_7 = arith.constant 0 : index
    %8 = vector.load %arg7[%c0_6, %c0_7] : memref<16x128xf32, #tpu.memory_space<vmem>>, vector<16x128xf32>
    tpu.vector_store %arg7[%c0_6, %c0_7], %7 {strides = array<i32>} : memref<16x128xf32, #tpu.memory_space<vmem>>, vector<16x128xf32>,
    %c0_i32_8 = arith.constant 0 : i32
    %9 = arith.cmpi eq, %arg2, %c0_i32_8 : i32
    %10 = arith.extui %9 : i1 to i32
    %c0_i32_9 = arith.constant 0 : i32
    %11 = arith.cmpi ne, %10, %c0_i32_9 : i32
    scf.if %11 {
      %c0_10 = arith.constant 0 : index
      %c0_11 = arith.constant 0 : index
      %12 = vector.load %arg7[%c0_10, %c0_11] : memref<16x128xf32, #tpu.memory_space<vmem>>, vector<16x128xf32>
      %c0_12 = arith.constant 0 : index
      %c0_13 = arith.constant 0 : index
      %13 = vector.load %arg5[%c0_12, %c0_13] : memref<1x128xf32, #tpu.memory_space<vmem>>, vector<1x128xf32>
      %14 = vector.broadcast %13 : vector<1x128xf32> to vector<16x128xf32>
      %15 = arith.addf %12, %14 : vector<16x128xf32>
      %16 = arith.truncf %15 : vector<16x128xf32> to vector<16x128xbf16>
      %c0_14 = arith.constant 0 : index
      %c0_15 = arith.constant 0 : index
      %17 = vector.load %arg6[%c0_14, %c0_15] : memref<16x128xbf16, #tpu.memory_space<vmem>>, vector<16x128xbf16>
      tpu.vector_store %arg6[%c0_14, %c0_15], %16 {strides = array<i32>} : memref<16x128xbf16, #tpu.memory_space<vmem>>, vector<16x128xbf16>,
    } else {
    }
    return
  }
  func.func @transform_0(%arg0: i32, %arg1: i32, %arg2: i32) -> (i32, i32) {
    %c0_i32 = arith.constant 0 : i32
    return %arg0, %arg2 : i32, i32
  }
  func.func @transform_1(%arg0: i32, %arg1: i32, %arg2: i32) -> (i32, i32) {
    %c0_i32 = arith.constant 0 : i32
    return %arg2, %arg1 : i32, i32
  }
  func.func @transform_2(%arg0: i32, %arg1: i32, %arg2: i32) -> (i32, i32) {
    %c0_i32 = arith.constant 0 : i32
    %c0_i32_0 = arith.constant 0 : i32
    return %c0_i32, %arg1 : i32, i32
  }
  func.func @transform_3(%arg0: i32, %arg1: i32, %arg2: i32) -> (i32, i32) {
    %c0_i32 = arith.constant 0 : i32
    return %arg0, %arg1 : i32, i32
  }
}

module attributes {stable_mosaic.version = 11 : i64} {
  func.func @_rel_attn_kernel(%arg0: i32, %arg1: memref<1x8x128xbf16, #tpu.memory_space<vmem>>, %arg2: memref<1x8x128xbf16, #tpu.memory_space<vmem>>, %arg3: memref<1x8x128xbf16, #tpu.memory_space<vmem>>, %arg4: memref<9x32xf32, #tpu.memory_space<vmem>>, %arg5: memref<1x1x8xi8, #tpu.memory_space<vmem>>, %arg6: memref<1x8x128xbf16, #tpu.memory_space<vmem>>) attributes {dimension_semantics = [#tpu.dimension_semantics<parallel>], iteration_bounds = array<i64: 2>, scalar_prefetch = 0 : i64, scratch_operands = 0 : i64, tpu.core_type = #tpu.core_type<tc>, window_params = [{transform_indices = @transform_0, window_bounds = array<i64: 1, 8, 128>}, {transform_indices = @transform_1, window_bounds = array<i64: 1, 8, 128>}, {transform_indices = @transform_2, window_bounds = array<i64: 1, 8, 128>}, {pipeline_mode = #tpu.pipeline_mode<synchronous>, transform_indices = @transform_3, window_bounds = array<i64: 9, 32>}, {transform_indices = @transform_4, window_bounds = array<i64: 1, 1, 8>}, {transform_indices = @transform_5, window_bounds = array<i64: 1, 8, 128>}]} {
    %c0 = arith.constant 0 : index
    %c0_0 = arith.constant 0 : index
    %c0_1 = arith.constant 0 : index
    %0 = vector.load %arg1[%c0, %c0_0, %c0_1] : memref<1x8x128xbf16, #tpu.memory_space<vmem>>, vector<1x8x128xbf16>
    %1 = vector.shape_cast %0 : vector<1x8x128xbf16> to vector<8x128xbf16>
    %2 = arith.extf %1 : vector<8x128xbf16> to vector<8x128xf32>
    %c0_2 = arith.constant 0 : index
    %c0_3 = arith.constant 0 : index
    %c0_4 = arith.constant 0 : index
    %3 = vector.load %arg2[%c0_2, %c0_3, %c0_4] : memref<1x8x128xbf16, #tpu.memory_space<vmem>>, vector<1x8x128xbf16>
    %4 = vector.shape_cast %3 : vector<1x8x128xbf16> to vector<8x128xbf16>
    %5 = arith.extf %4 : vector<8x128xbf16> to vector<8x128xf32>
    %c0_5 = arith.constant 0 : index
    %c0_6 = arith.constant 0 : index
    %c0_7 = arith.constant 0 : index
    %6 = vector.load %arg3[%c0_5, %c0_6, %c0_7] : memref<1x8x128xbf16, #tpu.memory_space<vmem>>, vector<1x8x128xbf16>
    %7 = vector.shape_cast %6 : vector<1x8x128xbf16> to vector<8x128xbf16>
    %c0_8 = arith.constant 0 : index
    %c0_9 = arith.constant 0 : index
    %8 = vector.load %arg4[%c0_8, %c0_9] : memref<9x32xf32, #tpu.memory_space<vmem>>, vector<9x32xf32>
    %c0_10 = arith.constant 0 : index
    %c0_11 = arith.constant 0 : index
    %c0_12 = arith.constant 0 : index
    %9 = vector.load %arg5[%c0_10, %c0_11, %c0_12] : memref<1x1x8xi8, #tpu.memory_space<vmem>>, vector<1x1x8xi8>
    %10 = vector.shape_cast %9 : vector<1x1x8xi8> to vector<1x8xi8>
    %c0_i8 = arith.constant 0 : i8
    %11 = vector.broadcast %c0_i8 : i8 to vector<1x8xi8>
    %12 = arith.cmpi ne, %10, %11 : vector<1x8xi8>
    %13 = tpu.iota {dimensions = array<i32: 0>} : vector<8x8xi32>
    %14 = tpu.iota {dimensions = array<i32: 1>} : vector<8x8xi32>
    %15 = arith.subi %13, %14 : vector<8x8xi32>
    %c-4_i32 = arith.constant -4 : i32
    %16 = vector.broadcast %c-4_i32 : i32 to vector<8x8xi32>
    %17 = arith.cmpi sle, %15, %16 : vector<8x8xi32>
    %c4_i32 = arith.constant 4 : i32
    %18 = vector.broadcast %c4_i32 : i32 to vector<8x8xi32>
    %19 = arith.cmpi sge, %15, %18 : vector<8x8xi32>
    %c5_i32 = arith.constant 5 : i32
    %20 = tpu.dynamic_rotate %5 by %c5_i32 dim 0 : vector<8x128xf32>, i32 -> vector<8x128xf32>
    %c-3_i32 = arith.constant -3 : i32
    %21 = vector.broadcast %c-3_i32 : i32 to vector<8x8xi32>
    %22 = arith.cmpi eq, %15, %21 : vector<8x8xi32>
    %c6_i32 = arith.constant 6 : i32
    %23 = tpu.dynamic_rotate %5 by %c6_i32 dim 0 : vector<8x128xf32>, i32 -> vector<8x128xf32>
    %c-2_i32 = arith.constant -2 : i32
    %24 = vector.broadcast %c-2_i32 : i32 to vector<8x8xi32>
    %25 = arith.cmpi eq, %15, %24 : vector<8x8xi32>
    %c7_i32 = arith.constant 7 : i32
    %26 = tpu.dynamic_rotate %5 by %c7_i32 dim 0 : vector<8x128xf32>, i32 -> vector<8x128xf32>
    %c-1_i32 = arith.constant -1 : i32
    %27 = vector.broadcast %c-1_i32 : i32 to vector<8x8xi32>
    %28 = arith.cmpi eq, %15, %27 : vector<8x8xi32>
    %c0_i32 = arith.constant 0 : i32
    %29 = vector.broadcast %c0_i32 : i32 to vector<8x8xi32>
    %30 = arith.cmpi eq, %15, %29 : vector<8x8xi32>
    %c1_i32 = arith.constant 1 : i32
    %31 = tpu.dynamic_rotate %5 by %c1_i32 dim 0 : vector<8x128xf32>, i32 -> vector<8x128xf32>
    %c1_i32_13 = arith.constant 1 : i32
    %32 = vector.broadcast %c1_i32_13 : i32 to vector<8x8xi32>
    %33 = arith.cmpi eq, %15, %32 : vector<8x8xi32>
    %c2_i32 = arith.constant 2 : i32
    %34 = tpu.dynamic_rotate %5 by %c2_i32 dim 0 : vector<8x128xf32>, i32 -> vector<8x128xf32>
    %c2_i32_14 = arith.constant 2 : i32
    %35 = vector.broadcast %c2_i32_14 : i32 to vector<8x8xi32>
    %36 = arith.cmpi eq, %15, %35 : vector<8x8xi32>
    %c3_i32 = arith.constant 3 : i32
    %37 = tpu.dynamic_rotate %5 by %c3_i32 dim 0 : vector<8x128xf32>, i32 -> vector<8x128xf32>
    %c3_i32_15 = arith.constant 3 : i32
    %38 = vector.broadcast %c3_i32_15 : i32 to vector<8x8xi32>
    %39 = arith.cmpi eq, %15, %38 : vector<8x8xi32>
    %40 = vector.extract_strided_slice %2 {offsets = [0, 0], sizes = [8, 32], strides = [1, 1]} : vector<8x128xf32> to vector<8x32xf32>
    %41 = vector.extract_strided_slice %4 {offsets = [0, 0], sizes = [8, 32], strides = [1, 1]} : vector<8x128xbf16> to vector<8x32xbf16>
    %42 = vector.extract_strided_slice %7 {offsets = [0, 0], sizes = [8, 32], strides = [1, 1]} : vector<8x128xbf16> to vector<8x32xbf16>
    %43 = vector.extract_strided_slice %8 {offsets = [0, 0], sizes = [1, 32], strides = [1, 1]} : vector<9x32xf32> to vector<1x32xf32>
    %44 = vector.shape_cast %43 : vector<1x32xf32> to vector<32xf32>
    %45 = vector.shape_cast %44 : vector<32xf32> to vector<1x32xf32>
    %46 = vector.broadcast %45 : vector<1x32xf32> to vector<8x32xf32>
    %47 = arith.mulf %40, %46 : vector<8x32xf32>
    %48 = arith.truncf %47 : vector<8x32xf32> to vector<8x32xbf16>
    %cst = arith.constant dense<0.000000e+00> : vector<8x8xf32>
    %49 = tpu.matmul %48, %41, %cst {dimension_numbers = #tpu.dot_dimension_numbers<[1], [1], [0], [0], [0, 0, 1, 0], [], []>} : vector<8x32xbf16>, vector<8x32xbf16>, vector<8x8xf32> -> vector<8x8xf32>
    %50 = vector.extract_strided_slice %8 {offsets = [8, 0], sizes = [1, 32], strides = [1, 1]} : vector<9x32xf32> to vector<1x32xf32>
    %51 = vector.shape_cast %50 : vector<1x32xf32> to vector<32xf32>
    %52 = vector.shape_cast %51 : vector<32xf32> to vector<1x32xf32>
    %53 = vector.broadcast %52 : vector<1x32xf32> to vector<8x32xf32>
    %54 = arith.mulf %40, %53 : vector<8x32xf32>
    %55 = arith.truncf %54 : vector<8x32xf32> to vector<8x32xbf16>
    %cst_16 = arith.constant dense<0.000000e+00> : vector<8x8xf32>
    %56 = tpu.matmul %55, %41, %cst_16 {dimension_numbers = #tpu.dot_dimension_numbers<[1], [1], [0], [0], [0, 0, 1, 0], [], []>} : vector<8x32xbf16>, vector<8x32xbf16>, vector<8x8xf32> -> vector<8x8xf32>
    %cst_17 = arith.constant 0.000000e+00 : f32
    %57 = vector.broadcast %cst_17 : f32 to vector<8x8xf32>
    %58 = arith.select %17, %49, %57 : vector<8x8xi1>, vector<8x8xf32>
    %59 = arith.select %19, %56, %58 : vector<8x8xi1>, vector<8x8xf32>
    %60 = vector.extract_strided_slice %8 {offsets = [1, 0], sizes = [1, 32], strides = [1, 1]} : vector<9x32xf32> to vector<1x32xf32>
    %61 = vector.shape_cast %60 : vector<1x32xf32> to vector<32xf32>
    %62 = vector.shape_cast %61 : vector<32xf32> to vector<1x32xf32>
    %63 = vector.broadcast %62 : vector<1x32xf32> to vector<8x32xf32>
    %64 = arith.mulf %40, %63 : vector<8x32xf32>
    %65 = vector.extract_strided_slice %20 {offsets = [0, 0], sizes = [8, 32], strides = [1, 1]} : vector<8x128xf32> to vector<8x32xf32>
    %66 = arith.mulf %64, %65 : vector<8x32xf32>
    %cst_18 = arith.constant dense<0.000000e+00> : vector<8xf32>
    %67 = vector.multi_reduction <add>, %66, %cst_18 [1] : vector<8x32xf32> to vector<8xf32>
    %68 = vector.shape_cast %67 : vector<8xf32> to vector<8x1xf32>
    %69 = vector.shape_cast %68 : vector<8x1xf32> to vector<8x1xf32>
    %70 = vector.broadcast %69 : vector<8x1xf32> to vector<8x8xf32>
    %71 = arith.select %22, %70, %59 : vector<8x8xi1>, vector<8x8xf32>
    %72 = vector.extract_strided_slice %8 {offsets = [2, 0], sizes = [1, 32], strides = [1, 1]} : vector<9x32xf32> to vector<1x32xf32>
    %73 = vector.shape_cast %72 : vector<1x32xf32> to vector<32xf32>
    %74 = vector.shape_cast %73 : vector<32xf32> to vector<1x32xf32>
    %75 = vector.broadcast %74 : vector<1x32xf32> to vector<8x32xf32>
    %76 = arith.mulf %40, %75 : vector<8x32xf32>
    %77 = vector.extract_strided_slice %23 {offsets = [0, 0], sizes = [8, 32], strides = [1, 1]} : vector<8x128xf32> to vector<8x32xf32>
    %78 = arith.mulf %76, %77 : vector<8x32xf32>
    %cst_19 = arith.constant dense<0.000000e+00> : vector<8xf32>
    %79 = vector.multi_reduction <add>, %78, %cst_19 [1] : vector<8x32xf32> to vector<8xf32>
    %80 = vector.shape_cast %79 : vector<8xf32> to vector<8x1xf32>
    %81 = vector.shape_cast %80 : vector<8x1xf32> to vector<8x1xf32>
    %82 = vector.broadcast %81 : vector<8x1xf32> to vector<8x8xf32>
    %83 = arith.select %25, %82, %71 : vector<8x8xi1>, vector<8x8xf32>
    %84 = vector.extract_strided_slice %8 {offsets = [3, 0], sizes = [1, 32], strides = [1, 1]} : vector<9x32xf32> to vector<1x32xf32>
    %85 = vector.shape_cast %84 : vector<1x32xf32> to vector<32xf32>
    %86 = vector.shape_cast %85 : vector<32xf32> to vector<1x32xf32>
    %87 = vector.broadcast %86 : vector<1x32xf32> to vector<8x32xf32>
    %88 = arith.mulf %40, %87 : vector<8x32xf32>
    %89 = vector.extract_strided_slice %26 {offsets = [0, 0], sizes = [8, 32], strides = [1, 1]} : vector<8x128xf32> to vector<8x32xf32>
    %90 = arith.mulf %88, %89 : vector<8x32xf32>
    %cst_20 = arith.constant dense<0.000000e+00> : vector<8xf32>
    %91 = vector.multi_reduction <add>, %90, %cst_20 [1] : vector<8x32xf32> to vector<8xf32>
    %92 = vector.shape_cast %91 : vector<8xf32> to vector<8x1xf32>
    %93 = vector.shape_cast %92 : vector<8x1xf32> to vector<8x1xf32>
    %94 = vector.broadcast %93 : vector<8x1xf32> to vector<8x8xf32>
    %95 = arith.select %28, %94, %83 : vector<8x8xi1>, vector<8x8xf32>
    %96 = vector.extract_strided_slice %8 {offsets = [4, 0], sizes = [1, 32], strides = [1, 1]} : vector<9x32xf32> to vector<1x32xf32>
    %97 = vector.shape_cast %96 : vector<1x32xf32> to vector<32xf32>
    %98 = vector.shape_cast %97 : vector<32xf32> to vector<1x32xf32>
    %99 = vector.broadcast %98 : vector<1x32xf32> to vector<8x32xf32>
    %100 = arith.mulf %40, %99 : vector<8x32xf32>
    %101 = vector.extract_strided_slice %5 {offsets = [0, 0], sizes = [8, 32], strides = [1, 1]} : vector<8x128xf32> to vector<8x32xf32>
    %102 = arith.mulf %100, %101 : vector<8x32xf32>
    %cst_21 = arith.constant dense<0.000000e+00> : vector<8xf32>
    %103 = vector.multi_reduction <add>, %102, %cst_21 [1] : vector<8x32xf32> to vector<8xf32>
    %104 = vector.shape_cast %103 : vector<8xf32> to vector<8x1xf32>
    %105 = vector.shape_cast %104 : vector<8x1xf32> to vector<8x1xf32>
    %106 = vector.broadcast %105 : vector<8x1xf32> to vector<8x8xf32>
    %107 = arith.select %30, %106, %95 : vector<8x8xi1>, vector<8x8xf32>
    %108 = vector.extract_strided_slice %8 {offsets = [5, 0], sizes = [1, 32], strides = [1, 1]} : vector<9x32xf32> to vector<1x32xf32>
    %109 = vector.shape_cast %108 : vector<1x32xf32> to vector<32xf32>
    %110 = vector.shape_cast %109 : vector<32xf32> to vector<1x32xf32>
    %111 = vector.broadcast %110 : vector<1x32xf32> to vector<8x32xf32>
    %112 = arith.mulf %40, %111 : vector<8x32xf32>
    %113 = vector.extract_strided_slice %31 {offsets = [0, 0], sizes = [8, 32], strides = [1, 1]} : vector<8x128xf32> to vector<8x32xf32>
    %114 = arith.mulf %112, %113 : vector<8x32xf32>
    %cst_22 = arith.constant dense<0.000000e+00> : vector<8xf32>
    %115 = vector.multi_reduction <add>, %114, %cst_22 [1] : vector<8x32xf32> to vector<8xf32>
    %116 = vector.shape_cast %115 : vector<8xf32> to vector<8x1xf32>
    %117 = vector.shape_cast %116 : vector<8x1xf32> to vector<8x1xf32>
    %118 = vector.broadcast %117 : vector<8x1xf32> to vector<8x8xf32>
    %119 = arith.select %33, %118, %107 : vector<8x8xi1>, vector<8x8xf32>
    %120 = vector.extract_strided_slice %8 {offsets = [6, 0], sizes = [1, 32], strides = [1, 1]} : vector<9x32xf32> to vector<1x32xf32>
    %121 = vector.shape_cast %120 : vector<1x32xf32> to vector<32xf32>
    %122 = vector.shape_cast %121 : vector<32xf32> to vector<1x32xf32>
    %123 = vector.broadcast %122 : vector<1x32xf32> to vector<8x32xf32>
    %124 = arith.mulf %40, %123 : vector<8x32xf32>
    %125 = vector.extract_strided_slice %34 {offsets = [0, 0], sizes = [8, 32], strides = [1, 1]} : vector<8x128xf32> to vector<8x32xf32>
    %126 = arith.mulf %124, %125 : vector<8x32xf32>
    %cst_23 = arith.constant dense<0.000000e+00> : vector<8xf32>
    %127 = vector.multi_reduction <add>, %126, %cst_23 [1] : vector<8x32xf32> to vector<8xf32>
    %128 = vector.shape_cast %127 : vector<8xf32> to vector<8x1xf32>
    %129 = vector.shape_cast %128 : vector<8x1xf32> to vector<8x1xf32>
    %130 = vector.broadcast %129 : vector<8x1xf32> to vector<8x8xf32>
    %131 = arith.select %36, %130, %119 : vector<8x8xi1>, vector<8x8xf32>
    %132 = vector.extract_strided_slice %8 {offsets = [7, 0], sizes = [1, 32], strides = [1, 1]} : vector<9x32xf32> to vector<1x32xf32>
    %133 = vector.shape_cast %132 : vector<1x32xf32> to vector<32xf32>
    %134 = vector.shape_cast %133 : vector<32xf32> to vector<1x32xf32>
    %135 = vector.broadcast %134 : vector<1x32xf32> to vector<8x32xf32>
    %136 = arith.mulf %40, %135 : vector<8x32xf32>
    %137 = vector.extract_strided_slice %37 {offsets = [0, 0], sizes = [8, 32], strides = [1, 1]} : vector<8x128xf32> to vector<8x32xf32>
    %138 = arith.mulf %136, %137 : vector<8x32xf32>
    %cst_24 = arith.constant dense<0.000000e+00> : vector<8xf32>
    %139 = vector.multi_reduction <add>, %138, %cst_24 [1] : vector<8x32xf32> to vector<8xf32>
    %140 = vector.shape_cast %139 : vector<8xf32> to vector<8x1xf32>
    %141 = vector.shape_cast %140 : vector<8x1xf32> to vector<8x1xf32>
    %142 = vector.broadcast %141 : vector<8x1xf32> to vector<8x8xf32>
    %143 = arith.select %39, %142, %131 : vector<8x8xi1>, vector<8x8xf32>
    %cst_25 = arith.constant -1.000000e+30 : f32
    %144 = vector.shape_cast %12 : vector<1x8xi1> to vector<1x8xi1>
    %145 = vector.broadcast %144 : vector<1x8xi1> to vector<8x8xi1>
    %146 = vector.broadcast %cst_25 : f32 to vector<8x8xf32>
    %147 = arith.select %145, %143, %146 : vector<8x8xi1>, vector<8x8xf32>
    %cst_26 = arith.constant dense<0xFF800000> : vector<8xf32>
    %148 = vector.multi_reduction <maximumf>, %147, %cst_26 [1] : vector<8x8xf32> to vector<8xf32>
    %149 = vector.shape_cast %148 : vector<8xf32> to vector<8x1xf32>
    %150 = vector.broadcast %149 : vector<8x1xf32> to vector<8x8xf32>
    %151 = arith.subf %147, %150 : vector<8x8xf32>
    %152 = math.exp %151 : vector<8x8xf32>
    %cst_27 = arith.constant dense<0.000000e+00> : vector<8xf32>
    %153 = vector.multi_reduction <add>, %152, %cst_27 [1] : vector<8x8xf32> to vector<8xf32>
    %154 = vector.shape_cast %153 : vector<8xf32> to vector<8x1xf32>
    %155 = tpu.reciprocal %154 {approx = true} : vector<8x1xf32> -> vector<8x1xf32>
    %156 = vector.broadcast %155 : vector<8x1xf32> to vector<8x8xf32>
    %157 = arith.mulf %152, %156 : vector<8x8xf32>
    %158 = arith.truncf %157 : vector<8x8xf32> to vector<8x8xbf16>
    %cst_28 = arith.constant dense<0.000000e+00> : vector<8x32xf32>
    %159 = tpu.matmul %158, %42, %cst_28 {dimension_numbers = #tpu.dot_dimension_numbers<[1], [0], [0], [1], [0, 0, 1, 1], [], []>} : vector<8x8xbf16>, vector<8x32xbf16>, vector<8x32xf32> -> vector<8x32xf32>
    %160 = arith.truncf %159 : vector<8x32xf32> to vector<8x32xbf16>
    %c0_29 = arith.constant 0 : index
    %c0_30 = arith.constant 0 : index
    %c0_31 = arith.constant 0 : index
    %161 = vector.load %arg6[%c0_29, %c0_30, %c0_31] : memref<1x8x128xbf16, #tpu.memory_space<vmem>>, vector<1x8x32xbf16>
    %162 = vector.shape_cast %161 : vector<1x8x32xbf16> to vector<8x32xbf16>
    %163 = vector.shape_cast %160 : vector<8x32xbf16> to vector<1x8x32xbf16>
    tpu.vector_store %arg6[%c0_29, %c0_30, %c0_31], %163 {strides = array<i32>} : memref<1x8x128xbf16, #tpu.memory_space<vmem>>, vector<1x8x32xbf16>,
    %164 = vector.extract_strided_slice %2 {offsets = [0, 32], sizes = [8, 32], strides = [1, 1]} : vector<8x128xf32> to vector<8x32xf32>
    %165 = vector.extract_strided_slice %4 {offsets = [0, 32], sizes = [8, 32], strides = [1, 1]} : vector<8x128xbf16> to vector<8x32xbf16>
    %166 = vector.extract_strided_slice %7 {offsets = [0, 32], sizes = [8, 32], strides = [1, 1]} : vector<8x128xbf16> to vector<8x32xbf16>
    %167 = vector.extract_strided_slice %8 {offsets = [0, 0], sizes = [1, 32], strides = [1, 1]} : vector<9x32xf32> to vector<1x32xf32>
    %168 = vector.shape_cast %167 : vector<1x32xf32> to vector<32xf32>
    %169 = vector.shape_cast %168 : vector<32xf32> to vector<1x32xf32>
    %170 = vector.broadcast %169 : vector<1x32xf32> to vector<8x32xf32>
    %171 = arith.mulf %164, %170 : vector<8x32xf32>
    %172 = arith.truncf %171 : vector<8x32xf32> to vector<8x32xbf16>
    %cst_32 = arith.constant dense<0.000000e+00> : vector<8x8xf32>
    %173 = tpu.matmul %172, %165, %cst_32 {dimension_numbers = #tpu.dot_dimension_numbers<[1], [1], [0], [0], [0, 0, 1, 0], [], []>} : vector<8x32xbf16>, vector<8x32xbf16>, vector<8x8xf32> -> vector<8x8xf32>
    %174 = vector.extract_strided_slice %8 {offsets = [8, 0], sizes = [1, 32], strides = [1, 1]} : vector<9x32xf32> to vector<1x32xf32>
    %175 = vector.shape_cast %174 : vector<1x32xf32> to vector<32xf32>
    %176 = vector.shape_cast %175 : vector<32xf32> to vector<1x32xf32>
    %177 = vector.broadcast %176 : vector<1x32xf32> to vector<8x32xf32>
    %178 = arith.mulf %164, %177 : vector<8x32xf32>
    %179 = arith.truncf %178 : vector<8x32xf32> to vector<8x32xbf16>
    %cst_33 = arith.constant dense<0.000000e+00> : vector<8x8xf32>
    %180 = tpu.matmul %179, %165, %cst_33 {dimension_numbers = #tpu.dot_dimension_numbers<[1], [1], [0], [0], [0, 0, 1, 0], [], []>} : vector<8x32xbf16>, vector<8x32xbf16>, vector<8x8xf32> -> vector<8x8xf32>
    %cst_34 = arith.constant 0.000000e+00 : f32
    %181 = vector.broadcast %cst_34 : f32 to vector<8x8xf32>
    %182 = arith.select %17, %173, %181 : vector<8x8xi1>, vector<8x8xf32>
    %183 = arith.select %19, %180, %182 : vector<8x8xi1>, vector<8x8xf32>
    %184 = vector.extract_strided_slice %8 {offsets = [1, 0], sizes = [1, 32], strides = [1, 1]} : vector<9x32xf32> to vector<1x32xf32>
    %185 = vector.shape_cast %184 : vector<1x32xf32> to vector<32xf32>
    %186 = vector.shape_cast %185 : vector<32xf32> to vector<1x32xf32>
    %187 = vector.broadcast %186 : vector<1x32xf32> to vector<8x32xf32>
    %188 = arith.mulf %164, %187 : vector<8x32xf32>
    %189 = vector.extract_strided_slice %20 {offsets = [0, 32], sizes = [8, 32], strides = [1, 1]} : vector<8x128xf32> to vector<8x32xf32>
    %190 = arith.mulf %188, %189 : vector<8x32xf32>
    %cst_35 = arith.constant dense<0.000000e+00> : vector<8xf32>
    %191 = vector.multi_reduction <add>, %190, %cst_35 [1] : vector<8x32xf32> to vector<8xf32>
    %192 = vector.shape_cast %191 : vector<8xf32> to vector<8x1xf32>
    %193 = vector.shape_cast %192 : vector<8x1xf32> to vector<8x1xf32>
    %194 = vector.broadcast %193 : vector<8x1xf32> to vector<8x8xf32>
    %195 = arith.select %22, %194, %183 : vector<8x8xi1>, vector<8x8xf32>
    %196 = vector.extract_strided_slice %8 {offsets = [2, 0], sizes = [1, 32], strides = [1, 1]} : vector<9x32xf32> to vector<1x32xf32>
    %197 = vector.shape_cast %196 : vector<1x32xf32> to vector<32xf32>
    %198 = vector.shape_cast %197 : vector<32xf32> to vector<1x32xf32>
    %199 = vector.broadcast %198 : vector<1x32xf32> to vector<8x32xf32>
    %200 = arith.mulf %164, %199 : vector<8x32xf32>
    %201 = vector.extract_strided_slice %23 {offsets = [0, 32], sizes = [8, 32], strides = [1, 1]} : vector<8x128xf32> to vector<8x32xf32>
    %202 = arith.mulf %200, %201 : vector<8x32xf32>
    %cst_36 = arith.constant dense<0.000000e+00> : vector<8xf32>
    %203 = vector.multi_reduction <add>, %202, %cst_36 [1] : vector<8x32xf32> to vector<8xf32>
    %204 = vector.shape_cast %203 : vector<8xf32> to vector<8x1xf32>
    %205 = vector.shape_cast %204 : vector<8x1xf32> to vector<8x1xf32>
    %206 = vector.broadcast %205 : vector<8x1xf32> to vector<8x8xf32>
    %207 = arith.select %25, %206, %195 : vector<8x8xi1>, vector<8x8xf32>
    %208 = vector.extract_strided_slice %8 {offsets = [3, 0], sizes = [1, 32], strides = [1, 1]} : vector<9x32xf32> to vector<1x32xf32>
    %209 = vector.shape_cast %208 : vector<1x32xf32> to vector<32xf32>
    %210 = vector.shape_cast %209 : vector<32xf32> to vector<1x32xf32>
    %211 = vector.broadcast %210 : vector<1x32xf32> to vector<8x32xf32>
    %212 = arith.mulf %164, %211 : vector<8x32xf32>
    %213 = vector.extract_strided_slice %26 {offsets = [0, 32], sizes = [8, 32], strides = [1, 1]} : vector<8x128xf32> to vector<8x32xf32>
    %214 = arith.mulf %212, %213 : vector<8x32xf32>
    %cst_37 = arith.constant dense<0.000000e+00> : vector<8xf32>
    %215 = vector.multi_reduction <add>, %214, %cst_37 [1] : vector<8x32xf32> to vector<8xf32>
    %216 = vector.shape_cast %215 : vector<8xf32> to vector<8x1xf32>
    %217 = vector.shape_cast %216 : vector<8x1xf32> to vector<8x1xf32>
    %218 = vector.broadcast %217 : vector<8x1xf32> to vector<8x8xf32>
    %219 = arith.select %28, %218, %207 : vector<8x8xi1>, vector<8x8xf32>
    %220 = vector.extract_strided_slice %8 {offsets = [4, 0], sizes = [1, 32], strides = [1, 1]} : vector<9x32xf32> to vector<1x32xf32>
    %221 = vector.shape_cast %220 : vector<1x32xf32> to vector<32xf32>
    %222 = vector.shape_cast %221 : vector<32xf32> to vector<1x32xf32>
    %223 = vector.broadcast %222 : vector<1x32xf32> to vector<8x32xf32>
    %224 = arith.mulf %164, %223 : vector<8x32xf32>
    %225 = vector.extract_strided_slice %5 {offsets = [0, 32], sizes = [8, 32], strides = [1, 1]} : vector<8x128xf32> to vector<8x32xf32>
    %226 = arith.mulf %224, %225 : vector<8x32xf32>
    %cst_38 = arith.constant dense<0.000000e+00> : vector<8xf32>
    %227 = vector.multi_reduction <add>, %226, %cst_38 [1] : vector<8x32xf32> to vector<8xf32>
    %228 = vector.shape_cast %227 : vector<8xf32> to vector<8x1xf32>
    %229 = vector.shape_cast %228 : vector<8x1xf32> to vector<8x1xf32>
    %230 = vector.broadcast %229 : vector<8x1xf32> to vector<8x8xf32>
    %231 = arith.select %30, %230, %219 : vector<8x8xi1>, vector<8x8xf32>
    %232 = vector.extract_strided_slice %8 {offsets = [5, 0], sizes = [1, 32], strides = [1, 1]} : vector<9x32xf32> to vector<1x32xf32>
    %233 = vector.shape_cast %232 : vector<1x32xf32> to vector<32xf32>
    %234 = vector.shape_cast %233 : vector<32xf32> to vector<1x32xf32>
    %235 = vector.broadcast %234 : vector<1x32xf32> to vector<8x32xf32>
    %236 = arith.mulf %164, %235 : vector<8x32xf32>
    %237 = vector.extract_strided_slice %31 {offsets = [0, 32], sizes = [8, 32], strides = [1, 1]} : vector<8x128xf32> to vector<8x32xf32>
    %238 = arith.mulf %236, %237 : vector<8x32xf32>
    %cst_39 = arith.constant dense<0.000000e+00> : vector<8xf32>
    %239 = vector.multi_reduction <add>, %238, %cst_39 [1] : vector<8x32xf32> to vector<8xf32>
    %240 = vector.shape_cast %239 : vector<8xf32> to vector<8x1xf32>
    %241 = vector.shape_cast %240 : vector<8x1xf32> to vector<8x1xf32>
    %242 = vector.broadcast %241 : vector<8x1xf32> to vector<8x8xf32>
    %243 = arith.select %33, %242, %231 : vector<8x8xi1>, vector<8x8xf32>
    %244 = vector.extract_strided_slice %8 {offsets = [6, 0], sizes = [1, 32], strides = [1, 1]} : vector<9x32xf32> to vector<1x32xf32>
    %245 = vector.shape_cast %244 : vector<1x32xf32> to vector<32xf32>
    %246 = vector.shape_cast %245 : vector<32xf32> to vector<1x32xf32>
    %247 = vector.broadcast %246 : vector<1x32xf32> to vector<8x32xf32>
    %248 = arith.mulf %164, %247 : vector<8x32xf32>
    %249 = vector.extract_strided_slice %34 {offsets = [0, 32], sizes = [8, 32], strides = [1, 1]} : vector<8x128xf32> to vector<8x32xf32>
    %250 = arith.mulf %248, %249 : vector<8x32xf32>
    %cst_40 = arith.constant dense<0.000000e+00> : vector<8xf32>
    %251 = vector.multi_reduction <add>, %250, %cst_40 [1] : vector<8x32xf32> to vector<8xf32>
    %252 = vector.shape_cast %251 : vector<8xf32> to vector<8x1xf32>
    %253 = vector.shape_cast %252 : vector<8x1xf32> to vector<8x1xf32>
    %254 = vector.broadcast %253 : vector<8x1xf32> to vector<8x8xf32>
    %255 = arith.select %36, %254, %243 : vector<8x8xi1>, vector<8x8xf32>
    %256 = vector.extract_strided_slice %8 {offsets = [7, 0], sizes = [1, 32], strides = [1, 1]} : vector<9x32xf32> to vector<1x32xf32>
    %257 = vector.shape_cast %256 : vector<1x32xf32> to vector<32xf32>
    %258 = vector.shape_cast %257 : vector<32xf32> to vector<1x32xf32>
    %259 = vector.broadcast %258 : vector<1x32xf32> to vector<8x32xf32>
    %260 = arith.mulf %164, %259 : vector<8x32xf32>
    %261 = vector.extract_strided_slice %37 {offsets = [0, 32], sizes = [8, 32], strides = [1, 1]} : vector<8x128xf32> to vector<8x32xf32>
    %262 = arith.mulf %260, %261 : vector<8x32xf32>
    %cst_41 = arith.constant dense<0.000000e+00> : vector<8xf32>
    %263 = vector.multi_reduction <add>, %262, %cst_41 [1] : vector<8x32xf32> to vector<8xf32>
    %264 = vector.shape_cast %263 : vector<8xf32> to vector<8x1xf32>
    %265 = vector.shape_cast %264 : vector<8x1xf32> to vector<8x1xf32>
    %266 = vector.broadcast %265 : vector<8x1xf32> to vector<8x8xf32>
    %267 = arith.select %39, %266, %255 : vector<8x8xi1>, vector<8x8xf32>
    %cst_42 = arith.constant -1.000000e+30 : f32
    %268 = vector.shape_cast %12 : vector<1x8xi1> to vector<1x8xi1>
    %269 = vector.broadcast %268 : vector<1x8xi1> to vector<8x8xi1>
    %270 = vector.broadcast %cst_42 : f32 to vector<8x8xf32>
    %271 = arith.select %269, %267, %270 : vector<8x8xi1>, vector<8x8xf32>
    %cst_43 = arith.constant dense<0xFF800000> : vector<8xf32>
    %272 = vector.multi_reduction <maximumf>, %271, %cst_43 [1] : vector<8x8xf32> to vector<8xf32>
    %273 = vector.shape_cast %272 : vector<8xf32> to vector<8x1xf32>
    %274 = vector.broadcast %273 : vector<8x1xf32> to vector<8x8xf32>
    %275 = arith.subf %271, %274 : vector<8x8xf32>
    %276 = math.exp %275 : vector<8x8xf32>
    %cst_44 = arith.constant dense<0.000000e+00> : vector<8xf32>
    %277 = vector.multi_reduction <add>, %276, %cst_44 [1] : vector<8x8xf32> to vector<8xf32>
    %278 = vector.shape_cast %277 : vector<8xf32> to vector<8x1xf32>
    %279 = tpu.reciprocal %278 {approx = true} : vector<8x1xf32> -> vector<8x1xf32>
    %280 = vector.broadcast %279 : vector<8x1xf32> to vector<8x8xf32>
    %281 = arith.mulf %276, %280 : vector<8x8xf32>
    %282 = arith.truncf %281 : vector<8x8xf32> to vector<8x8xbf16>
    %cst_45 = arith.constant dense<0.000000e+00> : vector<8x32xf32>
    %283 = tpu.matmul %282, %166, %cst_45 {dimension_numbers = #tpu.dot_dimension_numbers<[1], [0], [0], [1], [0, 0, 1, 1], [], []>} : vector<8x8xbf16>, vector<8x32xbf16>, vector<8x32xf32> -> vector<8x32xf32>
    %284 = arith.truncf %283 : vector<8x32xf32> to vector<8x32xbf16>
    %c0_46 = arith.constant 0 : index
    %c0_47 = arith.constant 0 : index
    %c32 = arith.constant 32 : index
    %285 = vector.load %arg6[%c0_46, %c0_47, %c32] : memref<1x8x128xbf16, #tpu.memory_space<vmem>>, vector<1x8x32xbf16>
    %286 = vector.shape_cast %285 : vector<1x8x32xbf16> to vector<8x32xbf16>
    %287 = vector.shape_cast %284 : vector<8x32xbf16> to vector<1x8x32xbf16>
    tpu.vector_store %arg6[%c0_46, %c0_47, %c32], %287 {strides = array<i32>} : memref<1x8x128xbf16, #tpu.memory_space<vmem>>, vector<1x8x32xbf16>,
    %288 = vector.extract_strided_slice %2 {offsets = [0, 64], sizes = [8, 32], strides = [1, 1]} : vector<8x128xf32> to vector<8x32xf32>
    %289 = vector.extract_strided_slice %4 {offsets = [0, 64], sizes = [8, 32], strides = [1, 1]} : vector<8x128xbf16> to vector<8x32xbf16>
    %290 = vector.extract_strided_slice %7 {offsets = [0, 64], sizes = [8, 32], strides = [1, 1]} : vector<8x128xbf16> to vector<8x32xbf16>
    %291 = vector.extract_strided_slice %8 {offsets = [0, 0], sizes = [1, 32], strides = [1, 1]} : vector<9x32xf32> to vector<1x32xf32>
    %292 = vector.shape_cast %291 : vector<1x32xf32> to vector<32xf32>
    %293 = vector.shape_cast %292 : vector<32xf32> to vector<1x32xf32>
    %294 = vector.broadcast %293 : vector<1x32xf32> to vector<8x32xf32>
    %295 = arith.mulf %288, %294 : vector<8x32xf32>
    %296 = arith.truncf %295 : vector<8x32xf32> to vector<8x32xbf16>
    %cst_48 = arith.constant dense<0.000000e+00> : vector<8x8xf32>
    %297 = tpu.matmul %296, %289, %cst_48 {dimension_numbers = #tpu.dot_dimension_numbers<[1], [1], [0], [0], [0, 0, 1, 0], [], []>} : vector<8x32xbf16>, vector<8x32xbf16>, vector<8x8xf32> -> vector<8x8xf32>
    %298 = vector.extract_strided_slice %8 {offsets = [8, 0], sizes = [1, 32], strides = [1, 1]} : vector<9x32xf32> to vector<1x32xf32>
    %299 = vector.shape_cast %298 : vector<1x32xf32> to vector<32xf32>
    %300 = vector.shape_cast %299 : vector<32xf32> to vector<1x32xf32>
    %301 = vector.broadcast %300 : vector<1x32xf32> to vector<8x32xf32>
    %302 = arith.mulf %288, %301 : vector<8x32xf32>
    %303 = arith.truncf %302 : vector<8x32xf32> to vector<8x32xbf16>
    %cst_49 = arith.constant dense<0.000000e+00> : vector<8x8xf32>
    %304 = tpu.matmul %303, %289, %cst_49 {dimension_numbers = #tpu.dot_dimension_numbers<[1], [1], [0], [0], [0, 0, 1, 0], [], []>} : vector<8x32xbf16>, vector<8x32xbf16>, vector<8x8xf32> -> vector<8x8xf32>
    %cst_50 = arith.constant 0.000000e+00 : f32
    %305 = vector.broadcast %cst_50 : f32 to vector<8x8xf32>
    %306 = arith.select %17, %297, %305 : vector<8x8xi1>, vector<8x8xf32>
    %307 = arith.select %19, %304, %306 : vector<8x8xi1>, vector<8x8xf32>
    %308 = vector.extract_strided_slice %8 {offsets = [1, 0], sizes = [1, 32], strides = [1, 1]} : vector<9x32xf32> to vector<1x32xf32>
    %309 = vector.shape_cast %308 : vector<1x32xf32> to vector<32xf32>
    %310 = vector.shape_cast %309 : vector<32xf32> to vector<1x32xf32>
    %311 = vector.broadcast %310 : vector<1x32xf32> to vector<8x32xf32>
    %312 = arith.mulf %288, %311 : vector<8x32xf32>
    %313 = vector.extract_strided_slice %20 {offsets = [0, 64], sizes = [8, 32], strides = [1, 1]} : vector<8x128xf32> to vector<8x32xf32>
    %314 = arith.mulf %312, %313 : vector<8x32xf32>
    %cst_51 = arith.constant dense<0.000000e+00> : vector<8xf32>
    %315 = vector.multi_reduction <add>, %314, %cst_51 [1] : vector<8x32xf32> to vector<8xf32>
    %316 = vector.shape_cast %315 : vector<8xf32> to vector<8x1xf32>
    %317 = vector.shape_cast %316 : vector<8x1xf32> to vector<8x1xf32>
    %318 = vector.broadcast %317 : vector<8x1xf32> to vector<8x8xf32>
    %319 = arith.select %22, %318, %307 : vector<8x8xi1>, vector<8x8xf32>
    %320 = vector.extract_strided_slice %8 {offsets = [2, 0], sizes = [1, 32], strides = [1, 1]} : vector<9x32xf32> to vector<1x32xf32>
    %321 = vector.shape_cast %320 : vector<1x32xf32> to vector<32xf32>
    %322 = vector.shape_cast %321 : vector<32xf32> to vector<1x32xf32>
    %323 = vector.broadcast %322 : vector<1x32xf32> to vector<8x32xf32>
    %324 = arith.mulf %288, %323 : vector<8x32xf32>
    %325 = vector.extract_strided_slice %23 {offsets = [0, 64], sizes = [8, 32], strides = [1, 1]} : vector<8x128xf32> to vector<8x32xf32>
    %326 = arith.mulf %324, %325 : vector<8x32xf32>
    %cst_52 = arith.constant dense<0.000000e+00> : vector<8xf32>
    %327 = vector.multi_reduction <add>, %326, %cst_52 [1] : vector<8x32xf32> to vector<8xf32>
    %328 = vector.shape_cast %327 : vector<8xf32> to vector<8x1xf32>
    %329 = vector.shape_cast %328 : vector<8x1xf32> to vector<8x1xf32>
    %330 = vector.broadcast %329 : vector<8x1xf32> to vector<8x8xf32>
    %331 = arith.select %25, %330, %319 : vector<8x8xi1>, vector<8x8xf32>
    %332 = vector.extract_strided_slice %8 {offsets = [3, 0], sizes = [1, 32], strides = [1, 1]} : vector<9x32xf32> to vector<1x32xf32>
    %333 = vector.shape_cast %332 : vector<1x32xf32> to vector<32xf32>
    %334 = vector.shape_cast %333 : vector<32xf32> to vector<1x32xf32>
    %335 = vector.broadcast %334 : vector<1x32xf32> to vector<8x32xf32>
    %336 = arith.mulf %288, %335 : vector<8x32xf32>
    %337 = vector.extract_strided_slice %26 {offsets = [0, 64], sizes = [8, 32], strides = [1, 1]} : vector<8x128xf32> to vector<8x32xf32>
    %338 = arith.mulf %336, %337 : vector<8x32xf32>
    %cst_53 = arith.constant dense<0.000000e+00> : vector<8xf32>
    %339 = vector.multi_reduction <add>, %338, %cst_53 [1] : vector<8x32xf32> to vector<8xf32>
    %340 = vector.shape_cast %339 : vector<8xf32> to vector<8x1xf32>
    %341 = vector.shape_cast %340 : vector<8x1xf32> to vector<8x1xf32>
    %342 = vector.broadcast %341 : vector<8x1xf32> to vector<8x8xf32>
    %343 = arith.select %28, %342, %331 : vector<8x8xi1>, vector<8x8xf32>
    %344 = vector.extract_strided_slice %8 {offsets = [4, 0], sizes = [1, 32], strides = [1, 1]} : vector<9x32xf32> to vector<1x32xf32>
    %345 = vector.shape_cast %344 : vector<1x32xf32> to vector<32xf32>
    %346 = vector.shape_cast %345 : vector<32xf32> to vector<1x32xf32>
    %347 = vector.broadcast %346 : vector<1x32xf32> to vector<8x32xf32>
    %348 = arith.mulf %288, %347 : vector<8x32xf32>
    %349 = vector.extract_strided_slice %5 {offsets = [0, 64], sizes = [8, 32], strides = [1, 1]} : vector<8x128xf32> to vector<8x32xf32>
    %350 = arith.mulf %348, %349 : vector<8x32xf32>
    %cst_54 = arith.constant dense<0.000000e+00> : vector<8xf32>
    %351 = vector.multi_reduction <add>, %350, %cst_54 [1] : vector<8x32xf32> to vector<8xf32>
    %352 = vector.shape_cast %351 : vector<8xf32> to vector<8x1xf32>
    %353 = vector.shape_cast %352 : vector<8x1xf32> to vector<8x1xf32>
    %354 = vector.broadcast %353 : vector<8x1xf32> to vector<8x8xf32>
    %355 = arith.select %30, %354, %343 : vector<8x8xi1>, vector<8x8xf32>
    %356 = vector.extract_strided_slice %8 {offsets = [5, 0], sizes = [1, 32], strides = [1, 1]} : vector<9x32xf32> to vector<1x32xf32>
    %357 = vector.shape_cast %356 : vector<1x32xf32> to vector<32xf32>
    %358 = vector.shape_cast %357 : vector<32xf32> to vector<1x32xf32>
    %359 = vector.broadcast %358 : vector<1x32xf32> to vector<8x32xf32>
    %360 = arith.mulf %288, %359 : vector<8x32xf32>
    %361 = vector.extract_strided_slice %31 {offsets = [0, 64], sizes = [8, 32], strides = [1, 1]} : vector<8x128xf32> to vector<8x32xf32>
    %362 = arith.mulf %360, %361 : vector<8x32xf32>
    %cst_55 = arith.constant dense<0.000000e+00> : vector<8xf32>
    %363 = vector.multi_reduction <add>, %362, %cst_55 [1] : vector<8x32xf32> to vector<8xf32>
    %364 = vector.shape_cast %363 : vector<8xf32> to vector<8x1xf32>
    %365 = vector.shape_cast %364 : vector<8x1xf32> to vector<8x1xf32>
    %366 = vector.broadcast %365 : vector<8x1xf32> to vector<8x8xf32>
    %367 = arith.select %33, %366, %355 : vector<8x8xi1>, vector<8x8xf32>
    %368 = vector.extract_strided_slice %8 {offsets = [6, 0], sizes = [1, 32], strides = [1, 1]} : vector<9x32xf32> to vector<1x32xf32>
    %369 = vector.shape_cast %368 : vector<1x32xf32> to vector<32xf32>
    %370 = vector.shape_cast %369 : vector<32xf32> to vector<1x32xf32>
    %371 = vector.broadcast %370 : vector<1x32xf32> to vector<8x32xf32>
    %372 = arith.mulf %288, %371 : vector<8x32xf32>
    %373 = vector.extract_strided_slice %34 {offsets = [0, 64], sizes = [8, 32], strides = [1, 1]} : vector<8x128xf32> to vector<8x32xf32>
    %374 = arith.mulf %372, %373 : vector<8x32xf32>
    %cst_56 = arith.constant dense<0.000000e+00> : vector<8xf32>
    %375 = vector.multi_reduction <add>, %374, %cst_56 [1] : vector<8x32xf32> to vector<8xf32>
    %376 = vector.shape_cast %375 : vector<8xf32> to vector<8x1xf32>
    %377 = vector.shape_cast %376 : vector<8x1xf32> to vector<8x1xf32>
    %378 = vector.broadcast %377 : vector<8x1xf32> to vector<8x8xf32>
    %379 = arith.select %36, %378, %367 : vector<8x8xi1>, vector<8x8xf32>
    %380 = vector.extract_strided_slice %8 {offsets = [7, 0], sizes = [1, 32], strides = [1, 1]} : vector<9x32xf32> to vector<1x32xf32>
    %381 = vector.shape_cast %380 : vector<1x32xf32> to vector<32xf32>
    %382 = vector.shape_cast %381 : vector<32xf32> to vector<1x32xf32>
    %383 = vector.broadcast %382 : vector<1x32xf32> to vector<8x32xf32>
    %384 = arith.mulf %288, %383 : vector<8x32xf32>
    %385 = vector.extract_strided_slice %37 {offsets = [0, 64], sizes = [8, 32], strides = [1, 1]} : vector<8x128xf32> to vector<8x32xf32>
    %386 = arith.mulf %384, %385 : vector<8x32xf32>
    %cst_57 = arith.constant dense<0.000000e+00> : vector<8xf32>
    %387 = vector.multi_reduction <add>, %386, %cst_57 [1] : vector<8x32xf32> to vector<8xf32>
    %388 = vector.shape_cast %387 : vector<8xf32> to vector<8x1xf32>
    %389 = vector.shape_cast %388 : vector<8x1xf32> to vector<8x1xf32>
    %390 = vector.broadcast %389 : vector<8x1xf32> to vector<8x8xf32>
    %391 = arith.select %39, %390, %379 : vector<8x8xi1>, vector<8x8xf32>
    %cst_58 = arith.constant -1.000000e+30 : f32
    %392 = vector.shape_cast %12 : vector<1x8xi1> to vector<1x8xi1>
    %393 = vector.broadcast %392 : vector<1x8xi1> to vector<8x8xi1>
    %394 = vector.broadcast %cst_58 : f32 to vector<8x8xf32>
    %395 = arith.select %393, %391, %394 : vector<8x8xi1>, vector<8x8xf32>
    %cst_59 = arith.constant dense<0xFF800000> : vector<8xf32>
    %396 = vector.multi_reduction <maximumf>, %395, %cst_59 [1] : vector<8x8xf32> to vector<8xf32>
    %397 = vector.shape_cast %396 : vector<8xf32> to vector<8x1xf32>
    %398 = vector.broadcast %397 : vector<8x1xf32> to vector<8x8xf32>
    %399 = arith.subf %395, %398 : vector<8x8xf32>
    %400 = math.exp %399 : vector<8x8xf32>
    %cst_60 = arith.constant dense<0.000000e+00> : vector<8xf32>
    %401 = vector.multi_reduction <add>, %400, %cst_60 [1] : vector<8x8xf32> to vector<8xf32>
    %402 = vector.shape_cast %401 : vector<8xf32> to vector<8x1xf32>
    %403 = tpu.reciprocal %402 {approx = true} : vector<8x1xf32> -> vector<8x1xf32>
    %404 = vector.broadcast %403 : vector<8x1xf32> to vector<8x8xf32>
    %405 = arith.mulf %400, %404 : vector<8x8xf32>
    %406 = arith.truncf %405 : vector<8x8xf32> to vector<8x8xbf16>
    %cst_61 = arith.constant dense<0.000000e+00> : vector<8x32xf32>
    %407 = tpu.matmul %406, %290, %cst_61 {dimension_numbers = #tpu.dot_dimension_numbers<[1], [0], [0], [1], [0, 0, 1, 1], [], []>} : vector<8x8xbf16>, vector<8x32xbf16>, vector<8x32xf32> -> vector<8x32xf32>
    %408 = arith.truncf %407 : vector<8x32xf32> to vector<8x32xbf16>
    %c0_62 = arith.constant 0 : index
    %c0_63 = arith.constant 0 : index
    %c64 = arith.constant 64 : index
    %409 = vector.load %arg6[%c0_62, %c0_63, %c64] : memref<1x8x128xbf16, #tpu.memory_space<vmem>>, vector<1x8x32xbf16>
    %410 = vector.shape_cast %409 : vector<1x8x32xbf16> to vector<8x32xbf16>
    %411 = vector.shape_cast %408 : vector<8x32xbf16> to vector<1x8x32xbf16>
    tpu.vector_store %arg6[%c0_62, %c0_63, %c64], %411 {strides = array<i32>} : memref<1x8x128xbf16, #tpu.memory_space<vmem>>, vector<1x8x32xbf16>,
    %412 = vector.extract_strided_slice %2 {offsets = [0, 96], sizes = [8, 32], strides = [1, 1]} : vector<8x128xf32> to vector<8x32xf32>
    %413 = vector.extract_strided_slice %4 {offsets = [0, 96], sizes = [8, 32], strides = [1, 1]} : vector<8x128xbf16> to vector<8x32xbf16>
    %414 = vector.extract_strided_slice %7 {offsets = [0, 96], sizes = [8, 32], strides = [1, 1]} : vector<8x128xbf16> to vector<8x32xbf16>
    %415 = vector.extract_strided_slice %8 {offsets = [0, 0], sizes = [1, 32], strides = [1, 1]} : vector<9x32xf32> to vector<1x32xf32>
    %416 = vector.shape_cast %415 : vector<1x32xf32> to vector<32xf32>
    %417 = vector.shape_cast %416 : vector<32xf32> to vector<1x32xf32>
    %418 = vector.broadcast %417 : vector<1x32xf32> to vector<8x32xf32>
    %419 = arith.mulf %412, %418 : vector<8x32xf32>
    %420 = arith.truncf %419 : vector<8x32xf32> to vector<8x32xbf16>
    %cst_64 = arith.constant dense<0.000000e+00> : vector<8x8xf32>
    %421 = tpu.matmul %420, %413, %cst_64 {dimension_numbers = #tpu.dot_dimension_numbers<[1], [1], [0], [0], [0, 0, 1, 0], [], []>} : vector<8x32xbf16>, vector<8x32xbf16>, vector<8x8xf32> -> vector<8x8xf32>
    %422 = vector.extract_strided_slice %8 {offsets = [8, 0], sizes = [1, 32], strides = [1, 1]} : vector<9x32xf32> to vector<1x32xf32>
    %423 = vector.shape_cast %422 : vector<1x32xf32> to vector<32xf32>
    %424 = vector.shape_cast %423 : vector<32xf32> to vector<1x32xf32>
    %425 = vector.broadcast %424 : vector<1x32xf32> to vector<8x32xf32>
    %426 = arith.mulf %412, %425 : vector<8x32xf32>
    %427 = arith.truncf %426 : vector<8x32xf32> to vector<8x32xbf16>
    %cst_65 = arith.constant dense<0.000000e+00> : vector<8x8xf32>
    %428 = tpu.matmul %427, %413, %cst_65 {dimension_numbers = #tpu.dot_dimension_numbers<[1], [1], [0], [0], [0, 0, 1, 0], [], []>} : vector<8x32xbf16>, vector<8x32xbf16>, vector<8x8xf32> -> vector<8x8xf32>
    %cst_66 = arith.constant 0.000000e+00 : f32
    %429 = vector.broadcast %cst_66 : f32 to vector<8x8xf32>
    %430 = arith.select %17, %421, %429 : vector<8x8xi1>, vector<8x8xf32>
    %431 = arith.select %19, %428, %430 : vector<8x8xi1>, vector<8x8xf32>
    %432 = vector.extract_strided_slice %8 {offsets = [1, 0], sizes = [1, 32], strides = [1, 1]} : vector<9x32xf32> to vector<1x32xf32>
    %433 = vector.shape_cast %432 : vector<1x32xf32> to vector<32xf32>
    %434 = vector.shape_cast %433 : vector<32xf32> to vector<1x32xf32>
    %435 = vector.broadcast %434 : vector<1x32xf32> to vector<8x32xf32>
    %436 = arith.mulf %412, %435 : vector<8x32xf32>
    %437 = vector.extract_strided_slice %20 {offsets = [0, 96], sizes = [8, 32], strides = [1, 1]} : vector<8x128xf32> to vector<8x32xf32>
    %438 = arith.mulf %436, %437 : vector<8x32xf32>
    %cst_67 = arith.constant dense<0.000000e+00> : vector<8xf32>
    %439 = vector.multi_reduction <add>, %438, %cst_67 [1] : vector<8x32xf32> to vector<8xf32>
    %440 = vector.shape_cast %439 : vector<8xf32> to vector<8x1xf32>
    %441 = vector.shape_cast %440 : vector<8x1xf32> to vector<8x1xf32>
    %442 = vector.broadcast %441 : vector<8x1xf32> to vector<8x8xf32>
    %443 = arith.select %22, %442, %431 : vector<8x8xi1>, vector<8x8xf32>
    %444 = vector.extract_strided_slice %8 {offsets = [2, 0], sizes = [1, 32], strides = [1, 1]} : vector<9x32xf32> to vector<1x32xf32>
    %445 = vector.shape_cast %444 : vector<1x32xf32> to vector<32xf32>
    %446 = vector.shape_cast %445 : vector<32xf32> to vector<1x32xf32>
    %447 = vector.broadcast %446 : vector<1x32xf32> to vector<8x32xf32>
    %448 = arith.mulf %412, %447 : vector<8x32xf32>
    %449 = vector.extract_strided_slice %23 {offsets = [0, 96], sizes = [8, 32], strides = [1, 1]} : vector<8x128xf32> to vector<8x32xf32>
    %450 = arith.mulf %448, %449 : vector<8x32xf32>
    %cst_68 = arith.constant dense<0.000000e+00> : vector<8xf32>
    %451 = vector.multi_reduction <add>, %450, %cst_68 [1] : vector<8x32xf32> to vector<8xf32>
    %452 = vector.shape_cast %451 : vector<8xf32> to vector<8x1xf32>
    %453 = vector.shape_cast %452 : vector<8x1xf32> to vector<8x1xf32>
    %454 = vector.broadcast %453 : vector<8x1xf32> to vector<8x8xf32>
    %455 = arith.select %25, %454, %443 : vector<8x8xi1>, vector<8x8xf32>
    %456 = vector.extract_strided_slice %8 {offsets = [3, 0], sizes = [1, 32], strides = [1, 1]} : vector<9x32xf32> to vector<1x32xf32>
    %457 = vector.shape_cast %456 : vector<1x32xf32> to vector<32xf32>
    %458 = vector.shape_cast %457 : vector<32xf32> to vector<1x32xf32>
    %459 = vector.broadcast %458 : vector<1x32xf32> to vector<8x32xf32>
    %460 = arith.mulf %412, %459 : vector<8x32xf32>
    %461 = vector.extract_strided_slice %26 {offsets = [0, 96], sizes = [8, 32], strides = [1, 1]} : vector<8x128xf32> to vector<8x32xf32>
    %462 = arith.mulf %460, %461 : vector<8x32xf32>
    %cst_69 = arith.constant dense<0.000000e+00> : vector<8xf32>
    %463 = vector.multi_reduction <add>, %462, %cst_69 [1] : vector<8x32xf32> to vector<8xf32>
    %464 = vector.shape_cast %463 : vector<8xf32> to vector<8x1xf32>
    %465 = vector.shape_cast %464 : vector<8x1xf32> to vector<8x1xf32>
    %466 = vector.broadcast %465 : vector<8x1xf32> to vector<8x8xf32>
    %467 = arith.select %28, %466, %455 : vector<8x8xi1>, vector<8x8xf32>
    %468 = vector.extract_strided_slice %8 {offsets = [4, 0], sizes = [1, 32], strides = [1, 1]} : vector<9x32xf32> to vector<1x32xf32>
    %469 = vector.shape_cast %468 : vector<1x32xf32> to vector<32xf32>
    %470 = vector.shape_cast %469 : vector<32xf32> to vector<1x32xf32>
    %471 = vector.broadcast %470 : vector<1x32xf32> to vector<8x32xf32>
    %472 = arith.mulf %412, %471 : vector<8x32xf32>
    %473 = vector.extract_strided_slice %5 {offsets = [0, 96], sizes = [8, 32], strides = [1, 1]} : vector<8x128xf32> to vector<8x32xf32>
    %474 = arith.mulf %472, %473 : vector<8x32xf32>
    %cst_70 = arith.constant dense<0.000000e+00> : vector<8xf32>
    %475 = vector.multi_reduction <add>, %474, %cst_70 [1] : vector<8x32xf32> to vector<8xf32>
    %476 = vector.shape_cast %475 : vector<8xf32> to vector<8x1xf32>
    %477 = vector.shape_cast %476 : vector<8x1xf32> to vector<8x1xf32>
    %478 = vector.broadcast %477 : vector<8x1xf32> to vector<8x8xf32>
    %479 = arith.select %30, %478, %467 : vector<8x8xi1>, vector<8x8xf32>
    %480 = vector.extract_strided_slice %8 {offsets = [5, 0], sizes = [1, 32], strides = [1, 1]} : vector<9x32xf32> to vector<1x32xf32>
    %481 = vector.shape_cast %480 : vector<1x32xf32> to vector<32xf32>
    %482 = vector.shape_cast %481 : vector<32xf32> to vector<1x32xf32>
    %483 = vector.broadcast %482 : vector<1x32xf32> to vector<8x32xf32>
    %484 = arith.mulf %412, %483 : vector<8x32xf32>
    %485 = vector.extract_strided_slice %31 {offsets = [0, 96], sizes = [8, 32], strides = [1, 1]} : vector<8x128xf32> to vector<8x32xf32>
    %486 = arith.mulf %484, %485 : vector<8x32xf32>
    %cst_71 = arith.constant dense<0.000000e+00> : vector<8xf32>
    %487 = vector.multi_reduction <add>, %486, %cst_71 [1] : vector<8x32xf32> to vector<8xf32>
    %488 = vector.shape_cast %487 : vector<8xf32> to vector<8x1xf32>
    %489 = vector.shape_cast %488 : vector<8x1xf32> to vector<8x1xf32>
    %490 = vector.broadcast %489 : vector<8x1xf32> to vector<8x8xf32>
    %491 = arith.select %33, %490, %479 : vector<8x8xi1>, vector<8x8xf32>
    %492 = vector.extract_strided_slice %8 {offsets = [6, 0], sizes = [1, 32], strides = [1, 1]} : vector<9x32xf32> to vector<1x32xf32>
    %493 = vector.shape_cast %492 : vector<1x32xf32> to vector<32xf32>
    %494 = vector.shape_cast %493 : vector<32xf32> to vector<1x32xf32>
    %495 = vector.broadcast %494 : vector<1x32xf32> to vector<8x32xf32>
    %496 = arith.mulf %412, %495 : vector<8x32xf32>
    %497 = vector.extract_strided_slice %34 {offsets = [0, 96], sizes = [8, 32], strides = [1, 1]} : vector<8x128xf32> to vector<8x32xf32>
    %498 = arith.mulf %496, %497 : vector<8x32xf32>
    %cst_72 = arith.constant dense<0.000000e+00> : vector<8xf32>
    %499 = vector.multi_reduction <add>, %498, %cst_72 [1] : vector<8x32xf32> to vector<8xf32>
    %500 = vector.shape_cast %499 : vector<8xf32> to vector<8x1xf32>
    %501 = vector.shape_cast %500 : vector<8x1xf32> to vector<8x1xf32>
    %502 = vector.broadcast %501 : vector<8x1xf32> to vector<8x8xf32>
    %503 = arith.select %36, %502, %491 : vector<8x8xi1>, vector<8x8xf32>
    %504 = vector.extract_strided_slice %8 {offsets = [7, 0], sizes = [1, 32], strides = [1, 1]} : vector<9x32xf32> to vector<1x32xf32>
    %505 = vector.shape_cast %504 : vector<1x32xf32> to vector<32xf32>
    %506 = vector.shape_cast %505 : vector<32xf32> to vector<1x32xf32>
    %507 = vector.broadcast %506 : vector<1x32xf32> to vector<8x32xf32>
    %508 = arith.mulf %412, %507 : vector<8x32xf32>
    %509 = vector.extract_strided_slice %37 {offsets = [0, 96], sizes = [8, 32], strides = [1, 1]} : vector<8x128xf32> to vector<8x32xf32>
    %510 = arith.mulf %508, %509 : vector<8x32xf32>
    %cst_73 = arith.constant dense<0.000000e+00> : vector<8xf32>
    %511 = vector.multi_reduction <add>, %510, %cst_73 [1] : vector<8x32xf32> to vector<8xf32>
    %512 = vector.shape_cast %511 : vector<8xf32> to vector<8x1xf32>
    %513 = vector.shape_cast %512 : vector<8x1xf32> to vector<8x1xf32>
    %514 = vector.broadcast %513 : vector<8x1xf32> to vector<8x8xf32>
    %515 = arith.select %39, %514, %503 : vector<8x8xi1>, vector<8x8xf32>
    %cst_74 = arith.constant -1.000000e+30 : f32
    %516 = vector.shape_cast %12 : vector<1x8xi1> to vector<1x8xi1>
    %517 = vector.broadcast %516 : vector<1x8xi1> to vector<8x8xi1>
    %518 = vector.broadcast %cst_74 : f32 to vector<8x8xf32>
    %519 = arith.select %517, %515, %518 : vector<8x8xi1>, vector<8x8xf32>
    %cst_75 = arith.constant dense<0xFF800000> : vector<8xf32>
    %520 = vector.multi_reduction <maximumf>, %519, %cst_75 [1] : vector<8x8xf32> to vector<8xf32>
    %521 = vector.shape_cast %520 : vector<8xf32> to vector<8x1xf32>
    %522 = vector.broadcast %521 : vector<8x1xf32> to vector<8x8xf32>
    %523 = arith.subf %519, %522 : vector<8x8xf32>
    %524 = math.exp %523 : vector<8x8xf32>
    %cst_76 = arith.constant dense<0.000000e+00> : vector<8xf32>
    %525 = vector.multi_reduction <add>, %524, %cst_76 [1] : vector<8x8xf32> to vector<8xf32>
    %526 = vector.shape_cast %525 : vector<8xf32> to vector<8x1xf32>
    %527 = tpu.reciprocal %526 {approx = true} : vector<8x1xf32> -> vector<8x1xf32>
    %528 = vector.broadcast %527 : vector<8x1xf32> to vector<8x8xf32>
    %529 = arith.mulf %524, %528 : vector<8x8xf32>
    %530 = arith.truncf %529 : vector<8x8xf32> to vector<8x8xbf16>
    %cst_77 = arith.constant dense<0.000000e+00> : vector<8x32xf32>
    %531 = tpu.matmul %530, %414, %cst_77 {dimension_numbers = #tpu.dot_dimension_numbers<[1], [0], [0], [1], [0, 0, 1, 1], [], []>} : vector<8x8xbf16>, vector<8x32xbf16>, vector<8x32xf32> -> vector<8x32xf32>
    %532 = arith.truncf %531 : vector<8x32xf32> to vector<8x32xbf16>
    %c0_78 = arith.constant 0 : index
    %c0_79 = arith.constant 0 : index
    %c96 = arith.constant 96 : index
    %533 = vector.load %arg6[%c0_78, %c0_79, %c96] : memref<1x8x128xbf16, #tpu.memory_space<vmem>>, vector<1x8x32xbf16>
    %534 = vector.shape_cast %533 : vector<1x8x32xbf16> to vector<8x32xbf16>
    %535 = vector.shape_cast %532 : vector<8x32xbf16> to vector<1x8x32xbf16>
    tpu.vector_store %arg6[%c0_78, %c0_79, %c96], %535 {strides = array<i32>} : memref<1x8x128xbf16, #tpu.memory_space<vmem>>, vector<1x8x32xbf16>,
    return
  }
  func.func @transform_0(%arg0: i32) -> (i32, i32, i32) {
    %c0_i32 = arith.constant 0 : i32
    %c0_i32_0 = arith.constant 0 : i32
    %c0_i32_1 = arith.constant 0 : i32
    return %arg0, %c0_i32, %c0_i32_0 : i32, i32, i32
  }
  func.func @transform_1(%arg0: i32) -> (i32, i32, i32) {
    %c0_i32 = arith.constant 0 : i32
    %c1_i32 = arith.constant 1 : i32
    %c0_i32_0 = arith.constant 0 : i32
    return %arg0, %c0_i32, %c1_i32 : i32, i32, i32
  }
  func.func @transform_2(%arg0: i32) -> (i32, i32, i32) {
    %c0_i32 = arith.constant 0 : i32
    %c2_i32 = arith.constant 2 : i32
    %c0_i32_0 = arith.constant 0 : i32
    return %arg0, %c0_i32, %c2_i32 : i32, i32, i32
  }
  func.func @transform_3(%arg0: i32) -> (i32, i32) {
    %c0_i32 = arith.constant 0 : i32
    %c0_i32_0 = arith.constant 0 : i32
    %c0_i32_1 = arith.constant 0 : i32
    return %c0_i32, %c0_i32_0 : i32, i32
  }
  func.func @transform_4(%arg0: i32) -> (i32, i32, i32) {
    %c0_i32 = arith.constant 0 : i32
    %c0_i32_0 = arith.constant 0 : i32
    %c0_i32_1 = arith.constant 0 : i32
    return %arg0, %c0_i32, %c0_i32_0 : i32, i32, i32
  }
  func.func @transform_5(%arg0: i32) -> (i32, i32, i32) {
    %c0_i32 = arith.constant 0 : i32
    %c0_i32_0 = arith.constant 0 : i32
    %c0_i32_1 = arith.constant 0 : i32
    return %arg0, %c0_i32, %c0_i32_0 : i32, i32, i32
  }
}

module attributes {stable_mosaic.version = 11 : i64} {
  func.func @_ln_res_kernel(%arg0: i32, %arg1: memref<16x128xbf16, #tpu.memory_space<vmem>>, %arg2: memref<16x128xbf16, #tpu.memory_space<vmem>>, %arg3: memref<1x128xf32, #tpu.memory_space<vmem>>, %arg4: memref<1x128xf32, #tpu.memory_space<vmem>>, %arg5: memref<16x128xbf16, #tpu.memory_space<vmem>>) attributes {dimension_semantics = [#tpu.dimension_semantics<parallel>], iteration_bounds = array<i64: 1>, scalar_prefetch = 0 : i64, scratch_operands = 0 : i64, tpu.core_type = #tpu.core_type<tc>, window_params = [{transform_indices = @transform_0, window_bounds = array<i64: 16, 128>}, {transform_indices = @transform_1, window_bounds = array<i64: 16, 128>}, {pipeline_mode = #tpu.pipeline_mode<synchronous>, transform_indices = @transform_2, window_bounds = array<i64: 1, 128>}, {pipeline_mode = #tpu.pipeline_mode<synchronous>, transform_indices = @transform_3, window_bounds = array<i64: 1, 128>}, {transform_indices = @transform_4, window_bounds = array<i64: 16, 128>}]} {
    %c0 = arith.constant 0 : index
    %c0_0 = arith.constant 0 : index
    %0 = vector.load %arg1[%c0, %c0_0] : memref<16x128xbf16, #tpu.memory_space<vmem>>, vector<16x128xbf16>
    %1 = arith.extf %0 : vector<16x128xbf16> to vector<16x128xf32>
    %c0_1 = arith.constant 0 : index
    %c0_2 = arith.constant 0 : index
    %2 = vector.load %arg2[%c0_1, %c0_2] : memref<16x128xbf16, #tpu.memory_space<vmem>>, vector<16x128xbf16>
    %3 = arith.extf %2 : vector<16x128xbf16> to vector<16x128xf32>
    %4 = arith.addf %1, %3 : vector<16x128xf32>
    %cst = arith.constant dense<0.000000e+00> : vector<16xf32>
    %5 = vector.multi_reduction <add>, %4, %cst [1] : vector<16x128xf32> to vector<16xf32>
    %6 = vector.shape_cast %5 : vector<16xf32> to vector<16x1xf32>
    %cst_3 = arith.constant 1.280000e+02 : f32
    %7 = vector.broadcast %cst_3 : f32 to vector<16x1xf32>
    %8 = arith.divf %6, %7 : vector<16x1xf32>
    %9 = vector.broadcast %8 : vector<16x1xf32> to vector<16x128xf32>
    %10 = arith.subf %4, %9 : vector<16x128xf32>
    %11 = arith.mulf %10, %10 : vector<16x128xf32>
    %cst_4 = arith.constant dense<0.000000e+00> : vector<16xf32>
    %12 = vector.multi_reduction <add>, %11, %cst_4 [1] : vector<16x128xf32> to vector<16xf32>
    %13 = vector.shape_cast %12 : vector<16xf32> to vector<16x1xf32>
    %cst_5 = arith.constant 1.280000e+02 : f32
    %14 = vector.broadcast %cst_5 : f32 to vector<16x1xf32>
    %15 = arith.divf %13, %14 : vector<16x1xf32>
    %cst_6 = arith.constant 9.99999974E-6 : f32
    %16 = vector.broadcast %cst_6 : f32 to vector<16x1xf32>
    %17 = arith.addf %15, %16 : vector<16x1xf32>
    %18 = math.rsqrt %17 : vector<16x1xf32>
    %19 = vector.broadcast %18 : vector<16x1xf32> to vector<16x128xf32>
    %20 = arith.mulf %10, %19 : vector<16x128xf32>
    %c0_7 = arith.constant 0 : index
    %c0_8 = arith.constant 0 : index
    %21 = vector.load %arg3[%c0_7, %c0_8] : memref<1x128xf32, #tpu.memory_space<vmem>>, vector<1x128xf32>
    %22 = vector.broadcast %21 : vector<1x128xf32> to vector<16x128xf32>
    %23 = arith.mulf %20, %22 : vector<16x128xf32>
    %c0_9 = arith.constant 0 : index
    %c0_10 = arith.constant 0 : index
    %24 = vector.load %arg4[%c0_9, %c0_10] : memref<1x128xf32, #tpu.memory_space<vmem>>, vector<1x128xf32>
    %25 = vector.broadcast %24 : vector<1x128xf32> to vector<16x128xf32>
    %26 = arith.addf %23, %25 : vector<16x128xf32>
    %27 = arith.truncf %26 : vector<16x128xf32> to vector<16x128xbf16>
    %c0_11 = arith.constant 0 : index
    %c0_12 = arith.constant 0 : index
    %28 = vector.load %arg5[%c0_11, %c0_12] : memref<16x128xbf16, #tpu.memory_space<vmem>>, vector<16x128xbf16>
    tpu.vector_store %arg5[%c0_11, %c0_12], %27 {strides = array<i32>} : memref<16x128xbf16, #tpu.memory_space<vmem>>, vector<16x128xbf16>,
    return
  }
  func.func @transform_0(%arg0: i32) -> (i32, i32) {
    %c0_i32 = arith.constant 0 : i32
    %c0_i32_0 = arith.constant 0 : i32
    return %arg0, %c0_i32 : i32, i32
  }
  func.func @transform_1(%arg0: i32) -> (i32, i32) {
    %c0_i32 = arith.constant 0 : i32
    %c0_i32_0 = arith.constant 0 : i32
    return %arg0, %c0_i32 : i32, i32
  }
  func.func @transform_2(%arg0: i32) -> (i32, i32) {
    %c0_i32 = arith.constant 0 : i32
    %c0_i32_0 = arith.constant 0 : i32
    %c0_i32_1 = arith.constant 0 : i32
    return %c0_i32, %c0_i32_0 : i32, i32
  }
  func.func @transform_3(%arg0: i32) -> (i32, i32) {
    %c0_i32 = arith.constant 0 : i32
    %c0_i32_0 = arith.constant 0 : i32
    %c0_i32_1 = arith.constant 0 : i32
    return %c0_i32, %c0_i32_0 : i32, i32
  }
  func.func @transform_4(%arg0: i32) -> (i32, i32) {
    %c0_i32 = arith.constant 0 : i32
    %c0_i32_0 = arith.constant 0 : i32
    return %arg0, %c0_i32 : i32, i32
  }
}

module attributes {stable_mosaic.version = 11 : i64} {
  func.func @_linear_kernel(%arg0: i32, %arg1: i32, %arg2: i32, %arg3: memref<16x128xbf16, #tpu.memory_space<vmem>>, %arg4: memref<128x512xbf16, #tpu.memory_space<vmem>>, %arg5: memref<1x512xf32, #tpu.memory_space<vmem>>, %arg6: memref<16x512xbf16, #tpu.memory_space<vmem>>, %arg7: memref<16x512xf32, #tpu.memory_space<vmem>>) attributes {dimension_semantics = [#tpu.dimension_semantics<parallel>, #tpu.dimension_semantics<parallel>, #tpu.dimension_semantics<arbitrary>], iteration_bounds = array<i64: 1, 1, 1>, scalar_prefetch = 0 : i64, scratch_operands = 1 : i64, tpu.core_type = #tpu.core_type<tc>, window_params = [{transform_indices = @transform_0, window_bounds = array<i64: 16, 128>}, {transform_indices = @transform_1, window_bounds = array<i64: 128, 512>}, {transform_indices = @transform_2, window_bounds = array<i64: 1, 512>}, {transform_indices = @transform_3, window_bounds = array<i64: 16, 512>}]} {
    %c0_i32 = arith.constant 0 : i32
    %0 = arith.cmpi eq, %arg2, %c0_i32 : i32
    %1 = arith.extui %0 : i1 to i32
    %c0_i32_0 = arith.constant 0 : i32
    %2 = arith.cmpi ne, %1, %c0_i32_0 : i32
    scf.if %2 {
      %cst_10 = arith.constant 0.000000e+00 : f32
      %12 = vector.broadcast %cst_10 : f32 to vector<16x512xf32>
      %c0_11 = arith.constant 0 : index
      %c0_12 = arith.constant 0 : index
      %13 = vector.load %arg7[%c0_11, %c0_12] : memref<16x512xf32, #tpu.memory_space<vmem>>, vector<16x512xf32>
      tpu.vector_store %arg7[%c0_11, %c0_12], %12 {strides = array<i32>} : memref<16x512xf32, #tpu.memory_space<vmem>>, vector<16x512xf32>,
    } else {
    }
    %c0 = arith.constant 0 : index
    %c0_1 = arith.constant 0 : index
    %3 = vector.load %arg3[%c0, %c0_1] : memref<16x128xbf16, #tpu.memory_space<vmem>>, vector<16x128xbf16>
    %c0_2 = arith.constant 0 : index
    %c0_3 = arith.constant 0 : index
    %4 = vector.load %arg4[%c0_2, %c0_3] : memref<128x512xbf16, #tpu.memory_space<vmem>>, vector<128x512xbf16>
    %c0_4 = arith.constant 0 : index
    %c0_5 = arith.constant 0 : index
    %5 = vector.load %arg7[%c0_4, %c0_5] : memref<16x512xf32, #tpu.memory_space<vmem>>, vector<16x512xf32>
    %cst = arith.constant dense<0.000000e+00> : vector<16x512xf32>
    %6 = tpu.matmul %3, %4, %cst {dimension_numbers = #tpu.dot_dimension_numbers<[1], [0], [0], [1], [0, 0, 1, 1], [], []>} : vector<16x128xbf16>, vector<128x512xbf16>, vector<16x512xf32> -> vector<16x512xf32>
    %7 = arith.addf %5, %6 : vector<16x512xf32>
    %c0_6 = arith.constant 0 : index
    %c0_7 = arith.constant 0 : index
    %8 = vector.load %arg7[%c0_6, %c0_7] : memref<16x512xf32, #tpu.memory_space<vmem>>, vector<16x512xf32>
    tpu.vector_store %arg7[%c0_6, %c0_7], %7 {strides = array<i32>} : memref<16x512xf32, #tpu.memory_space<vmem>>, vector<16x512xf32>,
    %c0_i32_8 = arith.constant 0 : i32
    %9 = arith.cmpi eq, %arg2, %c0_i32_8 : i32
    %10 = arith.extui %9 : i1 to i32
    %c0_i32_9 = arith.constant 0 : i32
    %11 = arith.cmpi ne, %10, %c0_i32_9 : i32
    scf.if %11 {
      %c0_10 = arith.constant 0 : index
      %c0_11 = arith.constant 0 : index
      %12 = vector.load %arg7[%c0_10, %c0_11] : memref<16x512xf32, #tpu.memory_space<vmem>>, vector<16x512xf32>
      %c0_12 = arith.constant 0 : index
      %c0_13 = arith.constant 0 : index
      %13 = vector.load %arg5[%c0_12, %c0_13] : memref<1x512xf32, #tpu.memory_space<vmem>>, vector<1x512xf32>
      %14 = vector.broadcast %13 : vector<1x512xf32> to vector<16x512xf32>
      %15 = arith.addf %12, %14 : vector<16x512xf32>
      %cst_14 = arith.constant 0.000000e+00 : f32
      %16 = vector.broadcast %cst_14 : f32 to vector<16x512xf32>
      %17 = arith.maximumf %15, %16 : vector<16x512xf32>
      %18 = arith.truncf %17 : vector<16x512xf32> to vector<16x512xbf16>
      %c0_15 = arith.constant 0 : index
      %c0_16 = arith.constant 0 : index
      %19 = vector.load %arg6[%c0_15, %c0_16] : memref<16x512xbf16, #tpu.memory_space<vmem>>, vector<16x512xbf16>
      tpu.vector_store %arg6[%c0_15, %c0_16], %18 {strides = array<i32>} : memref<16x512xbf16, #tpu.memory_space<vmem>>, vector<16x512xbf16>,
    } else {
    }
    return
  }
  func.func @transform_0(%arg0: i32, %arg1: i32, %arg2: i32) -> (i32, i32) {
    %c0_i32 = arith.constant 0 : i32
    return %arg0, %arg2 : i32, i32
  }
  func.func @transform_1(%arg0: i32, %arg1: i32, %arg2: i32) -> (i32, i32) {
    %c0_i32 = arith.constant 0 : i32
    return %arg2, %arg1 : i32, i32
  }
  func.func @transform_2(%arg0: i32, %arg1: i32, %arg2: i32) -> (i32, i32) {
    %c0_i32 = arith.constant 0 : i32
    %c0_i32_0 = arith.constant 0 : i32
    return %c0_i32, %arg1 : i32, i32
  }
  func.func @transform_3(%arg0: i32, %arg1: i32, %arg2: i32) -> (i32, i32) {
    %c0_i32 = arith.constant 0 : i32
    return %arg0, %arg1 : i32, i32
  }
}

module attributes {stable_mosaic.version = 11 : i64} {
  func.func @_linear_kernel(%arg0: i32, %arg1: i32, %arg2: i32, %arg3: memref<16x512xbf16, #tpu.memory_space<vmem>>, %arg4: memref<512x128xbf16, #tpu.memory_space<vmem>>, %arg5: memref<1x128xf32, #tpu.memory_space<vmem>>, %arg6: memref<16x128xbf16, #tpu.memory_space<vmem>>, %arg7: memref<16x128xf32, #tpu.memory_space<vmem>>) attributes {dimension_semantics = [#tpu.dimension_semantics<parallel>, #tpu.dimension_semantics<parallel>, #tpu.dimension_semantics<arbitrary>], iteration_bounds = array<i64: 1, 1, 1>, scalar_prefetch = 0 : i64, scratch_operands = 1 : i64, tpu.core_type = #tpu.core_type<tc>, window_params = [{transform_indices = @transform_0, window_bounds = array<i64: 16, 512>}, {transform_indices = @transform_1, window_bounds = array<i64: 512, 128>}, {transform_indices = @transform_2, window_bounds = array<i64: 1, 128>}, {transform_indices = @transform_3, window_bounds = array<i64: 16, 128>}]} {
    %c0_i32 = arith.constant 0 : i32
    %0 = arith.cmpi eq, %arg2, %c0_i32 : i32
    %1 = arith.extui %0 : i1 to i32
    %c0_i32_0 = arith.constant 0 : i32
    %2 = arith.cmpi ne, %1, %c0_i32_0 : i32
    scf.if %2 {
      %cst_10 = arith.constant 0.000000e+00 : f32
      %12 = vector.broadcast %cst_10 : f32 to vector<16x128xf32>
      %c0_11 = arith.constant 0 : index
      %c0_12 = arith.constant 0 : index
      %13 = vector.load %arg7[%c0_11, %c0_12] : memref<16x128xf32, #tpu.memory_space<vmem>>, vector<16x128xf32>
      tpu.vector_store %arg7[%c0_11, %c0_12], %12 {strides = array<i32>} : memref<16x128xf32, #tpu.memory_space<vmem>>, vector<16x128xf32>,
    } else {
    }
    %c0 = arith.constant 0 : index
    %c0_1 = arith.constant 0 : index
    %3 = vector.load %arg3[%c0, %c0_1] : memref<16x512xbf16, #tpu.memory_space<vmem>>, vector<16x512xbf16>
    %c0_2 = arith.constant 0 : index
    %c0_3 = arith.constant 0 : index
    %4 = vector.load %arg4[%c0_2, %c0_3] : memref<512x128xbf16, #tpu.memory_space<vmem>>, vector<512x128xbf16>
    %c0_4 = arith.constant 0 : index
    %c0_5 = arith.constant 0 : index
    %5 = vector.load %arg7[%c0_4, %c0_5] : memref<16x128xf32, #tpu.memory_space<vmem>>, vector<16x128xf32>
    %cst = arith.constant dense<0.000000e+00> : vector<16x128xf32>
    %6 = tpu.matmul %3, %4, %cst {dimension_numbers = #tpu.dot_dimension_numbers<[1], [0], [0], [1], [0, 0, 1, 1], [], []>} : vector<16x512xbf16>, vector<512x128xbf16>, vector<16x128xf32> -> vector<16x128xf32>
    %7 = arith.addf %5, %6 : vector<16x128xf32>
    %c0_6 = arith.constant 0 : index
    %c0_7 = arith.constant 0 : index
    %8 = vector.load %arg7[%c0_6, %c0_7] : memref<16x128xf32, #tpu.memory_space<vmem>>, vector<16x128xf32>
    tpu.vector_store %arg7[%c0_6, %c0_7], %7 {strides = array<i32>} : memref<16x128xf32, #tpu.memory_space<vmem>>, vector<16x128xf32>,
    %c0_i32_8 = arith.constant 0 : i32
    %9 = arith.cmpi eq, %arg2, %c0_i32_8 : i32
    %10 = arith.extui %9 : i1 to i32
    %c0_i32_9 = arith.constant 0 : i32
    %11 = arith.cmpi ne, %10, %c0_i32_9 : i32
    scf.if %11 {
      %c0_10 = arith.constant 0 : index
      %c0_11 = arith.constant 0 : index
      %12 = vector.load %arg7[%c0_10, %c0_11] : memref<16x128xf32, #tpu.memory_space<vmem>>, vector<16x128xf32>
      %c0_12 = arith.constant 0 : index
      %c0_13 = arith.constant 0 : index
      %13 = vector.load %arg5[%c0_12, %c0_13] : memref<1x128xf32, #tpu.memory_space<vmem>>, vector<1x128xf32>
      %14 = vector.broadcast %13 : vector<1x128xf32> to vector<16x128xf32>
      %15 = arith.addf %12, %14 : vector<16x128xf32>
      %16 = arith.truncf %15 : vector<16x128xf32> to vector<16x128xbf16>
      %c0_14 = arith.constant 0 : index
      %c0_15 = arith.constant 0 : index
      %17 = vector.load %arg6[%c0_14, %c0_15] : memref<16x128xbf16, #tpu.memory_space<vmem>>, vector<16x128xbf16>
      tpu.vector_store %arg6[%c0_14, %c0_15], %16 {strides = array<i32>} : memref<16x128xbf16, #tpu.memory_space<vmem>>, vector<16x128xbf16>,
    } else {
    }
    return
  }
  func.func @transform_0(%arg0: i32, %arg1: i32, %arg2: i32) -> (i32, i32) {
    %c0_i32 = arith.constant 0 : i32
    return %arg0, %arg2 : i32, i32
  }
  func.func @transform_1(%arg0: i32, %arg1: i32, %arg2: i32) -> (i32, i32) {
    %c0_i32 = arith.constant 0 : i32
    return %arg2, %arg1 : i32, i32
  }
  func.func @transform_2(%arg0: i32, %arg1: i32, %arg2: i32) -> (i32, i32) {
    %c0_i32 = arith.constant 0 : i32
    %c0_i32_0 = arith.constant 0 : i32
    return %c0_i32, %arg1 : i32, i32
  }
  func.func @transform_3(%arg0: i32, %arg1: i32, %arg2: i32) -> (i32, i32) {
    %c0_i32 = arith.constant 0 : i32
    return %arg0, %arg1 : i32, i32
  }
}

module attributes {stable_mosaic.version = 11 : i64} {
  func.func @_linear_kernel(%arg0: i32, %arg1: i32, %arg2: i32, %arg3: memref<16x128xbf16, #tpu.memory_space<vmem>>, %arg4: memref<128x256xbf16, #tpu.memory_space<vmem>>, %arg5: memref<1x256xf32, #tpu.memory_space<vmem>>, %arg6: memref<16x256xbf16, #tpu.memory_space<vmem>>, %arg7: memref<16x256xf32, #tpu.memory_space<vmem>>) attributes {dimension_semantics = [#tpu.dimension_semantics<parallel>, #tpu.dimension_semantics<parallel>, #tpu.dimension_semantics<arbitrary>], iteration_bounds = array<i64: 1, 1, 1>, scalar_prefetch = 0 : i64, scratch_operands = 1 : i64, tpu.core_type = #tpu.core_type<tc>, window_params = [{transform_indices = @transform_0, window_bounds = array<i64: 16, 128>}, {transform_indices = @transform_1, window_bounds = array<i64: 128, 256>}, {transform_indices = @transform_2, window_bounds = array<i64: 1, 256>}, {transform_indices = @transform_3, window_bounds = array<i64: 16, 256>}]} {
    %c0_i32 = arith.constant 0 : i32
    %0 = arith.cmpi eq, %arg2, %c0_i32 : i32
    %1 = arith.extui %0 : i1 to i32
    %c0_i32_0 = arith.constant 0 : i32
    %2 = arith.cmpi ne, %1, %c0_i32_0 : i32
    scf.if %2 {
      %cst_10 = arith.constant 0.000000e+00 : f32
      %12 = vector.broadcast %cst_10 : f32 to vector<16x256xf32>
      %c0_11 = arith.constant 0 : index
      %c0_12 = arith.constant 0 : index
      %13 = vector.load %arg7[%c0_11, %c0_12] : memref<16x256xf32, #tpu.memory_space<vmem>>, vector<16x256xf32>
      tpu.vector_store %arg7[%c0_11, %c0_12], %12 {strides = array<i32>} : memref<16x256xf32, #tpu.memory_space<vmem>>, vector<16x256xf32>,
    } else {
    }
    %c0 = arith.constant 0 : index
    %c0_1 = arith.constant 0 : index
    %3 = vector.load %arg3[%c0, %c0_1] : memref<16x128xbf16, #tpu.memory_space<vmem>>, vector<16x128xbf16>
    %c0_2 = arith.constant 0 : index
    %c0_3 = arith.constant 0 : index
    %4 = vector.load %arg4[%c0_2, %c0_3] : memref<128x256xbf16, #tpu.memory_space<vmem>>, vector<128x256xbf16>
    %c0_4 = arith.constant 0 : index
    %c0_5 = arith.constant 0 : index
    %5 = vector.load %arg7[%c0_4, %c0_5] : memref<16x256xf32, #tpu.memory_space<vmem>>, vector<16x256xf32>
    %cst = arith.constant dense<0.000000e+00> : vector<16x256xf32>
    %6 = tpu.matmul %3, %4, %cst {dimension_numbers = #tpu.dot_dimension_numbers<[1], [0], [0], [1], [0, 0, 1, 1], [], []>} : vector<16x128xbf16>, vector<128x256xbf16>, vector<16x256xf32> -> vector<16x256xf32>
    %7 = arith.addf %5, %6 : vector<16x256xf32>
    %c0_6 = arith.constant 0 : index
    %c0_7 = arith.constant 0 : index
    %8 = vector.load %arg7[%c0_6, %c0_7] : memref<16x256xf32, #tpu.memory_space<vmem>>, vector<16x256xf32>
    tpu.vector_store %arg7[%c0_6, %c0_7], %7 {strides = array<i32>} : memref<16x256xf32, #tpu.memory_space<vmem>>, vector<16x256xf32>,
    %c0_i32_8 = arith.constant 0 : i32
    %9 = arith.cmpi eq, %arg2, %c0_i32_8 : i32
    %10 = arith.extui %9 : i1 to i32
    %c0_i32_9 = arith.constant 0 : i32
    %11 = arith.cmpi ne, %10, %c0_i32_9 : i32
    scf.if %11 {
      %c0_10 = arith.constant 0 : index
      %c0_11 = arith.constant 0 : index
      %12 = vector.load %arg7[%c0_10, %c0_11] : memref<16x256xf32, #tpu.memory_space<vmem>>, vector<16x256xf32>
      %c0_12 = arith.constant 0 : index
      %c0_13 = arith.constant 0 : index
      %13 = vector.load %arg5[%c0_12, %c0_13] : memref<1x256xf32, #tpu.memory_space<vmem>>, vector<1x256xf32>
      %14 = vector.broadcast %13 : vector<1x256xf32> to vector<16x256xf32>
      %15 = arith.addf %12, %14 : vector<16x256xf32>
      %16 = arith.truncf %15 : vector<16x256xf32> to vector<16x256xbf16>
      %c0_14 = arith.constant 0 : index
      %c0_15 = arith.constant 0 : index
      %17 = vector.load %arg6[%c0_14, %c0_15] : memref<16x256xbf16, #tpu.memory_space<vmem>>, vector<16x256xbf16>
      tpu.vector_store %arg6[%c0_14, %c0_15], %16 {strides = array<i32>} : memref<16x256xbf16, #tpu.memory_space<vmem>>, vector<16x256xbf16>,
    } else {
    }
    return
  }
  func.func @transform_0(%arg0: i32, %arg1: i32, %arg2: i32) -> (i32, i32) {
    %c0_i32 = arith.constant 0 : i32
    return %arg0, %arg2 : i32, i32
  }
  func.func @transform_1(%arg0: i32, %arg1: i32, %arg2: i32) -> (i32, i32) {
    %c0_i32 = arith.constant 0 : i32
    return %arg2, %arg1 : i32, i32
  }
  func.func @transform_2(%arg0: i32, %arg1: i32, %arg2: i32) -> (i32, i32) {
    %c0_i32 = arith.constant 0 : i32
    %c0_i32_0 = arith.constant 0 : i32
    return %c0_i32, %arg1 : i32, i32
  }
  func.func @transform_3(%arg0: i32, %arg1: i32, %arg2: i32) -> (i32, i32) {
    %c0_i32 = arith.constant 0 : i32
    return %arg0, %arg1 : i32, i32
  }
}

module attributes {stable_mosaic.version = 11 : i64} {
  func.func @_linear_kernel(%arg0: i32, %arg1: i32, %arg2: i32, %arg3: memref<16x128xbf16, #tpu.memory_space<vmem>>, %arg4: memref<50x128xbf16, #tpu.memory_space<vmem>>, %arg5: memref<1x50xf32, #tpu.memory_space<vmem>>, %arg6: memref<16x50xf32, #tpu.memory_space<vmem>>, %arg7: memref<16x50xf32, #tpu.memory_space<vmem>>) attributes {dimension_semantics = [#tpu.dimension_semantics<parallel>, #tpu.dimension_semantics<parallel>, #tpu.dimension_semantics<arbitrary>], iteration_bounds = array<i64: 1, 1, 1>, scalar_prefetch = 0 : i64, scratch_operands = 1 : i64, tpu.core_type = #tpu.core_type<tc>, window_params = [{transform_indices = @transform_0, window_bounds = array<i64: 16, 128>}, {transform_indices = @transform_1, window_bounds = array<i64: 50, 128>}, {transform_indices = @transform_2, window_bounds = array<i64: 1, 50>}, {transform_indices = @transform_3, window_bounds = array<i64: 16, 50>}]} {
    %c0_i32 = arith.constant 0 : i32
    %0 = arith.cmpi eq, %arg2, %c0_i32 : i32
    %1 = arith.extui %0 : i1 to i32
    %c0_i32_0 = arith.constant 0 : i32
    %2 = arith.cmpi ne, %1, %c0_i32_0 : i32
    scf.if %2 {
      %cst_10 = arith.constant 0.000000e+00 : f32
      %12 = vector.broadcast %cst_10 : f32 to vector<16x50xf32>
      %c0_11 = arith.constant 0 : index
      %c0_12 = arith.constant 0 : index
      %13 = vector.load %arg7[%c0_11, %c0_12] : memref<16x50xf32, #tpu.memory_space<vmem>>, vector<16x50xf32>
      tpu.vector_store %arg7[%c0_11, %c0_12], %12 {strides = array<i32>} : memref<16x50xf32, #tpu.memory_space<vmem>>, vector<16x50xf32>,
    } else {
    }
    %c0 = arith.constant 0 : index
    %c0_1 = arith.constant 0 : index
    %3 = vector.load %arg3[%c0, %c0_1] : memref<16x128xbf16, #tpu.memory_space<vmem>>, vector<16x128xbf16>
    %c0_2 = arith.constant 0 : index
    %c0_3 = arith.constant 0 : index
    %4 = vector.load %arg4[%c0_2, %c0_3] : memref<50x128xbf16, #tpu.memory_space<vmem>>, vector<50x128xbf16>
    %c0_4 = arith.constant 0 : index
    %c0_5 = arith.constant 0 : index
    %5 = vector.load %arg7[%c0_4, %c0_5] : memref<16x50xf32, #tpu.memory_space<vmem>>, vector<16x50xf32>
    %cst = arith.constant dense<0.000000e+00> : vector<16x50xf32>
    %6 = tpu.matmul %3, %4, %cst {dimension_numbers = #tpu.dot_dimension_numbers<[1], [1], [0], [0], [0, 0, 1, 0], [], []>} : vector<16x128xbf16>, vector<50x128xbf16>, vector<16x50xf32> -> vector<16x50xf32>
    %7 = arith.addf %5, %6 : vector<16x50xf32>
    %c0_6 = arith.constant 0 : index
    %c0_7 = arith.constant 0 : index
    %8 = vector.load %arg7[%c0_6, %c0_7] : memref<16x50xf32, #tpu.memory_space<vmem>>, vector<16x50xf32>
    tpu.vector_store %arg7[%c0_6, %c0_7], %7 {strides = array<i32>} : memref<16x50xf32, #tpu.memory_space<vmem>>, vector<16x50xf32>,
    %c0_i32_8 = arith.constant 0 : i32
    %9 = arith.cmpi eq, %arg2, %c0_i32_8 : i32
    %10 = arith.extui %9 : i1 to i32
    %c0_i32_9 = arith.constant 0 : i32
    %11 = arith.cmpi ne, %10, %c0_i32_9 : i32
    scf.if %11 {
      %c0_10 = arith.constant 0 : index
      %c0_11 = arith.constant 0 : index
      %12 = vector.load %arg7[%c0_10, %c0_11] : memref<16x50xf32, #tpu.memory_space<vmem>>, vector<16x50xf32>
      %c0_12 = arith.constant 0 : index
      %c0_13 = arith.constant 0 : index
      %13 = vector.load %arg5[%c0_12, %c0_13] : memref<1x50xf32, #tpu.memory_space<vmem>>, vector<1x50xf32>
      %14 = vector.broadcast %13 : vector<1x50xf32> to vector<16x50xf32>
      %15 = arith.addf %12, %14 : vector<16x50xf32>
      %c0_14 = arith.constant 0 : index
      %c0_15 = arith.constant 0 : index
      %16 = vector.load %arg6[%c0_14, %c0_15] : memref<16x50xf32, #tpu.memory_space<vmem>>, vector<16x50xf32>
      tpu.vector_store %arg6[%c0_14, %c0_15], %15 {strides = array<i32>} : memref<16x50xf32, #tpu.memory_space<vmem>>, vector<16x50xf32>,
    } else {
    }
    return
  }
  func.func @transform_0(%arg0: i32, %arg1: i32, %arg2: i32) -> (i32, i32) {
    %c0_i32 = arith.constant 0 : i32
    return %arg0, %arg2 : i32, i32
  }
  func.func @transform_1(%arg0: i32, %arg1: i32, %arg2: i32) -> (i32, i32) {
    %c0_i32 = arith.constant 0 : i32
    return %arg1, %arg2 : i32, i32
  }
  func.func @transform_2(%arg0: i32, %arg1: i32, %arg2: i32) -> (i32, i32) {
    %c0_i32 = arith.constant 0 : i32
    %c0_i32_0 = arith.constant 0 : i32
    return %c0_i32, %arg1 : i32, i32
  }
  func.func @transform_3(%arg0: i32, %arg1: i32, %arg2: i32) -> (i32, i32) {
    %c0_i32 = arith.constant 0 : i32
    return %arg0, %arg1 : i32, i32
  }
}

module attributes {stable_mosaic.version = 11 : i64} {
  func.func @_rel_attn_kernel(%arg0: i32, %arg1: memref<1x8x128xbf16, #tpu.memory_space<vmem>>, %arg2: memref<1x8x128xbf16, #tpu.memory_space<vmem>>, %arg3: memref<1x8x128xbf16, #tpu.memory_space<vmem>>, %arg4: memref<9x32xf32, #tpu.memory_space<vmem>>, %arg5: memref<1x8x8xi8, #tpu.memory_space<vmem>>, %arg6: memref<1x8x128xbf16, #tpu.memory_space<vmem>>) attributes {dimension_semantics = [#tpu.dimension_semantics<parallel>], iteration_bounds = array<i64: 2>, scalar_prefetch = 0 : i64, scratch_operands = 0 : i64, tpu.core_type = #tpu.core_type<tc>, window_params = [{transform_indices = @transform_0, window_bounds = array<i64: 1, 8, 128>}, {transform_indices = @transform_1, window_bounds = array<i64: 1, 8, 128>}, {transform_indices = @transform_2, window_bounds = array<i64: 1, 8, 128>}, {pipeline_mode = #tpu.pipeline_mode<synchronous>, transform_indices = @transform_3, window_bounds = array<i64: 9, 32>}, {transform_indices = @transform_4, window_bounds = array<i64: 1, 8, 8>}, {transform_indices = @transform_5, window_bounds = array<i64: 1, 8, 128>}]} {
    %c0 = arith.constant 0 : index
    %c0_0 = arith.constant 0 : index
    %c0_1 = arith.constant 0 : index
    %0 = vector.load %arg1[%c0, %c0_0, %c0_1] : memref<1x8x128xbf16, #tpu.memory_space<vmem>>, vector<1x8x128xbf16>
    %1 = vector.shape_cast %0 : vector<1x8x128xbf16> to vector<8x128xbf16>
    %2 = arith.extf %1 : vector<8x128xbf16> to vector<8x128xf32>
    %c0_2 = arith.constant 0 : index
    %c0_3 = arith.constant 0 : index
    %c0_4 = arith.constant 0 : index
    %3 = vector.load %arg2[%c0_2, %c0_3, %c0_4] : memref<1x8x128xbf16, #tpu.memory_space<vmem>>, vector<1x8x128xbf16>
    %4 = vector.shape_cast %3 : vector<1x8x128xbf16> to vector<8x128xbf16>
    %5 = arith.extf %4 : vector<8x128xbf16> to vector<8x128xf32>
    %c0_5 = arith.constant 0 : index
    %c0_6 = arith.constant 0 : index
    %c0_7 = arith.constant 0 : index
    %6 = vector.load %arg3[%c0_5, %c0_6, %c0_7] : memref<1x8x128xbf16, #tpu.memory_space<vmem>>, vector<1x8x128xbf16>
    %7 = vector.shape_cast %6 : vector<1x8x128xbf16> to vector<8x128xbf16>
    %c0_8 = arith.constant 0 : index
    %c0_9 = arith.constant 0 : index
    %8 = vector.load %arg4[%c0_8, %c0_9] : memref<9x32xf32, #tpu.memory_space<vmem>>, vector<9x32xf32>
    %c0_10 = arith.constant 0 : index
    %c0_11 = arith.constant 0 : index
    %c0_12 = arith.constant 0 : index
    %9 = vector.load %arg5[%c0_10, %c0_11, %c0_12] : memref<1x8x8xi8, #tpu.memory_space<vmem>>, vector<1x8x8xi8>
    %10 = vector.shape_cast %9 : vector<1x8x8xi8> to vector<8x8xi8>
    %c0_i8 = arith.constant 0 : i8
    %11 = vector.broadcast %c0_i8 : i8 to vector<8x8xi8>
    %12 = arith.cmpi ne, %10, %11 : vector<8x8xi8>
    %13 = tpu.iota {dimensions = array<i32: 0>} : vector<8x8xi32>
    %14 = tpu.iota {dimensions = array<i32: 1>} : vector<8x8xi32>
    %15 = arith.subi %13, %14 : vector<8x8xi32>
    %c-4_i32 = arith.constant -4 : i32
    %16 = vector.broadcast %c-4_i32 : i32 to vector<8x8xi32>
    %17 = arith.cmpi sle, %15, %16 : vector<8x8xi32>
    %c4_i32 = arith.constant 4 : i32
    %18 = vector.broadcast %c4_i32 : i32 to vector<8x8xi32>
    %19 = arith.cmpi sge, %15, %18 : vector<8x8xi32>
    %c5_i32 = arith.constant 5 : i32
    %20 = tpu.dynamic_rotate %5 by %c5_i32 dim 0 : vector<8x128xf32>, i32 -> vector<8x128xf32>
    %c-3_i32 = arith.constant -3 : i32
    %21 = vector.broadcast %c-3_i32 : i32 to vector<8x8xi32>
    %22 = arith.cmpi eq, %15, %21 : vector<8x8xi32>
    %c6_i32 = arith.constant 6 : i32
    %23 = tpu.dynamic_rotate %5 by %c6_i32 dim 0 : vector<8x128xf32>, i32 -> vector<8x128xf32>
    %c-2_i32 = arith.constant -2 : i32
    %24 = vector.broadcast %c-2_i32 : i32 to vector<8x8xi32>
    %25 = arith.cmpi eq, %15, %24 : vector<8x8xi32>
    %c7_i32 = arith.constant 7 : i32
    %26 = tpu.dynamic_rotate %5 by %c7_i32 dim 0 : vector<8x128xf32>, i32 -> vector<8x128xf32>
    %c-1_i32 = arith.constant -1 : i32
    %27 = vector.broadcast %c-1_i32 : i32 to vector<8x8xi32>
    %28 = arith.cmpi eq, %15, %27 : vector<8x8xi32>
    %c0_i32 = arith.constant 0 : i32
    %29 = vector.broadcast %c0_i32 : i32 to vector<8x8xi32>
    %30 = arith.cmpi eq, %15, %29 : vector<8x8xi32>
    %c1_i32 = arith.constant 1 : i32
    %31 = tpu.dynamic_rotate %5 by %c1_i32 dim 0 : vector<8x128xf32>, i32 -> vector<8x128xf32>
    %c1_i32_13 = arith.constant 1 : i32
    %32 = vector.broadcast %c1_i32_13 : i32 to vector<8x8xi32>
    %33 = arith.cmpi eq, %15, %32 : vector<8x8xi32>
    %c2_i32 = arith.constant 2 : i32
    %34 = tpu.dynamic_rotate %5 by %c2_i32 dim 0 : vector<8x128xf32>, i32 -> vector<8x128xf32>
    %c2_i32_14 = arith.constant 2 : i32
    %35 = vector.broadcast %c2_i32_14 : i32 to vector<8x8xi32>
    %36 = arith.cmpi eq, %15, %35 : vector<8x8xi32>
    %c3_i32 = arith.constant 3 : i32
    %37 = tpu.dynamic_rotate %5 by %c3_i32 dim 0 : vector<8x128xf32>, i32 -> vector<8x128xf32>
    %c3_i32_15 = arith.constant 3 : i32
    %38 = vector.broadcast %c3_i32_15 : i32 to vector<8x8xi32>
    %39 = arith.cmpi eq, %15, %38 : vector<8x8xi32>
    %40 = vector.extract_strided_slice %2 {offsets = [0, 0], sizes = [8, 32], strides = [1, 1]} : vector<8x128xf32> to vector<8x32xf32>
    %41 = vector.extract_strided_slice %4 {offsets = [0, 0], sizes = [8, 32], strides = [1, 1]} : vector<8x128xbf16> to vector<8x32xbf16>
    %42 = vector.extract_strided_slice %7 {offsets = [0, 0], sizes = [8, 32], strides = [1, 1]} : vector<8x128xbf16> to vector<8x32xbf16>
    %43 = vector.extract_strided_slice %8 {offsets = [0, 0], sizes = [1, 32], strides = [1, 1]} : vector<9x32xf32> to vector<1x32xf32>
    %44 = vector.shape_cast %43 : vector<1x32xf32> to vector<32xf32>
    %45 = vector.shape_cast %44 : vector<32xf32> to vector<1x32xf32>
    %46 = vector.broadcast %45 : vector<1x32xf32> to vector<8x32xf32>
    %47 = arith.mulf %40, %46 : vector<8x32xf32>
    %48 = arith.truncf %47 : vector<8x32xf32> to vector<8x32xbf16>
    %cst = arith.constant dense<0.000000e+00> : vector<8x8xf32>
    %49 = tpu.matmul %48, %41, %cst {dimension_numbers = #tpu.dot_dimension_numbers<[1], [1], [0], [0], [0, 0, 1, 0], [], []>} : vector<8x32xbf16>, vector<8x32xbf16>, vector<8x8xf32> -> vector<8x8xf32>
    %50 = vector.extract_strided_slice %8 {offsets = [8, 0], sizes = [1, 32], strides = [1, 1]} : vector<9x32xf32> to vector<1x32xf32>
    %51 = vector.shape_cast %50 : vector<1x32xf32> to vector<32xf32>
    %52 = vector.shape_cast %51 : vector<32xf32> to vector<1x32xf32>
    %53 = vector.broadcast %52 : vector<1x32xf32> to vector<8x32xf32>
    %54 = arith.mulf %40, %53 : vector<8x32xf32>
    %55 = arith.truncf %54 : vector<8x32xf32> to vector<8x32xbf16>
    %cst_16 = arith.constant dense<0.000000e+00> : vector<8x8xf32>
    %56 = tpu.matmul %55, %41, %cst_16 {dimension_numbers = #tpu.dot_dimension_numbers<[1], [1], [0], [0], [0, 0, 1, 0], [], []>} : vector<8x32xbf16>, vector<8x32xbf16>, vector<8x8xf32> -> vector<8x8xf32>
    %cst_17 = arith.constant 0.000000e+00 : f32
    %57 = vector.broadcast %cst_17 : f32 to vector<8x8xf32>
    %58 = arith.select %17, %49, %57 : vector<8x8xi1>, vector<8x8xf32>
    %59 = arith.select %19, %56, %58 : vector<8x8xi1>, vector<8x8xf32>
    %60 = vector.extract_strided_slice %8 {offsets = [1, 0], sizes = [1, 32], strides = [1, 1]} : vector<9x32xf32> to vector<1x32xf32>
    %61 = vector.shape_cast %60 : vector<1x32xf32> to vector<32xf32>
    %62 = vector.shape_cast %61 : vector<32xf32> to vector<1x32xf32>
    %63 = vector.broadcast %62 : vector<1x32xf32> to vector<8x32xf32>
    %64 = arith.mulf %40, %63 : vector<8x32xf32>
    %65 = vector.extract_strided_slice %20 {offsets = [0, 0], sizes = [8, 32], strides = [1, 1]} : vector<8x128xf32> to vector<8x32xf32>
    %66 = arith.mulf %64, %65 : vector<8x32xf32>
    %cst_18 = arith.constant dense<0.000000e+00> : vector<8xf32>
    %67 = vector.multi_reduction <add>, %66, %cst_18 [1] : vector<8x32xf32> to vector<8xf32>
    %68 = vector.shape_cast %67 : vector<8xf32> to vector<8x1xf32>
    %69 = vector.shape_cast %68 : vector<8x1xf32> to vector<8x1xf32>
    %70 = vector.broadcast %69 : vector<8x1xf32> to vector<8x8xf32>
    %71 = arith.select %22, %70, %59 : vector<8x8xi1>, vector<8x8xf32>
    %72 = vector.extract_strided_slice %8 {offsets = [2, 0], sizes = [1, 32], strides = [1, 1]} : vector<9x32xf32> to vector<1x32xf32>
    %73 = vector.shape_cast %72 : vector<1x32xf32> to vector<32xf32>
    %74 = vector.shape_cast %73 : vector<32xf32> to vector<1x32xf32>
    %75 = vector.broadcast %74 : vector<1x32xf32> to vector<8x32xf32>
    %76 = arith.mulf %40, %75 : vector<8x32xf32>
    %77 = vector.extract_strided_slice %23 {offsets = [0, 0], sizes = [8, 32], strides = [1, 1]} : vector<8x128xf32> to vector<8x32xf32>
    %78 = arith.mulf %76, %77 : vector<8x32xf32>
    %cst_19 = arith.constant dense<0.000000e+00> : vector<8xf32>
    %79 = vector.multi_reduction <add>, %78, %cst_19 [1] : vector<8x32xf32> to vector<8xf32>
    %80 = vector.shape_cast %79 : vector<8xf32> to vector<8x1xf32>
    %81 = vector.shape_cast %80 : vector<8x1xf32> to vector<8x1xf32>
    %82 = vector.broadcast %81 : vector<8x1xf32> to vector<8x8xf32>
    %83 = arith.select %25, %82, %71 : vector<8x8xi1>, vector<8x8xf32>
    %84 = vector.extract_strided_slice %8 {offsets = [3, 0], sizes = [1, 32], strides = [1, 1]} : vector<9x32xf32> to vector<1x32xf32>
    %85 = vector.shape_cast %84 : vector<1x32xf32> to vector<32xf32>
    %86 = vector.shape_cast %85 : vector<32xf32> to vector<1x32xf32>
    %87 = vector.broadcast %86 : vector<1x32xf32> to vector<8x32xf32>
    %88 = arith.mulf %40, %87 : vector<8x32xf32>
    %89 = vector.extract_strided_slice %26 {offsets = [0, 0], sizes = [8, 32], strides = [1, 1]} : vector<8x128xf32> to vector<8x32xf32>
    %90 = arith.mulf %88, %89 : vector<8x32xf32>
    %cst_20 = arith.constant dense<0.000000e+00> : vector<8xf32>
    %91 = vector.multi_reduction <add>, %90, %cst_20 [1] : vector<8x32xf32> to vector<8xf32>
    %92 = vector.shape_cast %91 : vector<8xf32> to vector<8x1xf32>
    %93 = vector.shape_cast %92 : vector<8x1xf32> to vector<8x1xf32>
    %94 = vector.broadcast %93 : vector<8x1xf32> to vector<8x8xf32>
    %95 = arith.select %28, %94, %83 : vector<8x8xi1>, vector<8x8xf32>
    %96 = vector.extract_strided_slice %8 {offsets = [4, 0], sizes = [1, 32], strides = [1, 1]} : vector<9x32xf32> to vector<1x32xf32>
    %97 = vector.shape_cast %96 : vector<1x32xf32> to vector<32xf32>
    %98 = vector.shape_cast %97 : vector<32xf32> to vector<1x32xf32>
    %99 = vector.broadcast %98 : vector<1x32xf32> to vector<8x32xf32>
    %100 = arith.mulf %40, %99 : vector<8x32xf32>
    %101 = vector.extract_strided_slice %5 {offsets = [0, 0], sizes = [8, 32], strides = [1, 1]} : vector<8x128xf32> to vector<8x32xf32>
    %102 = arith.mulf %100, %101 : vector<8x32xf32>
    %cst_21 = arith.constant dense<0.000000e+00> : vector<8xf32>
    %103 = vector.multi_reduction <add>, %102, %cst_21 [1] : vector<8x32xf32> to vector<8xf32>
    %104 = vector.shape_cast %103 : vector<8xf32> to vector<8x1xf32>
    %105 = vector.shape_cast %104 : vector<8x1xf32> to vector<8x1xf32>
    %106 = vector.broadcast %105 : vector<8x1xf32> to vector<8x8xf32>
    %107 = arith.select %30, %106, %95 : vector<8x8xi1>, vector<8x8xf32>
    %108 = vector.extract_strided_slice %8 {offsets = [5, 0], sizes = [1, 32], strides = [1, 1]} : vector<9x32xf32> to vector<1x32xf32>
    %109 = vector.shape_cast %108 : vector<1x32xf32> to vector<32xf32>
    %110 = vector.shape_cast %109 : vector<32xf32> to vector<1x32xf32>
    %111 = vector.broadcast %110 : vector<1x32xf32> to vector<8x32xf32>
    %112 = arith.mulf %40, %111 : vector<8x32xf32>
    %113 = vector.extract_strided_slice %31 {offsets = [0, 0], sizes = [8, 32], strides = [1, 1]} : vector<8x128xf32> to vector<8x32xf32>
    %114 = arith.mulf %112, %113 : vector<8x32xf32>
    %cst_22 = arith.constant dense<0.000000e+00> : vector<8xf32>
    %115 = vector.multi_reduction <add>, %114, %cst_22 [1] : vector<8x32xf32> to vector<8xf32>
    %116 = vector.shape_cast %115 : vector<8xf32> to vector<8x1xf32>
    %117 = vector.shape_cast %116 : vector<8x1xf32> to vector<8x1xf32>
    %118 = vector.broadcast %117 : vector<8x1xf32> to vector<8x8xf32>
    %119 = arith.select %33, %118, %107 : vector<8x8xi1>, vector<8x8xf32>
    %120 = vector.extract_strided_slice %8 {offsets = [6, 0], sizes = [1, 32], strides = [1, 1]} : vector<9x32xf32> to vector<1x32xf32>
    %121 = vector.shape_cast %120 : vector<1x32xf32> to vector<32xf32>
    %122 = vector.shape_cast %121 : vector<32xf32> to vector<1x32xf32>
    %123 = vector.broadcast %122 : vector<1x32xf32> to vector<8x32xf32>
    %124 = arith.mulf %40, %123 : vector<8x32xf32>
    %125 = vector.extract_strided_slice %34 {offsets = [0, 0], sizes = [8, 32], strides = [1, 1]} : vector<8x128xf32> to vector<8x32xf32>
    %126 = arith.mulf %124, %125 : vector<8x32xf32>
    %cst_23 = arith.constant dense<0.000000e+00> : vector<8xf32>
    %127 = vector.multi_reduction <add>, %126, %cst_23 [1] : vector<8x32xf32> to vector<8xf32>
    %128 = vector.shape_cast %127 : vector<8xf32> to vector<8x1xf32>
    %129 = vector.shape_cast %128 : vector<8x1xf32> to vector<8x1xf32>
    %130 = vector.broadcast %129 : vector<8x1xf32> to vector<8x8xf32>
    %131 = arith.select %36, %130, %119 : vector<8x8xi1>, vector<8x8xf32>
    %132 = vector.extract_strided_slice %8 {offsets = [7, 0], sizes = [1, 32], strides = [1, 1]} : vector<9x32xf32> to vector<1x32xf32>
    %133 = vector.shape_cast %132 : vector<1x32xf32> to vector<32xf32>
    %134 = vector.shape_cast %133 : vector<32xf32> to vector<1x32xf32>
    %135 = vector.broadcast %134 : vector<1x32xf32> to vector<8x32xf32>
    %136 = arith.mulf %40, %135 : vector<8x32xf32>
    %137 = vector.extract_strided_slice %37 {offsets = [0, 0], sizes = [8, 32], strides = [1, 1]} : vector<8x128xf32> to vector<8x32xf32>
    %138 = arith.mulf %136, %137 : vector<8x32xf32>
    %cst_24 = arith.constant dense<0.000000e+00> : vector<8xf32>
    %139 = vector.multi_reduction <add>, %138, %cst_24 [1] : vector<8x32xf32> to vector<8xf32>
    %140 = vector.shape_cast %139 : vector<8xf32> to vector<8x1xf32>
    %141 = vector.shape_cast %140 : vector<8x1xf32> to vector<8x1xf32>
    %142 = vector.broadcast %141 : vector<8x1xf32> to vector<8x8xf32>
    %143 = arith.select %39, %142, %131 : vector<8x8xi1>, vector<8x8xf32>
    %cst_25 = arith.constant -1.000000e+30 : f32
    %144 = vector.broadcast %cst_25 : f32 to vector<8x8xf32>
    %145 = arith.select %12, %143, %144 : vector<8x8xi1>, vector<8x8xf32>
    %cst_26 = arith.constant dense<0xFF800000> : vector<8xf32>
    %146 = vector.multi_reduction <maximumf>, %145, %cst_26 [1] : vector<8x8xf32> to vector<8xf32>
    %147 = vector.shape_cast %146 : vector<8xf32> to vector<8x1xf32>
    %148 = vector.broadcast %147 : vector<8x1xf32> to vector<8x8xf32>
    %149 = arith.subf %145, %148 : vector<8x8xf32>
    %150 = math.exp %149 : vector<8x8xf32>
    %cst_27 = arith.constant dense<0.000000e+00> : vector<8xf32>
    %151 = vector.multi_reduction <add>, %150, %cst_27 [1] : vector<8x8xf32> to vector<8xf32>
    %152 = vector.shape_cast %151 : vector<8xf32> to vector<8x1xf32>
    %153 = tpu.reciprocal %152 {approx = true} : vector<8x1xf32> -> vector<8x1xf32>
    %154 = vector.broadcast %153 : vector<8x1xf32> to vector<8x8xf32>
    %155 = arith.mulf %150, %154 : vector<8x8xf32>
    %156 = arith.truncf %155 : vector<8x8xf32> to vector<8x8xbf16>
    %cst_28 = arith.constant dense<0.000000e+00> : vector<8x32xf32>
    %157 = tpu.matmul %156, %42, %cst_28 {dimension_numbers = #tpu.dot_dimension_numbers<[1], [0], [0], [1], [0, 0, 1, 1], [], []>} : vector<8x8xbf16>, vector<8x32xbf16>, vector<8x32xf32> -> vector<8x32xf32>
    %158 = arith.truncf %157 : vector<8x32xf32> to vector<8x32xbf16>
    %c0_29 = arith.constant 0 : index
    %c0_30 = arith.constant 0 : index
    %c0_31 = arith.constant 0 : index
    %159 = vector.load %arg6[%c0_29, %c0_30, %c0_31] : memref<1x8x128xbf16, #tpu.memory_space<vmem>>, vector<1x8x32xbf16>
    %160 = vector.shape_cast %159 : vector<1x8x32xbf16> to vector<8x32xbf16>
    %161 = vector.shape_cast %158 : vector<8x32xbf16> to vector<1x8x32xbf16>
    tpu.vector_store %arg6[%c0_29, %c0_30, %c0_31], %161 {strides = array<i32>} : memref<1x8x128xbf16, #tpu.memory_space<vmem>>, vector<1x8x32xbf16>,
    %162 = vector.extract_strided_slice %2 {offsets = [0, 32], sizes = [8, 32], strides = [1, 1]} : vector<8x128xf32> to vector<8x32xf32>
    %163 = vector.extract_strided_slice %4 {offsets = [0, 32], sizes = [8, 32], strides = [1, 1]} : vector<8x128xbf16> to vector<8x32xbf16>
    %164 = vector.extract_strided_slice %7 {offsets = [0, 32], sizes = [8, 32], strides = [1, 1]} : vector<8x128xbf16> to vector<8x32xbf16>
    %165 = vector.extract_strided_slice %8 {offsets = [0, 0], sizes = [1, 32], strides = [1, 1]} : vector<9x32xf32> to vector<1x32xf32>
    %166 = vector.shape_cast %165 : vector<1x32xf32> to vector<32xf32>
    %167 = vector.shape_cast %166 : vector<32xf32> to vector<1x32xf32>
    %168 = vector.broadcast %167 : vector<1x32xf32> to vector<8x32xf32>
    %169 = arith.mulf %162, %168 : vector<8x32xf32>
    %170 = arith.truncf %169 : vector<8x32xf32> to vector<8x32xbf16>
    %cst_32 = arith.constant dense<0.000000e+00> : vector<8x8xf32>
    %171 = tpu.matmul %170, %163, %cst_32 {dimension_numbers = #tpu.dot_dimension_numbers<[1], [1], [0], [0], [0, 0, 1, 0], [], []>} : vector<8x32xbf16>, vector<8x32xbf16>, vector<8x8xf32> -> vector<8x8xf32>
    %172 = vector.extract_strided_slice %8 {offsets = [8, 0], sizes = [1, 32], strides = [1, 1]} : vector<9x32xf32> to vector<1x32xf32>
    %173 = vector.shape_cast %172 : vector<1x32xf32> to vector<32xf32>
    %174 = vector.shape_cast %173 : vector<32xf32> to vector<1x32xf32>
    %175 = vector.broadcast %174 : vector<1x32xf32> to vector<8x32xf32>
    %176 = arith.mulf %162, %175 : vector<8x32xf32>
    %177 = arith.truncf %176 : vector<8x32xf32> to vector<8x32xbf16>
    %cst_33 = arith.constant dense<0.000000e+00> : vector<8x8xf32>
    %178 = tpu.matmul %177, %163, %cst_33 {dimension_numbers = #tpu.dot_dimension_numbers<[1], [1], [0], [0], [0, 0, 1, 0], [], []>} : vector<8x32xbf16>, vector<8x32xbf16>, vector<8x8xf32> -> vector<8x8xf32>
    %cst_34 = arith.constant 0.000000e+00 : f32
    %179 = vector.broadcast %cst_34 : f32 to vector<8x8xf32>
    %180 = arith.select %17, %171, %179 : vector<8x8xi1>, vector<8x8xf32>
    %181 = arith.select %19, %178, %180 : vector<8x8xi1>, vector<8x8xf32>
    %182 = vector.extract_strided_slice %8 {offsets = [1, 0], sizes = [1, 32], strides = [1, 1]} : vector<9x32xf32> to vector<1x32xf32>
    %183 = vector.shape_cast %182 : vector<1x32xf32> to vector<32xf32>
    %184 = vector.shape_cast %183 : vector<32xf32> to vector<1x32xf32>
    %185 = vector.broadcast %184 : vector<1x32xf32> to vector<8x32xf32>
    %186 = arith.mulf %162, %185 : vector<8x32xf32>
    %187 = vector.extract_strided_slice %20 {offsets = [0, 32], sizes = [8, 32], strides = [1, 1]} : vector<8x128xf32> to vector<8x32xf32>
    %188 = arith.mulf %186, %187 : vector<8x32xf32>
    %cst_35 = arith.constant dense<0.000000e+00> : vector<8xf32>
    %189 = vector.multi_reduction <add>, %188, %cst_35 [1] : vector<8x32xf32> to vector<8xf32>
    %190 = vector.shape_cast %189 : vector<8xf32> to vector<8x1xf32>
    %191 = vector.shape_cast %190 : vector<8x1xf32> to vector<8x1xf32>
    %192 = vector.broadcast %191 : vector<8x1xf32> to vector<8x8xf32>
    %193 = arith.select %22, %192, %181 : vector<8x8xi1>, vector<8x8xf32>
    %194 = vector.extract_strided_slice %8 {offsets = [2, 0], sizes = [1, 32], strides = [1, 1]} : vector<9x32xf32> to vector<1x32xf32>
    %195 = vector.shape_cast %194 : vector<1x32xf32> to vector<32xf32>
    %196 = vector.shape_cast %195 : vector<32xf32> to vector<1x32xf32>
    %197 = vector.broadcast %196 : vector<1x32xf32> to vector<8x32xf32>
    %198 = arith.mulf %162, %197 : vector<8x32xf32>
    %199 = vector.extract_strided_slice %23 {offsets = [0, 32], sizes = [8, 32], strides = [1, 1]} : vector<8x128xf32> to vector<8x32xf32>
    %200 = arith.mulf %198, %199 : vector<8x32xf32>
    %cst_36 = arith.constant dense<0.000000e+00> : vector<8xf32>
    %201 = vector.multi_reduction <add>, %200, %cst_36 [1] : vector<8x32xf32> to vector<8xf32>
    %202 = vector.shape_cast %201 : vector<8xf32> to vector<8x1xf32>
    %203 = vector.shape_cast %202 : vector<8x1xf32> to vector<8x1xf32>
    %204 = vector.broadcast %203 : vector<8x1xf32> to vector<8x8xf32>
    %205 = arith.select %25, %204, %193 : vector<8x8xi1>, vector<8x8xf32>
    %206 = vector.extract_strided_slice %8 {offsets = [3, 0], sizes = [1, 32], strides = [1, 1]} : vector<9x32xf32> to vector<1x32xf32>
    %207 = vector.shape_cast %206 : vector<1x32xf32> to vector<32xf32>
    %208 = vector.shape_cast %207 : vector<32xf32> to vector<1x32xf32>
    %209 = vector.broadcast %208 : vector<1x32xf32> to vector<8x32xf32>
    %210 = arith.mulf %162, %209 : vector<8x32xf32>
    %211 = vector.extract_strided_slice %26 {offsets = [0, 32], sizes = [8, 32], strides = [1, 1]} : vector<8x128xf32> to vector<8x32xf32>
    %212 = arith.mulf %210, %211 : vector<8x32xf32>
    %cst_37 = arith.constant dense<0.000000e+00> : vector<8xf32>
    %213 = vector.multi_reduction <add>, %212, %cst_37 [1] : vector<8x32xf32> to vector<8xf32>
    %214 = vector.shape_cast %213 : vector<8xf32> to vector<8x1xf32>
    %215 = vector.shape_cast %214 : vector<8x1xf32> to vector<8x1xf32>
    %216 = vector.broadcast %215 : vector<8x1xf32> to vector<8x8xf32>
    %217 = arith.select %28, %216, %205 : vector<8x8xi1>, vector<8x8xf32>
    %218 = vector.extract_strided_slice %8 {offsets = [4, 0], sizes = [1, 32], strides = [1, 1]} : vector<9x32xf32> to vector<1x32xf32>
    %219 = vector.shape_cast %218 : vector<1x32xf32> to vector<32xf32>
    %220 = vector.shape_cast %219 : vector<32xf32> to vector<1x32xf32>
    %221 = vector.broadcast %220 : vector<1x32xf32> to vector<8x32xf32>
    %222 = arith.mulf %162, %221 : vector<8x32xf32>
    %223 = vector.extract_strided_slice %5 {offsets = [0, 32], sizes = [8, 32], strides = [1, 1]} : vector<8x128xf32> to vector<8x32xf32>
    %224 = arith.mulf %222, %223 : vector<8x32xf32>
    %cst_38 = arith.constant dense<0.000000e+00> : vector<8xf32>
    %225 = vector.multi_reduction <add>, %224, %cst_38 [1] : vector<8x32xf32> to vector<8xf32>
    %226 = vector.shape_cast %225 : vector<8xf32> to vector<8x1xf32>
    %227 = vector.shape_cast %226 : vector<8x1xf32> to vector<8x1xf32>
    %228 = vector.broadcast %227 : vector<8x1xf32> to vector<8x8xf32>
    %229 = arith.select %30, %228, %217 : vector<8x8xi1>, vector<8x8xf32>
    %230 = vector.extract_strided_slice %8 {offsets = [5, 0], sizes = [1, 32], strides = [1, 1]} : vector<9x32xf32> to vector<1x32xf32>
    %231 = vector.shape_cast %230 : vector<1x32xf32> to vector<32xf32>
    %232 = vector.shape_cast %231 : vector<32xf32> to vector<1x32xf32>
    %233 = vector.broadcast %232 : vector<1x32xf32> to vector<8x32xf32>
    %234 = arith.mulf %162, %233 : vector<8x32xf32>
    %235 = vector.extract_strided_slice %31 {offsets = [0, 32], sizes = [8, 32], strides = [1, 1]} : vector<8x128xf32> to vector<8x32xf32>
    %236 = arith.mulf %234, %235 : vector<8x32xf32>
    %cst_39 = arith.constant dense<0.000000e+00> : vector<8xf32>
    %237 = vector.multi_reduction <add>, %236, %cst_39 [1] : vector<8x32xf32> to vector<8xf32>
    %238 = vector.shape_cast %237 : vector<8xf32> to vector<8x1xf32>
    %239 = vector.shape_cast %238 : vector<8x1xf32> to vector<8x1xf32>
    %240 = vector.broadcast %239 : vector<8x1xf32> to vector<8x8xf32>
    %241 = arith.select %33, %240, %229 : vector<8x8xi1>, vector<8x8xf32>
    %242 = vector.extract_strided_slice %8 {offsets = [6, 0], sizes = [1, 32], strides = [1, 1]} : vector<9x32xf32> to vector<1x32xf32>
    %243 = vector.shape_cast %242 : vector<1x32xf32> to vector<32xf32>
    %244 = vector.shape_cast %243 : vector<32xf32> to vector<1x32xf32>
    %245 = vector.broadcast %244 : vector<1x32xf32> to vector<8x32xf32>
    %246 = arith.mulf %162, %245 : vector<8x32xf32>
    %247 = vector.extract_strided_slice %34 {offsets = [0, 32], sizes = [8, 32], strides = [1, 1]} : vector<8x128xf32> to vector<8x32xf32>
    %248 = arith.mulf %246, %247 : vector<8x32xf32>
    %cst_40 = arith.constant dense<0.000000e+00> : vector<8xf32>
    %249 = vector.multi_reduction <add>, %248, %cst_40 [1] : vector<8x32xf32> to vector<8xf32>
    %250 = vector.shape_cast %249 : vector<8xf32> to vector<8x1xf32>
    %251 = vector.shape_cast %250 : vector<8x1xf32> to vector<8x1xf32>
    %252 = vector.broadcast %251 : vector<8x1xf32> to vector<8x8xf32>
    %253 = arith.select %36, %252, %241 : vector<8x8xi1>, vector<8x8xf32>
    %254 = vector.extract_strided_slice %8 {offsets = [7, 0], sizes = [1, 32], strides = [1, 1]} : vector<9x32xf32> to vector<1x32xf32>
    %255 = vector.shape_cast %254 : vector<1x32xf32> to vector<32xf32>
    %256 = vector.shape_cast %255 : vector<32xf32> to vector<1x32xf32>
    %257 = vector.broadcast %256 : vector<1x32xf32> to vector<8x32xf32>
    %258 = arith.mulf %162, %257 : vector<8x32xf32>
    %259 = vector.extract_strided_slice %37 {offsets = [0, 32], sizes = [8, 32], strides = [1, 1]} : vector<8x128xf32> to vector<8x32xf32>
    %260 = arith.mulf %258, %259 : vector<8x32xf32>
    %cst_41 = arith.constant dense<0.000000e+00> : vector<8xf32>
    %261 = vector.multi_reduction <add>, %260, %cst_41 [1] : vector<8x32xf32> to vector<8xf32>
    %262 = vector.shape_cast %261 : vector<8xf32> to vector<8x1xf32>
    %263 = vector.shape_cast %262 : vector<8x1xf32> to vector<8x1xf32>
    %264 = vector.broadcast %263 : vector<8x1xf32> to vector<8x8xf32>
    %265 = arith.select %39, %264, %253 : vector<8x8xi1>, vector<8x8xf32>
    %cst_42 = arith.constant -1.000000e+30 : f32
    %266 = vector.broadcast %cst_42 : f32 to vector<8x8xf32>
    %267 = arith.select %12, %265, %266 : vector<8x8xi1>, vector<8x8xf32>
    %cst_43 = arith.constant dense<0xFF800000> : vector<8xf32>
    %268 = vector.multi_reduction <maximumf>, %267, %cst_43 [1] : vector<8x8xf32> to vector<8xf32>
    %269 = vector.shape_cast %268 : vector<8xf32> to vector<8x1xf32>
    %270 = vector.broadcast %269 : vector<8x1xf32> to vector<8x8xf32>
    %271 = arith.subf %267, %270 : vector<8x8xf32>
    %272 = math.exp %271 : vector<8x8xf32>
    %cst_44 = arith.constant dense<0.000000e+00> : vector<8xf32>
    %273 = vector.multi_reduction <add>, %272, %cst_44 [1] : vector<8x8xf32> to vector<8xf32>
    %274 = vector.shape_cast %273 : vector<8xf32> to vector<8x1xf32>
    %275 = tpu.reciprocal %274 {approx = true} : vector<8x1xf32> -> vector<8x1xf32>
    %276 = vector.broadcast %275 : vector<8x1xf32> to vector<8x8xf32>
    %277 = arith.mulf %272, %276 : vector<8x8xf32>
    %278 = arith.truncf %277 : vector<8x8xf32> to vector<8x8xbf16>
    %cst_45 = arith.constant dense<0.000000e+00> : vector<8x32xf32>
    %279 = tpu.matmul %278, %164, %cst_45 {dimension_numbers = #tpu.dot_dimension_numbers<[1], [0], [0], [1], [0, 0, 1, 1], [], []>} : vector<8x8xbf16>, vector<8x32xbf16>, vector<8x32xf32> -> vector<8x32xf32>
    %280 = arith.truncf %279 : vector<8x32xf32> to vector<8x32xbf16>
    %c0_46 = arith.constant 0 : index
    %c0_47 = arith.constant 0 : index
    %c32 = arith.constant 32 : index
    %281 = vector.load %arg6[%c0_46, %c0_47, %c32] : memref<1x8x128xbf16, #tpu.memory_space<vmem>>, vector<1x8x32xbf16>
    %282 = vector.shape_cast %281 : vector<1x8x32xbf16> to vector<8x32xbf16>
    %283 = vector.shape_cast %280 : vector<8x32xbf16> to vector<1x8x32xbf16>
    tpu.vector_store %arg6[%c0_46, %c0_47, %c32], %283 {strides = array<i32>} : memref<1x8x128xbf16, #tpu.memory_space<vmem>>, vector<1x8x32xbf16>,
    %284 = vector.extract_strided_slice %2 {offsets = [0, 64], sizes = [8, 32], strides = [1, 1]} : vector<8x128xf32> to vector<8x32xf32>
    %285 = vector.extract_strided_slice %4 {offsets = [0, 64], sizes = [8, 32], strides = [1, 1]} : vector<8x128xbf16> to vector<8x32xbf16>
    %286 = vector.extract_strided_slice %7 {offsets = [0, 64], sizes = [8, 32], strides = [1, 1]} : vector<8x128xbf16> to vector<8x32xbf16>
    %287 = vector.extract_strided_slice %8 {offsets = [0, 0], sizes = [1, 32], strides = [1, 1]} : vector<9x32xf32> to vector<1x32xf32>
    %288 = vector.shape_cast %287 : vector<1x32xf32> to vector<32xf32>
    %289 = vector.shape_cast %288 : vector<32xf32> to vector<1x32xf32>
    %290 = vector.broadcast %289 : vector<1x32xf32> to vector<8x32xf32>
    %291 = arith.mulf %284, %290 : vector<8x32xf32>
    %292 = arith.truncf %291 : vector<8x32xf32> to vector<8x32xbf16>
    %cst_48 = arith.constant dense<0.000000e+00> : vector<8x8xf32>
    %293 = tpu.matmul %292, %285, %cst_48 {dimension_numbers = #tpu.dot_dimension_numbers<[1], [1], [0], [0], [0, 0, 1, 0], [], []>} : vector<8x32xbf16>, vector<8x32xbf16>, vector<8x8xf32> -> vector<8x8xf32>
    %294 = vector.extract_strided_slice %8 {offsets = [8, 0], sizes = [1, 32], strides = [1, 1]} : vector<9x32xf32> to vector<1x32xf32>
    %295 = vector.shape_cast %294 : vector<1x32xf32> to vector<32xf32>
    %296 = vector.shape_cast %295 : vector<32xf32> to vector<1x32xf32>
    %297 = vector.broadcast %296 : vector<1x32xf32> to vector<8x32xf32>
    %298 = arith.mulf %284, %297 : vector<8x32xf32>
    %299 = arith.truncf %298 : vector<8x32xf32> to vector<8x32xbf16>
    %cst_49 = arith.constant dense<0.000000e+00> : vector<8x8xf32>
    %300 = tpu.matmul %299, %285, %cst_49 {dimension_numbers = #tpu.dot_dimension_numbers<[1], [1], [0], [0], [0, 0, 1, 0], [], []>} : vector<8x32xbf16>, vector<8x32xbf16>, vector<8x8xf32> -> vector<8x8xf32>
    %cst_50 = arith.constant 0.000000e+00 : f32
    %301 = vector.broadcast %cst_50 : f32 to vector<8x8xf32>
    %302 = arith.select %17, %293, %301 : vector<8x8xi1>, vector<8x8xf32>
    %303 = arith.select %19, %300, %302 : vector<8x8xi1>, vector<8x8xf32>
    %304 = vector.extract_strided_slice %8 {offsets = [1, 0], sizes = [1, 32], strides = [1, 1]} : vector<9x32xf32> to vector<1x32xf32>
    %305 = vector.shape_cast %304 : vector<1x32xf32> to vector<32xf32>
    %306 = vector.shape_cast %305 : vector<32xf32> to vector<1x32xf32>
    %307 = vector.broadcast %306 : vector<1x32xf32> to vector<8x32xf32>
    %308 = arith.mulf %284, %307 : vector<8x32xf32>
    %309 = vector.extract_strided_slice %20 {offsets = [0, 64], sizes = [8, 32], strides = [1, 1]} : vector<8x128xf32> to vector<8x32xf32>
    %310 = arith.mulf %308, %309 : vector<8x32xf32>
    %cst_51 = arith.constant dense<0.000000e+00> : vector<8xf32>
    %311 = vector.multi_reduction <add>, %310, %cst_51 [1] : vector<8x32xf32> to vector<8xf32>
    %312 = vector.shape_cast %311 : vector<8xf32> to vector<8x1xf32>
    %313 = vector.shape_cast %312 : vector<8x1xf32> to vector<8x1xf32>
    %314 = vector.broadcast %313 : vector<8x1xf32> to vector<8x8xf32>
    %315 = arith.select %22, %314, %303 : vector<8x8xi1>, vector<8x8xf32>
    %316 = vector.extract_strided_slice %8 {offsets = [2, 0], sizes = [1, 32], strides = [1, 1]} : vector<9x32xf32> to vector<1x32xf32>
    %317 = vector.shape_cast %316 : vector<1x32xf32> to vector<32xf32>
    %318 = vector.shape_cast %317 : vector<32xf32> to vector<1x32xf32>
    %319 = vector.broadcast %318 : vector<1x32xf32> to vector<8x32xf32>
    %320 = arith.mulf %284, %319 : vector<8x32xf32>
    %321 = vector.extract_strided_slice %23 {offsets = [0, 64], sizes = [8, 32], strides = [1, 1]} : vector<8x128xf32> to vector<8x32xf32>
    %322 = arith.mulf %320, %321 : vector<8x32xf32>
    %cst_52 = arith.constant dense<0.000000e+00> : vector<8xf32>
    %323 = vector.multi_reduction <add>, %322, %cst_52 [1] : vector<8x32xf32> to vector<8xf32>
    %324 = vector.shape_cast %323 : vector<8xf32> to vector<8x1xf32>
    %325 = vector.shape_cast %324 : vector<8x1xf32> to vector<8x1xf32>
    %326 = vector.broadcast %325 : vector<8x1xf32> to vector<8x8xf32>
    %327 = arith.select %25, %326, %315 : vector<8x8xi1>, vector<8x8xf32>
    %328 = vector.extract_strided_slice %8 {offsets = [3, 0], sizes = [1, 32], strides = [1, 1]} : vector<9x32xf32> to vector<1x32xf32>
    %329 = vector.shape_cast %328 : vector<1x32xf32> to vector<32xf32>
    %330 = vector.shape_cast %329 : vector<32xf32> to vector<1x32xf32>
    %331 = vector.broadcast %330 : vector<1x32xf32> to vector<8x32xf32>
    %332 = arith.mulf %284, %331 : vector<8x32xf32>
    %333 = vector.extract_strided_slice %26 {offsets = [0, 64], sizes = [8, 32], strides = [1, 1]} : vector<8x128xf32> to vector<8x32xf32>
    %334 = arith.mulf %332, %333 : vector<8x32xf32>
    %cst_53 = arith.constant dense<0.000000e+00> : vector<8xf32>
    %335 = vector.multi_reduction <add>, %334, %cst_53 [1] : vector<8x32xf32> to vector<8xf32>
    %336 = vector.shape_cast %335 : vector<8xf32> to vector<8x1xf32>
    %337 = vector.shape_cast %336 : vector<8x1xf32> to vector<8x1xf32>
    %338 = vector.broadcast %337 : vector<8x1xf32> to vector<8x8xf32>
    %339 = arith.select %28, %338, %327 : vector<8x8xi1>, vector<8x8xf32>
    %340 = vector.extract_strided_slice %8 {offsets = [4, 0], sizes = [1, 32], strides = [1, 1]} : vector<9x32xf32> to vector<1x32xf32>
    %341 = vector.shape_cast %340 : vector<1x32xf32> to vector<32xf32>
    %342 = vector.shape_cast %341 : vector<32xf32> to vector<1x32xf32>
    %343 = vector.broadcast %342 : vector<1x32xf32> to vector<8x32xf32>
    %344 = arith.mulf %284, %343 : vector<8x32xf32>
    %345 = vector.extract_strided_slice %5 {offsets = [0, 64], sizes = [8, 32], strides = [1, 1]} : vector<8x128xf32> to vector<8x32xf32>
    %346 = arith.mulf %344, %345 : vector<8x32xf32>
    %cst_54 = arith.constant dense<0.000000e+00> : vector<8xf32>
    %347 = vector.multi_reduction <add>, %346, %cst_54 [1] : vector<8x32xf32> to vector<8xf32>
    %348 = vector.shape_cast %347 : vector<8xf32> to vector<8x1xf32>
    %349 = vector.shape_cast %348 : vector<8x1xf32> to vector<8x1xf32>
    %350 = vector.broadcast %349 : vector<8x1xf32> to vector<8x8xf32>
    %351 = arith.select %30, %350, %339 : vector<8x8xi1>, vector<8x8xf32>
    %352 = vector.extract_strided_slice %8 {offsets = [5, 0], sizes = [1, 32], strides = [1, 1]} : vector<9x32xf32> to vector<1x32xf32>
    %353 = vector.shape_cast %352 : vector<1x32xf32> to vector<32xf32>
    %354 = vector.shape_cast %353 : vector<32xf32> to vector<1x32xf32>
    %355 = vector.broadcast %354 : vector<1x32xf32> to vector<8x32xf32>
    %356 = arith.mulf %284, %355 : vector<8x32xf32>
    %357 = vector.extract_strided_slice %31 {offsets = [0, 64], sizes = [8, 32], strides = [1, 1]} : vector<8x128xf32> to vector<8x32xf32>
    %358 = arith.mulf %356, %357 : vector<8x32xf32>
    %cst_55 = arith.constant dense<0.000000e+00> : vector<8xf32>
    %359 = vector.multi_reduction <add>, %358, %cst_55 [1] : vector<8x32xf32> to vector<8xf32>
    %360 = vector.shape_cast %359 : vector<8xf32> to vector<8x1xf32>
    %361 = vector.shape_cast %360 : vector<8x1xf32> to vector<8x1xf32>
    %362 = vector.broadcast %361 : vector<8x1xf32> to vector<8x8xf32>
    %363 = arith.select %33, %362, %351 : vector<8x8xi1>, vector<8x8xf32>
    %364 = vector.extract_strided_slice %8 {offsets = [6, 0], sizes = [1, 32], strides = [1, 1]} : vector<9x32xf32> to vector<1x32xf32>
    %365 = vector.shape_cast %364 : vector<1x32xf32> to vector<32xf32>
    %366 = vector.shape_cast %365 : vector<32xf32> to vector<1x32xf32>
    %367 = vector.broadcast %366 : vector<1x32xf32> to vector<8x32xf32>
    %368 = arith.mulf %284, %367 : vector<8x32xf32>
    %369 = vector.extract_strided_slice %34 {offsets = [0, 64], sizes = [8, 32], strides = [1, 1]} : vector<8x128xf32> to vector<8x32xf32>
    %370 = arith.mulf %368, %369 : vector<8x32xf32>
    %cst_56 = arith.constant dense<0.000000e+00> : vector<8xf32>
    %371 = vector.multi_reduction <add>, %370, %cst_56 [1] : vector<8x32xf32> to vector<8xf32>
    %372 = vector.shape_cast %371 : vector<8xf32> to vector<8x1xf32>
    %373 = vector.shape_cast %372 : vector<8x1xf32> to vector<8x1xf32>
    %374 = vector.broadcast %373 : vector<8x1xf32> to vector<8x8xf32>
    %375 = arith.select %36, %374, %363 : vector<8x8xi1>, vector<8x8xf32>
    %376 = vector.extract_strided_slice %8 {offsets = [7, 0], sizes = [1, 32], strides = [1, 1]} : vector<9x32xf32> to vector<1x32xf32>
    %377 = vector.shape_cast %376 : vector<1x32xf32> to vector<32xf32>
    %378 = vector.shape_cast %377 : vector<32xf32> to vector<1x32xf32>
    %379 = vector.broadcast %378 : vector<1x32xf32> to vector<8x32xf32>
    %380 = arith.mulf %284, %379 : vector<8x32xf32>
    %381 = vector.extract_strided_slice %37 {offsets = [0, 64], sizes = [8, 32], strides = [1, 1]} : vector<8x128xf32> to vector<8x32xf32>
    %382 = arith.mulf %380, %381 : vector<8x32xf32>
    %cst_57 = arith.constant dense<0.000000e+00> : vector<8xf32>
    %383 = vector.multi_reduction <add>, %382, %cst_57 [1] : vector<8x32xf32> to vector<8xf32>
    %384 = vector.shape_cast %383 : vector<8xf32> to vector<8x1xf32>
    %385 = vector.shape_cast %384 : vector<8x1xf32> to vector<8x1xf32>
    %386 = vector.broadcast %385 : vector<8x1xf32> to vector<8x8xf32>
    %387 = arith.select %39, %386, %375 : vector<8x8xi1>, vector<8x8xf32>
    %cst_58 = arith.constant -1.000000e+30 : f32
    %388 = vector.broadcast %cst_58 : f32 to vector<8x8xf32>
    %389 = arith.select %12, %387, %388 : vector<8x8xi1>, vector<8x8xf32>
    %cst_59 = arith.constant dense<0xFF800000> : vector<8xf32>
    %390 = vector.multi_reduction <maximumf>, %389, %cst_59 [1] : vector<8x8xf32> to vector<8xf32>
    %391 = vector.shape_cast %390 : vector<8xf32> to vector<8x1xf32>
    %392 = vector.broadcast %391 : vector<8x1xf32> to vector<8x8xf32>
    %393 = arith.subf %389, %392 : vector<8x8xf32>
    %394 = math.exp %393 : vector<8x8xf32>
    %cst_60 = arith.constant dense<0.000000e+00> : vector<8xf32>
    %395 = vector.multi_reduction <add>, %394, %cst_60 [1] : vector<8x8xf32> to vector<8xf32>
    %396 = vector.shape_cast %395 : vector<8xf32> to vector<8x1xf32>
    %397 = tpu.reciprocal %396 {approx = true} : vector<8x1xf32> -> vector<8x1xf32>
    %398 = vector.broadcast %397 : vector<8x1xf32> to vector<8x8xf32>
    %399 = arith.mulf %394, %398 : vector<8x8xf32>
    %400 = arith.truncf %399 : vector<8x8xf32> to vector<8x8xbf16>
    %cst_61 = arith.constant dense<0.000000e+00> : vector<8x32xf32>
    %401 = tpu.matmul %400, %286, %cst_61 {dimension_numbers = #tpu.dot_dimension_numbers<[1], [0], [0], [1], [0, 0, 1, 1], [], []>} : vector<8x8xbf16>, vector<8x32xbf16>, vector<8x32xf32> -> vector<8x32xf32>
    %402 = arith.truncf %401 : vector<8x32xf32> to vector<8x32xbf16>
    %c0_62 = arith.constant 0 : index
    %c0_63 = arith.constant 0 : index
    %c64 = arith.constant 64 : index
    %403 = vector.load %arg6[%c0_62, %c0_63, %c64] : memref<1x8x128xbf16, #tpu.memory_space<vmem>>, vector<1x8x32xbf16>
    %404 = vector.shape_cast %403 : vector<1x8x32xbf16> to vector<8x32xbf16>
    %405 = vector.shape_cast %402 : vector<8x32xbf16> to vector<1x8x32xbf16>
    tpu.vector_store %arg6[%c0_62, %c0_63, %c64], %405 {strides = array<i32>} : memref<1x8x128xbf16, #tpu.memory_space<vmem>>, vector<1x8x32xbf16>,
    %406 = vector.extract_strided_slice %2 {offsets = [0, 96], sizes = [8, 32], strides = [1, 1]} : vector<8x128xf32> to vector<8x32xf32>
    %407 = vector.extract_strided_slice %4 {offsets = [0, 96], sizes = [8, 32], strides = [1, 1]} : vector<8x128xbf16> to vector<8x32xbf16>
    %408 = vector.extract_strided_slice %7 {offsets = [0, 96], sizes = [8, 32], strides = [1, 1]} : vector<8x128xbf16> to vector<8x32xbf16>
    %409 = vector.extract_strided_slice %8 {offsets = [0, 0], sizes = [1, 32], strides = [1, 1]} : vector<9x32xf32> to vector<1x32xf32>
    %410 = vector.shape_cast %409 : vector<1x32xf32> to vector<32xf32>
    %411 = vector.shape_cast %410 : vector<32xf32> to vector<1x32xf32>
    %412 = vector.broadcast %411 : vector<1x32xf32> to vector<8x32xf32>
    %413 = arith.mulf %406, %412 : vector<8x32xf32>
    %414 = arith.truncf %413 : vector<8x32xf32> to vector<8x32xbf16>
    %cst_64 = arith.constant dense<0.000000e+00> : vector<8x8xf32>
    %415 = tpu.matmul %414, %407, %cst_64 {dimension_numbers = #tpu.dot_dimension_numbers<[1], [1], [0], [0], [0, 0, 1, 0], [], []>} : vector<8x32xbf16>, vector<8x32xbf16>, vector<8x8xf32> -> vector<8x8xf32>
    %416 = vector.extract_strided_slice %8 {offsets = [8, 0], sizes = [1, 32], strides = [1, 1]} : vector<9x32xf32> to vector<1x32xf32>
    %417 = vector.shape_cast %416 : vector<1x32xf32> to vector<32xf32>
    %418 = vector.shape_cast %417 : vector<32xf32> to vector<1x32xf32>
    %419 = vector.broadcast %418 : vector<1x32xf32> to vector<8x32xf32>
    %420 = arith.mulf %406, %419 : vector<8x32xf32>
    %421 = arith.truncf %420 : vector<8x32xf32> to vector<8x32xbf16>
    %cst_65 = arith.constant dense<0.000000e+00> : vector<8x8xf32>
    %422 = tpu.matmul %421, %407, %cst_65 {dimension_numbers = #tpu.dot_dimension_numbers<[1], [1], [0], [0], [0, 0, 1, 0], [], []>} : vector<8x32xbf16>, vector<8x32xbf16>, vector<8x8xf32> -> vector<8x8xf32>
    %cst_66 = arith.constant 0.000000e+00 : f32
    %423 = vector.broadcast %cst_66 : f32 to vector<8x8xf32>
    %424 = arith.select %17, %415, %423 : vector<8x8xi1>, vector<8x8xf32>
    %425 = arith.select %19, %422, %424 : vector<8x8xi1>, vector<8x8xf32>
    %426 = vector.extract_strided_slice %8 {offsets = [1, 0], sizes = [1, 32], strides = [1, 1]} : vector<9x32xf32> to vector<1x32xf32>
    %427 = vector.shape_cast %426 : vector<1x32xf32> to vector<32xf32>
    %428 = vector.shape_cast %427 : vector<32xf32> to vector<1x32xf32>
    %429 = vector.broadcast %428 : vector<1x32xf32> to vector<8x32xf32>
    %430 = arith.mulf %406, %429 : vector<8x32xf32>
    %431 = vector.extract_strided_slice %20 {offsets = [0, 96], sizes = [8, 32], strides = [1, 1]} : vector<8x128xf32> to vector<8x32xf32>
    %432 = arith.mulf %430, %431 : vector<8x32xf32>
    %cst_67 = arith.constant dense<0.000000e+00> : vector<8xf32>
    %433 = vector.multi_reduction <add>, %432, %cst_67 [1] : vector<8x32xf32> to vector<8xf32>
    %434 = vector.shape_cast %433 : vector<8xf32> to vector<8x1xf32>
    %435 = vector.shape_cast %434 : vector<8x1xf32> to vector<8x1xf32>
    %436 = vector.broadcast %435 : vector<8x1xf32> to vector<8x8xf32>
    %437 = arith.select %22, %436, %425 : vector<8x8xi1>, vector<8x8xf32>
    %438 = vector.extract_strided_slice %8 {offsets = [2, 0], sizes = [1, 32], strides = [1, 1]} : vector<9x32xf32> to vector<1x32xf32>
    %439 = vector.shape_cast %438 : vector<1x32xf32> to vector<32xf32>
    %440 = vector.shape_cast %439 : vector<32xf32> to vector<1x32xf32>
    %441 = vector.broadcast %440 : vector<1x32xf32> to vector<8x32xf32>
    %442 = arith.mulf %406, %441 : vector<8x32xf32>
    %443 = vector.extract_strided_slice %23 {offsets = [0, 96], sizes = [8, 32], strides = [1, 1]} : vector<8x128xf32> to vector<8x32xf32>
    %444 = arith.mulf %442, %443 : vector<8x32xf32>
    %cst_68 = arith.constant dense<0.000000e+00> : vector<8xf32>
    %445 = vector.multi_reduction <add>, %444, %cst_68 [1] : vector<8x32xf32> to vector<8xf32>
    %446 = vector.shape_cast %445 : vector<8xf32> to vector<8x1xf32>
    %447 = vector.shape_cast %446 : vector<8x1xf32> to vector<8x1xf32>
    %448 = vector.broadcast %447 : vector<8x1xf32> to vector<8x8xf32>
    %449 = arith.select %25, %448, %437 : vector<8x8xi1>, vector<8x8xf32>
    %450 = vector.extract_strided_slice %8 {offsets = [3, 0], sizes = [1, 32], strides = [1, 1]} : vector<9x32xf32> to vector<1x32xf32>
    %451 = vector.shape_cast %450 : vector<1x32xf32> to vector<32xf32>
    %452 = vector.shape_cast %451 : vector<32xf32> to vector<1x32xf32>
    %453 = vector.broadcast %452 : vector<1x32xf32> to vector<8x32xf32>
    %454 = arith.mulf %406, %453 : vector<8x32xf32>
    %455 = vector.extract_strided_slice %26 {offsets = [0, 96], sizes = [8, 32], strides = [1, 1]} : vector<8x128xf32> to vector<8x32xf32>
    %456 = arith.mulf %454, %455 : vector<8x32xf32>
    %cst_69 = arith.constant dense<0.000000e+00> : vector<8xf32>
    %457 = vector.multi_reduction <add>, %456, %cst_69 [1] : vector<8x32xf32> to vector<8xf32>
    %458 = vector.shape_cast %457 : vector<8xf32> to vector<8x1xf32>
    %459 = vector.shape_cast %458 : vector<8x1xf32> to vector<8x1xf32>
    %460 = vector.broadcast %459 : vector<8x1xf32> to vector<8x8xf32>
    %461 = arith.select %28, %460, %449 : vector<8x8xi1>, vector<8x8xf32>
    %462 = vector.extract_strided_slice %8 {offsets = [4, 0], sizes = [1, 32], strides = [1, 1]} : vector<9x32xf32> to vector<1x32xf32>
    %463 = vector.shape_cast %462 : vector<1x32xf32> to vector<32xf32>
    %464 = vector.shape_cast %463 : vector<32xf32> to vector<1x32xf32>
    %465 = vector.broadcast %464 : vector<1x32xf32> to vector<8x32xf32>
    %466 = arith.mulf %406, %465 : vector<8x32xf32>
    %467 = vector.extract_strided_slice %5 {offsets = [0, 96], sizes = [8, 32], strides = [1, 1]} : vector<8x128xf32> to vector<8x32xf32>
    %468 = arith.mulf %466, %467 : vector<8x32xf32>
    %cst_70 = arith.constant dense<0.000000e+00> : vector<8xf32>
    %469 = vector.multi_reduction <add>, %468, %cst_70 [1] : vector<8x32xf32> to vector<8xf32>
    %470 = vector.shape_cast %469 : vector<8xf32> to vector<8x1xf32>
    %471 = vector.shape_cast %470 : vector<8x1xf32> to vector<8x1xf32>
    %472 = vector.broadcast %471 : vector<8x1xf32> to vector<8x8xf32>
    %473 = arith.select %30, %472, %461 : vector<8x8xi1>, vector<8x8xf32>
    %474 = vector.extract_strided_slice %8 {offsets = [5, 0], sizes = [1, 32], strides = [1, 1]} : vector<9x32xf32> to vector<1x32xf32>
    %475 = vector.shape_cast %474 : vector<1x32xf32> to vector<32xf32>
    %476 = vector.shape_cast %475 : vector<32xf32> to vector<1x32xf32>
    %477 = vector.broadcast %476 : vector<1x32xf32> to vector<8x32xf32>
    %478 = arith.mulf %406, %477 : vector<8x32xf32>
    %479 = vector.extract_strided_slice %31 {offsets = [0, 96], sizes = [8, 32], strides = [1, 1]} : vector<8x128xf32> to vector<8x32xf32>
    %480 = arith.mulf %478, %479 : vector<8x32xf32>
    %cst_71 = arith.constant dense<0.000000e+00> : vector<8xf32>
    %481 = vector.multi_reduction <add>, %480, %cst_71 [1] : vector<8x32xf32> to vector<8xf32>
    %482 = vector.shape_cast %481 : vector<8xf32> to vector<8x1xf32>
    %483 = vector.shape_cast %482 : vector<8x1xf32> to vector<8x1xf32>
    %484 = vector.broadcast %483 : vector<8x1xf32> to vector<8x8xf32>
    %485 = arith.select %33, %484, %473 : vector<8x8xi1>, vector<8x8xf32>
    %486 = vector.extract_strided_slice %8 {offsets = [6, 0], sizes = [1, 32], strides = [1, 1]} : vector<9x32xf32> to vector<1x32xf32>
    %487 = vector.shape_cast %486 : vector<1x32xf32> to vector<32xf32>
    %488 = vector.shape_cast %487 : vector<32xf32> to vector<1x32xf32>
    %489 = vector.broadcast %488 : vector<1x32xf32> to vector<8x32xf32>
    %490 = arith.mulf %406, %489 : vector<8x32xf32>
    %491 = vector.extract_strided_slice %34 {offsets = [0, 96], sizes = [8, 32], strides = [1, 1]} : vector<8x128xf32> to vector<8x32xf32>
    %492 = arith.mulf %490, %491 : vector<8x32xf32>
    %cst_72 = arith.constant dense<0.000000e+00> : vector<8xf32>
    %493 = vector.multi_reduction <add>, %492, %cst_72 [1] : vector<8x32xf32> to vector<8xf32>
    %494 = vector.shape_cast %493 : vector<8xf32> to vector<8x1xf32>
    %495 = vector.shape_cast %494 : vector<8x1xf32> to vector<8x1xf32>
    %496 = vector.broadcast %495 : vector<8x1xf32> to vector<8x8xf32>
    %497 = arith.select %36, %496, %485 : vector<8x8xi1>, vector<8x8xf32>
    %498 = vector.extract_strided_slice %8 {offsets = [7, 0], sizes = [1, 32], strides = [1, 1]} : vector<9x32xf32> to vector<1x32xf32>
    %499 = vector.shape_cast %498 : vector<1x32xf32> to vector<32xf32>
    %500 = vector.shape_cast %499 : vector<32xf32> to vector<1x32xf32>
    %501 = vector.broadcast %500 : vector<1x32xf32> to vector<8x32xf32>
    %502 = arith.mulf %406, %501 : vector<8x32xf32>
    %503 = vector.extract_strided_slice %37 {offsets = [0, 96], sizes = [8, 32], strides = [1, 1]} : vector<8x128xf32> to vector<8x32xf32>
    %504 = arith.mulf %502, %503 : vector<8x32xf32>
    %cst_73 = arith.constant dense<0.000000e+00> : vector<8xf32>
    %505 = vector.multi_reduction <add>, %504, %cst_73 [1] : vector<8x32xf32> to vector<8xf32>
    %506 = vector.shape_cast %505 : vector<8xf32> to vector<8x1xf32>
    %507 = vector.shape_cast %506 : vector<8x1xf32> to vector<8x1xf32>
    %508 = vector.broadcast %507 : vector<8x1xf32> to vector<8x8xf32>
    %509 = arith.select %39, %508, %497 : vector<8x8xi1>, vector<8x8xf32>
    %cst_74 = arith.constant -1.000000e+30 : f32
    %510 = vector.broadcast %cst_74 : f32 to vector<8x8xf32>
    %511 = arith.select %12, %509, %510 : vector<8x8xi1>, vector<8x8xf32>
    %cst_75 = arith.constant dense<0xFF800000> : vector<8xf32>
    %512 = vector.multi_reduction <maximumf>, %511, %cst_75 [1] : vector<8x8xf32> to vector<8xf32>
    %513 = vector.shape_cast %512 : vector<8xf32> to vector<8x1xf32>
    %514 = vector.broadcast %513 : vector<8x1xf32> to vector<8x8xf32>
    %515 = arith.subf %511, %514 : vector<8x8xf32>
    %516 = math.exp %515 : vector<8x8xf32>
    %cst_76 = arith.constant dense<0.000000e+00> : vector<8xf32>
    %517 = vector.multi_reduction <add>, %516, %cst_76 [1] : vector<8x8xf32> to vector<8xf32>
    %518 = vector.shape_cast %517 : vector<8xf32> to vector<8x1xf32>
    %519 = tpu.reciprocal %518 {approx = true} : vector<8x1xf32> -> vector<8x1xf32>
    %520 = vector.broadcast %519 : vector<8x1xf32> to vector<8x8xf32>
    %521 = arith.mulf %516, %520 : vector<8x8xf32>
    %522 = arith.truncf %521 : vector<8x8xf32> to vector<8x8xbf16>
    %cst_77 = arith.constant dense<0.000000e+00> : vector<8x32xf32>
    %523 = tpu.matmul %522, %408, %cst_77 {dimension_numbers = #tpu.dot_dimension_numbers<[1], [0], [0], [1], [0, 0, 1, 1], [], []>} : vector<8x8xbf16>, vector<8x32xbf16>, vector<8x32xf32> -> vector<8x32xf32>
    %524 = arith.truncf %523 : vector<8x32xf32> to vector<8x32xbf16>
    %c0_78 = arith.constant 0 : index
    %c0_79 = arith.constant 0 : index
    %c96 = arith.constant 96 : index
    %525 = vector.load %arg6[%c0_78, %c0_79, %c96] : memref<1x8x128xbf16, #tpu.memory_space<vmem>>, vector<1x8x32xbf16>
    %526 = vector.shape_cast %525 : vector<1x8x32xbf16> to vector<8x32xbf16>
    %527 = vector.shape_cast %524 : vector<8x32xbf16> to vector<1x8x32xbf16>
    tpu.vector_store %arg6[%c0_78, %c0_79, %c96], %527 {strides = array<i32>} : memref<1x8x128xbf16, #tpu.memory_space<vmem>>, vector<1x8x32xbf16>,
    return
  }
  func.func @transform_0(%arg0: i32) -> (i32, i32, i32) {
    %c0_i32 = arith.constant 0 : i32
    %c0_i32_0 = arith.constant 0 : i32
    %c0_i32_1 = arith.constant 0 : i32
    return %arg0, %c0_i32, %c0_i32_0 : i32, i32, i32
  }
  func.func @transform_1(%arg0: i32) -> (i32, i32, i32) {
    %c0_i32 = arith.constant 0 : i32
    %c1_i32 = arith.constant 1 : i32
    %c0_i32_0 = arith.constant 0 : i32
    return %arg0, %c0_i32, %c1_i32 : i32, i32, i32
  }
  func.func @transform_2(%arg0: i32) -> (i32, i32, i32) {
    %c0_i32 = arith.constant 0 : i32
    %c2_i32 = arith.constant 2 : i32
    %c0_i32_0 = arith.constant 0 : i32
    return %arg0, %c0_i32, %c2_i32 : i32, i32, i32
  }
  func.func @transform_3(%arg0: i32) -> (i32, i32) {
    %c0_i32 = arith.constant 0 : i32
    %c0_i32_0 = arith.constant 0 : i32
    %c0_i32_1 = arith.constant 0 : i32
    return %c0_i32, %c0_i32_0 : i32, i32
  }
  func.func @transform_4(%arg0: i32) -> (i32, i32, i32) {
    %c0_i32 = arith.constant 0 : i32
    %c0_i32_0 = arith.constant 0 : i32
    %c0_i32_1 = arith.constant 0 : i32
    return %arg0, %c0_i32, %c0_i32_0 : i32, i32, i32
  }
  func.func @transform_5(%arg0: i32) -> (i32, i32, i32) {
    %c0_i32 = arith.constant 0 : i32
    %c0_i32_0 = arith.constant 0 : i32
    %c0_i32_1 = arith.constant 0 : i32
    return %arg0, %c0_i32, %c0_i32_0 : i32, i32, i32
  }
}

module attributes {stable_mosaic.version = 11 : i64} {
  func.func @_rel_attn_kernel(%arg0: i32, %arg1: memref<1x8x128xbf16, #tpu.memory_space<vmem>>, %arg2: memref<1x8x128xbf16, #tpu.memory_space<vmem>>, %arg3: memref<1x8x128xbf16, #tpu.memory_space<vmem>>, %arg4: memref<9x32xf32, #tpu.memory_space<vmem>>, %arg5: memref<1x1x8xi8, #tpu.memory_space<vmem>>, %arg6: memref<1x8x128xbf16, #tpu.memory_space<vmem>>) attributes {dimension_semantics = [#tpu.dimension_semantics<parallel>], iteration_bounds = array<i64: 2>, scalar_prefetch = 0 : i64, scratch_operands = 0 : i64, tpu.core_type = #tpu.core_type<tc>, window_params = [{transform_indices = @transform_0, window_bounds = array<i64: 1, 8, 128>}, {transform_indices = @transform_1, window_bounds = array<i64: 1, 8, 128>}, {transform_indices = @transform_2, window_bounds = array<i64: 1, 8, 128>}, {pipeline_mode = #tpu.pipeline_mode<synchronous>, transform_indices = @transform_3, window_bounds = array<i64: 9, 32>}, {transform_indices = @transform_4, window_bounds = array<i64: 1, 1, 8>}, {transform_indices = @transform_5, window_bounds = array<i64: 1, 8, 128>}]} {
    %c0 = arith.constant 0 : index
    %c0_0 = arith.constant 0 : index
    %c0_1 = arith.constant 0 : index
    %0 = vector.load %arg1[%c0, %c0_0, %c0_1] : memref<1x8x128xbf16, #tpu.memory_space<vmem>>, vector<1x8x128xbf16>
    %1 = vector.shape_cast %0 : vector<1x8x128xbf16> to vector<8x128xbf16>
    %2 = arith.extf %1 : vector<8x128xbf16> to vector<8x128xf32>
    %c0_2 = arith.constant 0 : index
    %c0_3 = arith.constant 0 : index
    %c0_4 = arith.constant 0 : index
    %3 = vector.load %arg2[%c0_2, %c0_3, %c0_4] : memref<1x8x128xbf16, #tpu.memory_space<vmem>>, vector<1x8x128xbf16>
    %4 = vector.shape_cast %3 : vector<1x8x128xbf16> to vector<8x128xbf16>
    %5 = arith.extf %4 : vector<8x128xbf16> to vector<8x128xf32>
    %c0_5 = arith.constant 0 : index
    %c0_6 = arith.constant 0 : index
    %c0_7 = arith.constant 0 : index
    %6 = vector.load %arg3[%c0_5, %c0_6, %c0_7] : memref<1x8x128xbf16, #tpu.memory_space<vmem>>, vector<1x8x128xbf16>
    %7 = vector.shape_cast %6 : vector<1x8x128xbf16> to vector<8x128xbf16>
    %c0_8 = arith.constant 0 : index
    %c0_9 = arith.constant 0 : index
    %8 = vector.load %arg4[%c0_8, %c0_9] : memref<9x32xf32, #tpu.memory_space<vmem>>, vector<9x32xf32>
    %c0_10 = arith.constant 0 : index
    %c0_11 = arith.constant 0 : index
    %c0_12 = arith.constant 0 : index
    %9 = vector.load %arg5[%c0_10, %c0_11, %c0_12] : memref<1x1x8xi8, #tpu.memory_space<vmem>>, vector<1x1x8xi8>
    %10 = vector.shape_cast %9 : vector<1x1x8xi8> to vector<1x8xi8>
    %c0_i8 = arith.constant 0 : i8
    %11 = vector.broadcast %c0_i8 : i8 to vector<1x8xi8>
    %12 = arith.cmpi ne, %10, %11 : vector<1x8xi8>
    %13 = tpu.iota {dimensions = array<i32: 0>} : vector<8x8xi32>
    %14 = tpu.iota {dimensions = array<i32: 1>} : vector<8x8xi32>
    %15 = arith.subi %13, %14 : vector<8x8xi32>
    %c-4_i32 = arith.constant -4 : i32
    %16 = vector.broadcast %c-4_i32 : i32 to vector<8x8xi32>
    %17 = arith.cmpi sle, %15, %16 : vector<8x8xi32>
    %c4_i32 = arith.constant 4 : i32
    %18 = vector.broadcast %c4_i32 : i32 to vector<8x8xi32>
    %19 = arith.cmpi sge, %15, %18 : vector<8x8xi32>
    %c5_i32 = arith.constant 5 : i32
    %20 = tpu.dynamic_rotate %5 by %c5_i32 dim 0 : vector<8x128xf32>, i32 -> vector<8x128xf32>
    %c-3_i32 = arith.constant -3 : i32
    %21 = vector.broadcast %c-3_i32 : i32 to vector<8x8xi32>
    %22 = arith.cmpi eq, %15, %21 : vector<8x8xi32>
    %c6_i32 = arith.constant 6 : i32
    %23 = tpu.dynamic_rotate %5 by %c6_i32 dim 0 : vector<8x128xf32>, i32 -> vector<8x128xf32>
    %c-2_i32 = arith.constant -2 : i32
    %24 = vector.broadcast %c-2_i32 : i32 to vector<8x8xi32>
    %25 = arith.cmpi eq, %15, %24 : vector<8x8xi32>
    %c7_i32 = arith.constant 7 : i32
    %26 = tpu.dynamic_rotate %5 by %c7_i32 dim 0 : vector<8x128xf32>, i32 -> vector<8x128xf32>
    %c-1_i32 = arith.constant -1 : i32
    %27 = vector.broadcast %c-1_i32 : i32 to vector<8x8xi32>
    %28 = arith.cmpi eq, %15, %27 : vector<8x8xi32>
    %c0_i32 = arith.constant 0 : i32
    %29 = vector.broadcast %c0_i32 : i32 to vector<8x8xi32>
    %30 = arith.cmpi eq, %15, %29 : vector<8x8xi32>
    %c1_i32 = arith.constant 1 : i32
    %31 = tpu.dynamic_rotate %5 by %c1_i32 dim 0 : vector<8x128xf32>, i32 -> vector<8x128xf32>
    %c1_i32_13 = arith.constant 1 : i32
    %32 = vector.broadcast %c1_i32_13 : i32 to vector<8x8xi32>
    %33 = arith.cmpi eq, %15, %32 : vector<8x8xi32>
    %c2_i32 = arith.constant 2 : i32
    %34 = tpu.dynamic_rotate %5 by %c2_i32 dim 0 : vector<8x128xf32>, i32 -> vector<8x128xf32>
    %c2_i32_14 = arith.constant 2 : i32
    %35 = vector.broadcast %c2_i32_14 : i32 to vector<8x8xi32>
    %36 = arith.cmpi eq, %15, %35 : vector<8x8xi32>
    %c3_i32 = arith.constant 3 : i32
    %37 = tpu.dynamic_rotate %5 by %c3_i32 dim 0 : vector<8x128xf32>, i32 -> vector<8x128xf32>
    %c3_i32_15 = arith.constant 3 : i32
    %38 = vector.broadcast %c3_i32_15 : i32 to vector<8x8xi32>
    %39 = arith.cmpi eq, %15, %38 : vector<8x8xi32>
    %40 = vector.extract_strided_slice %2 {offsets = [0, 0], sizes = [8, 32], strides = [1, 1]} : vector<8x128xf32> to vector<8x32xf32>
    %41 = vector.extract_strided_slice %4 {offsets = [0, 0], sizes = [8, 32], strides = [1, 1]} : vector<8x128xbf16> to vector<8x32xbf16>
    %42 = vector.extract_strided_slice %7 {offsets = [0, 0], sizes = [8, 32], strides = [1, 1]} : vector<8x128xbf16> to vector<8x32xbf16>
    %43 = vector.extract_strided_slice %8 {offsets = [0, 0], sizes = [1, 32], strides = [1, 1]} : vector<9x32xf32> to vector<1x32xf32>
    %44 = vector.shape_cast %43 : vector<1x32xf32> to vector<32xf32>
    %45 = vector.shape_cast %44 : vector<32xf32> to vector<1x32xf32>
    %46 = vector.broadcast %45 : vector<1x32xf32> to vector<8x32xf32>
    %47 = arith.mulf %40, %46 : vector<8x32xf32>
    %48 = arith.truncf %47 : vector<8x32xf32> to vector<8x32xbf16>
    %cst = arith.constant dense<0.000000e+00> : vector<8x8xf32>
    %49 = tpu.matmul %48, %41, %cst {dimension_numbers = #tpu.dot_dimension_numbers<[1], [1], [0], [0], [0, 0, 1, 0], [], []>} : vector<8x32xbf16>, vector<8x32xbf16>, vector<8x8xf32> -> vector<8x8xf32>
    %50 = vector.extract_strided_slice %8 {offsets = [8, 0], sizes = [1, 32], strides = [1, 1]} : vector<9x32xf32> to vector<1x32xf32>
    %51 = vector.shape_cast %50 : vector<1x32xf32> to vector<32xf32>
    %52 = vector.shape_cast %51 : vector<32xf32> to vector<1x32xf32>
    %53 = vector.broadcast %52 : vector<1x32xf32> to vector<8x32xf32>
    %54 = arith.mulf %40, %53 : vector<8x32xf32>
    %55 = arith.truncf %54 : vector<8x32xf32> to vector<8x32xbf16>
    %cst_16 = arith.constant dense<0.000000e+00> : vector<8x8xf32>
    %56 = tpu.matmul %55, %41, %cst_16 {dimension_numbers = #tpu.dot_dimension_numbers<[1], [1], [0], [0], [0, 0, 1, 0], [], []>} : vector<8x32xbf16>, vector<8x32xbf16>, vector<8x8xf32> -> vector<8x8xf32>
    %cst_17 = arith.constant 0.000000e+00 : f32
    %57 = vector.broadcast %cst_17 : f32 to vector<8x8xf32>
    %58 = arith.select %17, %49, %57 : vector<8x8xi1>, vector<8x8xf32>
    %59 = arith.select %19, %56, %58 : vector<8x8xi1>, vector<8x8xf32>
    %60 = vector.extract_strided_slice %8 {offsets = [1, 0], sizes = [1, 32], strides = [1, 1]} : vector<9x32xf32> to vector<1x32xf32>
    %61 = vector.shape_cast %60 : vector<1x32xf32> to vector<32xf32>
    %62 = vector.shape_cast %61 : vector<32xf32> to vector<1x32xf32>
    %63 = vector.broadcast %62 : vector<1x32xf32> to vector<8x32xf32>
    %64 = arith.mulf %40, %63 : vector<8x32xf32>
    %65 = vector.extract_strided_slice %20 {offsets = [0, 0], sizes = [8, 32], strides = [1, 1]} : vector<8x128xf32> to vector<8x32xf32>
    %66 = arith.mulf %64, %65 : vector<8x32xf32>
    %cst_18 = arith.constant dense<0.000000e+00> : vector<8xf32>
    %67 = vector.multi_reduction <add>, %66, %cst_18 [1] : vector<8x32xf32> to vector<8xf32>
    %68 = vector.shape_cast %67 : vector<8xf32> to vector<8x1xf32>
    %69 = vector.shape_cast %68 : vector<8x1xf32> to vector<8x1xf32>
    %70 = vector.broadcast %69 : vector<8x1xf32> to vector<8x8xf32>
    %71 = arith.select %22, %70, %59 : vector<8x8xi1>, vector<8x8xf32>
    %72 = vector.extract_strided_slice %8 {offsets = [2, 0], sizes = [1, 32], strides = [1, 1]} : vector<9x32xf32> to vector<1x32xf32>
    %73 = vector.shape_cast %72 : vector<1x32xf32> to vector<32xf32>
    %74 = vector.shape_cast %73 : vector<32xf32> to vector<1x32xf32>
    %75 = vector.broadcast %74 : vector<1x32xf32> to vector<8x32xf32>
    %76 = arith.mulf %40, %75 : vector<8x32xf32>
    %77 = vector.extract_strided_slice %23 {offsets = [0, 0], sizes = [8, 32], strides = [1, 1]} : vector<8x128xf32> to vector<8x32xf32>
    %78 = arith.mulf %76, %77 : vector<8x32xf32>
    %cst_19 = arith.constant dense<0.000000e+00> : vector<8xf32>
    %79 = vector.multi_reduction <add>, %78, %cst_19 [1] : vector<8x32xf32> to vector<8xf32>
    %80 = vector.shape_cast %79 : vector<8xf32> to vector<8x1xf32>
    %81 = vector.shape_cast %80 : vector<8x1xf32> to vector<8x1xf32>
    %82 = vector.broadcast %81 : vector<8x1xf32> to vector<8x8xf32>
    %83 = arith.select %25, %82, %71 : vector<8x8xi1>, vector<8x8xf32>
    %84 = vector.extract_strided_slice %8 {offsets = [3, 0], sizes = [1, 32], strides = [1, 1]} : vector<9x32xf32> to vector<1x32xf32>
    %85 = vector.shape_cast %84 : vector<1x32xf32> to vector<32xf32>
    %86 = vector.shape_cast %85 : vector<32xf32> to vector<1x32xf32>
    %87 = vector.broadcast %86 : vector<1x32xf32> to vector<8x32xf32>
    %88 = arith.mulf %40, %87 : vector<8x32xf32>
    %89 = vector.extract_strided_slice %26 {offsets = [0, 0], sizes = [8, 32], strides = [1, 1]} : vector<8x128xf32> to vector<8x32xf32>
    %90 = arith.mulf %88, %89 : vector<8x32xf32>
    %cst_20 = arith.constant dense<0.000000e+00> : vector<8xf32>
    %91 = vector.multi_reduction <add>, %90, %cst_20 [1] : vector<8x32xf32> to vector<8xf32>
    %92 = vector.shape_cast %91 : vector<8xf32> to vector<8x1xf32>
    %93 = vector.shape_cast %92 : vector<8x1xf32> to vector<8x1xf32>
    %94 = vector.broadcast %93 : vector<8x1xf32> to vector<8x8xf32>
    %95 = arith.select %28, %94, %83 : vector<8x8xi1>, vector<8x8xf32>
    %96 = vector.extract_strided_slice %8 {offsets = [4, 0], sizes = [1, 32], strides = [1, 1]} : vector<9x32xf32> to vector<1x32xf32>
    %97 = vector.shape_cast %96 : vector<1x32xf32> to vector<32xf32>
    %98 = vector.shape_cast %97 : vector<32xf32> to vector<1x32xf32>
    %99 = vector.broadcast %98 : vector<1x32xf32> to vector<8x32xf32>
    %100 = arith.mulf %40, %99 : vector<8x32xf32>
    %101 = vector.extract_strided_slice %5 {offsets = [0, 0], sizes = [8, 32], strides = [1, 1]} : vector<8x128xf32> to vector<8x32xf32>
    %102 = arith.mulf %100, %101 : vector<8x32xf32>
    %cst_21 = arith.constant dense<0.000000e+00> : vector<8xf32>
    %103 = vector.multi_reduction <add>, %102, %cst_21 [1] : vector<8x32xf32> to vector<8xf32>
    %104 = vector.shape_cast %103 : vector<8xf32> to vector<8x1xf32>
    %105 = vector.shape_cast %104 : vector<8x1xf32> to vector<8x1xf32>
    %106 = vector.broadcast %105 : vector<8x1xf32> to vector<8x8xf32>
    %107 = arith.select %30, %106, %95 : vector<8x8xi1>, vector<8x8xf32>
    %108 = vector.extract_strided_slice %8 {offsets = [5, 0], sizes = [1, 32], strides = [1, 1]} : vector<9x32xf32> to vector<1x32xf32>
    %109 = vector.shape_cast %108 : vector<1x32xf32> to vector<32xf32>
    %110 = vector.shape_cast %109 : vector<32xf32> to vector<1x32xf32>
    %111 = vector.broadcast %110 : vector<1x32xf32> to vector<8x32xf32>
    %112 = arith.mulf %40, %111 : vector<8x32xf32>
    %113 = vector.extract_strided_slice %31 {offsets = [0, 0], sizes = [8, 32], strides = [1, 1]} : vector<8x128xf32> to vector<8x32xf32>
    %114 = arith.mulf %112, %113 : vector<8x32xf32>
    %cst_22 = arith.constant dense<0.000000e+00> : vector<8xf32>
    %115 = vector.multi_reduction <add>, %114, %cst_22 [1] : vector<8x32xf32> to vector<8xf32>
    %116 = vector.shape_cast %115 : vector<8xf32> to vector<8x1xf32>
    %117 = vector.shape_cast %116 : vector<8x1xf32> to vector<8x1xf32>
    %118 = vector.broadcast %117 : vector<8x1xf32> to vector<8x8xf32>
    %119 = arith.select %33, %118, %107 : vector<8x8xi1>, vector<8x8xf32>
    %120 = vector.extract_strided_slice %8 {offsets = [6, 0], sizes = [1, 32], strides = [1, 1]} : vector<9x32xf32> to vector<1x32xf32>
    %121 = vector.shape_cast %120 : vector<1x32xf32> to vector<32xf32>
    %122 = vector.shape_cast %121 : vector<32xf32> to vector<1x32xf32>
    %123 = vector.broadcast %122 : vector<1x32xf32> to vector<8x32xf32>
    %124 = arith.mulf %40, %123 : vector<8x32xf32>
    %125 = vector.extract_strided_slice %34 {offsets = [0, 0], sizes = [8, 32], strides = [1, 1]} : vector<8x128xf32> to vector<8x32xf32>
    %126 = arith.mulf %124, %125 : vector<8x32xf32>
    %cst_23 = arith.constant dense<0.000000e+00> : vector<8xf32>
    %127 = vector.multi_reduction <add>, %126, %cst_23 [1] : vector<8x32xf32> to vector<8xf32>
    %128 = vector.shape_cast %127 : vector<8xf32> to vector<8x1xf32>
    %129 = vector.shape_cast %128 : vector<8x1xf32> to vector<8x1xf32>
    %130 = vector.broadcast %129 : vector<8x1xf32> to vector<8x8xf32>
    %131 = arith.select %36, %130, %119 : vector<8x8xi1>, vector<8x8xf32>
    %132 = vector.extract_strided_slice %8 {offsets = [7, 0], sizes = [1, 32], strides = [1, 1]} : vector<9x32xf32> to vector<1x32xf32>
    %133 = vector.shape_cast %132 : vector<1x32xf32> to vector<32xf32>
    %134 = vector.shape_cast %133 : vector<32xf32> to vector<1x32xf32>
    %135 = vector.broadcast %134 : vector<1x32xf32> to vector<8x32xf32>
    %136 = arith.mulf %40, %135 : vector<8x32xf32>
    %137 = vector.extract_strided_slice %37 {offsets = [0, 0], sizes = [8, 32], strides = [1, 1]} : vector<8x128xf32> to vector<8x32xf32>
    %138 = arith.mulf %136, %137 : vector<8x32xf32>
    %cst_24 = arith.constant dense<0.000000e+00> : vector<8xf32>
    %139 = vector.multi_reduction <add>, %138, %cst_24 [1] : vector<8x32xf32> to vector<8xf32>
    %140 = vector.shape_cast %139 : vector<8xf32> to vector<8x1xf32>
    %141 = vector.shape_cast %140 : vector<8x1xf32> to vector<8x1xf32>
    %142 = vector.broadcast %141 : vector<8x1xf32> to vector<8x8xf32>
    %143 = arith.select %39, %142, %131 : vector<8x8xi1>, vector<8x8xf32>
    %cst_25 = arith.constant -1.000000e+30 : f32
    %144 = vector.shape_cast %12 : vector<1x8xi1> to vector<1x8xi1>
    %145 = vector.broadcast %144 : vector<1x8xi1> to vector<8x8xi1>
    %146 = vector.broadcast %cst_25 : f32 to vector<8x8xf32>
    %147 = arith.select %145, %143, %146 : vector<8x8xi1>, vector<8x8xf32>
    %cst_26 = arith.constant dense<0xFF800000> : vector<8xf32>
    %148 = vector.multi_reduction <maximumf>, %147, %cst_26 [1] : vector<8x8xf32> to vector<8xf32>
    %149 = vector.shape_cast %148 : vector<8xf32> to vector<8x1xf32>
    %150 = vector.broadcast %149 : vector<8x1xf32> to vector<8x8xf32>
    %151 = arith.subf %147, %150 : vector<8x8xf32>
    %152 = math.exp %151 : vector<8x8xf32>
    %cst_27 = arith.constant dense<0.000000e+00> : vector<8xf32>
    %153 = vector.multi_reduction <add>, %152, %cst_27 [1] : vector<8x8xf32> to vector<8xf32>
    %154 = vector.shape_cast %153 : vector<8xf32> to vector<8x1xf32>
    %155 = tpu.reciprocal %154 {approx = true} : vector<8x1xf32> -> vector<8x1xf32>
    %156 = vector.broadcast %155 : vector<8x1xf32> to vector<8x8xf32>
    %157 = arith.mulf %152, %156 : vector<8x8xf32>
    %158 = arith.truncf %157 : vector<8x8xf32> to vector<8x8xbf16>
    %cst_28 = arith.constant dense<0.000000e+00> : vector<8x32xf32>
    %159 = tpu.matmul %158, %42, %cst_28 {dimension_numbers = #tpu.dot_dimension_numbers<[1], [0], [0], [1], [0, 0, 1, 1], [], []>} : vector<8x8xbf16>, vector<8x32xbf16>, vector<8x32xf32> -> vector<8x32xf32>
    %160 = arith.truncf %159 : vector<8x32xf32> to vector<8x32xbf16>
    %c0_29 = arith.constant 0 : index
    %c0_30 = arith.constant 0 : index
    %c0_31 = arith.constant 0 : index
    %161 = vector.load %arg6[%c0_29, %c0_30, %c0_31] : memref<1x8x128xbf16, #tpu.memory_space<vmem>>, vector<1x8x32xbf16>
    %162 = vector.shape_cast %161 : vector<1x8x32xbf16> to vector<8x32xbf16>
    %163 = vector.shape_cast %160 : vector<8x32xbf16> to vector<1x8x32xbf16>
    tpu.vector_store %arg6[%c0_29, %c0_30, %c0_31], %163 {strides = array<i32>} : memref<1x8x128xbf16, #tpu.memory_space<vmem>>, vector<1x8x32xbf16>,
    %164 = vector.extract_strided_slice %2 {offsets = [0, 32], sizes = [8, 32], strides = [1, 1]} : vector<8x128xf32> to vector<8x32xf32>
    %165 = vector.extract_strided_slice %4 {offsets = [0, 32], sizes = [8, 32], strides = [1, 1]} : vector<8x128xbf16> to vector<8x32xbf16>
    %166 = vector.extract_strided_slice %7 {offsets = [0, 32], sizes = [8, 32], strides = [1, 1]} : vector<8x128xbf16> to vector<8x32xbf16>
    %167 = vector.extract_strided_slice %8 {offsets = [0, 0], sizes = [1, 32], strides = [1, 1]} : vector<9x32xf32> to vector<1x32xf32>
    %168 = vector.shape_cast %167 : vector<1x32xf32> to vector<32xf32>
    %169 = vector.shape_cast %168 : vector<32xf32> to vector<1x32xf32>
    %170 = vector.broadcast %169 : vector<1x32xf32> to vector<8x32xf32>
    %171 = arith.mulf %164, %170 : vector<8x32xf32>
    %172 = arith.truncf %171 : vector<8x32xf32> to vector<8x32xbf16>
    %cst_32 = arith.constant dense<0.000000e+00> : vector<8x8xf32>
    %173 = tpu.matmul %172, %165, %cst_32 {dimension_numbers = #tpu.dot_dimension_numbers<[1], [1], [0], [0], [0, 0, 1, 0], [], []>} : vector<8x32xbf16>, vector<8x32xbf16>, vector<8x8xf32> -> vector<8x8xf32>
    %174 = vector.extract_strided_slice %8 {offsets = [8, 0], sizes = [1, 32], strides = [1, 1]} : vector<9x32xf32> to vector<1x32xf32>
    %175 = vector.shape_cast %174 : vector<1x32xf32> to vector<32xf32>
    %176 = vector.shape_cast %175 : vector<32xf32> to vector<1x32xf32>
    %177 = vector.broadcast %176 : vector<1x32xf32> to vector<8x32xf32>
    %178 = arith.mulf %164, %177 : vector<8x32xf32>
    %179 = arith.truncf %178 : vector<8x32xf32> to vector<8x32xbf16>
    %cst_33 = arith.constant dense<0.000000e+00> : vector<8x8xf32>
    %180 = tpu.matmul %179, %165, %cst_33 {dimension_numbers = #tpu.dot_dimension_numbers<[1], [1], [0], [0], [0, 0, 1, 0], [], []>} : vector<8x32xbf16>, vector<8x32xbf16>, vector<8x8xf32> -> vector<8x8xf32>
    %cst_34 = arith.constant 0.000000e+00 : f32
    %181 = vector.broadcast %cst_34 : f32 to vector<8x8xf32>
    %182 = arith.select %17, %173, %181 : vector<8x8xi1>, vector<8x8xf32>
    %183 = arith.select %19, %180, %182 : vector<8x8xi1>, vector<8x8xf32>
    %184 = vector.extract_strided_slice %8 {offsets = [1, 0], sizes = [1, 32], strides = [1, 1]} : vector<9x32xf32> to vector<1x32xf32>
    %185 = vector.shape_cast %184 : vector<1x32xf32> to vector<32xf32>
    %186 = vector.shape_cast %185 : vector<32xf32> to vector<1x32xf32>
    %187 = vector.broadcast %186 : vector<1x32xf32> to vector<8x32xf32>
    %188 = arith.mulf %164, %187 : vector<8x32xf32>
    %189 = vector.extract_strided_slice %20 {offsets = [0, 32], sizes = [8, 32], strides = [1, 1]} : vector<8x128xf32> to vector<8x32xf32>
    %190 = arith.mulf %188, %189 : vector<8x32xf32>
    %cst_35 = arith.constant dense<0.000000e+00> : vector<8xf32>
    %191 = vector.multi_reduction <add>, %190, %cst_35 [1] : vector<8x32xf32> to vector<8xf32>
    %192 = vector.shape_cast %191 : vector<8xf32> to vector<8x1xf32>
    %193 = vector.shape_cast %192 : vector<8x1xf32> to vector<8x1xf32>
    %194 = vector.broadcast %193 : vector<8x1xf32> to vector<8x8xf32>
    %195 = arith.select %22, %194, %183 : vector<8x8xi1>, vector<8x8xf32>
    %196 = vector.extract_strided_slice %8 {offsets = [2, 0], sizes = [1, 32], strides = [1, 1]} : vector<9x32xf32> to vector<1x32xf32>
    %197 = vector.shape_cast %196 : vector<1x32xf32> to vector<32xf32>
    %198 = vector.shape_cast %197 : vector<32xf32> to vector<1x32xf32>
    %199 = vector.broadcast %198 : vector<1x32xf32> to vector<8x32xf32>
    %200 = arith.mulf %164, %199 : vector<8x32xf32>
    %201 = vector.extract_strided_slice %23 {offsets = [0, 32], sizes = [8, 32], strides = [1, 1]} : vector<8x128xf32> to vector<8x32xf32>
    %202 = arith.mulf %200, %201 : vector<8x32xf32>
    %cst_36 = arith.constant dense<0.000000e+00> : vector<8xf32>
    %203 = vector.multi_reduction <add>, %202, %cst_36 [1] : vector<8x32xf32> to vector<8xf32>
    %204 = vector.shape_cast %203 : vector<8xf32> to vector<8x1xf32>
    %205 = vector.shape_cast %204 : vector<8x1xf32> to vector<8x1xf32>
    %206 = vector.broadcast %205 : vector<8x1xf32> to vector<8x8xf32>
    %207 = arith.select %25, %206, %195 : vector<8x8xi1>, vector<8x8xf32>
    %208 = vector.extract_strided_slice %8 {offsets = [3, 0], sizes = [1, 32], strides = [1, 1]} : vector<9x32xf32> to vector<1x32xf32>
    %209 = vector.shape_cast %208 : vector<1x32xf32> to vector<32xf32>
    %210 = vector.shape_cast %209 : vector<32xf32> to vector<1x32xf32>
    %211 = vector.broadcast %210 : vector<1x32xf32> to vector<8x32xf32>
    %212 = arith.mulf %164, %211 : vector<8x32xf32>
    %213 = vector.extract_strided_slice %26 {offsets = [0, 32], sizes = [8, 32], strides = [1, 1]} : vector<8x128xf32> to vector<8x32xf32>
    %214 = arith.mulf %212, %213 : vector<8x32xf32>
    %cst_37 = arith.constant dense<0.000000e+00> : vector<8xf32>
    %215 = vector.multi_reduction <add>, %214, %cst_37 [1] : vector<8x32xf32> to vector<8xf32>
    %216 = vector.shape_cast %215 : vector<8xf32> to vector<8x1xf32>
    %217 = vector.shape_cast %216 : vector<8x1xf32> to vector<8x1xf32>
    %218 = vector.broadcast %217 : vector<8x1xf32> to vector<8x8xf32>
    %219 = arith.select %28, %218, %207 : vector<8x8xi1>, vector<8x8xf32>
    %220 = vector.extract_strided_slice %8 {offsets = [4, 0], sizes = [1, 32], strides = [1, 1]} : vector<9x32xf32> to vector<1x32xf32>
    %221 = vector.shape_cast %220 : vector<1x32xf32> to vector<32xf32>
    %222 = vector.shape_cast %221 : vector<32xf32> to vector<1x32xf32>
    %223 = vector.broadcast %222 : vector<1x32xf32> to vector<8x32xf32>
    %224 = arith.mulf %164, %223 : vector<8x32xf32>
    %225 = vector.extract_strided_slice %5 {offsets = [0, 32], sizes = [8, 32], strides = [1, 1]} : vector<8x128xf32> to vector<8x32xf32>
    %226 = arith.mulf %224, %225 : vector<8x32xf32>
    %cst_38 = arith.constant dense<0.000000e+00> : vector<8xf32>
    %227 = vector.multi_reduction <add>, %226, %cst_38 [1] : vector<8x32xf32> to vector<8xf32>
    %228 = vector.shape_cast %227 : vector<8xf32> to vector<8x1xf32>
    %229 = vector.shape_cast %228 : vector<8x1xf32> to vector<8x1xf32>
    %230 = vector.broadcast %229 : vector<8x1xf32> to vector<8x8xf32>
    %231 = arith.select %30, %230, %219 : vector<8x8xi1>, vector<8x8xf32>
    %232 = vector.extract_strided_slice %8 {offsets = [5, 0], sizes = [1, 32], strides = [1, 1]} : vector<9x32xf32> to vector<1x32xf32>
    %233 = vector.shape_cast %232 : vector<1x32xf32> to vector<32xf32>
    %234 = vector.shape_cast %233 : vector<32xf32> to vector<1x32xf32>
    %235 = vector.broadcast %234 : vector<1x32xf32> to vector<8x32xf32>
    %236 = arith.mulf %164, %235 : vector<8x32xf32>
    %237 = vector.extract_strided_slice %31 {offsets = [0, 32], sizes = [8, 32], strides = [1, 1]} : vector<8x128xf32> to vector<8x32xf32>
    %238 = arith.mulf %236, %237 : vector<8x32xf32>
    %cst_39 = arith.constant dense<0.000000e+00> : vector<8xf32>
    %239 = vector.multi_reduction <add>, %238, %cst_39 [1] : vector<8x32xf32> to vector<8xf32>
    %240 = vector.shape_cast %239 : vector<8xf32> to vector<8x1xf32>
    %241 = vector.shape_cast %240 : vector<8x1xf32> to vector<8x1xf32>
    %242 = vector.broadcast %241 : vector<8x1xf32> to vector<8x8xf32>
    %243 = arith.select %33, %242, %231 : vector<8x8xi1>, vector<8x8xf32>
    %244 = vector.extract_strided_slice %8 {offsets = [6, 0], sizes = [1, 32], strides = [1, 1]} : vector<9x32xf32> to vector<1x32xf32>
    %245 = vector.shape_cast %244 : vector<1x32xf32> to vector<32xf32>
    %246 = vector.shape_cast %245 : vector<32xf32> to vector<1x32xf32>
    %247 = vector.broadcast %246 : vector<1x32xf32> to vector<8x32xf32>
    %248 = arith.mulf %164, %247 : vector<8x32xf32>
    %249 = vector.extract_strided_slice %34 {offsets = [0, 32], sizes = [8, 32], strides = [1, 1]} : vector<8x128xf32> to vector<8x32xf32>
    %250 = arith.mulf %248, %249 : vector<8x32xf32>
    %cst_40 = arith.constant dense<0.000000e+00> : vector<8xf32>
    %251 = vector.multi_reduction <add>, %250, %cst_40 [1] : vector<8x32xf32> to vector<8xf32>
    %252 = vector.shape_cast %251 : vector<8xf32> to vector<8x1xf32>
    %253 = vector.shape_cast %252 : vector<8x1xf32> to vector<8x1xf32>
    %254 = vector.broadcast %253 : vector<8x1xf32> to vector<8x8xf32>
    %255 = arith.select %36, %254, %243 : vector<8x8xi1>, vector<8x8xf32>
    %256 = vector.extract_strided_slice %8 {offsets = [7, 0], sizes = [1, 32], strides = [1, 1]} : vector<9x32xf32> to vector<1x32xf32>
    %257 = vector.shape_cast %256 : vector<1x32xf32> to vector<32xf32>
    %258 = vector.shape_cast %257 : vector<32xf32> to vector<1x32xf32>
    %259 = vector.broadcast %258 : vector<1x32xf32> to vector<8x32xf32>
    %260 = arith.mulf %164, %259 : vector<8x32xf32>
    %261 = vector.extract_strided_slice %37 {offsets = [0, 32], sizes = [8, 32], strides = [1, 1]} : vector<8x128xf32> to vector<8x32xf32>
    %262 = arith.mulf %260, %261 : vector<8x32xf32>
    %cst_41 = arith.constant dense<0.000000e+00> : vector<8xf32>
    %263 = vector.multi_reduction <add>, %262, %cst_41 [1] : vector<8x32xf32> to vector<8xf32>
    %264 = vector.shape_cast %263 : vector<8xf32> to vector<8x1xf32>
    %265 = vector.shape_cast %264 : vector<8x1xf32> to vector<8x1xf32>
    %266 = vector.broadcast %265 : vector<8x1xf32> to vector<8x8xf32>
    %267 = arith.select %39, %266, %255 : vector<8x8xi1>, vector<8x8xf32>
    %cst_42 = arith.constant -1.000000e+30 : f32
    %268 = vector.shape_cast %12 : vector<1x8xi1> to vector<1x8xi1>
    %269 = vector.broadcast %268 : vector<1x8xi1> to vector<8x8xi1>
    %270 = vector.broadcast %cst_42 : f32 to vector<8x8xf32>
    %271 = arith.select %269, %267, %270 : vector<8x8xi1>, vector<8x8xf32>
    %cst_43 = arith.constant dense<0xFF800000> : vector<8xf32>
    %272 = vector.multi_reduction <maximumf>, %271, %cst_43 [1] : vector<8x8xf32> to vector<8xf32>
    %273 = vector.shape_cast %272 : vector<8xf32> to vector<8x1xf32>
    %274 = vector.broadcast %273 : vector<8x1xf32> to vector<8x8xf32>
    %275 = arith.subf %271, %274 : vector<8x8xf32>
    %276 = math.exp %275 : vector<8x8xf32>
    %cst_44 = arith.constant dense<0.000000e+00> : vector<8xf32>
    %277 = vector.multi_reduction <add>, %276, %cst_44 [1] : vector<8x8xf32> to vector<8xf32>
    %278 = vector.shape_cast %277 : vector<8xf32> to vector<8x1xf32>
    %279 = tpu.reciprocal %278 {approx = true} : vector<8x1xf32> -> vector<8x1xf32>
    %280 = vector.broadcast %279 : vector<8x1xf32> to vector<8x8xf32>
    %281 = arith.mulf %276, %280 : vector<8x8xf32>
    %282 = arith.truncf %281 : vector<8x8xf32> to vector<8x8xbf16>
    %cst_45 = arith.constant dense<0.000000e+00> : vector<8x32xf32>
    %283 = tpu.matmul %282, %166, %cst_45 {dimension_numbers = #tpu.dot_dimension_numbers<[1], [0], [0], [1], [0, 0, 1, 1], [], []>} : vector<8x8xbf16>, vector<8x32xbf16>, vector<8x32xf32> -> vector<8x32xf32>
    %284 = arith.truncf %283 : vector<8x32xf32> to vector<8x32xbf16>
    %c0_46 = arith.constant 0 : index
    %c0_47 = arith.constant 0 : index
    %c32 = arith.constant 32 : index
    %285 = vector.load %arg6[%c0_46, %c0_47, %c32] : memref<1x8x128xbf16, #tpu.memory_space<vmem>>, vector<1x8x32xbf16>
    %286 = vector.shape_cast %285 : vector<1x8x32xbf16> to vector<8x32xbf16>
    %287 = vector.shape_cast %284 : vector<8x32xbf16> to vector<1x8x32xbf16>
    tpu.vector_store %arg6[%c0_46, %c0_47, %c32], %287 {strides = array<i32>} : memref<1x8x128xbf16, #tpu.memory_space<vmem>>, vector<1x8x32xbf16>,
    %288 = vector.extract_strided_slice %2 {offsets = [0, 64], sizes = [8, 32], strides = [1, 1]} : vector<8x128xf32> to vector<8x32xf32>
    %289 = vector.extract_strided_slice %4 {offsets = [0, 64], sizes = [8, 32], strides = [1, 1]} : vector<8x128xbf16> to vector<8x32xbf16>
    %290 = vector.extract_strided_slice %7 {offsets = [0, 64], sizes = [8, 32], strides = [1, 1]} : vector<8x128xbf16> to vector<8x32xbf16>
    %291 = vector.extract_strided_slice %8 {offsets = [0, 0], sizes = [1, 32], strides = [1, 1]} : vector<9x32xf32> to vector<1x32xf32>
    %292 = vector.shape_cast %291 : vector<1x32xf32> to vector<32xf32>
    %293 = vector.shape_cast %292 : vector<32xf32> to vector<1x32xf32>
    %294 = vector.broadcast %293 : vector<1x32xf32> to vector<8x32xf32>
    %295 = arith.mulf %288, %294 : vector<8x32xf32>
    %296 = arith.truncf %295 : vector<8x32xf32> to vector<8x32xbf16>
    %cst_48 = arith.constant dense<0.000000e+00> : vector<8x8xf32>
    %297 = tpu.matmul %296, %289, %cst_48 {dimension_numbers = #tpu.dot_dimension_numbers<[1], [1], [0], [0], [0, 0, 1, 0], [], []>} : vector<8x32xbf16>, vector<8x32xbf16>, vector<8x8xf32> -> vector<8x8xf32>
    %298 = vector.extract_strided_slice %8 {offsets = [8, 0], sizes = [1, 32], strides = [1, 1]} : vector<9x32xf32> to vector<1x32xf32>
    %299 = vector.shape_cast %298 : vector<1x32xf32> to vector<32xf32>
    %300 = vector.shape_cast %299 : vector<32xf32> to vector<1x32xf32>
    %301 = vector.broadcast %300 : vector<1x32xf32> to vector<8x32xf32>
    %302 = arith.mulf %288, %301 : vector<8x32xf32>
    %303 = arith.truncf %302 : vector<8x32xf32> to vector<8x32xbf16>
    %cst_49 = arith.constant dense<0.000000e+00> : vector<8x8xf32>
    %304 = tpu.matmul %303, %289, %cst_49 {dimension_numbers = #tpu.dot_dimension_numbers<[1], [1], [0], [0], [0, 0, 1, 0], [], []>} : vector<8x32xbf16>, vector<8x32xbf16>, vector<8x8xf32> -> vector<8x8xf32>
    %cst_50 = arith.constant 0.000000e+00 : f32
    %305 = vector.broadcast %cst_50 : f32 to vector<8x8xf32>
    %306 = arith.select %17, %297, %305 : vector<8x8xi1>, vector<8x8xf32>
    %307 = arith.select %19, %304, %306 : vector<8x8xi1>, vector<8x8xf32>
    %308 = vector.extract_strided_slice %8 {offsets = [1, 0], sizes = [1, 32], strides = [1, 1]} : vector<9x32xf32> to vector<1x32xf32>
    %309 = vector.shape_cast %308 : vector<1x32xf32> to vector<32xf32>
    %310 = vector.shape_cast %309 : vector<32xf32> to vector<1x32xf32>
    %311 = vector.broadcast %310 : vector<1x32xf32> to vector<8x32xf32>
    %312 = arith.mulf %288, %311 : vector<8x32xf32>
    %313 = vector.extract_strided_slice %20 {offsets = [0, 64], sizes = [8, 32], strides = [1, 1]} : vector<8x128xf32> to vector<8x32xf32>
    %314 = arith.mulf %312, %313 : vector<8x32xf32>
    %cst_51 = arith.constant dense<0.000000e+00> : vector<8xf32>
    %315 = vector.multi_reduction <add>, %314, %cst_51 [1] : vector<8x32xf32> to vector<8xf32>
    %316 = vector.shape_cast %315 : vector<8xf32> to vector<8x1xf32>
    %317 = vector.shape_cast %316 : vector<8x1xf32> to vector<8x1xf32>
    %318 = vector.broadcast %317 : vector<8x1xf32> to vector<8x8xf32>
    %319 = arith.select %22, %318, %307 : vector<8x8xi1>, vector<8x8xf32>
    %320 = vector.extract_strided_slice %8 {offsets = [2, 0], sizes = [1, 32], strides = [1, 1]} : vector<9x32xf32> to vector<1x32xf32>
    %321 = vector.shape_cast %320 : vector<1x32xf32> to vector<32xf32>
    %322 = vector.shape_cast %321 : vector<32xf32> to vector<1x32xf32>
    %323 = vector.broadcast %322 : vector<1x32xf32> to vector<8x32xf32>
    %324 = arith.mulf %288, %323 : vector<8x32xf32>
    %325 = vector.extract_strided_slice %23 {offsets = [0, 64], sizes = [8, 32], strides = [1, 1]} : vector<8x128xf32> to vector<8x32xf32>
    %326 = arith.mulf %324, %325 : vector<8x32xf32>
    %cst_52 = arith.constant dense<0.000000e+00> : vector<8xf32>
    %327 = vector.multi_reduction <add>, %326, %cst_52 [1] : vector<8x32xf32> to vector<8xf32>
    %328 = vector.shape_cast %327 : vector<8xf32> to vector<8x1xf32>
    %329 = vector.shape_cast %328 : vector<8x1xf32> to vector<8x1xf32>
    %330 = vector.broadcast %329 : vector<8x1xf32> to vector<8x8xf32>
    %331 = arith.select %25, %330, %319 : vector<8x8xi1>, vector<8x8xf32>
    %332 = vector.extract_strided_slice %8 {offsets = [3, 0], sizes = [1, 32], strides = [1, 1]} : vector<9x32xf32> to vector<1x32xf32>
    %333 = vector.shape_cast %332 : vector<1x32xf32> to vector<32xf32>
    %334 = vector.shape_cast %333 : vector<32xf32> to vector<1x32xf32>
    %335 = vector.broadcast %334 : vector<1x32xf32> to vector<8x32xf32>
    %336 = arith.mulf %288, %335 : vector<8x32xf32>
    %337 = vector.extract_strided_slice %26 {offsets = [0, 64], sizes = [8, 32], strides = [1, 1]} : vector<8x128xf32> to vector<8x32xf32>
    %338 = arith.mulf %336, %337 : vector<8x32xf32>
    %cst_53 = arith.constant dense<0.000000e+00> : vector<8xf32>
    %339 = vector.multi_reduction <add>, %338, %cst_53 [1] : vector<8x32xf32> to vector<8xf32>
    %340 = vector.shape_cast %339 : vector<8xf32> to vector<8x1xf32>
    %341 = vector.shape_cast %340 : vector<8x1xf32> to vector<8x1xf32>
    %342 = vector.broadcast %341 : vector<8x1xf32> to vector<8x8xf32>
    %343 = arith.select %28, %342, %331 : vector<8x8xi1>, vector<8x8xf32>
    %344 = vector.extract_strided_slice %8 {offsets = [4, 0], sizes = [1, 32], strides = [1, 1]} : vector<9x32xf32> to vector<1x32xf32>
    %345 = vector.shape_cast %344 : vector<1x32xf32> to vector<32xf32>
    %346 = vector.shape_cast %345 : vector<32xf32> to vector<1x32xf32>
    %347 = vector.broadcast %346 : vector<1x32xf32> to vector<8x32xf32>
    %348 = arith.mulf %288, %347 : vector<8x32xf32>
    %349 = vector.extract_strided_slice %5 {offsets = [0, 64], sizes = [8, 32], strides = [1, 1]} : vector<8x128xf32> to vector<8x32xf32>
    %350 = arith.mulf %348, %349 : vector<8x32xf32>
    %cst_54 = arith.constant dense<0.000000e+00> : vector<8xf32>
    %351 = vector.multi_reduction <add>, %350, %cst_54 [1] : vector<8x32xf32> to vector<8xf32>
    %352 = vector.shape_cast %351 : vector<8xf32> to vector<8x1xf32>
    %353 = vector.shape_cast %352 : vector<8x1xf32> to vector<8x1xf32>
    %354 = vector.broadcast %353 : vector<8x1xf32> to vector<8x8xf32>
    %355 = arith.select %30, %354, %343 : vector<8x8xi1>, vector<8x8xf32>
    %356 = vector.extract_strided_slice %8 {offsets = [5, 0], sizes = [1, 32], strides = [1, 1]} : vector<9x32xf32> to vector<1x32xf32>
    %357 = vector.shape_cast %356 : vector<1x32xf32> to vector<32xf32>
    %358 = vector.shape_cast %357 : vector<32xf32> to vector<1x32xf32>
    %359 = vector.broadcast %358 : vector<1x32xf32> to vector<8x32xf32>
    %360 = arith.mulf %288, %359 : vector<8x32xf32>
    %361 = vector.extract_strided_slice %31 {offsets = [0, 64], sizes = [8, 32], strides = [1, 1]} : vector<8x128xf32> to vector<8x32xf32>
    %362 = arith.mulf %360, %361 : vector<8x32xf32>
    %cst_55 = arith.constant dense<0.000000e+00> : vector<8xf32>
    %363 = vector.multi_reduction <add>, %362, %cst_55 [1] : vector<8x32xf32> to vector<8xf32>
    %364 = vector.shape_cast %363 : vector<8xf32> to vector<8x1xf32>
    %365 = vector.shape_cast %364 : vector<8x1xf32> to vector<8x1xf32>
    %366 = vector.broadcast %365 : vector<8x1xf32> to vector<8x8xf32>
    %367 = arith.select %33, %366, %355 : vector<8x8xi1>, vector<8x8xf32>
    %368 = vector.extract_strided_slice %8 {offsets = [6, 0], sizes = [1, 32], strides = [1, 1]} : vector<9x32xf32> to vector<1x32xf32>
    %369 = vector.shape_cast %368 : vector<1x32xf32> to vector<32xf32>
    %370 = vector.shape_cast %369 : vector<32xf32> to vector<1x32xf32>
    %371 = vector.broadcast %370 : vector<1x32xf32> to vector<8x32xf32>
    %372 = arith.mulf %288, %371 : vector<8x32xf32>
    %373 = vector.extract_strided_slice %34 {offsets = [0, 64], sizes = [8, 32], strides = [1, 1]} : vector<8x128xf32> to vector<8x32xf32>
    %374 = arith.mulf %372, %373 : vector<8x32xf32>
    %cst_56 = arith.constant dense<0.000000e+00> : vector<8xf32>
    %375 = vector.multi_reduction <add>, %374, %cst_56 [1] : vector<8x32xf32> to vector<8xf32>
    %376 = vector.shape_cast %375 : vector<8xf32> to vector<8x1xf32>
    %377 = vector.shape_cast %376 : vector<8x1xf32> to vector<8x1xf32>
    %378 = vector.broadcast %377 : vector<8x1xf32> to vector<8x8xf32>
    %379 = arith.select %36, %378, %367 : vector<8x8xi1>, vector<8x8xf32>
    %380 = vector.extract_strided_slice %8 {offsets = [7, 0], sizes = [1, 32], strides = [1, 1]} : vector<9x32xf32> to vector<1x32xf32>
    %381 = vector.shape_cast %380 : vector<1x32xf32> to vector<32xf32>
    %382 = vector.shape_cast %381 : vector<32xf32> to vector<1x32xf32>
    %383 = vector.broadcast %382 : vector<1x32xf32> to vector<8x32xf32>
    %384 = arith.mulf %288, %383 : vector<8x32xf32>
    %385 = vector.extract_strided_slice %37 {offsets = [0, 64], sizes = [8, 32], strides = [1, 1]} : vector<8x128xf32> to vector<8x32xf32>
    %386 = arith.mulf %384, %385 : vector<8x32xf32>
    %cst_57 = arith.constant dense<0.000000e+00> : vector<8xf32>
    %387 = vector.multi_reduction <add>, %386, %cst_57 [1] : vector<8x32xf32> to vector<8xf32>
    %388 = vector.shape_cast %387 : vector<8xf32> to vector<8x1xf32>
    %389 = vector.shape_cast %388 : vector<8x1xf32> to vector<8x1xf32>
    %390 = vector.broadcast %389 : vector<8x1xf32> to vector<8x8xf32>
    %391 = arith.select %39, %390, %379 : vector<8x8xi1>, vector<8x8xf32>
    %cst_58 = arith.constant -1.000000e+30 : f32
    %392 = vector.shape_cast %12 : vector<1x8xi1> to vector<1x8xi1>
    %393 = vector.broadcast %392 : vector<1x8xi1> to vector<8x8xi1>
    %394 = vector.broadcast %cst_58 : f32 to vector<8x8xf32>
    %395 = arith.select %393, %391, %394 : vector<8x8xi1>, vector<8x8xf32>
    %cst_59 = arith.constant dense<0xFF800000> : vector<8xf32>
    %396 = vector.multi_reduction <maximumf>, %395, %cst_59 [1] : vector<8x8xf32> to vector<8xf32>
    %397 = vector.shape_cast %396 : vector<8xf32> to vector<8x1xf32>
    %398 = vector.broadcast %397 : vector<8x1xf32> to vector<8x8xf32>
    %399 = arith.subf %395, %398 : vector<8x8xf32>
    %400 = math.exp %399 : vector<8x8xf32>
    %cst_60 = arith.constant dense<0.000000e+00> : vector<8xf32>
    %401 = vector.multi_reduction <add>, %400, %cst_60 [1] : vector<8x8xf32> to vector<8xf32>
    %402 = vector.shape_cast %401 : vector<8xf32> to vector<8x1xf32>
    %403 = tpu.reciprocal %402 {approx = true} : vector<8x1xf32> -> vector<8x1xf32>
    %404 = vector.broadcast %403 : vector<8x1xf32> to vector<8x8xf32>
    %405 = arith.mulf %400, %404 : vector<8x8xf32>
    %406 = arith.truncf %405 : vector<8x8xf32> to vector<8x8xbf16>
    %cst_61 = arith.constant dense<0.000000e+00> : vector<8x32xf32>
    %407 = tpu.matmul %406, %290, %cst_61 {dimension_numbers = #tpu.dot_dimension_numbers<[1], [0], [0], [1], [0, 0, 1, 1], [], []>} : vector<8x8xbf16>, vector<8x32xbf16>, vector<8x32xf32> -> vector<8x32xf32>
    %408 = arith.truncf %407 : vector<8x32xf32> to vector<8x32xbf16>
    %c0_62 = arith.constant 0 : index
    %c0_63 = arith.constant 0 : index
    %c64 = arith.constant 64 : index
    %409 = vector.load %arg6[%c0_62, %c0_63, %c64] : memref<1x8x128xbf16, #tpu.memory_space<vmem>>, vector<1x8x32xbf16>
    %410 = vector.shape_cast %409 : vector<1x8x32xbf16> to vector<8x32xbf16>
    %411 = vector.shape_cast %408 : vector<8x32xbf16> to vector<1x8x32xbf16>
    tpu.vector_store %arg6[%c0_62, %c0_63, %c64], %411 {strides = array<i32>} : memref<1x8x128xbf16, #tpu.memory_space<vmem>>, vector<1x8x32xbf16>,
    %412 = vector.extract_strided_slice %2 {offsets = [0, 96], sizes = [8, 32], strides = [1, 1]} : vector<8x128xf32> to vector<8x32xf32>
    %413 = vector.extract_strided_slice %4 {offsets = [0, 96], sizes = [8, 32], strides = [1, 1]} : vector<8x128xbf16> to vector<8x32xbf16>
    %414 = vector.extract_strided_slice %7 {offsets = [0, 96], sizes = [8, 32], strides = [1, 1]} : vector<8x128xbf16> to vector<8x32xbf16>
    %415 = vector.extract_strided_slice %8 {offsets = [0, 0], sizes = [1, 32], strides = [1, 1]} : vector<9x32xf32> to vector<1x32xf32>
    %416 = vector.shape_cast %415 : vector<1x32xf32> to vector<32xf32>
    %417 = vector.shape_cast %416 : vector<32xf32> to vector<1x32xf32>
    %418 = vector.broadcast %417 : vector<1x32xf32> to vector<8x32xf32>
    %419 = arith.mulf %412, %418 : vector<8x32xf32>
    %420 = arith.truncf %419 : vector<8x32xf32> to vector<8x32xbf16>
    %cst_64 = arith.constant dense<0.000000e+00> : vector<8x8xf32>
    %421 = tpu.matmul %420, %413, %cst_64 {dimension_numbers = #tpu.dot_dimension_numbers<[1], [1], [0], [0], [0, 0, 1, 0], [], []>} : vector<8x32xbf16>, vector<8x32xbf16>, vector<8x8xf32> -> vector<8x8xf32>
    %422 = vector.extract_strided_slice %8 {offsets = [8, 0], sizes = [1, 32], strides = [1, 1]} : vector<9x32xf32> to vector<1x32xf32>
    %423 = vector.shape_cast %422 : vector<1x32xf32> to vector<32xf32>
    %424 = vector.shape_cast %423 : vector<32xf32> to vector<1x32xf32>
    %425 = vector.broadcast %424 : vector<1x32xf32> to vector<8x32xf32>
    %426 = arith.mulf %412, %425 : vector<8x32xf32>
    %427 = arith.truncf %426 : vector<8x32xf32> to vector<8x32xbf16>
    %cst_65 = arith.constant dense<0.000000e+00> : vector<8x8xf32>
    %428 = tpu.matmul %427, %413, %cst_65 {dimension_numbers = #tpu.dot_dimension_numbers<[1], [1], [0], [0], [0, 0, 1, 0], [], []>} : vector<8x32xbf16>, vector<8x32xbf16>, vector<8x8xf32> -> vector<8x8xf32>
    %cst_66 = arith.constant 0.000000e+00 : f32
    %429 = vector.broadcast %cst_66 : f32 to vector<8x8xf32>
    %430 = arith.select %17, %421, %429 : vector<8x8xi1>, vector<8x8xf32>
    %431 = arith.select %19, %428, %430 : vector<8x8xi1>, vector<8x8xf32>
    %432 = vector.extract_strided_slice %8 {offsets = [1, 0], sizes = [1, 32], strides = [1, 1]} : vector<9x32xf32> to vector<1x32xf32>
    %433 = vector.shape_cast %432 : vector<1x32xf32> to vector<32xf32>
    %434 = vector.shape_cast %433 : vector<32xf32> to vector<1x32xf32>
    %435 = vector.broadcast %434 : vector<1x32xf32> to vector<8x32xf32>
    %436 = arith.mulf %412, %435 : vector<8x32xf32>
    %437 = vector.extract_strided_slice %20 {offsets = [0, 96], sizes = [8, 32], strides = [1, 1]} : vector<8x128xf32> to vector<8x32xf32>
    %438 = arith.mulf %436, %437 : vector<8x32xf32>
    %cst_67 = arith.constant dense<0.000000e+00> : vector<8xf32>
    %439 = vector.multi_reduction <add>, %438, %cst_67 [1] : vector<8x32xf32> to vector<8xf32>
    %440 = vector.shape_cast %439 : vector<8xf32> to vector<8x1xf32>
    %441 = vector.shape_cast %440 : vector<8x1xf32> to vector<8x1xf32>
    %442 = vector.broadcast %441 : vector<8x1xf32> to vector<8x8xf32>
    %443 = arith.select %22, %442, %431 : vector<8x8xi1>, vector<8x8xf32>
    %444 = vector.extract_strided_slice %8 {offsets = [2, 0], sizes = [1, 32], strides = [1, 1]} : vector<9x32xf32> to vector<1x32xf32>
    %445 = vector.shape_cast %444 : vector<1x32xf32> to vector<32xf32>
    %446 = vector.shape_cast %445 : vector<32xf32> to vector<1x32xf32>
    %447 = vector.broadcast %446 : vector<1x32xf32> to vector<8x32xf32>
    %448 = arith.mulf %412, %447 : vector<8x32xf32>
    %449 = vector.extract_strided_slice %23 {offsets = [0, 96], sizes = [8, 32], strides = [1, 1]} : vector<8x128xf32> to vector<8x32xf32>
    %450 = arith.mulf %448, %449 : vector<8x32xf32>
    %cst_68 = arith.constant dense<0.000000e+00> : vector<8xf32>
    %451 = vector.multi_reduction <add>, %450, %cst_68 [1] : vector<8x32xf32> to vector<8xf32>
    %452 = vector.shape_cast %451 : vector<8xf32> to vector<8x1xf32>
    %453 = vector.shape_cast %452 : vector<8x1xf32> to vector<8x1xf32>
    %454 = vector.broadcast %453 : vector<8x1xf32> to vector<8x8xf32>
    %455 = arith.select %25, %454, %443 : vector<8x8xi1>, vector<8x8xf32>
    %456 = vector.extract_strided_slice %8 {offsets = [3, 0], sizes = [1, 32], strides = [1, 1]} : vector<9x32xf32> to vector<1x32xf32>
    %457 = vector.shape_cast %456 : vector<1x32xf32> to vector<32xf32>
    %458 = vector.shape_cast %457 : vector<32xf32> to vector<1x32xf32>
    %459 = vector.broadcast %458 : vector<1x32xf32> to vector<8x32xf32>
    %460 = arith.mulf %412, %459 : vector<8x32xf32>
    %461 = vector.extract_strided_slice %26 {offsets = [0, 96], sizes = [8, 32], strides = [1, 1]} : vector<8x128xf32> to vector<8x32xf32>
    %462 = arith.mulf %460, %461 : vector<8x32xf32>
    %cst_69 = arith.constant dense<0.000000e+00> : vector<8xf32>
    %463 = vector.multi_reduction <add>, %462, %cst_69 [1] : vector<8x32xf32> to vector<8xf32>
    %464 = vector.shape_cast %463 : vector<8xf32> to vector<8x1xf32>
    %465 = vector.shape_cast %464 : vector<8x1xf32> to vector<8x1xf32>
    %466 = vector.broadcast %465 : vector<8x1xf32> to vector<8x8xf32>
    %467 = arith.select %28, %466, %455 : vector<8x8xi1>, vector<8x8xf32>
    %468 = vector.extract_strided_slice %8 {offsets = [4, 0], sizes = [1, 32], strides = [1, 1]} : vector<9x32xf32> to vector<1x32xf32>
    %469 = vector.shape_cast %468 : vector<1x32xf32> to vector<32xf32>
    %470 = vector.shape_cast %469 : vector<32xf32> to vector<1x32xf32>
    %471 = vector.broadcast %470 : vector<1x32xf32> to vector<8x32xf32>
    %472 = arith.mulf %412, %471 : vector<8x32xf32>
    %473 = vector.extract_strided_slice %5 {offsets = [0, 96], sizes = [8, 32], strides = [1, 1]} : vector<8x128xf32> to vector<8x32xf32>
    %474 = arith.mulf %472, %473 : vector<8x32xf32>
    %cst_70 = arith.constant dense<0.000000e+00> : vector<8xf32>
    %475 = vector.multi_reduction <add>, %474, %cst_70 [1] : vector<8x32xf32> to vector<8xf32>
    %476 = vector.shape_cast %475 : vector<8xf32> to vector<8x1xf32>
    %477 = vector.shape_cast %476 : vector<8x1xf32> to vector<8x1xf32>
    %478 = vector.broadcast %477 : vector<8x1xf32> to vector<8x8xf32>
    %479 = arith.select %30, %478, %467 : vector<8x8xi1>, vector<8x8xf32>
    %480 = vector.extract_strided_slice %8 {offsets = [5, 0], sizes = [1, 32], strides = [1, 1]} : vector<9x32xf32> to vector<1x32xf32>
    %481 = vector.shape_cast %480 : vector<1x32xf32> to vector<32xf32>
    %482 = vector.shape_cast %481 : vector<32xf32> to vector<1x32xf32>
    %483 = vector.broadcast %482 : vector<1x32xf32> to vector<8x32xf32>
    %484 = arith.mulf %412, %483 : vector<8x32xf32>
    %485 = vector.extract_strided_slice %31 {offsets = [0, 96], sizes = [8, 32], strides = [1, 1]} : vector<8x128xf32> to vector<8x32xf32>
    %486 = arith.mulf %484, %485 : vector<8x32xf32>
    %cst_71 = arith.constant dense<0.000000e+00> : vector<8xf32>
    %487 = vector.multi_reduction <add>, %486, %cst_71 [1] : vector<8x32xf32> to vector<8xf32>
    %488 = vector.shape_cast %487 : vector<8xf32> to vector<8x1xf32>
    %489 = vector.shape_cast %488 : vector<8x1xf32> to vector<8x1xf32>
    %490 = vector.broadcast %489 : vector<8x1xf32> to vector<8x8xf32>
    %491 = arith.select %33, %490, %479 : vector<8x8xi1>, vector<8x8xf32>
    %492 = vector.extract_strided_slice %8 {offsets = [6, 0], sizes = [1, 32], strides = [1, 1]} : vector<9x32xf32> to vector<1x32xf32>
    %493 = vector.shape_cast %492 : vector<1x32xf32> to vector<32xf32>
    %494 = vector.shape_cast %493 : vector<32xf32> to vector<1x32xf32>
    %495 = vector.broadcast %494 : vector<1x32xf32> to vector<8x32xf32>
    %496 = arith.mulf %412, %495 : vector<8x32xf32>
    %497 = vector.extract_strided_slice %34 {offsets = [0, 96], sizes = [8, 32], strides = [1, 1]} : vector<8x128xf32> to vector<8x32xf32>
    %498 = arith.mulf %496, %497 : vector<8x32xf32>
    %cst_72 = arith.constant dense<0.000000e+00> : vector<8xf32>
    %499 = vector.multi_reduction <add>, %498, %cst_72 [1] : vector<8x32xf32> to vector<8xf32>
    %500 = vector.shape_cast %499 : vector<8xf32> to vector<8x1xf32>
    %501 = vector.shape_cast %500 : vector<8x1xf32> to vector<8x1xf32>
    %502 = vector.broadcast %501 : vector<8x1xf32> to vector<8x8xf32>
    %503 = arith.select %36, %502, %491 : vector<8x8xi1>, vector<8x8xf32>
    %504 = vector.extract_strided_slice %8 {offsets = [7, 0], sizes = [1, 32], strides = [1, 1]} : vector<9x32xf32> to vector<1x32xf32>
    %505 = vector.shape_cast %504 : vector<1x32xf32> to vector<32xf32>
    %506 = vector.shape_cast %505 : vector<32xf32> to vector<1x32xf32>
    %507 = vector.broadcast %506 : vector<1x32xf32> to vector<8x32xf32>
    %508 = arith.mulf %412, %507 : vector<8x32xf32>
    %509 = vector.extract_strided_slice %37 {offsets = [0, 96], sizes = [8, 32], strides = [1, 1]} : vector<8x128xf32> to vector<8x32xf32>
    %510 = arith.mulf %508, %509 : vector<8x32xf32>
    %cst_73 = arith.constant dense<0.000000e+00> : vector<8xf32>
    %511 = vector.multi_reduction <add>, %510, %cst_73 [1] : vector<8x32xf32> to vector<8xf32>
    %512 = vector.shape_cast %511 : vector<8xf32> to vector<8x1xf32>
    %513 = vector.shape_cast %512 : vector<8x1xf32> to vector<8x1xf32>
    %514 = vector.broadcast %513 : vector<8x1xf32> to vector<8x8xf32>
    %515 = arith.select %39, %514, %503 : vector<8x8xi1>, vector<8x8xf32>
    %cst_74 = arith.constant -1.000000e+30 : f32
    %516 = vector.shape_cast %12 : vector<1x8xi1> to vector<1x8xi1>
    %517 = vector.broadcast %516 : vector<1x8xi1> to vector<8x8xi1>
    %518 = vector.broadcast %cst_74 : f32 to vector<8x8xf32>
    %519 = arith.select %517, %515, %518 : vector<8x8xi1>, vector<8x8xf32>
    %cst_75 = arith.constant dense<0xFF800000> : vector<8xf32>
    %520 = vector.multi_reduction <maximumf>, %519, %cst_75 [1] : vector<8x8xf32> to vector<8xf32>
    %521 = vector.shape_cast %520 : vector<8xf32> to vector<8x1xf32>
    %522 = vector.broadcast %521 : vector<8x1xf32> to vector<8x8xf32>
    %523 = arith.subf %519, %522 : vector<8x8xf32>
    %524 = math.exp %523 : vector<8x8xf32>
    %cst_76 = arith.constant dense<0.000000e+00> : vector<8xf32>
    %525 = vector.multi_reduction <add>, %524, %cst_76 [1] : vector<8x8xf32> to vector<8xf32>
    %526 = vector.shape_cast %525 : vector<8xf32> to vector<8x1xf32>
    %527 = tpu.reciprocal %526 {approx = true} : vector<8x1xf32> -> vector<8x1xf32>
    %528 = vector.broadcast %527 : vector<8x1xf32> to vector<8x8xf32>
    %529 = arith.mulf %524, %528 : vector<8x8xf32>
    %530 = arith.truncf %529 : vector<8x8xf32> to vector<8x8xbf16>
    %cst_77 = arith.constant dense<0.000000e+00> : vector<8x32xf32>
    %531 = tpu.matmul %530, %414, %cst_77 {dimension_numbers = #tpu.dot_dimension_numbers<[1], [0], [0], [1], [0, 0, 1, 1], [], []>} : vector<8x8xbf16>, vector<8x32xbf16>, vector<8x32xf32> -> vector<8x32xf32>
    %532 = arith.truncf %531 : vector<8x32xf32> to vector<8x32xbf16>
    %c0_78 = arith.constant 0 : index
    %c0_79 = arith.constant 0 : index
    %c96 = arith.constant 96 : index
    %533 = vector.load %arg6[%c0_78, %c0_79, %c96] : memref<1x8x128xbf16, #tpu.memory_space<vmem>>, vector<1x8x32xbf16>
    %534 = vector.shape_cast %533 : vector<1x8x32xbf16> to vector<8x32xbf16>
    %535 = vector.shape_cast %532 : vector<8x32xbf16> to vector<1x8x32xbf16>
    tpu.vector_store %arg6[%c0_78, %c0_79, %c96], %535 {strides = array<i32>} : memref<1x8x128xbf16, #tpu.memory_space<vmem>>, vector<1x8x32xbf16>,
    return
  }
  func.func @transform_0(%arg0: i32) -> (i32, i32, i32) {
    %c0_i32 = arith.constant 0 : i32
    %c0_i32_0 = arith.constant 0 : i32
    %c0_i32_1 = arith.constant 0 : i32
    return %arg0, %c0_i32, %c0_i32_0 : i32, i32, i32
  }
  func.func @transform_1(%arg0: i32) -> (i32, i32, i32) {
    %c0_i32 = arith.constant 0 : i32
    %c0_i32_0 = arith.constant 0 : i32
    %c0_i32_1 = arith.constant 0 : i32
    return %arg0, %c0_i32, %c0_i32_0 : i32, i32, i32
  }
  func.func @transform_2(%arg0: i32) -> (i32, i32, i32) {
    %c0_i32 = arith.constant 0 : i32
    %c1_i32 = arith.constant 1 : i32
    %c0_i32_0 = arith.constant 0 : i32
    return %arg0, %c0_i32, %c1_i32 : i32, i32, i32
  }
  func.func @transform_3(%arg0: i32) -> (i32, i32) {
    %c0_i32 = arith.constant 0 : i32
    %c0_i32_0 = arith.constant 0 : i32
    %c0_i32_1 = arith.constant 0 : i32
    return %c0_i32, %c0_i32_0 : i32, i32
  }
  func.func @transform_4(%arg0: i32) -> (i32, i32, i32) {
    %c0_i32 = arith.constant 0 : i32
    %c0_i32_0 = arith.constant 0 : i32
    %c0_i32_1 = arith.constant 0 : i32
    return %arg0, %c0_i32, %c0_i32_0 : i32, i32, i32
  }
  func.func @transform_5(%arg0: i32) -> (i32, i32, i32) {
    %c0_i32 = arith.constant 0 : i32
    %c0_i32_0 = arith.constant 0 : i32
    %c0_i32_1 = arith.constant 0 : i32
    return %arg0, %c0_i32, %c0_i32_0 : i32, i32, i32
  }
}

</mosaic_0001>

<bundles_post_ra>
// kernel: forward_train.42
= control target key start
LH: loop header
LB: loop body
LE: loop exit
PB: predicated region body
PF: predicated region fallthrough
CT: control target
= control target key end

     0   :  { %s145_s0 = inlined_call_operand.vmem [shape: bf16[16,128], index: 0, kind: input, shape index: {}]   ;;  %s146_s1 = inlined_call_operand.vmem [shape: bf16[16,128], index: 1, kind: input, shape index: {}]   ;;  %s147_s2 = inlined_call_operand.vmem [shape: f32[1,128], index: 2, kind: input, shape index: {}]   ;;  %s148_s3 = inlined_call_operand.vmem [shape: f32[1,128], index: 3, kind: input, shape index: {}]   ;;  %s149_s4 = inlined_call_operand.vmem [shape: bf16[16,128], index: 4, kind: output, shape index: {}]  }
   0x1   :  { %v89_v0 = vld [vmem:[%s145_s0] sm:$0xff]  }
   0x2   :  { %v93_v1 = vld [vmem:[%s146_s1] sm:$0xff]   ;;  %v90_v2 = vunpack.c.l.bf16 %v89_v0  ;;  %v91_v4 = vunpack.c.h.bf16 %v89_v0 }
   0x3   :  { %v94_v3 = vunpack.c.l.bf16 %v93_v1  ;;  %v95_v5 = vunpack.c.h.bf16 %v93_v1  ;;  %v82_v24 = vld [vmem:[%s147_s2] ss:$0 sm:$0xff] }
   0x4   :  { %v83_v28 = vld [vmem:[%s148_s3] ss:$0 sm:$0xff] }
   0x5   :  { %v25_v6 = vadd.f32 %v94_v3, %v90_v2  ;;  %v26_v7 = vadd.f32 %v95_v5, %v91_v4 }
   0x7   :  { %27 = vadd.xlane.f32.xlu0 %v25_v6 }
   0xb   :  { %29 = vadd.xlane.f32.xlu0 %v26_v7 }
  0x94   :  { %v28_v8 = vpop.xlane.xlu0 %27 }
  0x95   :  { %v32_v9 = vmul.f32 0.0078125, %v28_v8 }
  0x97   :  { %v34_v10 = vsub.f32 %v25_v6, %v32_v9 }
  0x98   :  { %v30_v11 = vpop.xlane.xlu0 %29 }
  0x99   :  { %v33_v12 = vmul.f32 0.0078125, %v30_v11  ;;  %v36_v13 = vmul.f32 %v34_v10, %v34_v10 }
  0x9b   :  { %v35_v14 = vsub.f32 %v26_v7, %v33_v12  ;;  %38 = vadd.xlane.f32.xlu1 %v36_v13 }
  0x9d   :  { %v37_v15 = vmul.f32 %v35_v14, %v35_v14 }
  0x9f   :  { %40 = vadd.xlane.f32.xlu1 %v37_v15 }
 0x128   :  { %v39_v16 = vpop.xlane.xlu1 %38 }
 0x129   :  { %v42_v17 = vmul.f32 0.0078125, %v39_v16 }
 0x12b   :  { %v44_v18 = vadd.f32 1e-05, %v42_v17 }
 0x12c   :  { %v41_v19 = vpop.xlane.xlu1 %40 }
 0x12d   :  { %101 = vrsqrt.f32 %v44_v18  ;;  %v43_v20 = vmul.f32 0.0078125, %v41_v19 }
 0x12f   :  { %v45_v21 = vadd.f32 1e-05, %v43_v20 }
 0x131   :  { %103 = vrsqrt.f32 %v45_v21 }
 0x137   :  { %v102_v22 = vpop.eup %101 }
 0x138   :  { %v48_v23 = vmul.f32 %v102_v22, %v34_v10 }
 0x13a   :  { %v57_v26 = vmul.f32 %v82_v24, %v48_v23 }
 0x13b   :  { %v104_v25 = vpop.eup %103 }
 0x13c   :  { %v49_v27 = vmul.f32 %v104_v25, %v35_v14  ;;  %v66_v30 = vadd.f32 %v83_v28, %v57_v26 }
 0x13e   :  { %v58_v29 = vmul.f32 %v82_v24, %v49_v27 }
 0x140   :  { %v67_v31 = vadd.f32 %v83_v28, %v58_v29 }
 0x142   :  { %v99_v32 = vpack.c.bf16 %v67_v31, %v66_v30 }
 0x144   :  { %100 = vst [vmem:[%s149_s4] sm:$0xff] %v99_v32  }

// kernel: forward_train.41
= control target key start
LH: loop header
LB: loop body
LE: loop exit
PB: predicated region body
PF: predicated region fallthrough
CT: control target
= control target key end

     0   :  { %v227_v0 = vmov 0.0   ;;  %vm228_vm0 = vmmov 0   ;;  %s282_s1 = inlined_call_operand.vmem [shape: bf16[128,128], index: 1, kind: input, shape index: {}]   ;;  %s283_s0 = inlined_call_operand.vmem [shape: bf16[16,128], index: 0, kind: input, shape index: {}]   ;;  %s284_s2 = inlined_call_operand.vmem [shape: f32[1,128], index: 2, kind: input, shape index: {}]   ;;  %s285_s3 = inlined_call_operand.vmem [shape: bf16[16,128], index: 3, kind: output, shape index: {}]  }
   0x1   :  { %196 = vmatprep.subr.bf16.mxu0 %v227_v0  ;;  %v218_v1 = vld [vmem:[%s282_s1] sm:$0xff]   ;;  %212 = vmatprep.mubr.msk.bf16.mxu0 %vm228_vm0, %v227_v0  ;;  %v219_v2 = vld [vmem:[%s282_s1 + $0x8] sm:$0xff]   ;;  %v220_v3 = vld [vmem:[%s282_s1 + $0x10] sm:$0xff]  }
   0x2   :  { %197 = vmatpush3.bf16.msra.mxu0 %v218_v1  ;;  %v221_v4 = vld [vmem:[%s282_s1 + $0x18] sm:$0xff]   ;;  %v222_v5 = vld [vmem:[%s282_s1 + $0x20] sm:$0xff]   ;;  %v223_v6 = vld [vmem:[%s282_s1 + $0x28] sm:$0xff]  }
   0x3   :  { %198 = vmatprep.subr.bf16.mxu0 %v227_v0  ;;  %v224_v7 = vld [vmem:[%s282_s1 + $0x30] sm:$0xff]   ;;  %v225_v8 = vld [vmem:[%s282_s1 + $0x38] sm:$0xff]   ;;  %v226_v9 = vld [vmem:[%s283_s0] sm:$0xff]  }
   0x4   :  { %v177_v11 = vld [vmem:[%s284_s2] ss:$0 sm:$0xff] }
   0x6   :  { %199 = vmatpush3.bf16.msra.mxu0 %v219_v2 }
   0x7   :  { %200 = vmatprep.subr.bf16.mxu0 %v227_v0 }
   0xa   :  { %201 = vmatpush3.bf16.msra.mxu0 %v220_v3 }
   0xb   :  { %202 = vmatprep.subr.bf16.mxu0 %v227_v0 }
   0xe   :  { %203 = vmatpush3.bf16.msra.mxu0 %v221_v4 }
   0xf   :  { %204 = vmatprep.subr.bf16.mxu0 %v227_v0 }
  0x12   :  { %205 = vmatpush3.bf16.msra.mxu0 %v222_v5 }
  0x13   :  { %206 = vmatprep.subr.bf16.mxu0 %v227_v0 }
  0x16   :  { %207 = vmatpush3.bf16.msra.mxu0 %v223_v6 }
  0x17   :  { %208 = vmatprep.subr.bf16.mxu0 %v227_v0 }
  0x1a   :  { %209 = vmatpush3.bf16.msra.mxu0 %v224_v7 }
  0x1b   :  { %210 = vmatprep.subr.bf16.mxu0 %v227_v0 }
  0x1e   :  { %211 = vmatpush3.bf16.msra.mxu0 %v225_v8 }
  0x21   :  { %213 = vmatmul.mubr.bf16.vlgmr.msra.gmra.mrb[0].mxu0 %v226_v9 }
  0xf4   :  { %v129_v10 = vpop.f32.mrb[0].mxu0 }
  0xf5   :  { %v214_v12 = vpop.f32.mrb[1].mxu0  ;;  %v152_v14 = vadd.f32 %v177_v11, %v129_v10 }
  0xf6   :  { %v132_v13 = vpop.f32.mrb[2].mxu0 }
  0xf7   :  { %v153_v15 = vadd.f32 %v177_v11, %v132_v13  ;;  %v215_v16 = vpop.f32.mrb[3].mxu0 }
  0xf9   :  { %v185_v17 = vpack.c.bf16 %v153_v15, %v152_v14 }
  0xfb   :  { %186 = vst [vmem:[%s285_s3] sm:$0xff] %v185_v17  }

// kernel: forward_train.39
= control target key start
LH: loop header
LB: loop body
LE: loop exit
PB: predicated region body
PF: predicated region fallthrough
CT: control target
= control target key end

     0   :  { %v453_v0 = vmov 0.0   ;;  %vm454_vm0 = vmmov 0   ;;  %v455_v3 = vmov 0   ;;  %v306_v27 = vlaneseq  ;;  %s566_s1 = inlined_call_operand.vmem [shape: bf16[128,384], index: 1, kind: input, shape index: {}]   ;;  %s567_s0 = inlined_call_operand.vmem [shape: bf16[16,128], index: 0, kind: input, shape index: {}]   ;;  %s568_s2 = inlined_call_operand.vmem [shape: f32[1,384], index: 2, kind: input, shape index: {}]   ;;  %s569_s3 = inlined_call_operand.vmem [shape: bf16[16,384], index: 3, kind: output, shape index: {}]  }
   0x1   :  { %397 = vmatprep.subr.bf16.mxu1 %v453_v0  ;;  %v420_v1 = vld [vmem:[%s566_s1 + $0x4] ss:$12 sps:$4 sm:$0xff]   ;;  %413 = vmatprep.mubr.msk.bf16.mxu1 %vm454_vm0, %v453_v0  ;;  %v422_v2 = vld [vmem:[%s566_s1 + $0x8] ss:$12 sps:$4 sm:$0xff]   ;;  %v423_v4 = vld [vmem:[%s566_s1] ss:$12 sps:$4 sm:$0xff]  }
   0x2   :  { %231 = vmatprep.mubr.bf16.mxu0 %v455_v3  ;;  %199 = vmatprep.subr.bf16.mxu0 %v420_v1  ;;  %v424_v5 = vld [vmem:[%s566_s1 + $0x1c] ss:$12 sps:$4 sm:$0xff]   ;;  %v426_v6 = vld [vmem:[%s566_s1 + $0x20] ss:$12 sps:$4 sm:$0xff]   ;;  %v427_v7 = vld [vmem:[%s566_s1 + $0x18] ss:$12 sps:$4 sm:$0xff]  }
   0x3   :  { %398 = vmatpush3.bf16.msra.mxu1 %v422_v2  ;;  %200 = vmatpush1.bf16.msra.mxu0 %v423_v4  ;;  %v428_v8 = vld [vmem:[%s566_s1 + $0x34] ss:$12 sps:$4 sm:$0xff]   ;;  %v430_v9 = vld [vmem:[%s566_s1 + $0x38] ss:$12 sps:$4 sm:$0xff]   ;;  %v431_v10 = vld [vmem:[%s566_s1 + $0x30] ss:$12 sps:$4 sm:$0xff]  }
   0x4   :  { %399 = vmatprep.subr.bf16.mxu1 %v453_v0  ;;  %201 = vmatprep.subr.bf16.mxu0 %v424_v5  ;;  %v432_v11 = vld [vmem:[%s566_s1 + $0x4c] ss:$12 sps:$4 sm:$0xff]   ;;  %v434_v12 = vld [vmem:[%s566_s1 + $0x50] ss:$12 sps:$4 sm:$0xff]   ;;  %v435_v13 = vld [vmem:[%s566_s1 + $0x48] ss:$12 sps:$4 sm:$0xff]  }
   0x5   :  { %v436_v14 = vld [vmem:[%s566_s1 + $0x64] ss:$12 sps:$4 sm:$0xff]   ;;  %v438_v15 = vld [vmem:[%s566_s1 + $0x68] ss:$12 sps:$4 sm:$0xff]   ;;  %v439_v16 = vld [vmem:[%s566_s1 + $0x60] ss:$12 sps:$4 sm:$0xff]  }
   0x6   :  { %v440_v17 = vld [vmem:[%s566_s1 + $0x7c] ss:$12 sps:$4 sm:$0xff]   ;;  %v442_v18 = vld [vmem:[%s566_s1 + $0x80] ss:$12 sps:$4 sm:$0xff]   ;;  %v443_v19 = vld [vmem:[%s566_s1 + $0x78] ss:$12 sps:$4 sm:$0xff]  }
   0x7   :  { %400 = vmatpush3.bf16.msra.mxu1 %v426_v6  ;;  %202 = vmatpush1.bf16.msra.mxu0 %v427_v7  ;;  %v444_v20 = vld [vmem:[%s566_s1 + $0x94] ss:$12 sps:$4 sm:$0xff]   ;;  %v446_v21 = vld [vmem:[%s566_s1 + $0x98] ss:$12 sps:$4 sm:$0xff]   ;;  %v447_v22 = vld [vmem:[%s566_s1 + $0x90] ss:$12 sps:$4 sm:$0xff]  }
   0x8   :  { %401 = vmatprep.subr.bf16.mxu1 %v453_v0  ;;  %203 = vmatprep.subr.bf16.mxu0 %v428_v8  ;;  %v448_v23 = vld [vmem:[%s566_s1 + $0xac] ss:$12 sps:$4 sm:$0xff]   ;;  %v450_v24 = vld [vmem:[%s566_s1 + $0xb0] ss:$12 sps:$4 sm:$0xff]   ;;  %v451_v25 = vld [vmem:[%s566_s1 + $0xa8] ss:$12 sps:$4 sm:$0xff]  }
   0x9   :  { %v452_v26 = vld [vmem:[%s567_s0] sm:$0xff]   ;;  %v307_v28 = vshrl.u32 %v306_v27, 7 }
   0xa   :  { %v304_v30 = vld [vmem:[%s568_s2] sm:$0x7] }
   0xb   :  { %402 = vmatpush3.bf16.msra.mxu1 %v430_v9  ;;  %204 = vmatpush1.bf16.msra.mxu0 %v431_v10  ;;  %v316_v29 = vsub.s32 2, %v307_v28  ;;  %v308_v31 = vsub.s32 0, %v307_v28  ;;  %v312_v32 = vsub.s32 1, %v307_v28 }
   0xc   :  { %403 = vmatprep.subr.bf16.mxu1 %v453_v0  ;;  %205 = vmatprep.subr.bf16.mxu0 %v432_v11 }
   0xd   :  { %v317_v33 = vrot.slane %v304_v30, %v316_v29  ;;  %v309_v34 = vrot.slane %v304_v30, %v308_v31  ;;  %v313_v35 = vrot.slane %v304_v30, %v312_v32 }
   0xf   :  { %404 = vmatpush3.bf16.msra.mxu1 %v434_v12  ;;  %206 = vmatpush1.bf16.msra.mxu0 %v435_v13 }
  0x10   :  { %405 = vmatprep.subr.bf16.mxu1 %v453_v0  ;;  %207 = vmatprep.subr.bf16.mxu0 %v436_v14 }
  0x13   :  { %406 = vmatpush3.bf16.msra.mxu1 %v438_v15  ;;  %208 = vmatpush1.bf16.msra.mxu0 %v439_v16 }
  0x14   :  { %407 = vmatprep.subr.bf16.mxu1 %v453_v0  ;;  %209 = vmatprep.subr.bf16.mxu0 %v440_v17 }
  0x17   :  { %408 = vmatpush3.bf16.msra.mxu1 %v442_v18  ;;  %210 = vmatpush1.bf16.msra.mxu0 %v443_v19 }
  0x18   :  { %409 = vmatprep.subr.bf16.mxu1 %v453_v0  ;;  %211 = vmatprep.subr.bf16.mxu0 %v444_v20 }
  0x1b   :  { %410 = vmatpush3.bf16.msra.mxu1 %v446_v21  ;;  %212 = vmatpush1.bf16.msra.mxu0 %v447_v22 }
  0x1c   :  { %411 = vmatprep.subr.bf16.mxu1 %v453_v0  ;;  %213 = vmatprep.subr.bf16.mxu0 %v448_v23 }
  0x1f   :  { %412 = vmatpush3.bf16.msra.mxu1 %v450_v24  ;;  %214 = vmatpush1.bf16.msra.mxu0 %v451_v25 }
  0x22   :  { %414 = vmatmul.mubr.bf16.vlgmr.msra.gmra.mrb[0].mxu1 %v452_v26  ;;  %232 = vmatmul.mubr.bf16.vlgmr.msra.gmra.mrb[0].mxu0 %v452_v26 }
  0xf5   :  { %v276_v36 = vpop.f32.mrb[0].mxu1  ;;  %v233_v38 = vpop.f32.mrb[0].mxu0 }
  0xf6   :  { %v323_v37 = vadd.f32 %v317_v33, %v276_v36  ;;  %v415_v39 = vpop.f32.mrb[1].mxu1  ;;  %v321_v40 = vadd.f32 %v309_v34, %v233_v38  ;;  %v235_v41 = vpop.f32.mrb[1].mxu0 }
  0xf7   :  { %v279_v42 = vpop.f32.mrb[2].mxu1  ;;  %v322_v44 = vadd.f32 %v313_v35, %v235_v41  ;;  %v237_v46 = vpop.f32.mrb[2].mxu0 }
  0xf8   :  { %v385_v43 = vpack.c.bf16 %v323_v37, %v323_v37  ;;  %v326_v45 = vadd.f32 %v317_v33, %v279_v42  ;;  %v416_v47 = vpop.f32.mrb[3].mxu1  ;;  %v324_v48 = vadd.f32 %v309_v34, %v237_v46  ;;  %v239_v49 = vpop.f32.mrb[3].mxu0 }
  0xf9   :  { %v384_v50 = vpack.c.bf16 %v322_v44, %v321_v40  ;;  %v325_v52 = vadd.f32 %v313_v35, %v239_v49 }
  0xfa   :  { %348 = vst [vmem:[%s569_s3 + $0x8] sm:$0xf] %v385_v43  ;;  %v387_v51 = vpack.c.bf16 %v326_v45, %v326_v45 }
  0xfb   :  { %347 = vst [vmem:[%s569_s3] sm:$0xff] %v384_v50  ;;  %v386_v53 = vpack.c.bf16 %v325_v52, %v324_v48 }
  0xfc   :  { %350 = vst [vmem:[%s569_s3 + $0x14] sm:$0xf] %v387_v51 }
  0xfd   :  { %349 = vst [vmem:[%s569_s3 + $0xc] sm:$0xff] %v386_v53 }

// kernel: forward_train.40
= control target key start
LH: loop header
LB: loop body
LE: loop exit
PB: predicated region body
PF: predicated region fallthrough
CT: control target
= control target key end

     0   :  { %s1691_s18 = smov 0   ;;  %s2174_s0 = inlined_call_operand.vmem [shape: bf16[2,8,384], index: 0, kind: input, shape index: {}, may-alias: {0,1,2}]   ;;  %s2175_s1 = inlined_call_operand.vmem [shape: bf16[2,8,384], index: 1, kind: input, shape index: {}, may-alias: {0,1,2}]   ;;  %s2176_s2 = inlined_call_operand.vmem [shape: bf16[2,8,384], index: 2, kind: input, shape index: {}, may-alias: {0,1,2}]   ;;  %s2177_s3 = inlined_call_operand.vmem [shape: f32[9,32], index: 3, kind: input, shape index: {}]   ;;  %s2178_s4 = inlined_call_operand.vmem [shape: s8[2,1,8], index: 4, kind: input, shape index: {}]   ;;  %s2179_s5 = inlined_call_operand.vmem [shape: bf16[2,8,128], index: 5, kind: output, shape index: {}]  }
   0x1 LB: > { %s1485_s19 = sadd.s32 4294967295, %s1653_s18   ;;  %p1489_p0 = scmp.ge.s32.totalorder %s1653_s18, 1  ;;  %s1653_s18 = sphi %s1691_s18, %s15_s18  }
   0x2   : > { %p217_p1 = scmp.lt.s32.totalorder %s1653_s18, 3 }
   0x4   : > { %p218_p2 = pnand %p1489_p0, %p217_p1 }
   0x5   : > { %p259_p3 = scmp.lt.s32.totalorder (!%p218_p2), %s1485_s19, 1  ;;  %v295_v0 = vlaneseq (!%p218_p2)  ;;  %v1655_v1 = vmov (!%p218_p2), 0.0   ;;  %vm1656_vm0 = vmmov (!%p218_p2), 0   ;;  %vm321_vm1 = vcmask (!%p218_p2), 261120   ;;  %v291_v3 = vld [vmem:[%s2177_s3] sm:$0xff] (!%p218_p2)  ;;  %s1657_s6 = smov (!%p218_p2), 32  }
   0x6   : > { %221 = sbr.rel (%p218_p2) target bundleno = 2610 (0xa32), region = 40  ;;  %1543 = vmatprep.subr.bf16.mxu0 (!%p218_p2), %v1655_v1  ;;  %1549 = vmatprep.subr.bf16.mxu1 (!%p218_p2), %v1655_v1  ;;  %v1743_v16 = vld [vmem:[%s2177_s3 + $0x8] ss:$0 sm:$0xff] (!%p218_p2)  ;;  %v1658_v61 = vmov (!%p218_p2), 0   ;;  %vm499_vm14 = vcmask (!%p218_p2), 64512   ;;  %s1659_s10 = smov (!%p218_p2), 96  }
   0x7   : > { %1545 = vmatprep.mubr.msk.bf16.mxu0 (!%p218_p2), %vm1656_vm0, %v1655_v1  ;;  %1551 = vmatprep.mubr.msk.bf16.mxu1 (!%p218_p2), %vm1656_vm0, %v1655_v1  ;;  %v1708_v2 = vshrl.u32 (!%p218_p2), %v295_v0, 7  ;;  %v298_v57 = vand.u32 (!%p218_p2), 127, %v295_v0  ;;  %vm515_vm15 = vcmask (!%p218_p2), 1043456   ;;  %s1660_s14 = smov (!%p218_p2), 64  }
   0x9   : > { %v317_v4 = vsub.s32 (!%p218_p2), 0, %v1708_v2  ;;  %v421_v5 = vsub.s32 (!%p218_p2), 1, %v1708_v2  ;;  %v441_v6 = vsub.s32 (!%p218_p2), 3, %v1708_v2  ;;  %v431_v7 = vsub.s32 (!%p218_p2), 2, %v1708_v2 }
   0xa   : > { %v451_v8 = vsub.s32 (!%p218_p2), 4, %v1708_v2  ;;  %v461_v9 = vsub.s32 (!%p218_p2), 5, %v1708_v2  ;;  %v471_v10 = vsub.s32 (!%p218_p2), 6, %v1708_v2  ;;  %v481_v11 = vsub.s32 (!%p218_p2), 7, %v1708_v2 }
   0xb   : > { %v1734_v12 = vrot.slane (!%p218_p2), %v291_v3, %v317_v4  ;;  %v1736_v13 = vrot.slane (!%p218_p2), %v291_v3, %v421_v5  ;;  %v1745_v17 = vrot.slane (!%p218_p2), %v291_v3, %v441_v6  ;;  %v1747_v18 = vrot.slane (!%p218_p2), %v291_v3, %v431_v7 }
   0xc   : > { %v1756_v22 = vrot.slane (!%p218_p2), %v291_v3, %v451_v8  ;;  %v1758_v23 = vrot.slane (!%p218_p2), %v291_v3, %v461_v9  ;;  %v1760_v24 = vrot.slane (!%p218_p2), %v291_v3, %v471_v10  ;;  %v1762_v25 = vrot.slane (!%p218_p2), %v291_v3, %v481_v11 }
   0xd   : > { %s2181_s19 = smov (!%p259_p3, %s1485_s19), 1  ;;  %v1824_v58 = vsub.s32 %v1708_v2, %v298_v57 }
   0xe   : > { %s1714_s22 = smul.u32 12, %s2181_s19  ;;  %s278_s9 = scalar_lea.vmem %s2178_s4, %s2181_s19 }
   0xf   : > { %v293_v59 = vld [vmem:[%s278_s9] sm:$0x1]  ;;  %vm300_vm4 = vcmp.le.s32.totalorder %v1824_v58, 4294967292  ;;  %vm301_vm5 = vcmp.ge.s32.totalorder %v1824_v58, 4  ;;  %vm303_vm6 = vcmp.eq.s32.totalorder %v1824_v58, 4294967293  ;;  %vm305_vm7 = vcmp.eq.s32.totalorder %v1824_v58, 4294967294 }
  0x10   : > { %s263_s25 = scalar_lea.vmem %s2174_s0, %s1714_s22  ;;  %s1434_s28 = scalar_lea.vmem %s2175_s1, %s1714_s22  ;;  %vm294_vm2 = vnez %v293_v59  ;;  %vm307_vm8 = vcmp.eq.s32.totalorder %v1824_v58, 4294967295  ;;  %vm308_vm9 = vcmp.eq.s32.totalorder %v1824_v58, 0  ;;  %vm310_vm10 = vcmp.eq.s32.totalorder %v1824_v58, 1 }
  0x11   : > { %v286_v14 = vld [vmem:[%s263_s25] sm:$0xf]  ;;  %v1738_v15 = vld [vmem:[%s1434_s28 + $0x4] sm:$0xf]  ;;  %v489_v62 = vsel %vm294_vm2, 16843009, %v1658_v61  ;;  %s1438_s13 = scalar_lea.vmem %s2176_s2, %s1714_s22 }
  0x12   : > { %v1749_v19 = vunpack.c.l.bf16 %v286_v14  ;;  %v1752_v20 = vunpack.c.l.bf16 %v1738_v15  ;;  %v326_v21 = vsel %vm321_vm1, %v1738_v15, 0  ;;  %v490_v5 = vunpack.c.0.s8 %v489_v62  ;;  %s1493_s15 = sshll.u32 %s2181_s19, 2 }
  0x13   : > { %1544 = vmatpush3.bf16.xpose.msra.mxu0 %v326_v21  ;;  %1550 = vmatpush3.bf16.xpose.msra.mxu1 %v326_v21  ;;  %vm312_vm11 = vcmp.eq.s32.totalorder %v1824_v58, 2  ;;  %vm314_vm12 = vcmp.eq.s32.totalorder %v1824_v58, 3  ;;  %s1953_s20 = scalar_lea.vmem %s2179_s5, %s1493_s15  ;;  %vm560_vm2 = vcmask 257024  }
  0x14   : > { %v319_v26 = vmul.f32 %v1734_v12, %v1749_v19  ;;  %v372_v27 = vmul.f32 %v1743_v16, %v1749_v19  ;;  %v1769_v28 = vrot.slane %v1752_v20, 3  ;;  %v423_v29 = vmul.f32 %v1736_v13, %v1749_v19  ;;  %1561 = vmatprep.subr.bf16.mxu1 %v1655_v1  ;;  %1555 = vmatprep.subr.bf16.mxu0 %v1655_v1 }
  0x15   : > { %v1776_v30 = vrot.slane %v1752_v20, 1  ;;  %v443_v31 = vmul.f32 %v1745_v17, %v1749_v19  ;;  %v1781_v32 = vrot.slane %v1752_v20, 2  ;;  %v433_v33 = vmul.f32 %v1747_v18, %v1749_v19 }
  0x16   : > { %v320_v34 = vpack.c.bf16 %v319_v26, %v319_v26  ;;  %v373_v35 = vpack.c.bf16 %v372_v27, %v372_v27  ;;  %v424_v36 = vmul.f32 %v423_v29, %v1769_v28  ;;  %v453_v37 = vmul.f32 %v1756_v22, %v1749_v19 }
  0x17   : > { %v444_v38 = vmul.f32 %v443_v31, %v1776_v30  ;;  %v434_v39 = vmul.f32 %v433_v33, %v1781_v32  ;;  %v1791_v40 = vrot.slane %v1752_v20, 7  ;;  %v463_v41 = vmul.f32 %v1758_v23, %v1749_v19 }
  0x18   : > { %v425_v42 = vsel %vm321_vm1, %v424_v36, 0.0  ;;  %v454_v43 = vmul.f32 %v453_v37, %v1752_v20  ;;  %v1798_v44 = vrot.slane %v1752_v20, 6  ;;  %v473_v45 = vmul.f32 %v1760_v24, %v1749_v19 }
  0x19   : > { %426 = vadd.xlane.f32.xlu0 %v425_v42  ;;  %v445_v46 = vsel %vm321_vm1, %v444_v38, 0.0  ;;  %v435_v47 = vsel %vm321_vm1, %v434_v39, 0.0  ;;  %v464_v48 = vmul.f32 %v463_v41, %v1791_v40  ;;  %v1808_v49 = vrot.slane %v1752_v20, 5 }
  0x1a   : > { %1546 = vmatmul.mubr.msk.bf16.vlgmr.msra.gmra.mrb[0].mxu0 %vm321_vm1, %v320_v34  ;;  %1552 = vmatmul.mubr.msk.bf16.vlgmr.msra.gmra.mrb[0].mxu1 %vm321_vm1, %v373_v35  ;;  %v483_v50 = vmul.f32 %v1762_v25, %v1749_v19  ;;  %v455_v51 = vsel %vm321_vm1, %v454_v43, 0.0  ;;  %v474_v52 = vmul.f32 %v473_v45, %v1798_v44  ;;  %vm491_vm3 = vcmp.ne.s32.totalorder %v490_v5, 0 }
  0x1b   : > { %446 = vadd.xlane.f32.xlu1 %v445_v46  ;;  %1563 = vmatprep.mubr.msk.bf16.mxu1 %vm1656_vm0, %v1655_v1  ;;  %v465_v53 = vsel %vm321_vm1, %v464_v48, 0.0  ;;  %v492_v9 = vsel %vm491_vm3, 1, %v1658_v61  ;;  %v1906_v61 = vld [vmem:[%s1438_s13 + $0x8] sm:$0xf]  ;;  %vm1385_vm3 = vcmask 1044224  }
  0x1c   : > { %1557 = vmatprep.mubr.msk.bf16.mxu0 %vm1656_vm0, %v1655_v1  ;;  %v484_v54 = vmul.f32 %v483_v50, %v1808_v49  ;;  %v475_v55 = vsel %vm321_vm1, %v474_v52, 0.0  ;;  %v1846_v34 = vrot.slane %v492_v9, %v317_v4  ;;  %v517_v62 = vsel %vm515_vm15, %v1906_v61, 0 }
  0x1d   : > { %436 = vadd.xlane.f32.xlu0 %v435_v47  ;;  %v1870_v47 = vcombine.low %v1738_v15, %v1738_v15  ;;  %1556 = vmatpush3.bf16.msra.mxu0 %v517_v62 }
  0x1e   : > { %v485_v56 = vsel %vm321_vm1, %v484_v54, 0.0  ;;  %vm497_vm13 = vcmp.eq.s32.totalorder %v1846_v34, 1  ;;  %1567 = vmatprep.subr.bf16.mxu0 %v1655_v1 }
  0x1f   : > { %456 = vadd.xlane.f32.xlu1 %v455_v51 }
  0x21   : > { %466 = vadd.xlane.f32.xlu0 %v465_v53 }
  0x23   : > { %476 = vadd.xlane.f32.xlu1 %v475_v55 }
  0x25   : > { %486 = vadd.xlane.f32.xlu0 %v485_v56 }
  0x3b   : > { %563 = vrot.lane.b32.xlu0 %v1734_v12, %s1657_s6 }
  0x3f   : > { %574 = vrot.lane.b32.xlu0 %v1870_v47, %s1659_s10 }
  0xa6   : > { %v427_v60 = vpop.xlane.xlu0 %426 }
  0xa8   : > { %v447_v63 = vpop.xlane.xlu1 %446 }
  0xaa   : > { %v437_v3 = vpop.xlane.xlu0 %436 }
  0xac   : > { %v457_v0 = vpop.xlane.xlu1 %456 }
  0xae   : > { %v467_v6 = vpop.xlane.xlu0 %466 }
  0xb0   : > { %v477_v37 = vpop.xlane.xlu1 %476 }
  0xb2   : > { %v487_v39 = vpop.xlane.xlu0 %486 }
  0xb6   : > { %v564_v45 = vpop.permute.xlu0 %563 }
  0xb7   : > { %v566_v46 = vmul.f32 %v564_v45, %v1749_v19 }
  0xb9   : > { %v567_v48 = vpack.c.bf16 %v566_v46, %v566_v46 }
  0xba   : > { %v575_v50 = vpop.permute.xlu0 %574 }
  0xbb   : > { %569 = vrot.lane.b32.xlu0 %v567_v48, %s1659_s10  ;;  %v1878_v51 = vsel %vm321_vm1, %v575_v50, 0 }
  0xbc   : > { %1562 = vmatpush3.bf16.xpose.msra.mxu1 %v1878_v51 }
  0xbd   : > { %1573 = vmatprep.subr.bf16.mxu1 %v1655_v1 }
  0xed   : > { %v362_v7 = vpop.f32.mrb[0].mxu0  ;;  %v411_v8 = vpop.f32.mrb[0].mxu1 }
  0xee   : > { %v417_v10 = vsel %vm300_vm4, %v362_v7, 0.0  ;;  %v1547_v11 = vpop.f32.mrb[1].mxu0  ;;  %v1553_v14 = vpop.f32.mrb[1].mxu1 }
  0xef   : > { %v418_v21 = vsel %vm301_vm5, %v411_v8, %v417_v10  ;;  %v365_v26 = vpop.f32.mrb[2].mxu0  ;;  %v414_v27 = vpop.f32.mrb[2].mxu1 }
  0xf0   : > { %v428_v29 = vsel %vm303_vm6, %v427_v60, %v418_v21  ;;  %v1548_v31 = vpop.f32.mrb[3].mxu0  ;;  %v1554_v33 = vpop.f32.mrb[3].mxu1 }
  0xf1   : > { %v438_v35 = vsel %vm305_vm7, %v437_v3, %v428_v29 }
  0xf2   : > { %v448_v36 = vsel %vm307_vm8, %v447_v63, %v438_v35 }
  0xf3   : > { %v458_v38 = vsel %vm308_vm9, %v457_v0, %v448_v36 }
  0xf4   : > { %v468_v2 = vsel %vm310_vm10, %v467_v6, %v458_v38 }
  0xf5   : > { %v478_v4 = vsel %vm312_vm11, %v477_v37, %v468_v2 }
  0xf6   : > { %v488_v41 = vsel %vm314_vm12, %v487_v39, %v478_v4 }
  0xf7   : > { %v498_v42 = vsel %vm497_vm13, %v488_v41, -1e+30 }
  0xf8   : > { %v500_v43 = vsel %vm499_vm14, %v498_v42, -inf }
  0xf9   : > { %501 = vmax.xlane.f32.xlu1 %v500_v43 }
 0x10a   : > { %623 = vrot.lane.b32.xlu1 %v1743_v16, %s1657_s6 }
 0x12d   : > { %v570_v15 = vpop.permute.xlu0 %569 }
 0x12e   : > { %1564 = vmatmul.mubr.msk.bf16.vlgmr.msra.gmra.mrb[4].mxu1 %vm321_vm1, %v570_v15 }
 0x12f   : > { %1575 = vmatprep.mubr.msk.bf16.mxu1 %vm1656_vm0, %v1655_v1 }
 0x186   : > { %v502_v52 = vpop.xlane.xlu1 %501 }
 0x187   : > { %v503_v53 = vsub.f32 %v498_v42, %v502_v52 }
 0x189   : > { %v504_v54 = vmul.f32 1.442695, %v503_v53 }
 0x18a   : > { %v624_v55 = vpop.permute.xlu1 %623 }
 0x18b   : > { %1631 = vpow2.f32 %v504_v54  ;;  %v626_v56 = vmul.f32 %v624_v55, %v1749_v19 }
 0x18d   : > { %v627_v57 = vpack.c.bf16 %v626_v56, %v626_v56 }
 0x18f   : > { %629 = vrot.lane.b32.xlu0 %v627_v57, %s1659_s10 }
 0x193   : > { %677 = vrot.lane.b32.xlu0 %v1736_v13, %s1657_s6 }
 0x195   : > { %v1632_v59 = vpop.eup %1631 }
 0x196   : > { %v506_v60 = vsel %vm499_vm14, %v1632_v59, 0.0 }
 0x197   : > { %507 = vadd.xlane.f32.xlu1 %v506_v60  ;;  %691 = vrot.lane.b32.xlu0 %v1747_v18, %s1657_s6 }
 0x19b   : > { %705 = vrot.lane.b32.xlu0 %v1745_v17, %s1657_s6 }
 0x19f   : > { %719 = vrot.lane.b32.xlu0 %v1756_v22, %s1657_s6 }
 0x1a3   : > { %733 = vrot.lane.b32.xlu0 %v1758_v23, %s1657_s6 }
 0x1a7   : > { %761 = vrot.lane.b32.xlu0 %v1762_v25, %s1657_s6 }
 0x1a8   : > { %747 = vrot.lane.b32.xlu1 %v1760_v24, %s1657_s6 }
 0x201   : > { %v630_v63 = vpop.permute.xlu0 %629  ;;  %v616_v43 = vpop.f32.mrb[4].mxu1 }
 0x202   : > { %v1565_v45 = vpop.f32.mrb[5].mxu1 }
 0x203   : > { %v619_v46 = vpop.f32.mrb[6].mxu1 }
 0x204   : > { %v1566_v48 = vpop.f32.mrb[7].mxu1 }
 0x205   : > { %v678_v3 = vpop.permute.xlu0 %677  ;;  %v1981_v48 = vcombine.low %v1906_v61, %v1906_v61 }
 0x206   : > { %v680_v5 = vmul.f32 %v678_v3, %v1749_v19 }
 0x208   : > { %v681_v0 = vmul.f32 %v680_v5, %v1769_v28 }
 0x209   : > { %v692_v6 = vpop.permute.xlu0 %691 }
 0x20a   : > { %v694_v7 = vmul.f32 %v692_v6, %v1749_v19  ;;  %683 = vrot.lane.b32.xlu0 %v681_v0, %s1659_s10 }
 0x20c   : > { %v695_v8 = vmul.f32 %v694_v7, %v1781_v32 }
 0x20d   : > { %v706_v9 = vpop.permute.xlu0 %705 }
 0x20e   : > { %v708_v10 = vmul.f32 %v706_v9, %v1749_v19  ;;  %697 = vrot.lane.b32.xlu0 %v695_v8, %s1659_s10  ;;  %v674_v9 = vsel %vm300_vm4, %v616_v43, 0.0 }
 0x210   : > { %v709_v11 = vmul.f32 %v708_v10, %v1776_v30 }
 0x211   : > { %v720_v14 = vpop.permute.xlu0 %719 }
 0x212   : > { %v722_v21 = vmul.f32 %v720_v14, %v1749_v19  ;;  %711 = vrot.lane.b32.xlu0 %v709_v11, %s1659_s10 }
 0x214   : > { %v723_v26 = vmul.f32 %v722_v21, %v1752_v20 }
 0x215   : > { %v734_v27 = vpop.permute.xlu0 %733 }
 0x216   : > { %v736_v29 = vmul.f32 %v734_v27, %v1749_v19  ;;  %725 = vrot.lane.b32.xlu0 %v723_v26, %s1659_s10 }
 0x218   : > { %v737_v31 = vmul.f32 %v736_v29, %v1791_v40 }
 0x219   : > { %v762_v33 = vpop.permute.xlu0 %761 }
 0x21a   : > { %739 = vrot.lane.b32.xlu1 %v737_v31, %s1659_s10  ;;  %v764_v35 = vmul.f32 %v762_v33, %v1749_v19 }
 0x21c   : > { %v765_v36 = vmul.f32 %v764_v35, %v1808_v49 }
 0x21e   : > { %767 = vrot.lane.b32.xlu1 %v765_v36, %s1659_s10 }
 0x224   : > { %v508_v37 = vpop.xlane.xlu1 %507 }
 0x225   : > { %1633 = vrcp.f32 %v508_v37 }
 0x228   : > { %v748_v38 = vpop.permute.xlu1 %747 }
 0x229   : > { %v750_v39 = vmul.f32 %v748_v38, %v1749_v19 }
 0x22b   : > { %v751_v2 = vmul.f32 %v750_v39, %v1798_v44 }
 0x22d   : > { %753 = vrot.lane.b32.xlu0 %v751_v2, %s1659_s10 }
 0x22f   : > { %v1634_v4 = vpop.eup %1633 }
 0x230   : > { %v510_v41 = vmul.f32 %v1634_v4, %v1632_v59 }
 0x232   : > { %v511_v42 = vpack.c.bf16 %v510_v41, %v510_v41 }
 0x234   : > { %1558 = vmatmul.mubr.msk.bf16.vlgmr.msra.gmra.mrb[4].mxu0 %vm499_vm14, %v511_v42 }
 0x235   : > { %1568 = vmatpush3.bf16.xpose.msra.mxu0 %v1878_v51  ;;  %1569 = vmatprep.mubr.msk.bf16.mxu0 %vm1656_vm0, %v1655_v1 }
 0x236   : > { %1579 = vmatprep.subr.bf16.mxu0 %v1655_v1 }
 0x23c   : > { %1570 = vmatmul.mubr.msk.bf16.vlgmr.msra.gmra.mrb[8].mxu0 %vm321_vm1, %v630_v63 }
 0x23d   : > { %1581 = vmatprep.mubr.msk.bf16.mxu0 %vm1656_vm0, %v1655_v1 }
 0x27c   : > { %v684_v50 = vpop.permute.xlu0 %683 }
 0x27d   : > { %v686_v15 = vsel %vm321_vm1, %v684_v50, 0.0 }
 0x27e   : > { %687 = vadd.xlane.f32.xlu0 %v686_v15 }
 0x280   : > { %v698_v52 = vpop.permute.xlu0 %697 }
 0x281   : > { %v700_v51 = vsel %vm321_vm1, %v698_v52, 0.0 }
 0x282   : > { %701 = vadd.xlane.f32.xlu1 %v700_v51 }
 0x284   : > { %v712_v53 = vpop.permute.xlu0 %711 }
 0x285   : > { %v714_v54 = vsel %vm321_vm1, %v712_v53, 0.0 }
 0x286   : > { %715 = vadd.xlane.f32.xlu0 %v714_v54 }
 0x288   : > { %v726_v55 = vpop.permute.xlu0 %725 }
 0x289   : > { %v728_v56 = vsel %vm321_vm1, %v726_v55, 0.0 }
 0x28a   : > { %729 = vadd.xlane.f32.xlu0 %v728_v56 }
 0x28c   : > { %v740_v57 = vpop.permute.xlu1 %739 }
 0x28d   : > { %v742_v59 = vsel %vm321_vm1, %v740_v57, 0.0 }
 0x28e   : > { %743 = vadd.xlane.f32.xlu1 %v742_v59 }
 0x290   : > { %v768_v60 = vpop.permute.xlu1 %767 }
 0x291   : > { %v770_v62 = vsel %vm321_vm1, %v768_v60, 0.0 }
 0x292   : > { %771 = vadd.xlane.f32.xlu1 %v770_v62 }
 0x29f   : > { %v754_v63 = vpop.permute.xlu0 %753 }
 0x2a0   : > { %v756_v3 = vsel %vm321_vm1, %v754_v63, 0.0 }
 0x2a1   : > { %757 = vadd.xlane.f32.xlu0 %v756_v3 }
 0x2a3   : > { %847 = vrot.lane.b32.xlu1 %v1734_v12, %s1660_s14 }
 0x307   : > { %v553_v5 = vpop.f32.mrb[4].mxu0 }
 0x308   : > { %v559_v0 = vpack.c.bf16 %v553_v5, %v553_v5  ;;  %v1559_v6 = vpop.f32.mrb[5].mxu0 }
 0x309   : > { %v556_v7 = vpop.f32.mrb[6].mxu0 }
 0x30a   : > { %561 = vst.msk [vmem:[%s1953_s20] sm:$0xf] %vm560_vm2, %v559_v0  ;;  %v1560_v8 = vpop.f32.mrb[7].mxu0 }
 0x30b   : > { %v688_v27 = vpop.xlane.xlu0 %687 }
 0x30f   : > { %v668_v10 = vpop.f32.mrb[8].mxu0  ;;  %v702_v31 = vpop.xlane.xlu1 %701 }
 0x310   : > { %v675_v11 = vsel %vm301_vm5, %v668_v10, %v674_v9  ;;  %v1571_v14 = vpop.f32.mrb[9].mxu0 }
 0x311   : > { %v671_v21 = vpop.f32.mrb[10].mxu0  ;;  %v689_v33 = vsel %vm303_vm6, %v688_v27, %v675_v11 }
 0x312   : > { %v1572_v26 = vpop.f32.mrb[11].mxu0  ;;  %v703_v35 = vsel %vm305_vm7, %v702_v31, %v689_v33 }
 0x313   : > { %v716_v29 = vpop.xlane.xlu0 %715 }
 0x314   : > { %v717_v38 = vsel %vm307_vm8, %v716_v29, %v703_v35 }
 0x317   : > { %v730_v37 = vpop.xlane.xlu0 %729 }
 0x318   : > { %v731_v39 = vsel %vm308_vm9, %v730_v37, %v717_v38 }
 0x31b   : > { %v744_v36 = vpop.xlane.xlu1 %743 }
 0x31c   : > { %v745_v4 = vsel %vm310_vm10, %v744_v36, %v731_v39 }
 0x31f   : > { %v772_v2 = vpop.xlane.xlu1 %771 }
 0x323   : > { %v848_v50 = vpop.permute.xlu1 %847 }
 0x324   : > { %v850_v15 = vmul.f32 %v848_v50, %v1749_v19 }
 0x326   : > { %v851_v52 = vpack.c.bf16 %v850_v15, %v850_v15 }
 0x32e   : > { %v758_v41 = vpop.xlane.xlu0 %757 }
 0x32f   : > { %v759_v42 = vsel %vm312_vm11, %v758_v41, %v745_v4 }
 0x330   : > { %v773_v43 = vsel %vm314_vm12, %v772_v2, %v759_v42 }
 0x331   : > { %v774_v45 = vsel %vm497_vm13, %v773_v43, -1e+30 }
 0x332   : > { %v775_v46 = vsel %vm499_vm14, %v774_v45, -inf }
 0x333   : > { %776 = vmax.xlane.f32.xlu0 %v775_v46 }
 0x349   : > { %903 = vrot.lane.b32.xlu0 %v1743_v16, %s1660_s14 }
 0x34d   : > { %790 = vrot.lane.b32.xlu0 %v1981_v48, %s1659_s10 }
 0x351   : > { %855 = vrot.lane.b32.xlu0 %v1870_v47, %s1660_s14 }
 0x355   : > { %853 = vrot.lane.b32.xlu0 %v851_v52, %s1660_s14 }
 0x3c0   : > { %v777_v51 = vpop.xlane.xlu0 %776 }
 0x3c1   : > { %v778_v53 = vsub.f32 %v774_v45, %v777_v51 }
 0x3c3   : > { %v779_v54 = vmul.f32 1.442695, %v778_v53 }
 0x3c4   : > { %v904_v55 = vpop.permute.xlu0 %903 }
 0x3c5   : > { %1635 = vpow2.f32 %v779_v54  ;;  %v906_v61 = vmul.f32 %v904_v55, %v1749_v19 }
 0x3c7   : > { %v907_v56 = vpack.c.bf16 %v906_v61, %v906_v61 }
 0x3c8   : > { %v791_v57 = vpop.permute.xlu0 %790 }
 0x3c9   : > { %909 = vrot.lane.b32.xlu0 %v907_v56, %s1660_s14  ;;  %v796_v59 = vsel %vm515_vm15, %v791_v57, 0 }
 0x3ca   : > { %1574 = vmatpush3.bf16.msra.mxu1 %v796_v59 }
 0x3cb   : > { %1585 = vmatprep.subr.bf16.mxu1 %v1655_v1 }
 0x3cc   : > { %v856_v60 = vpop.permute.xlu0 %855 }
 0x3cd   : > { %956 = vrot.lane.b32.xlu0 %v1736_v13, %s1660_s14  ;;  %v861_v62 = vsel %vm321_vm1, %v856_v60, 0 }
 0x3ce   : > { %1580 = vmatpush3.bf16.xpose.msra.mxu0 %v861_v62 }
 0x3cf   : > { %v1636_v63 = vpop.eup %1635  ;;  %1591 = vmatprep.subr.bf16.mxu0 %v1655_v1 }
 0x3d0   : > { %v781_v3 = vsel %vm499_vm14, %v1636_v63, 0.0  ;;  %v854_v5 = vpop.permute.xlu0 %853 }
 0x3d1   : > { %782 = vadd.xlane.f32.xlu1 %v781_v3  ;;  %969 = vrot.lane.b32.xlu0 %v1747_v18, %s1660_s14 }
 0x3d5   : > { %982 = vrot.lane.b32.xlu0 %v1745_v17, %s1660_s14  ;;  %1582 = vmatmul.mubr.msk.bf16.vlgmr.msra.gmra.mrb[12].mxu0 %vm321_vm1, %v854_v5 }
 0x3d6   : > { %1593 = vmatprep.mubr.msk.bf16.mxu0 %vm1656_vm0, %v1655_v1 }
 0x3d9   : > { %995 = vrot.lane.b32.xlu0 %v1756_v22, %s1660_s14 }
 0x3dd   : > { %1021 = vrot.lane.b32.xlu0 %v1760_v24, %s1660_s14 }
 0x3e1   : > { %1034 = vrot.lane.b32.xlu0 %v1762_v25, %s1660_s14 }
 0x3e2   : > { %1008 = vrot.lane.b32.xlu1 %v1758_v23, %s1660_s14 }
 0x43b   : > { %v910_v0 = vpop.permute.xlu0 %909 }
 0x43f   : > { %v957_v6 = vpop.permute.xlu0 %956 }
 0x440   : > { %v959_v7 = vmul.f32 %v957_v6, %v1749_v19 }
 0x442   : > { %v960_v8 = vmul.f32 %v959_v7, %v1769_v28 }
 0x443   : > { %v970_v9 = vpop.permute.xlu0 %969 }
 0x444   : > { %v972_v10 = vmul.f32 %v970_v9, %v1749_v19  ;;  %962 = vrot.lane.b32.xlu0 %v960_v8, %s1660_s14 }
 0x446   : > { %v973_v11 = vmul.f32 %v972_v10, %v1781_v32 }
 0x447   : > { %v983_v14 = vpop.permute.xlu0 %982 }
 0x448   : > { %v985_v21 = vmul.f32 %v983_v14, %v1749_v19  ;;  %975 = vrot.lane.b32.xlu0 %v973_v11, %s1660_s14 }
 0x44a   : > { %v986_v26 = vmul.f32 %v985_v21, %v1776_v30 }
 0x44b   : > { %v996_v27 = vpop.permute.xlu0 %995 }
 0x44c   : > { %v998_v29 = vmul.f32 %v996_v27, %v1749_v19  ;;  %988 = vrot.lane.b32.xlu1 %v986_v26, %s1660_s14 }
 0x44e   : > { %v999_v31 = vmul.f32 %v998_v29, %v1752_v20 }
 0x44f   : > { %v1022_v33 = vpop.permute.xlu0 %1021 }
 0x450   : > { %1001 = vrot.lane.b32.xlu0 %v999_v31, %s1660_s14  ;;  %v1024_v35 = vmul.f32 %v1022_v33, %v1749_v19 }
 0x452   : > { %v1025_v36 = vmul.f32 %v1024_v35, %v1798_v44 }
 0x453   : > { %v1035_v38 = vpop.permute.xlu0 %1034 }
 0x454   : > { %1027 = vrot.lane.b32.xlu0 %v1025_v36, %s1660_s14  ;;  %v1037_v4 = vmul.f32 %v1035_v38, %v1749_v19 }
 0x456   : > { %v1038_v42 = vmul.f32 %v1037_v4, %v1808_v49 }
 0x45e   : > { %v783_v37 = vpop.xlane.xlu1 %782 }
 0x45f   : > { %1637 = vrcp.f32 %v783_v37 }
 0x462   : > { %v1009_v39 = vpop.permute.xlu1 %1008 }
 0x463   : > { %v1011_v2 = vmul.f32 %v1009_v39, %v1749_v19 }
 0x465   : > { %v1012_v41 = vmul.f32 %v1011_v2, %v1791_v40 }
 0x467   : > { %1014 = vrot.lane.b32.xlu1 %v1012_v41, %s1660_s14 }
 0x469   : > { %v1638_v43 = vpop.eup %1637 }
 0x46a   : > { %v785_v45 = vmul.f32 %v1638_v43, %v1636_v63 }
 0x46b   : > { %1040 = vrot.lane.b32.xlu1 %v1038_v42, %s1660_s14 }
 0x46c   : > { %v786_v46 = vpack.c.bf16 %v785_v45, %v785_v45 }
 0x46e   : > { %1576 = vmatmul.mubr.msk.bf16.vlgmr.msra.gmra.mrb[8].mxu1 %vm499_vm14, %v786_v46 }
 0x46f   : > { %1586 = vmatpush3.bf16.xpose.msra.mxu1 %v861_v62  ;;  %1587 = vmatprep.mubr.msk.bf16.mxu1 %vm1656_vm0, %v1655_v1 }
 0x470   : > { %1597 = vmatprep.subr.bf16.mxu1 %v1655_v1 }
 0x476   : > { %1588 = vmatmul.mubr.msk.bf16.vlgmr.msra.gmra.mrb[12].mxu1 %vm321_vm1, %v910_v0 }
 0x477   : > { %1599 = vmatprep.mubr.msk.bf16.mxu1 %vm1656_vm0, %v1655_v1 }
 0x4a8   : > { %v897_v50 = vpop.f32.mrb[12].mxu0 }
 0x4a9   : > { %v1583_v15 = vpop.f32.mrb[13].mxu0  ;;  %v954_v11 = vsel %vm300_vm4, %v897_v50, 0.0 }
 0x4aa   : > { %v900_v52 = vpop.f32.mrb[14].mxu0 }
 0x4ab   : > { %v1584_v51 = vpop.f32.mrb[15].mxu0 }
 0x4b6   : > { %v963_v53 = vpop.permute.xlu0 %962 }
 0x4b7   : > { %v965_v54 = vsel %vm321_vm1, %v963_v53, 0.0 }
 0x4b8   : > { %966 = vadd.xlane.f32.xlu0 %v965_v54 }
 0x4ba   : > { %v976_v55 = vpop.permute.xlu0 %975 }
 0x4bb   : > { %v978_v61 = vsel %vm321_vm1, %v976_v55, 0.0 }
 0x4bc   : > { %979 = vadd.xlane.f32.xlu1 %v978_v61 }
 0x4be   : > { %v989_v56 = vpop.permute.xlu1 %988 }
 0x4bf   : > { %v991_v57 = vsel %vm321_vm1, %v989_v56, 0.0 }
 0x4c0   : > { %992 = vadd.xlane.f32.xlu0 %v991_v57 }
 0x4c2   : > { %v1002_v59 = vpop.permute.xlu0 %1001 }
 0x4c3   : > { %v1004_v60 = vsel %vm321_vm1, %v1002_v59, 0.0 }
 0x4c4   : > { %1005 = vadd.xlane.f32.xlu0 %v1004_v60 }
 0x4c6   : > { %v1028_v62 = vpop.permute.xlu0 %1027 }
 0x4c7   : > { %v1030_v63 = vsel %vm321_vm1, %v1028_v62, 0.0 }
 0x4c8   : > { %1031 = vadd.xlane.f32.xlu0 %v1030_v63 }
 0x4d9   : > { %v1015_v3 = vpop.permute.xlu1 %1014 }
 0x4da   : > { %v1017_v5 = vsel %vm321_vm1, %v1015_v3, 0.0 }
 0x4db   : > { %1018 = vadd.xlane.f32.xlu1 %v1017_v5 }
 0x4dd   : > { %v1041_v0 = vpop.permute.xlu1 %1040 }
 0x4de   : > { %v1043_v6 = vsel %vm321_vm1, %v1041_v0, 0.0 }
 0x4df   : > { %1044 = vadd.xlane.f32.xlu1 %v1043_v6 }
 0x4f0   : > { %1117 = vrot.lane.b32.xlu1 %v1734_v12, %s1659_s10 }
 0x541   : > { %v2050_v7 = vpop.f32.mrb[8].mxu1 }
 0x542   : > { %v1577_v8 = vpop.f32.mrb[9].mxu1 }
 0x543   : > { %v835_v9 = vpop.f32.mrb[10].mxu1 }
 0x544   : > { %v1578_v10 = vpop.f32.mrb[11].mxu1 }
 0x545   : > { %v967_v31 = vpop.xlane.xlu0 %966 }
 0x549   : > { %v948_v14 = vpop.f32.mrb[12].mxu1  ;;  %v980_v35 = vpop.xlane.xlu1 %979 }
 0x54a   : > { %v955_v21 = vsel %vm301_vm5, %v948_v14, %v954_v11  ;;  %v1589_v26 = vpop.f32.mrb[13].mxu1 }
 0x54b   : > { %v951_v27 = vpop.f32.mrb[14].mxu1  ;;  %v968_v12 = vsel %vm303_vm6, %v967_v31, %v955_v21 }
 0x54c   : > { %v1590_v29 = vpop.f32.mrb[15].mxu1  ;;  %v981_v36 = vsel %vm305_vm7, %v980_v35, %v968_v12 }
 0x54d   : > { %v993_v33 = vpop.xlane.xlu0 %992 }
 0x54e   : > { %v994_v38 = vsel %vm307_vm8, %v993_v33, %v981_v36 }
 0x551   : > { %v1006_v37 = vpop.xlane.xlu0 %1005 }
 0x552   : > { %v1007_v39 = vsel %vm308_vm9, %v1006_v37, %v994_v38 }
 0x555   : > { %v1032_v41 = vpop.xlane.xlu0 %1031 }
 0x568   : > { %v1019_v2 = vpop.xlane.xlu1 %1018 }
 0x569   : > { %v1020_v4 = vsel %vm310_vm10, %v1019_v2, %v1007_v39 }
 0x56a   : > { %v1033_v42 = vsel %vm312_vm11, %v1032_v41, %v1020_v4 }
 0x56c   : > { %v1045_v43 = vpop.xlane.xlu1 %1044 }
 0x56d   : > { %v1046_v45 = vsel %vm314_vm12, %v1045_v43, %v1033_v42 }
 0x56e   : > { %v1047_v46 = vsel %vm497_vm13, %v1046_v45, -1e+30 }
 0x56f   : > { %v1048_v50 = vsel %vm499_vm14, %v1047_v46, -inf }
 0x570   : > { %1049 = vmax.xlane.f32.xlu0 %v1048_v50  ;;  %v1118_v15 = vpop.permute.xlu1 %1117 }
 0x571   : > { %v1120_v52 = vmul.f32 %v1118_v15, %v1749_v19  ;;  %v1516_v15 = vpack.c.bf16 %v2050_v7, %v2050_v7 }
 0x573   : > { %v1121_v51 = vpack.c.bf16 %v1120_v52, %v1120_v52 }
 0x586   : > { %1173 = vrot.lane.b32.xlu0 %v1743_v16, %s1659_s10 }
 0x58a   : > { %1060 = vrot.lane.b32.xlu0 %v1981_v48, %s1660_s14 }
 0x58e   : > { %1125 = vrot.lane.b32.xlu0 %v1870_v47, %s1657_s6 }
 0x592   : > { %1123 = vrot.lane.b32.xlu0 %v1121_v51, %s1657_s6 }
 0x5fd   : > { %v1050_v53 = vpop.xlane.xlu0 %1049 }
 0x5fe   : > { %v1051_v54 = vsub.f32 %v1047_v46, %v1050_v53 }
 0x600   : > { %v1052_v55 = vmul.f32 1.442695, %v1051_v54 }
 0x601   : > { %v1174_v61 = vpop.permute.xlu0 %1173 }
 0x602   : > { %1639 = vpow2.f32 %v1052_v55  ;;  %v1176_v56 = vmul.f32 %v1174_v61, %v1749_v19 }
 0x604   : > { %v1177_v16 = vpack.c.bf16 %v1176_v56, %v1176_v56 }
 0x605   : > { %v1061_v57 = vpop.permute.xlu0 %1060 }
 0x606   : > { %1179 = vrot.lane.b32.xlu0 %v1177_v16, %s1657_s6  ;;  %v1066_v59 = vsel %vm515_vm15, %v1061_v57, 0 }
 0x607   : > { %1592 = vmatpush3.bf16.msra.mxu0 %v1066_v59 }
 0x608   : > { %1603 = vmatprep.subr.bf16.mxu0 %v1655_v1 }
 0x609   : > { %v1126_v60 = vpop.permute.xlu0 %1125 }
 0x60a   : > { %1226 = vrot.lane.b32.xlu0 %v1736_v13, %s1659_s10  ;;  %v1131_v47 = vsel %vm321_vm1, %v1126_v60, 0 }
 0x60b   : > { %1598 = vmatpush3.bf16.xpose.msra.mxu1 %v1131_v47 }
 0x60c   : > { %v1640_v62 = vpop.eup %1639  ;;  %1609 = vmatprep.subr.bf16.mxu1 %v1655_v1 }
 0x60d   : > { %v1054_v63 = vsel %vm499_vm14, %v1640_v62, 0.0  ;;  %v1124_v3 = vpop.permute.xlu0 %1123 }
 0x60e   : > { %1055 = vadd.xlane.f32.xlu1 %v1054_v63  ;;  %1239 = vrot.lane.b32.xlu0 %v1747_v18, %s1659_s10 }
 0x612   : > { %1252 = vrot.lane.b32.xlu0 %v1745_v17, %s1659_s10  ;;  %1600 = vmatmul.mubr.msk.bf16.vlgmr.msra.gmra.mrb[16].mxu1 %vm321_vm1, %v1124_v3 }
 0x613   : > { %1611 = vmatprep.mubr.msk.bf16.mxu1 %vm1656_vm0, %v1655_v1 }
 0x616   : > { %1265 = vrot.lane.b32.xlu0 %v1756_v22, %s1659_s10 }
 0x61a   : > { %1291 = vrot.lane.b32.xlu0 %v1760_v24, %s1659_s10 }
 0x61e   : > { %1304 = vrot.lane.b32.xlu0 %v1762_v25, %s1659_s10 }
 0x61f   : > { %1278 = vrot.lane.b32.xlu1 %v1758_v23, %s1659_s10 }
 0x678   : > { %v1180_v13 = vpop.permute.xlu0 %1179 }
 0x67c   : > { %v1227_v18 = vpop.permute.xlu0 %1226 }
 0x67d   : > { %v1229_v17 = vmul.f32 %v1227_v18, %v1749_v19 }
 0x67f   : > { %v1230_v5 = vmul.f32 %v1229_v17, %v1769_v28 }
 0x680   : > { %v1240_v0 = vpop.permute.xlu0 %1239 }
 0x681   : > { %v1242_v6 = vmul.f32 %v1240_v0, %v1749_v19  ;;  %1232 = vrot.lane.b32.xlu0 %v1230_v5, %s1657_s6 }
 0x683   : > { %v1243_v22 = vmul.f32 %v1242_v6, %v1781_v32 }
 0x684   : > { %v1253_v24 = vpop.permute.xlu0 %1252 }
 0x685   : > { %v1255_v8 = vmul.f32 %v1253_v24, %v1749_v19  ;;  %1245 = vrot.lane.b32.xlu0 %v1243_v22, %s1657_s6 }
 0x687   : > { %v1256_v23 = vmul.f32 %v1255_v8, %v1776_v30 }
 0x688   : > { %v1266_v25 = vpop.permute.xlu0 %1265 }
 0x689   : > { %v1268_v9 = vmul.f32 %v1266_v25, %v1749_v19  ;;  %1258 = vrot.lane.b32.xlu1 %v1256_v23, %s1657_s6 }
 0x68b   : > { %v1269_v28 = vmul.f32 %v1268_v9, %v1752_v20 }
 0x68c   : > { %v1292_v10 = vpop.permute.xlu0 %1291 }
 0x68d   : > { %1271 = vrot.lane.b32.xlu0 %v1269_v28, %s1657_s6  ;;  %v1294_v11 = vmul.f32 %v1292_v10, %v1749_v19 }
 0x68f   : > { %v1295_v32 = vmul.f32 %v1294_v11, %v1798_v44 }
 0x690   : > { %v1305_v21 = vpop.permute.xlu0 %1304 }
 0x691   : > { %1297 = vrot.lane.b32.xlu0 %v1295_v32, %s1657_s6  ;;  %v1307_v27 = vmul.f32 %v1305_v21, %v1749_v19 }
 0x693   : > { %v1308_v20 = vmul.f32 %v1307_v27, %v1808_v49 }
 0x69b   : > { %v1056_v14 = vpop.xlane.xlu1 %1055 }
 0x69c   : > { %1641 = vrcp.f32 %v1056_v14 }
 0x69f   : > { %v1279_v30 = vpop.permute.xlu1 %1278 }
 0x6a0   : > { %v1281_v26 = vmul.f32 %v1279_v30, %v1749_v19 }
 0x6a2   : > { %v1282_v29 = vmul.f32 %v1281_v26, %v1791_v40 }
 0x6a4   : > { %1284 = vrot.lane.b32.xlu1 %v1282_v29, %s1657_s6 }
 0x6a6   : > { %v1642_v31 = vpop.eup %1641 }
 0x6a7   : > { %v1058_v33 = vmul.f32 %v1642_v31, %v1640_v62 }
 0x6a8   : > { %1310 = vrot.lane.b32.xlu1 %v1308_v20, %s1657_s6 }
 0x6a9   : > { %v1059_v44 = vpack.c.bf16 %v1058_v33, %v1058_v33 }
 0x6ab   : > { %1594 = vmatmul.mubr.msk.bf16.vlgmr.msra.gmra.mrb[16].mxu0 %vm499_vm14, %v1059_v44 }
 0x6ac   : > { %1604 = vmatpush3.bf16.xpose.msra.mxu0 %v1131_v47  ;;  %1605 = vmatprep.mubr.msk.bf16.mxu0 %vm1656_vm0, %v1655_v1  ;;  %vm845_vm0 = vcmask 519424  }
 0x6b3   : > { %1606 = vmatmul.mubr.msk.bf16.vlgmr.msra.gmra.mrb[20].mxu0 %vm321_vm1, %v1180_v13 }
 0x6e5   : > { %v1167_v19 = vpop.f32.mrb[16].mxu1 }
 0x6e6   : > { %v1601_v12 = vpop.f32.mrb[17].mxu1  ;;  %v1224_v55 = vsel %vm300_vm4, %v1167_v19, 0.0 }
 0x6e7   : > { %v1170_v40 = vpop.f32.mrb[18].mxu1 }
 0x6e8   : > { %v1602_v35 = vpop.f32.mrb[19].mxu1 }
 0x6f3   : > { %v1233_v49 = vpop.permute.xlu0 %1232 }
 0x6f4   : > { %v1235_v36 = vsel %vm321_vm1, %v1233_v49, 0.0 }
 0x6f5   : > { %1236 = vadd.xlane.f32.xlu0 %v1235_v36 }
 0x6f7   : > { %v1246_v37 = vpop.permute.xlu0 %1245 }
 0x6f8   : > { %v1248_v38 = vsel %vm321_vm1, %v1246_v37, 0.0 }
 0x6f9   : > { %1249 = vadd.xlane.f32.xlu1 %v1248_v38 }
 0x6fb   : > { %v1259_v39 = vpop.permute.xlu1 %1258 }
 0x6fc   : > { %v1261_v2 = vsel %vm321_vm1, %v1259_v39, 0.0 }
 0x6fd   : > { %1262 = vadd.xlane.f32.xlu0 %v1261_v2 }
 0x6ff   : > { %v1272_v4 = vpop.permute.xlu0 %1271 }
 0x700   : > { %v1274_v1 = vsel %vm321_vm1, %v1272_v4, 0.0 }
 0x701   : > { %1275 = vadd.xlane.f32.xlu0 %v1274_v1 }
 0x703   : > { %v1298_v41 = vpop.permute.xlu0 %1297 }
 0x704   : > { %v1300_v42 = vsel %vm321_vm1, %v1298_v41, 0.0 }
 0x705   : > { %1301 = vadd.xlane.f32.xlu0 %v1300_v42 }
 0x716   : > { %v1285_v43 = vpop.permute.xlu1 %1284 }
 0x717   : > { %v1287_v45 = vsel %vm321_vm1, %v1285_v43, 0.0 }
 0x718   : > { %1288 = vadd.xlane.f32.xlu1 %v1287_v45 }
 0x71a   : > { %v1311_v46 = vpop.permute.xlu1 %1310 }
 0x71b   : > { %v1313_v50 = vsel %vm321_vm1, %v1311_v46, 0.0  ;;  %vm1115_vm1 = vcmask 781824  }
 0x71c   : > { %1314 = vadd.xlane.f32.xlu1 %v1313_v50 }
 0x72d   : > { %842 = vrot.lane.b32.xlu1 %v1516_v15, %s1657_s6 }
 0x731   : > { %1330 = vrot.lane.b32.xlu1 %v1981_v48, %s1657_s6 }
 0x77e   : > { %v1102_v52 = vpop.f32.mrb[16].mxu0 }
 0x77f   : > { %v1595_v51 = vpop.f32.mrb[17].mxu0  ;;  %v1517_v58 = vpack.c.bf16 %v1102_v52, %v1102_v52 }
 0x780   : > { %v1105_v53 = vpop.f32.mrb[18].mxu0 }
 0x781   : > { %v1596_v54 = vpop.f32.mrb[19].mxu0 }
 0x782   : > { %v1237_v7 = vpop.xlane.xlu0 %1236 }
 0x786   : > { %v1218_v61 = vpop.f32.mrb[20].mxu0  ;;  %v1250_v47 = vpop.xlane.xlu1 %1249 }
 0x787   : > { %v1225_v56 = vsel %vm301_vm5, %v1218_v61, %v1224_v55  ;;  %v1607_v16 = vpop.f32.mrb[21].mxu0 }
 0x788   : > { %v1221_v57 = vpop.f32.mrb[22].mxu0  ;;  %v1238_v48 = vsel %vm303_vm6, %v1237_v7, %v1225_v56 }
 0x789   : > { %v1608_v59 = vpop.f32.mrb[23].mxu0  ;;  %v1251_v62 = vsel %vm305_vm7, %v1250_v47, %v1238_v48 }
 0x78a   : > { %v1263_v60 = vpop.xlane.xlu0 %1262 }
 0x78b   : > { %v1264_v3 = vsel %vm307_vm8, %v1263_v60, %v1251_v62 }
 0x78e   : > { %v1276_v63 = vpop.xlane.xlu0 %1275 }
 0x78f   : > { %v1277_v13 = vsel %vm308_vm9, %v1276_v63, %v1264_v3 }
 0x792   : > { %v1302_v5 = vpop.xlane.xlu0 %1301 }
 0x7a5   : > { %v1289_v18 = vpop.xlane.xlu1 %1288 }
 0x7a6   : > { %v1290_v17 = vsel %vm310_vm10, %v1289_v18, %v1277_v13 }
 0x7a7   : > { %v1303_v0 = vsel %vm312_vm11, %v1302_v5, %v1290_v17 }
 0x7a9   : > { %v1315_v6 = vpop.xlane.xlu1 %1314 }
 0x7aa   : > { %v1316_v22 = vsel %vm314_vm12, %v1315_v6, %v1303_v0 }
 0x7ab   : > { %v1317_v24 = vsel %vm497_vm13, %v1316_v22, -1e+30 }
 0x7ac   : > { %v1318_v8 = vsel %vm499_vm14, %v1317_v24, -inf }
 0x7ad   : > { %v843_v23 = vpop.permute.xlu1 %842  ;;  %1319 = vmax.xlane.f32.xlu0 %v1318_v8 }
 0x7ae   : > { %846 = vst.msk [vmem:[%s1953_s20] sm:$0xf] %vm845_vm0, %v843_v23 }
 0x7b1   : > { %v1331_v32 = vpop.permute.xlu1 %1330 }
 0x7b2   : > { %v1336_v34 = vsel %vm515_vm15, %v1331_v32, 0 }
 0x7b3   : > { %1610 = vmatpush3.bf16.msra.mxu1 %v1336_v34 }
 0x83a   : > { %v1320_v25 = vpop.xlane.xlu0 %1319 }
 0x83b   : > { %v1321_v9 = vsub.f32 %v1317_v24, %v1320_v25 }
 0x83d   : > { %v1322_v28 = vmul.f32 1.442695, %v1321_v9 }
 0x83f   : > { %1643 = vpow2.f32 %v1322_v28 }
 0x849   : > { %v1644_v10 = vpop.eup %1643 }
 0x84a   : > { %v1324_v11 = vsel %vm499_vm14, %v1644_v10, 0.0 }
 0x84b   : > { %1325 = vadd.xlane.f32.xlu0 %v1324_v11 }
 0x861   : > { %1112 = vrot.lane.b32.xlu0 %v1517_v58, %s1660_s14 }
 0x8d8   : > { %v1326_v14 = vpop.xlane.xlu0 %1325 }
 0x8d9   : > { %1645 = vrcp.f32 %v1326_v14 }
 0x8dc   : > { %v1113_v21 = vpop.permute.xlu0 %1112 }
 0x8dd   : > { %1116 = vst.msk [vmem:[%s1953_s20] sm:$0xf] %vm1115_vm1, %v1113_v21 }
 0x8e3   : > { %v1646_v30 = vpop.eup %1645 }
 0x8e4   : > { %v1328_v26 = vmul.f32 %v1646_v30, %v1644_v10 }
 0x8e6   : > { %v1329_v27 = vpack.c.bf16 %v1328_v26, %v1328_v26 }
 0x8e8   : > { %1612 = vmatmul.mubr.msk.bf16.vlgmr.msra.gmra.mrb[20].mxu1 %vm499_vm14, %v1329_v27 }
 0x9bb   : > { %v1372_v29 = vpop.f32.mrb[20].mxu1 }
 0x9bc   : > { %v1518_v20 = vpack.c.bf16 %v1372_v29, %v1372_v29  ;;  %v1613_v31 = vpop.f32.mrb[21].mxu1 }
 0x9bd   : > { %v1375_v33 = vpop.f32.mrb[22].mxu1 }
 0x9be   : > { %1382 = vrot.lane.b32.xlu1 %v1518_v20, %s1659_s10  ;;  %v1614_v44 = vpop.f32.mrb[23].mxu1 }
 0xa30   : > { %v1383_v19 = vpop.permute.xlu1 %1382 }
 0xa31   : > { %1386 = vst.msk [vmem:[%s1953_s20] sm:$0xf] %vm1385_vm3, %v1383_v19 }
 0xa32 PF: > { %s15_s18 = sadd.s32 1, %s1653_s18  }
 0xa33   : > { %p12_p4 = scmp.ge.s32.totalorder %s15_s18, 4  }
 0xa35   :  { %14 = sbr.rel (!%p12_p4) target bundleno = 1 (0x1), region = 79 }

// kernel: forward_train.58
= control target key start
LH: loop header
LB: loop body
LE: loop exit
PB: predicated region body
PF: predicated region fallthrough
CT: control target
= control target key end

     0   :  { %v270_v1 = vmov 0   ;;  %v191_v18 = vlaneseq  ;;  %s351_s1 = inlined_call_operand.vmem [shape: bf16[128,256], index: 1, kind: input, shape index: {}]   ;;  %s352_s0 = inlined_call_operand.vmem [shape: bf16[16,128], index: 0, kind: input, shape index: {}]   ;;  %s353_s2 = inlined_call_operand.vmem [shape: f32[1,256], index: 2, kind: input, shape index: {}]   ;;  %s354_s3 = inlined_call_operand.vmem [shape: bf16[16,256], index: 3, kind: output, shape index: {}]  }
   0x1   :  { %v245_v0 = vld [vmem:[%s351_s1 + $0x4] ss:$8 sps:$4 sm:$0xff]   ;;  %163 = vmatprep.mubr.bf16.mxu0 %v270_v1  ;;  %v247_v2 = vld [vmem:[%s351_s1] ss:$8 sps:$4 sm:$0xff]   ;;  %v248_v3 = vld [vmem:[%s351_s1 + $0x14] ss:$8 sps:$4 sm:$0xff]  }
   0x2   :  { %131 = vmatprep.subr.bf16.mxu0 %v245_v0  ;;  %v250_v4 = vld [vmem:[%s351_s1 + $0x10] ss:$8 sps:$4 sm:$0xff]   ;;  %v251_v5 = vld [vmem:[%s351_s1 + $0x24] ss:$8 sps:$4 sm:$0xff]   ;;  %v253_v6 = vld [vmem:[%s351_s1 + $0x20] ss:$8 sps:$4 sm:$0xff]  }
   0x3   :  { %132 = vmatpush1.bf16.msra.mxu0 %v247_v2  ;;  %v254_v7 = vld [vmem:[%s351_s1 + $0x34] ss:$8 sps:$4 sm:$0xff]   ;;  %v256_v8 = vld [vmem:[%s351_s1 + $0x30] ss:$8 sps:$4 sm:$0xff]   ;;  %v257_v9 = vld [vmem:[%s351_s1 + $0x44] ss:$8 sps:$4 sm:$0xff]  }
   0x4   :  { %133 = vmatprep.subr.bf16.mxu0 %v248_v3  ;;  %v259_v10 = vld [vmem:[%s351_s1 + $0x40] ss:$8 sps:$4 sm:$0xff]   ;;  %v260_v11 = vld [vmem:[%s351_s1 + $0x54] ss:$8 sps:$4 sm:$0xff]   ;;  %v262_v12 = vld [vmem:[%s351_s1 + $0x50] ss:$8 sps:$4 sm:$0xff]  }
   0x5   :  { %v263_v13 = vld [vmem:[%s351_s1 + $0x64] ss:$8 sps:$4 sm:$0xff]   ;;  %v265_v14 = vld [vmem:[%s351_s1 + $0x60] ss:$8 sps:$4 sm:$0xff]   ;;  %v266_v15 = vld [vmem:[%s351_s1 + $0x74] ss:$8 sps:$4 sm:$0xff]  }
   0x6   :  { %v268_v16 = vld [vmem:[%s351_s1 + $0x70] ss:$8 sps:$4 sm:$0xff]   ;;  %v269_v17 = vld [vmem:[%s352_s0] sm:$0xff]   ;;  %v192_v19 = vshrl.u32 %v191_v18, 7 }
   0x7   :  { %134 = vmatpush1.bf16.msra.mxu0 %v250_v4  ;;  %v189_v21 = vld [vmem:[%s353_s2] sm:$0x3] }
   0x8   :  { %135 = vmatprep.subr.bf16.mxu0 %v251_v5  ;;  %v193_v20 = vsub.s32 0, %v192_v19  ;;  %v197_v22 = vsub.s32 1, %v192_v19 }
   0xa   :  { %v194_v23 = vrot.slane %v189_v21, %v193_v20  ;;  %v198_v24 = vrot.slane %v189_v21, %v197_v22 }
   0xb   :  { %136 = vmatpush1.bf16.msra.mxu0 %v253_v6 }
   0xc   :  { %137 = vmatprep.subr.bf16.mxu0 %v254_v7 }
   0xf   :  { %138 = vmatpush1.bf16.msra.mxu0 %v256_v8 }
  0x10   :  { %139 = vmatprep.subr.bf16.mxu0 %v257_v9 }
  0x13   :  { %140 = vmatpush1.bf16.msra.mxu0 %v259_v10 }
  0x14   :  { %141 = vmatprep.subr.bf16.mxu0 %v260_v11 }
  0x17   :  { %142 = vmatpush1.bf16.msra.mxu0 %v262_v12 }
  0x18   :  { %143 = vmatprep.subr.bf16.mxu0 %v263_v13 }
  0x1b   :  { %144 = vmatpush1.bf16.msra.mxu0 %v265_v14 }
  0x1c   :  { %145 = vmatprep.subr.bf16.mxu0 %v266_v15 }
  0x1f   :  { %146 = vmatpush1.bf16.msra.mxu0 %v268_v16 }
  0x22   :  { %164 = vmatmul.mubr.bf16.vlgmr.msra.gmra.mrb[0].mxu0 %v269_v17 }
  0xf5   :  { %v165_v25 = vpop.f32.mrb[0].mxu0 }
  0xf6   :  { %v201_v26 = vadd.f32 %v194_v23, %v165_v25  ;;  %v167_v27 = vpop.f32.mrb[1].mxu0 }
  0xf7   :  { %v202_v28 = vadd.f32 %v198_v24, %v167_v27  ;;  %v169_v29 = vpop.f32.mrb[2].mxu0 }
  0xf8   :  { %v203_v30 = vadd.f32 %v194_v23, %v169_v29  ;;  %v171_v31 = vpop.f32.mrb[3].mxu0 }
  0xf9   :  { %v242_v32 = vpack.c.bf16 %v202_v28, %v201_v26  ;;  %v204_v33 = vadd.f32 %v198_v24, %v171_v31 }
  0xfb   :  { %217 = vst [vmem:[%s354_s3] sm:$0xff] %v242_v32  ;;  %v243_v34 = vpack.c.bf16 %v204_v33, %v203_v30 }
  0xfd   :  { %218 = vst [vmem:[%s354_s3 + $0x8] sm:$0xff] %v243_v34 }

// kernel: forward_train.43
= control target key start
LH: loop header
LB: loop body
LE: loop exit
PB: predicated region body
PF: predicated region fallthrough
CT: control target
= control target key end

     0   :  { %v509_v1 = vmov 0   ;;  %v350_v34 = vlaneseq  ;;  %s644_s1 = inlined_call_operand.vmem [shape: bf16[128,512], index: 1, kind: input, shape index: {}]   ;;  %s645_s0 = inlined_call_operand.vmem [shape: bf16[16,128], index: 0, kind: input, shape index: {}]   ;;  %s646_s2 = inlined_call_operand.vmem [shape: f32[1,512], index: 2, kind: input, shape index: {}]   ;;  %s647_s3 = inlined_call_operand.vmem [shape: bf16[16,512], index: 3, kind: output, shape index: {}]  }
   0x1   :  { %v460_v0 = vld [vmem:[%s644_s1 + $0x4] ss:$16 sps:$4 sm:$0xff]   ;;  %267 = vmatprep.mubr.bf16.mxu0 %v509_v1  ;;  %310 = vmatprep.mubr.bf16.mxu1 %v509_v1  ;;  %v462_v2 = vld [vmem:[%s644_s1 + $0xc] ss:$16 sps:$4 sm:$0xff]   ;;  %v464_v3 = vld [vmem:[%s644_s1] ss:$16 sps:$4 sm:$0xff]  }
   0x2   :  { %235 = vmatprep.subr.bf16.mxu0 %v460_v0  ;;  %v465_v4 = vld [vmem:[%s644_s1 + $0x8] ss:$16 sps:$4 sm:$0xff]   ;;  %278 = vmatprep.subr.bf16.mxu1 %v462_v2  ;;  %v466_v5 = vld [vmem:[%s644_s1 + $0x24] ss:$16 sps:$4 sm:$0xff]   ;;  %v468_v6 = vld [vmem:[%s644_s1 + $0x2c] ss:$16 sps:$4 sm:$0xff]  }
   0x3   :  { %236 = vmatpush1.bf16.msra.mxu0 %v464_v3  ;;  %279 = vmatpush1.bf16.msra.mxu1 %v465_v4  ;;  %v470_v7 = vld [vmem:[%s644_s1 + $0x20] ss:$16 sps:$4 sm:$0xff]   ;;  %v471_v8 = vld [vmem:[%s644_s1 + $0x28] ss:$16 sps:$4 sm:$0xff]   ;;  %v472_v9 = vld [vmem:[%s644_s1 + $0x44] ss:$16 sps:$4 sm:$0xff]  }
   0x4   :  { %237 = vmatprep.subr.bf16.mxu0 %v466_v5  ;;  %280 = vmatprep.subr.bf16.mxu1 %v468_v6  ;;  %v474_v10 = vld [vmem:[%s644_s1 + $0x4c] ss:$16 sps:$4 sm:$0xff]   ;;  %v476_v11 = vld [vmem:[%s644_s1 + $0x40] ss:$16 sps:$4 sm:$0xff]   ;;  %v477_v12 = vld [vmem:[%s644_s1 + $0x48] ss:$16 sps:$4 sm:$0xff]  }
   0x5   :  { %v478_v13 = vld [vmem:[%s644_s1 + $0x64] ss:$16 sps:$4 sm:$0xff]   ;;  %v480_v14 = vld [vmem:[%s644_s1 + $0x6c] ss:$16 sps:$4 sm:$0xff]   ;;  %v482_v15 = vld [vmem:[%s644_s1 + $0x60] ss:$16 sps:$4 sm:$0xff]  }
   0x6   :  { %v483_v16 = vld [vmem:[%s644_s1 + $0x68] ss:$16 sps:$4 sm:$0xff]   ;;  %v484_v17 = vld [vmem:[%s644_s1 + $0x84] ss:$16 sps:$4 sm:$0xff]   ;;  %v486_v18 = vld [vmem:[%s644_s1 + $0x8c] ss:$16 sps:$4 sm:$0xff]  }
   0x7   :  { %238 = vmatpush1.bf16.msra.mxu0 %v470_v7  ;;  %281 = vmatpush1.bf16.msra.mxu1 %v471_v8  ;;  %v488_v19 = vld [vmem:[%s644_s1 + $0x80] ss:$16 sps:$4 sm:$0xff]   ;;  %v489_v20 = vld [vmem:[%s644_s1 + $0x88] ss:$16 sps:$4 sm:$0xff]   ;;  %v490_v21 = vld [vmem:[%s644_s1 + $0xa4] ss:$16 sps:$4 sm:$0xff]  }
   0x8   :  { %239 = vmatprep.subr.bf16.mxu0 %v472_v9  ;;  %282 = vmatprep.subr.bf16.mxu1 %v474_v10  ;;  %v492_v22 = vld [vmem:[%s644_s1 + $0xac] ss:$16 sps:$4 sm:$0xff]   ;;  %v494_v23 = vld [vmem:[%s644_s1 + $0xa0] ss:$16 sps:$4 sm:$0xff]   ;;  %v495_v24 = vld [vmem:[%s644_s1 + $0xa8] ss:$16 sps:$4 sm:$0xff]  }
   0x9   :  { %v496_v25 = vld [vmem:[%s644_s1 + $0xc4] ss:$16 sps:$4 sm:$0xff]   ;;  %v498_v26 = vld [vmem:[%s644_s1 + $0xcc] ss:$16 sps:$4 sm:$0xff]   ;;  %v500_v27 = vld [vmem:[%s644_s1 + $0xc0] ss:$16 sps:$4 sm:$0xff]  }
   0xa   :  { %v501_v28 = vld [vmem:[%s644_s1 + $0xc8] ss:$16 sps:$4 sm:$0xff]   ;;  %v502_v29 = vld [vmem:[%s644_s1 + $0xe4] ss:$16 sps:$4 sm:$0xff]   ;;  %v504_v30 = vld [vmem:[%s644_s1 + $0xec] ss:$16 sps:$4 sm:$0xff]  }
   0xb   :  { %240 = vmatpush1.bf16.msra.mxu0 %v476_v11  ;;  %283 = vmatpush1.bf16.msra.mxu1 %v477_v12  ;;  %v506_v31 = vld [vmem:[%s644_s1 + $0xe0] ss:$16 sps:$4 sm:$0xff]   ;;  %v507_v32 = vld [vmem:[%s644_s1 + $0xe8] ss:$16 sps:$4 sm:$0xff]   ;;  %v351_v35 = vshrl.u32 %v350_v34, 7 }
   0xc   :  { %241 = vmatprep.subr.bf16.mxu0 %v478_v13  ;;  %284 = vmatprep.subr.bf16.mxu1 %v480_v14  ;;  %v508_v33 = vld [vmem:[%s645_s0] sm:$0xff]  }
   0xd   :  { %v352_v36 = vsub.s32 0, %v351_v35  ;;  %v360_v37 = vsub.s32 2, %v351_v35  ;;  %v348_v38 = vld [vmem:[%s646_s2] sm:$0xf]  ;;  %v356_v39 = vsub.s32 1, %v351_v35  ;;  %v364_v40 = vsub.s32 3, %v351_v35 }
   0xf   :  { %242 = vmatpush1.bf16.msra.mxu0 %v482_v15  ;;  %285 = vmatpush1.bf16.msra.mxu1 %v483_v16  ;;  %v353_v41 = vrot.slane %v348_v38, %v352_v36  ;;  %v361_v42 = vrot.slane %v348_v38, %v360_v37  ;;  %v357_v43 = vrot.slane %v348_v38, %v356_v39 }
  0x10   :  { %243 = vmatprep.subr.bf16.mxu0 %v484_v17  ;;  %286 = vmatprep.subr.bf16.mxu1 %v486_v18  ;;  %v365_v44 = vrot.slane %v348_v38, %v364_v40 }
  0x13   :  { %244 = vmatpush1.bf16.msra.mxu0 %v488_v19  ;;  %287 = vmatpush1.bf16.msra.mxu1 %v489_v20 }
  0x14   :  { %245 = vmatprep.subr.bf16.mxu0 %v490_v21  ;;  %288 = vmatprep.subr.bf16.mxu1 %v492_v22 }
  0x17   :  { %246 = vmatpush1.bf16.msra.mxu0 %v494_v23  ;;  %289 = vmatpush1.bf16.msra.mxu1 %v495_v24 }
  0x18   :  { %247 = vmatprep.subr.bf16.mxu0 %v496_v25  ;;  %290 = vmatprep.subr.bf16.mxu1 %v498_v26 }
  0x1b   :  { %248 = vmatpush1.bf16.msra.mxu0 %v500_v27  ;;  %291 = vmatpush1.bf16.msra.mxu1 %v501_v28 }
  0x1c   :  { %249 = vmatprep.subr.bf16.mxu0 %v502_v29  ;;  %292 = vmatprep.subr.bf16.mxu1 %v504_v30 }
  0x1f   :  { %250 = vmatpush1.bf16.msra.mxu0 %v506_v31  ;;  %293 = vmatpush1.bf16.msra.mxu1 %v507_v32 }
  0x22   :  { %268 = vmatmul.mubr.bf16.vlgmr.msra.gmra.mrb[0].mxu0 %v508_v33  ;;  %311 = vmatmul.mubr.bf16.vlgmr.msra.gmra.mrb[0].mxu1 %v508_v33 }
  0xf5   :  { %v269_v45 = vpop.f32.mrb[0].mxu0  ;;  %v312_v46 = vpop.f32.mrb[0].mxu1 }
  0xf6   :  { %v370_v47 = vadd.f32 %v353_v41, %v269_v45  ;;  %v372_v48 = vadd.f32 %v361_v42, %v312_v46  ;;  %v271_v49 = vpop.f32.mrb[1].mxu0  ;;  %v314_v50 = vpop.f32.mrb[1].mxu1 }
  0xf7   :  { %v371_v51 = vadd.f32 %v357_v43, %v271_v49  ;;  %v373_v52 = vadd.f32 %v365_v44, %v314_v50  ;;  %v273_v53 = vpop.f32.mrb[2].mxu0  ;;  %v316_v54 = vpop.f32.mrb[2].mxu1 }
  0xf8   :  { %v378_v55 = vmax.f32 %v370_v47, 0.0  ;;  %v380_v56 = vmax.f32 %v372_v48, 0.0  ;;  %v374_v57 = vadd.f32 %v353_v41, %v273_v53  ;;  %v376_v58 = vadd.f32 %v361_v42, %v316_v54  ;;  %v275_v59 = vpop.f32.mrb[3].mxu0  ;;  %v318_v60 = vpop.f32.mrb[3].mxu1 }
  0xf9   :  { %v379_v61 = vmax.f32 %v371_v51, 0.0  ;;  %v381_v62 = vmax.f32 %v373_v52, 0.0  ;;  %v375_v63 = vadd.f32 %v357_v43, %v275_v59  ;;  %v377_v0 = vadd.f32 %v365_v44, %v318_v60 }
  0xfa   :  { %v382_v1 = vmax.f32 %v374_v57, 0.0  ;;  %v384_v2 = vmax.f32 %v376_v58, 0.0 }
  0xfb   :  { %v455_v3 = vpack.c.bf16 %v379_v61, %v378_v55  ;;  %v456_v4 = vpack.c.bf16 %v381_v62, %v380_v56  ;;  %v383_v5 = vmax.f32 %v375_v63, 0.0  ;;  %v385_v6 = vmax.f32 %v377_v0, 0.0 }
  0xfd   :  { %410 = vst [vmem:[%s647_s3] sm:$0xff] %v455_v3  ;;  %411 = vst [vmem:[%s647_s3 + $0x8] sm:$0xff] %v456_v4  ;;  %v457_v7 = vpack.c.bf16 %v383_v5, %v382_v1  ;;  %v458_v8 = vpack.c.bf16 %v385_v6, %v384_v2 }
  0xff   :  { %412 = vst [vmem:[%s647_s3 + $0x10] sm:$0xff] %v457_v7  ;;  %413 = vst [vmem:[%s647_s3 + $0x18] sm:$0xff] %v458_v8 }

// kernel: forward_train.44
= control target key start
LH: loop header
LB: loop body
LE: loop exit
PB: predicated region body
PF: predicated region fallthrough
CT: control target
= control target key end

     0   :  { %s679_s1 = inlined_call_operand.vmem [shape: bf16[512,128], index: 1, kind: input, shape index: {}]   ;;  %s680_s0 = inlined_call_operand.vmem [shape: bf16[16,512], index: 0, kind: input, shape index: {}]   ;;  %s681_s2 = inlined_call_operand.vmem [shape: f32[1,128], index: 2, kind: input, shape index: {}]   ;;  %s682_s3 = inlined_call_operand.vmem [shape: bf16[16,128], index: 3, kind: output, shape index: {}]  }
   0x1   :  { %v507_v0 = vld [vmem:[%s679_s1 + $0x40] sm:$0xff]   ;;  %v511_v4 = vld [vmem:[%s679_s1 + $0x48] sm:$0xff]   ;;  %v515_v8 = vld [vmem:[%s679_s1 + $0x50] sm:$0xff]  }
   0x2   :  { %v508_v1 = vld [vmem:[%s679_s1 + $0xc0] sm:$0xff]   ;;  %463 = vmatprep.subr.bf16.mxu0 %v507_v0  ;;  %v512_v5 = vld [vmem:[%s679_s1 + $0xc8] sm:$0xff]   ;;  %v516_v9 = vld [vmem:[%s679_s1 + $0xd0] sm:$0xff]  }
   0x3   :  { %v509_v2 = vld [vmem:[%s679_s1] sm:$0xff]   ;;  %485 = vmatprep.subr.bf16.mxu1 %v508_v1  ;;  %v513_v6 = vld [vmem:[%s679_s1 + $0x8] sm:$0xff]   ;;  %v517_v10 = vld [vmem:[%s679_s1 + $0x10] sm:$0xff]  }
   0x4   :  { %v510_v3 = vld [vmem:[%s679_s1 + $0x80] sm:$0xff]   ;;  %464 = vmatpush3.bf16.msra.mxu0 %v509_v2  ;;  %v514_v7 = vld [vmem:[%s679_s1 + $0x88] sm:$0xff]   ;;  %v518_v11 = vld [vmem:[%s679_s1 + $0x90] sm:$0xff]  }
   0x5   :  { %486 = vmatpush3.bf16.msra.mxu1 %v510_v3  ;;  %465 = vmatprep.subr.bf16.mxu0 %v511_v4  ;;  %v519_v12 = vld [vmem:[%s679_s1 + $0x58] sm:$0xff]   ;;  %v523_v16 = vld [vmem:[%s679_s1 + $0x60] sm:$0xff]   ;;  %v527_v20 = vld [vmem:[%s679_s1 + $0x68] sm:$0xff]  }
   0x6   :  { %487 = vmatprep.subr.bf16.mxu1 %v512_v5  ;;  %v520_v13 = vld [vmem:[%s679_s1 + $0xd8] sm:$0xff]   ;;  %v524_v17 = vld [vmem:[%s679_s1 + $0xe0] sm:$0xff]   ;;  %v528_v21 = vld [vmem:[%s679_s1 + $0xe8] sm:$0xff]  }
   0x7   :  { %v521_v14 = vld [vmem:[%s679_s1 + $0x18] sm:$0xff]   ;;  %v525_v18 = vld [vmem:[%s679_s1 + $0x20] sm:$0xff]   ;;  %v529_v22 = vld [vmem:[%s679_s1 + $0x28] sm:$0xff]  }
   0x8   :  { %466 = vmatpush3.bf16.msra.mxu0 %v513_v6  ;;  %v522_v15 = vld [vmem:[%s679_s1 + $0x98] sm:$0xff]   ;;  %v526_v19 = vld [vmem:[%s679_s1 + $0xa0] sm:$0xff]   ;;  %v530_v23 = vld [vmem:[%s679_s1 + $0xa8] sm:$0xff]  }
   0x9   :  { %488 = vmatpush3.bf16.msra.mxu1 %v514_v7  ;;  %467 = vmatprep.subr.bf16.mxu0 %v515_v8  ;;  %v531_v24 = vld [vmem:[%s679_s1 + $0x70] sm:$0xff]   ;;  %v535_v28 = vld [vmem:[%s679_s1 + $0x78] sm:$0xff]   ;;  %v453_v49 = vld [vmem:[%s681_s2] ss:$0 sm:$0xff] }
   0xa   :  { %489 = vmatprep.subr.bf16.mxu1 %v516_v9  ;;  %v532_v25 = vld [vmem:[%s679_s1 + $0xf0] sm:$0xff]   ;;  %v536_v29 = vld [vmem:[%s679_s1 + $0xf8] sm:$0xff]  }
   0xb   :  { %v533_v26 = vld [vmem:[%s679_s1 + $0x30] sm:$0xff]   ;;  %v537_v30 = vld [vmem:[%s679_s1 + $0x38] sm:$0xff]  }
   0xc   :  { %468 = vmatpush3.bf16.msra.mxu0 %v517_v10  ;;  %v534_v27 = vld [vmem:[%s679_s1 + $0xb0] sm:$0xff]   ;;  %v538_v31 = vld [vmem:[%s679_s1 + $0xb8] sm:$0xff]  }
   0xd   :  { %490 = vmatpush3.bf16.msra.mxu1 %v518_v11  ;;  %469 = vmatprep.subr.bf16.mxu0 %v519_v12  ;;  %v539_v32 = vld [vmem:[%s680_s0] ss:$16 sps:$4 sm:$0xff]   ;;  %v541_v33 = vld [vmem:[%s680_s0 + $0x4] ss:$16 sps:$4 sm:$0xff]   ;;  %v542_v34 = vld [vmem:[%s680_s0 + $0x8] ss:$16 sps:$4 sm:$0xff]  }
   0xe   :  { %491 = vmatprep.subr.bf16.mxu1 %v520_v13  ;;  %v544_v35 = vld [vmem:[%s680_s0 + $0xc] ss:$16 sps:$4 sm:$0xff]   ;;  %335 = vmatprep.mubr.bf16.mxu0 %v541_v33 }
   0xf   :  { %376 = vmatprep.mubr.bf16.mxu1 %v544_v35 }
  0x10   :  { %470 = vmatpush3.bf16.msra.mxu0 %v521_v14 }
  0x11   :  { %492 = vmatpush3.bf16.msra.mxu1 %v522_v15  ;;  %471 = vmatprep.subr.bf16.mxu0 %v523_v16 }
  0x12   :  { %493 = vmatprep.subr.bf16.mxu1 %v524_v17 }
  0x14   :  { %472 = vmatpush3.bf16.msra.mxu0 %v525_v18 }
  0x15   :  { %494 = vmatpush3.bf16.msra.mxu1 %v526_v19  ;;  %473 = vmatprep.subr.bf16.mxu0 %v527_v20 }
  0x16   :  { %495 = vmatprep.subr.bf16.mxu1 %v528_v21 }
  0x18   :  { %474 = vmatpush3.bf16.msra.mxu0 %v529_v22 }
  0x19   :  { %496 = vmatpush3.bf16.msra.mxu1 %v530_v23  ;;  %475 = vmatprep.subr.bf16.mxu0 %v531_v24 }
  0x1a   :  { %497 = vmatprep.subr.bf16.mxu1 %v532_v25 }
  0x1c   :  { %476 = vmatpush3.bf16.msra.mxu0 %v533_v26 }
  0x1d   :  { %498 = vmatpush3.bf16.msra.mxu1 %v534_v27  ;;  %477 = vmatprep.subr.bf16.mxu0 %v535_v28 }
  0x1e   :  { %499 = vmatprep.subr.bf16.mxu1 %v536_v29 }
  0x20   :  { %478 = vmatpush3.bf16.msra.mxu0 %v537_v30 }
  0x21   :  { %500 = vmatpush3.bf16.msra.mxu1 %v538_v31 }
  0x23   :  { %336 = vmatmul.mubr.bf16.vlgmr.msra.gmra.mrb[0].mxu0 %v539_v32 }
  0x24   :  { %377 = vmatmul.mubr.bf16.vlgmr.msra.gmra.mrb[0].mxu1 %v542_v34 }
  0xf6   :  { %v479_v36 = vpop.f32.mrb[0].mxu0 }
  0xf7   :  { %v501_v37 = vpop.f32.mrb[0].mxu1  ;;  %v480_v38 = vpop.f32.mrb[1].mxu0 }
  0xf8   :  { %v481_v39 = vadd.f32 %v480_v38, %v479_v36  ;;  %v502_v40 = vpop.f32.mrb[1].mxu1  ;;  %v482_v41 = vpop.f32.mrb[2].mxu0 }
  0xf9   :  { %v503_v42 = vadd.f32 %v502_v40, %v501_v37  ;;  %v504_v43 = vpop.f32.mrb[2].mxu1  ;;  %v483_v44 = vpop.f32.mrb[3].mxu0 }
  0xfa   :  { %v484_v45 = vadd.f32 %v483_v44, %v482_v41  ;;  %v505_v46 = vpop.f32.mrb[3].mxu1 }
  0xfb   :  { %v379_v47 = vadd.f32 %v503_v42, %v481_v39  ;;  %v506_v48 = vadd.f32 %v505_v46, %v504_v43 }
  0xfd   :  { %v382_v50 = vadd.f32 %v506_v48, %v484_v45  ;;  %v401_v51 = vadd.f32 %v453_v49, %v379_v47 }
  0xff   :  { %v402_v52 = vadd.f32 %v453_v49, %v382_v50 }
 0x101   :  { %v461_v53 = vpack.c.bf16 %v402_v52, %v401_v51 }
 0x103   :  { %462 = vst [vmem:[%s682_s3] sm:$0xff] %v461_v53  }

// kernel: forward_train.77
= control target key start
LH: loop header
LB: loop body
LE: loop exit
PB: predicated region body
PF: predicated region fallthrough
CT: control target
= control target key end

     0   :  { %v197_v1 = vmov 0.0   ;;  %vm198_vm0 = vmmov 0   ;;  %vm20_vm1 = vcmask 408576   ;;  %s258_s0 = inlined_call_operand.vmem [shape: bf16[16,128], index: 0, kind: input, shape index: {}]   ;;  %s259_s1 = inlined_call_operand.vmem [shape: bf16[50,128], index: 1, kind: input, shape index: {}]   ;;  %s260_s2 = inlined_call_operand.vmem [shape: f32[1,50], index: 2, kind: input, shape index: {}]   ;;  %s261_s3 = inlined_call_operand.hbm [shape: f32[16,50], index: 3, kind: output, shape index: {}]  }
   0x1   :  { %v168_v0 = vld [vmem:[%s259_s1] sm:$0xff]   ;;  %151 = vmatprep.subr.bf16.mxu0 %v197_v1  ;;  %159 = vmatprep.mubr.msk.bf16.mxu0 %vm198_vm0, %v197_v1  ;;  %21 = vst.msk [vmem:[#allocation2] sm:$0xff] %vm20_vm1, %v197_v1  ;;  %22 = vst.msk [vmem:[#allocation2 + $0x8] sm:$0xff] %vm20_vm1, %v197_v1 }
   0x2   :  { %152 = vmatpush3.bf16.xpose.msra.mxu0 %v168_v0 }
   0x3   :  { %153 = vmatprep.subr.bf16.mxu0 %v197_v1 }
   0x4   :  { %8 = vsyncpa [#allocation4], 0  ;;  %v169_v2 = vld [vmem:[%s259_s1 + $0x8] sm:$0xff]   ;;  %v170_v3 = vld [vmem:[%s259_s1 + $0x10] sm:$0xff]   ;;  %s199_s23 = smov [#allocation3]  }
   0x5   :  { %v171_v4 = vld [vmem:[%s259_s1 + $0x18] ss:$0 sps:$4 sm:$0x11]   ;;  %v172_v5 = vld [vmem:[%s258_s0] sm:$0xff]   ;;  %s129_s24 = sshll.u32 %s199_s23, 4  ;;  %s130_s24 = int_to_ptr.vmem [resolvable:$true] %s129_s24 }
   0x6   :  { %v145_v14 = vld [vmem:[%s260_s2] ss:$0 sm:$0xff]  ;;  %s173_s0 = scalar_lea.vmem %s130_s24, 256  ;;  %p178_p1 = scmp.lt.s32.totalorder %s130_s24, %s130_s24 }
   0x7   :  { %p174_p0 = scmp.ne.s32.totalorder %s130_s24, %s173_s0  ;;  %p179_p2 = scmp.lt.s32.totalorder %s173_s0, %s173_s0 }
   0x8   :  { %v32_v6 = vld [vmem:[#allocation2] sm:$0xff]  ;;  %v33_v8 = vld [vmem:[#allocation2 + $0x8] sm:$0xff] }
   0x9   :  { %p180_p3 = por %p179_p2, %p178_p1 }
   0xa   :  { %154 = vmatpush3.bf16.xpose.msra.mxu0 %v169_v2 }
   0xb   :  { %155 = vmatprep.subr.bf16.mxu0 %v197_v1  ;;  %p181_p4 = pnand %p180_p3, %p174_p0 }
  0x12   :  { %156 = vmatpush3.bf16.xpose.msra.mxu0 %v170_v3 }
  0x13   :  { %157 = vmatprep.subr.bf16.mxu0 %v197_v1 }
  0x1a   :  { %158 = vmatpush3.bf16.xpose.msra.mxu0 %v171_v4 }
  0x21   :  { %160 = vmatmul.mubr.bf16.vlgmr.msra.gmra.mrb[0].mxu0 %v172_v5 }
  0xf4   :  { %v96_v7 = vpop.f32.mrb[0].mxu0 }
  0xf5   :  { %v103_v9 = vadd.f32 %v96_v7, %v32_v6  ;;  %v161_v10 = vpop.f32.mrb[1].mxu0 }
  0xf6   :  { %v99_v11 = vpop.f32.mrb[2].mxu0 }
  0xf7   :  { %106 = vst.msk [vmem:[#allocation2] sm:$0xff] %vm20_vm1, %v103_v9  ;;  %v104_v12 = vadd.f32 %v99_v11, %v33_v8  ;;  %v162_v13 = vpop.f32.mrb[3].mxu0 }
  0xf9   :  { %107 = vst.msk [vmem:[#allocation2 + $0x8] sm:$0xff] %vm20_vm1, %v104_v12 }
  0xfe   :  { %v111_v15 = vld [vmem:[#allocation2] sm:$0xff] }
  0xff   :  { %v120_v16 = vadd.f32 %v145_v14, %v111_v15 }
 0x100   :  { %v112_v17 = vld [vmem:[#allocation2 + $0x8] sm:$0xff] }
 0x101   :  { %v121_v18 = vadd.f32 %v145_v14, %v112_v17  ;;  %122 = vst.msk [vmem:[#allocation3] sm:$0xff] %vm20_vm1, %v120_v16 }
 0x103   :  { %123 = vst.msk [vmem:[#allocation3 + $0x8] sm:$0xff] %vm20_vm1, %v121_v18 }
 0x104   :  { %184 = shalt.err (!%p181_p4)
}
 0x105   :  { %s185_s26 = scalar_lea.hbm %s261_s3, 256 }
 0x106   :  { %p186_p5 = scmp.ne.s32.totalorder %s261_s3, %s185_s26  ;;  %p189_p6 = scmp.lt.u32.totalorder %s185_s26, %s261_s3 }
 0x108   :  { %p191_p7 = pnand %p189_p6, %p186_p5 }
 0x10a   :  { %194 = shalt.err (!%p191_p7)
}
 0x10b   :  { %s200_s4 = smov 128   ;;  %s201_s5 = smov 8  }
 0x10c   :  { %135 = dma.vmem_to_hbm [thread:$0]  %s130_s24, 256, %s261_s3, [#allocation4], %s200_s4, %s200_s4, %s201_s5  }
 0x10d   :  { %195 = dma.done.wait [#allocation4], 256  }
 0x10e   :  { %196 = vsyncadd [#allocation4], 4294967040 }
 0x10f   :  { %139 = vsyncpa [#allocation4], 1 }

// kernel: forward_train.54
= control target key start
LH: loop header
LB: loop body
LE: loop exit
PB: predicated region body
PF: predicated region fallthrough
CT: control target
= control target key end

     0   :  { %s1692_s18 = smov 0   ;;  %s2172_s0 = inlined_call_operand.vmem [shape: bf16[2,8,384], index: 0, kind: input, shape index: {}, may-alias: {0,1,2}]   ;;  %s2173_s1 = inlined_call_operand.vmem [shape: bf16[2,8,384], index: 1, kind: input, shape index: {}, may-alias: {0,1,2}]   ;;  %s2174_s2 = inlined_call_operand.vmem [shape: bf16[2,8,384], index: 2, kind: input, shape index: {}, may-alias: {0,1,2}]   ;;  %s2175_s3 = inlined_call_operand.vmem [shape: f32[9,32], index: 3, kind: input, shape index: {}]   ;;  %s2176_s4 = inlined_call_operand.vmem [shape: s8[2,8,8], index: 4, kind: input, shape index: {}]   ;;  %s2177_s5 = inlined_call_operand.vmem [shape: bf16[2,8,128], index: 5, kind: output, shape index: {}]  }
   0x1 LB: > { %s1485_s19 = sadd.s32 4294967295, %s1654_s18   ;;  %p1489_p0 = scmp.ge.s32.totalorder %s1654_s18, 1  ;;  %s1654_s18 = sphi %s1692_s18, %s15_s18  }
   0x2   : > { %p218_p1 = scmp.lt.s32.totalorder %s1654_s18, 3 }
   0x4   : > { %p219_p2 = pnand %p1489_p0, %p218_p1 }
   0x5   : > { %p261_p3 = scmp.lt.s32.totalorder (!%p219_p2), %s1485_s19, 1  ;;  %v298_v0 = vlaneseq (!%p219_p2)  ;;  %v1656_v1 = vmov (!%p219_p2), 0.0   ;;  %vm1657_vm0 = vmmov (!%p219_p2), 0   ;;  %vm324_vm1 = vcmask (!%p219_p2), 261120   ;;  %v294_v3 = vld [vmem:[%s2175_s3] sm:$0xff] (!%p219_p2)  ;;  %s1658_s6 = smov (!%p219_p2), 32  }
   0x6   : > { %222 = sbr.rel (%p219_p2) target bundleno = 2610 (0xa32), region = 40  ;;  %1544 = vmatprep.subr.bf16.mxu0 (!%p219_p2), %v1656_v1  ;;  %1550 = vmatprep.subr.bf16.mxu1 (!%p219_p2), %v1656_v1  ;;  %v1742_v16 = vld [vmem:[%s2175_s3 + $0x8] ss:$0 sm:$0xff] (!%p219_p2)  ;;  %vm496_vm13 = vcmask (!%p219_p2), 64512   ;;  %s1660_s11 = smov (!%p219_p2), 96   ;;  %vm512_vm14 = vcmask (!%p219_p2), 1043456  }
   0x7   : > { %1546 = vmatprep.mubr.msk.bf16.mxu0 (!%p219_p2), %vm1657_vm0, %v1656_v1  ;;  %1552 = vmatprep.mubr.msk.bf16.mxu1 (!%p219_p2), %vm1657_vm0, %v1656_v1  ;;  %v1709_v2 = vshrl.u32 (!%p219_p2), %v298_v0, 7  ;;  %v301_v57 = vand.u32 (!%p219_p2), 127, %v298_v0  ;;  %s1661_s15 = smov (!%p219_p2), 64   ;;  %vm557_vm15 = vcmask (!%p219_p2), 257024  }
   0x9   : > { %v320_v4 = vsub.s32 (!%p219_p2), 0, %v1709_v2  ;;  %v424_v5 = vsub.s32 (!%p219_p2), 1, %v1709_v2  ;;  %v444_v6 = vsub.s32 (!%p219_p2), 3, %v1709_v2  ;;  %v434_v7 = vsub.s32 (!%p219_p2), 2, %v1709_v2 }
   0xa   : > { %v454_v8 = vsub.s32 (!%p219_p2), 4, %v1709_v2  ;;  %v464_v9 = vsub.s32 (!%p219_p2), 5, %v1709_v2  ;;  %v474_v10 = vsub.s32 (!%p219_p2), 6, %v1709_v2  ;;  %v484_v11 = vsub.s32 (!%p219_p2), 7, %v1709_v2 }
   0xb   : > { %v1733_v12 = vrot.slane (!%p219_p2), %v294_v3, %v320_v4  ;;  %v1735_v13 = vrot.slane (!%p219_p2), %v294_v3, %v424_v5  ;;  %v1744_v17 = vrot.slane (!%p219_p2), %v294_v3, %v444_v6  ;;  %v1746_v18 = vrot.slane (!%p219_p2), %v294_v3, %v434_v7 }
   0xc   : > { %v1755_v22 = vrot.slane (!%p219_p2), %v294_v3, %v454_v8  ;;  %v1757_v23 = vrot.slane (!%p219_p2), %v294_v3, %v464_v9  ;;  %v1759_v24 = vrot.slane (!%p219_p2), %v294_v3, %v474_v10  ;;  %v1761_v25 = vrot.slane (!%p219_p2), %v294_v3, %v484_v11 }
   0xd   : > { %s2181_s19 = smov (!%p261_p3, %s1485_s19), 1  ;;  %v1823_v58 = vsub.s32 %v1709_v2, %v301_v57  ;;  %v1659_v4 = vmov 0  }
   0xe   : > { %s1715_s22 = smul.u32 12, %s2181_s19  ;;  %s1493_s7 = sshll.u32 %s2181_s19, 1 }
   0xf   : > { %s281_s10 = scalar_lea.vmem %s2176_s4, %s1493_s7  ;;  %vm303_vm3 = vcmp.le.s32.totalorder %v1823_v58, 4294967292  ;;  %vm304_vm4 = vcmp.ge.s32.totalorder %v1823_v58, 4  ;;  %vm306_vm5 = vcmp.eq.s32.totalorder %v1823_v58, 4294967293  ;;  %vm308_vm6 = vcmp.eq.s32.totalorder %v1823_v58, 4294967294  ;;  %s1494_s16 = sshll.u32 %s2181_s19, 2 }
  0x10   : > { %s265_s25 = scalar_lea.vmem %s2172_s0, %s1715_s22  ;;  %s1433_s28 = scalar_lea.vmem %s2173_s1, %s1715_s22  ;;  %v296_v62 = vld [vmem:[%s281_s10] sm:$0x3]  ;;  %vm310_vm7 = vcmp.eq.s32.totalorder %v1823_v58, 4294967295  ;;  %vm311_vm8 = vcmp.eq.s32.totalorder %v1823_v58, 0  ;;  %vm313_vm9 = vcmp.eq.s32.totalorder %v1823_v58, 1  ;;  %vm315_vm10 = vcmp.eq.s32.totalorder %v1823_v58, 2 }
  0x11   : > { %v289_v14 = vld [vmem:[%s265_s25] sm:$0xf]  ;;  %v1737_v15 = vld [vmem:[%s1433_s28 + $0x4] sm:$0xf]  ;;  %vm297_vm2 = vnez %v296_v62  ;;  %vm317_vm11 = vcmp.eq.s32.totalorder %v1823_v58, 3  ;;  %s1437_s14 = scalar_lea.vmem %s2174_s2, %s1715_s22  ;;  %s1951_s21 = scalar_lea.vmem %s2177_s5, %s1494_s16 }
  0x12   : > { %v1748_v19 = vunpack.c.l.bf16 %v289_v14  ;;  %v1751_v20 = vunpack.c.l.bf16 %v1737_v15  ;;  %v329_v21 = vsel %vm324_vm1, %v1737_v15, 0  ;;  %v492_v5 = vsel %vm297_vm2, 16843009, %v1659_v4 }
  0x13   : > { %1545 = vmatpush3.bf16.xpose.msra.mxu0 %v329_v21  ;;  %1551 = vmatpush3.bf16.xpose.msra.mxu1 %v329_v21  ;;  %vm1382_vm2 = vcmask 1044224  }
  0x14   : > { %v322_v26 = vmul.f32 %v1733_v12, %v1748_v19  ;;  %v375_v27 = vmul.f32 %v1742_v16, %v1748_v19  ;;  %v1768_v28 = vrot.slane %v1751_v20, 3  ;;  %v426_v29 = vmul.f32 %v1735_v13, %v1748_v19  ;;  %1562 = vmatprep.subr.bf16.mxu1 %v1656_v1  ;;  %1556 = vmatprep.subr.bf16.mxu0 %v1656_v1 }
  0x15   : > { %v1775_v30 = vrot.slane %v1751_v20, 1  ;;  %v446_v31 = vmul.f32 %v1744_v17, %v1748_v19  ;;  %v1780_v32 = vrot.slane %v1751_v20, 2  ;;  %v436_v33 = vmul.f32 %v1746_v18, %v1748_v19 }
  0x16   : > { %v323_v34 = vpack.c.bf16 %v322_v26, %v322_v26  ;;  %v376_v35 = vpack.c.bf16 %v375_v27, %v375_v27  ;;  %v427_v36 = vmul.f32 %v426_v29, %v1768_v28  ;;  %v456_v37 = vmul.f32 %v1755_v22, %v1748_v19 }
  0x17   : > { %v447_v38 = vmul.f32 %v446_v31, %v1775_v30  ;;  %v437_v39 = vmul.f32 %v436_v33, %v1780_v32  ;;  %v1790_v40 = vrot.slane %v1751_v20, 7  ;;  %v466_v41 = vmul.f32 %v1757_v23, %v1748_v19 }
  0x18   : > { %v428_v42 = vsel %vm324_vm1, %v427_v36, 0.0  ;;  %v457_v43 = vmul.f32 %v456_v37, %v1751_v20  ;;  %v1797_v44 = vrot.slane %v1751_v20, 6  ;;  %v476_v45 = vmul.f32 %v1759_v24, %v1748_v19 }
  0x19   : > { %429 = vadd.xlane.f32.xlu0 %v428_v42  ;;  %v448_v46 = vsel %vm324_vm1, %v447_v38, 0.0  ;;  %v438_v47 = vsel %vm324_vm1, %v437_v39, 0.0  ;;  %v467_v48 = vmul.f32 %v466_v41, %v1790_v40  ;;  %v1807_v49 = vrot.slane %v1751_v20, 5 }
  0x1a   : > { %1547 = vmatmul.mubr.msk.bf16.vlgmr.msra.gmra.mrb[0].mxu0 %vm324_vm1, %v323_v34  ;;  %1553 = vmatmul.mubr.msk.bf16.vlgmr.msra.gmra.mrb[0].mxu1 %vm324_vm1, %v376_v35  ;;  %v486_v50 = vmul.f32 %v1761_v25, %v1748_v19  ;;  %v458_v51 = vsel %vm324_vm1, %v457_v43, 0.0  ;;  %v477_v52 = vmul.f32 %v476_v45, %v1797_v44  ;;  %v493_v27 = vunpack.c.0.s8 %v492_v5 }
  0x1b   : > { %449 = vadd.xlane.f32.xlu1 %v448_v46  ;;  %1564 = vmatprep.mubr.msk.bf16.mxu1 %vm1657_vm0, %v1656_v1  ;;  %v468_v53 = vsel %vm324_vm1, %v467_v48, 0.0  ;;  %v1868_v46 = vcombine.low %v1737_v15, %v1737_v15 }
  0x1c   : > { %1558 = vmatprep.mubr.msk.bf16.mxu0 %vm1657_vm0, %v1656_v1  ;;  %v487_v54 = vmul.f32 %v486_v50, %v1807_v49  ;;  %v478_v55 = vsel %vm324_vm1, %v477_v52, 0.0  ;;  %vm1854_vm12 = vcmp.ne.s32.totalorder %v493_v27, 0 }
  0x1d   : > { %439 = vadd.xlane.f32.xlu0 %v438_v47 }
  0x1e   : > { %v488_v56 = vsel %vm324_vm1, %v487_v54, 0.0 }
  0x1f   : > { %459 = vadd.xlane.f32.xlu1 %v458_v51 }
  0x21   : > { %469 = vadd.xlane.f32.xlu0 %v468_v53 }
  0x23   : > { %479 = vadd.xlane.f32.xlu1 %v478_v55 }
  0x25   : > { %489 = vadd.xlane.f32.xlu0 %v488_v56 }
  0x3b   : > { %560 = vrot.lane.b32.xlu0 %v1733_v12, %s1658_s6 }
  0x3f   : > { %571 = vrot.lane.b32.xlu0 %v1868_v46, %s1660_s11 }
  0xa6   : > { %v430_v59 = vpop.xlane.xlu0 %429 }
  0xa8   : > { %v450_v60 = vpop.xlane.xlu1 %449 }
  0xaa   : > { %v440_v61 = vpop.xlane.xlu0 %439 }
  0xac   : > { %v460_v63 = vpop.xlane.xlu1 %459 }
  0xae   : > { %v470_v0 = vpop.xlane.xlu0 %469 }
  0xb0   : > { %v480_v33 = vpop.xlane.xlu1 %479 }
  0xb2   : > { %v490_v35 = vpop.xlane.xlu0 %489 }
  0xb6   : > { %v561_v43 = vpop.permute.xlu0 %560 }
  0xb7   : > { %v563_v45 = vmul.f32 %v561_v43, %v1748_v19 }
  0xb9   : > { %v564_v47 = vpack.c.bf16 %v563_v45, %v563_v45 }
  0xba   : > { %v572_v48 = vpop.permute.xlu0 %571 }
  0xbb   : > { %566 = vrot.lane.b32.xlu0 %v564_v47, %s1660_s11  ;;  %v1876_v50 = vsel %vm324_vm1, %v572_v48, 0 }
  0xbc   : > { %1563 = vmatpush3.bf16.xpose.msra.mxu1 %v1876_v50 }
  0xbd   : > { %1574 = vmatprep.subr.bf16.mxu1 %v1656_v1 }
  0xed   : > { %v365_v2 = vpop.f32.mrb[0].mxu0  ;;  %v414_v3 = vpop.f32.mrb[0].mxu1 }
  0xee   : > { %v420_v6 = vsel %vm303_vm3, %v365_v2, 0.0  ;;  %v1548_v7 = vpop.f32.mrb[1].mxu0  ;;  %v1554_v8 = vpop.f32.mrb[1].mxu1 }
  0xef   : > { %v421_v9 = vsel %vm304_vm4, %v414_v3, %v420_v6  ;;  %v368_v10 = vpop.f32.mrb[2].mxu0  ;;  %v417_v11 = vpop.f32.mrb[2].mxu1 }
  0xf0   : > { %v431_v14 = vsel %vm306_vm5, %v430_v59, %v421_v9  ;;  %v1549_v21 = vpop.f32.mrb[3].mxu0  ;;  %v1555_v26 = vpop.f32.mrb[3].mxu1 }
  0xf1   : > { %v441_v29 = vsel %vm308_vm6, %v440_v61, %v431_v14 }
  0xf2   : > { %v451_v31 = vsel %vm310_vm7, %v450_v60, %v441_v29  ;;  %v1904_v60 = vld [vmem:[%s1437_s14 + $0x8] sm:$0xf] }
  0xf3   : > { %v461_v34 = vsel %vm311_vm8, %v460_v63, %v451_v31  ;;  %v514_v61 = vsel %vm512_vm14, %v1904_v60, 0 }
  0xf4   : > { %v471_v36 = vsel %vm313_vm9, %v470_v0, %v461_v34  ;;  %1557 = vmatpush3.bf16.msra.mxu0 %v514_v61 }
  0xf5   : > { %v481_v38 = vsel %vm315_vm10, %v480_v33, %v471_v36  ;;  %1568 = vmatprep.subr.bf16.mxu0 %v1656_v1 }
  0xf6   : > { %v491_v39 = vsel %vm317_vm11, %v490_v35, %v481_v38 }
  0xf7   : > { %v495_v41 = vsel %vm1854_vm12, %v491_v39, -1e+30 }
  0xf8   : > { %v497_v42 = vsel %vm496_vm13, %v495_v41, -inf }
  0xf9   : > { %498 = vmax.xlane.f32.xlu1 %v497_v42 }
 0x10a   : > { %620 = vrot.lane.b32.xlu1 %v1742_v16, %s1658_s6 }
 0x12d   : > { %v567_v15 = vpop.permute.xlu0 %566 }
 0x12e   : > { %1565 = vmatmul.mubr.msk.bf16.vlgmr.msra.gmra.mrb[4].mxu1 %vm324_vm1, %v567_v15 }
 0x12f   : > { %1576 = vmatprep.mubr.msk.bf16.mxu1 %vm1657_vm0, %v1656_v1 }
 0x186   : > { %v499_v51 = vpop.xlane.xlu1 %498 }
 0x187   : > { %v500_v52 = vsub.f32 %v495_v41, %v499_v51 }
 0x189   : > { %v501_v53 = vmul.f32 1.442695, %v500_v52 }
 0x18a   : > { %v621_v54 = vpop.permute.xlu1 %620 }
 0x18b   : > { %1632 = vpow2.f32 %v501_v53  ;;  %v623_v55 = vmul.f32 %v621_v54, %v1748_v19 }
 0x18d   : > { %v624_v56 = vpack.c.bf16 %v623_v55, %v623_v55 }
 0x18f   : > { %626 = vrot.lane.b32.xlu0 %v624_v56, %s1660_s11 }
 0x193   : > { %674 = vrot.lane.b32.xlu0 %v1735_v13, %s1658_s6 }
 0x195   : > { %v1633_v57 = vpop.eup %1632 }
 0x196   : > { %v503_v59 = vsel %vm496_vm13, %v1633_v57, 0.0 }
 0x197   : > { %504 = vadd.xlane.f32.xlu1 %v503_v59  ;;  %688 = vrot.lane.b32.xlu0 %v1746_v18, %s1658_s6 }
 0x19b   : > { %702 = vrot.lane.b32.xlu0 %v1744_v17, %s1658_s6 }
 0x19f   : > { %716 = vrot.lane.b32.xlu0 %v1755_v22, %s1658_s6 }
 0x1a3   : > { %730 = vrot.lane.b32.xlu0 %v1757_v23, %s1658_s6 }
 0x1a7   : > { %758 = vrot.lane.b32.xlu0 %v1761_v25, %s1658_s6 }
 0x1a8   : > { %744 = vrot.lane.b32.xlu1 %v1759_v24, %s1658_s6 }
 0x201   : > { %v627_v62 = vpop.permute.xlu0 %626  ;;  %v613_v42 = vpop.f32.mrb[4].mxu1 }
 0x202   : > { %v1566_v43 = vpop.f32.mrb[5].mxu1 }
 0x203   : > { %v616_v45 = vpop.f32.mrb[6].mxu1 }
 0x204   : > { %v1567_v47 = vpop.f32.mrb[7].mxu1 }
 0x205   : > { %v675_v63 = vpop.permute.xlu0 %674  ;;  %v1979_v47 = vcombine.low %v1904_v60, %v1904_v60 }
 0x206   : > { %v677_v0 = vmul.f32 %v675_v63, %v1748_v19 }
 0x208   : > { %v678_v2 = vmul.f32 %v677_v0, %v1768_v28 }
 0x209   : > { %v689_v3 = vpop.permute.xlu0 %688 }
 0x20a   : > { %v691_v4 = vmul.f32 %v689_v3, %v1748_v19  ;;  %680 = vrot.lane.b32.xlu0 %v678_v2, %s1660_s11 }
 0x20c   : > { %v692_v5 = vmul.f32 %v691_v4, %v1780_v32 }
 0x20d   : > { %v703_v6 = vpop.permute.xlu0 %702 }
 0x20e   : > { %v705_v7 = vmul.f32 %v703_v6, %v1748_v19  ;;  %694 = vrot.lane.b32.xlu0 %v692_v5, %s1660_s11  ;;  %v671_v6 = vsel %vm303_vm3, %v613_v42, 0.0 }
 0x210   : > { %v706_v8 = vmul.f32 %v705_v7, %v1775_v30 }
 0x211   : > { %v717_v9 = vpop.permute.xlu0 %716 }
 0x212   : > { %v719_v10 = vmul.f32 %v717_v9, %v1748_v19  ;;  %708 = vrot.lane.b32.xlu0 %v706_v8, %s1660_s11 }
 0x214   : > { %v720_v11 = vmul.f32 %v719_v10, %v1751_v20 }
 0x215   : > { %v731_v14 = vpop.permute.xlu0 %730 }
 0x216   : > { %v733_v21 = vmul.f32 %v731_v14, %v1748_v19  ;;  %722 = vrot.lane.b32.xlu0 %v720_v11, %s1660_s11 }
 0x218   : > { %v734_v26 = vmul.f32 %v733_v21, %v1790_v40 }
 0x219   : > { %v759_v27 = vpop.permute.xlu0 %758 }
 0x21a   : > { %736 = vrot.lane.b32.xlu1 %v734_v26, %s1660_s11  ;;  %v761_v29 = vmul.f32 %v759_v27, %v1748_v19 }
 0x21c   : > { %v762_v31 = vmul.f32 %v761_v29, %v1807_v49 }
 0x21e   : > { %764 = vrot.lane.b32.xlu1 %v762_v31, %s1660_s11 }
 0x224   : > { %v505_v33 = vpop.xlane.xlu1 %504 }
 0x225   : > { %1634 = vrcp.f32 %v505_v33 }
 0x228   : > { %v745_v34 = vpop.permute.xlu1 %744 }
 0x229   : > { %v747_v35 = vmul.f32 %v745_v34, %v1748_v19 }
 0x22b   : > { %v748_v36 = vmul.f32 %v747_v35, %v1797_v44 }
 0x22d   : > { %750 = vrot.lane.b32.xlu0 %v748_v36, %s1660_s11 }
 0x22f   : > { %v1635_v38 = vpop.eup %1634 }
 0x230   : > { %v507_v39 = vmul.f32 %v1635_v38, %v1633_v57 }
 0x232   : > { %v508_v41 = vpack.c.bf16 %v507_v39, %v507_v39 }
 0x234   : > { %1559 = vmatmul.mubr.msk.bf16.vlgmr.msra.gmra.mrb[4].mxu0 %vm496_vm13, %v508_v41 }
 0x235   : > { %1569 = vmatpush3.bf16.xpose.msra.mxu0 %v1876_v50  ;;  %1570 = vmatprep.mubr.msk.bf16.mxu0 %vm1657_vm0, %v1656_v1 }
 0x236   : > { %1580 = vmatprep.subr.bf16.mxu0 %v1656_v1 }
 0x23c   : > { %1571 = vmatmul.mubr.msk.bf16.vlgmr.msra.gmra.mrb[8].mxu0 %vm324_vm1, %v627_v62 }
 0x23d   : > { %1582 = vmatprep.mubr.msk.bf16.mxu0 %vm1657_vm0, %v1656_v1 }
 0x27c   : > { %v681_v48 = vpop.permute.xlu0 %680 }
 0x27d   : > { %v683_v15 = vsel %vm324_vm1, %v681_v48, 0.0 }
 0x27e   : > { %684 = vadd.xlane.f32.xlu0 %v683_v15 }
 0x280   : > { %v695_v51 = vpop.permute.xlu0 %694 }
 0x281   : > { %v697_v50 = vsel %vm324_vm1, %v695_v51, 0.0 }
 0x282   : > { %698 = vadd.xlane.f32.xlu1 %v697_v50 }
 0x284   : > { %v709_v52 = vpop.permute.xlu0 %708 }
 0x285   : > { %v711_v53 = vsel %vm324_vm1, %v709_v52, 0.0 }
 0x286   : > { %712 = vadd.xlane.f32.xlu0 %v711_v53 }
 0x288   : > { %v723_v54 = vpop.permute.xlu0 %722 }
 0x289   : > { %v725_v55 = vsel %vm324_vm1, %v723_v54, 0.0 }
 0x28a   : > { %726 = vadd.xlane.f32.xlu0 %v725_v55 }
 0x28c   : > { %v737_v56 = vpop.permute.xlu1 %736 }
 0x28d   : > { %v739_v57 = vsel %vm324_vm1, %v737_v56, 0.0 }
 0x28e   : > { %740 = vadd.xlane.f32.xlu1 %v739_v57 }
 0x290   : > { %v765_v59 = vpop.permute.xlu1 %764 }
 0x291   : > { %v767_v61 = vsel %vm324_vm1, %v765_v59, 0.0 }
 0x292   : > { %768 = vadd.xlane.f32.xlu1 %v767_v61 }
 0x29f   : > { %v751_v62 = vpop.permute.xlu0 %750 }
 0x2a0   : > { %v753_v63 = vsel %vm324_vm1, %v751_v62, 0.0 }
 0x2a1   : > { %754 = vadd.xlane.f32.xlu0 %v753_v63 }
 0x2a3   : > { %844 = vrot.lane.b32.xlu1 %v1733_v12, %s1661_s15 }
 0x307   : > { %v550_v0 = vpop.f32.mrb[4].mxu0 }
 0x308   : > { %v556_v2 = vpack.c.bf16 %v550_v0, %v550_v0  ;;  %v1560_v3 = vpop.f32.mrb[5].mxu0 }
 0x309   : > { %v553_v4 = vpop.f32.mrb[6].mxu0 }
 0x30a   : > { %558 = vst.msk [vmem:[%s1951_s21] sm:$0xf] %vm557_vm15, %v556_v2  ;;  %v1561_v5 = vpop.f32.mrb[7].mxu0 }
 0x30b   : > { %v685_v14 = vpop.xlane.xlu0 %684 }
 0x30f   : > { %v665_v7 = vpop.f32.mrb[8].mxu0  ;;  %v699_v26 = vpop.xlane.xlu1 %698 }
 0x310   : > { %v672_v8 = vsel %vm304_vm4, %v665_v7, %v671_v6  ;;  %v1572_v9 = vpop.f32.mrb[9].mxu0 }
 0x311   : > { %v668_v10 = vpop.f32.mrb[10].mxu0  ;;  %v686_v27 = vsel %vm306_vm5, %v685_v14, %v672_v8 }
 0x312   : > { %v1573_v11 = vpop.f32.mrb[11].mxu0  ;;  %v700_v29 = vsel %vm308_vm6, %v699_v26, %v686_v27 }
 0x313   : > { %v713_v21 = vpop.xlane.xlu0 %712 }
 0x314   : > { %v714_v34 = vsel %vm310_vm7, %v713_v21, %v700_v29 }
 0x317   : > { %v727_v33 = vpop.xlane.xlu0 %726 }
 0x318   : > { %v728_v35 = vsel %vm311_vm8, %v727_v33, %v714_v34 }
 0x31b   : > { %v741_v31 = vpop.xlane.xlu1 %740 }
 0x31c   : > { %v742_v38 = vsel %vm313_vm9, %v741_v31, %v728_v35 }
 0x31f   : > { %v769_v36 = vpop.xlane.xlu1 %768 }
 0x323   : > { %v845_v48 = vpop.permute.xlu1 %844 }
 0x324   : > { %v847_v15 = vmul.f32 %v845_v48, %v1748_v19 }
 0x326   : > { %v848_v51 = vpack.c.bf16 %v847_v15, %v847_v15 }
 0x32e   : > { %v755_v39 = vpop.xlane.xlu0 %754 }
 0x32f   : > { %v756_v41 = vsel %vm315_vm10, %v755_v39, %v742_v38 }
 0x330   : > { %v770_v42 = vsel %vm317_vm11, %v769_v36, %v756_v41 }
 0x331   : > { %v771_v43 = vsel %vm1854_vm12, %v770_v42, -1e+30 }
 0x332   : > { %v772_v45 = vsel %vm496_vm13, %v771_v43, -inf }
 0x333   : > { %773 = vmax.xlane.f32.xlu0 %v772_v45 }
 0x349   : > { %900 = vrot.lane.b32.xlu0 %v1742_v16, %s1661_s15 }
 0x34d   : > { %787 = vrot.lane.b32.xlu0 %v1979_v47, %s1660_s11 }
 0x351   : > { %852 = vrot.lane.b32.xlu0 %v1868_v46, %s1661_s15 }
 0x355   : > { %850 = vrot.lane.b32.xlu0 %v848_v51, %s1661_s15 }
 0x3c0   : > { %v774_v50 = vpop.xlane.xlu0 %773 }
 0x3c1   : > { %v775_v52 = vsub.f32 %v771_v43, %v774_v50 }
 0x3c3   : > { %v776_v53 = vmul.f32 1.442695, %v775_v52 }
 0x3c4   : > { %v901_v54 = vpop.permute.xlu0 %900 }
 0x3c5   : > { %1636 = vpow2.f32 %v776_v53  ;;  %v903_v60 = vmul.f32 %v901_v54, %v1748_v19 }
 0x3c7   : > { %v904_v55 = vpack.c.bf16 %v903_v60, %v903_v60 }
 0x3c8   : > { %v788_v56 = vpop.permute.xlu0 %787 }
 0x3c9   : > { %906 = vrot.lane.b32.xlu0 %v904_v55, %s1661_s15  ;;  %v793_v57 = vsel %vm512_vm14, %v788_v56, 0 }
 0x3ca   : > { %1575 = vmatpush3.bf16.msra.mxu1 %v793_v57 }
 0x3cb   : > { %1586 = vmatprep.subr.bf16.mxu1 %v1656_v1 }
 0x3cc   : > { %v853_v59 = vpop.permute.xlu0 %852 }
 0x3cd   : > { %953 = vrot.lane.b32.xlu0 %v1735_v13, %s1661_s15  ;;  %v858_v61 = vsel %vm324_vm1, %v853_v59, 0 }
 0x3ce   : > { %1581 = vmatpush3.bf16.xpose.msra.mxu0 %v858_v61 }
 0x3cf   : > { %v1637_v62 = vpop.eup %1636  ;;  %1592 = vmatprep.subr.bf16.mxu0 %v1656_v1 }
 0x3d0   : > { %v778_v63 = vsel %vm496_vm13, %v1637_v62, 0.0  ;;  %v851_v0 = vpop.permute.xlu0 %850 }
 0x3d1   : > { %779 = vadd.xlane.f32.xlu1 %v778_v63  ;;  %966 = vrot.lane.b32.xlu0 %v1746_v18, %s1661_s15 }
 0x3d5   : > { %979 = vrot.lane.b32.xlu0 %v1744_v17, %s1661_s15  ;;  %1583 = vmatmul.mubr.msk.bf16.vlgmr.msra.gmra.mrb[12].mxu0 %vm324_vm1, %v851_v0 }
 0x3d6   : > { %1594 = vmatprep.mubr.msk.bf16.mxu0 %vm1657_vm0, %v1656_v1 }
 0x3d9   : > { %992 = vrot.lane.b32.xlu0 %v1755_v22, %s1661_s15 }
 0x3dd   : > { %1018 = vrot.lane.b32.xlu0 %v1759_v24, %s1661_s15 }
 0x3e1   : > { %1031 = vrot.lane.b32.xlu0 %v1761_v25, %s1661_s15 }
 0x3e2   : > { %1005 = vrot.lane.b32.xlu1 %v1757_v23, %s1661_s15 }
 0x43b   : > { %v907_v2 = vpop.permute.xlu0 %906 }
 0x43f   : > { %v954_v3 = vpop.permute.xlu0 %953 }
 0x440   : > { %v956_v4 = vmul.f32 %v954_v3, %v1748_v19 }
 0x442   : > { %v957_v5 = vmul.f32 %v956_v4, %v1768_v28 }
 0x443   : > { %v967_v6 = vpop.permute.xlu0 %966 }
 0x444   : > { %v969_v7 = vmul.f32 %v967_v6, %v1748_v19  ;;  %959 = vrot.lane.b32.xlu0 %v957_v5, %s1661_s15 }
 0x446   : > { %v970_v8 = vmul.f32 %v969_v7, %v1780_v32 }
 0x447   : > { %v980_v9 = vpop.permute.xlu0 %979 }
 0x448   : > { %v982_v10 = vmul.f32 %v980_v9, %v1748_v19  ;;  %972 = vrot.lane.b32.xlu0 %v970_v8, %s1661_s15 }
 0x44a   : > { %v983_v11 = vmul.f32 %v982_v10, %v1775_v30 }
 0x44b   : > { %v993_v14 = vpop.permute.xlu0 %992 }
 0x44c   : > { %v995_v21 = vmul.f32 %v993_v14, %v1748_v19  ;;  %985 = vrot.lane.b32.xlu1 %v983_v11, %s1661_s15 }
 0x44e   : > { %v996_v26 = vmul.f32 %v995_v21, %v1751_v20 }
 0x44f   : > { %v1019_v27 = vpop.permute.xlu0 %1018 }
 0x450   : > { %998 = vrot.lane.b32.xlu0 %v996_v26, %s1661_s15  ;;  %v1021_v29 = vmul.f32 %v1019_v27, %v1748_v19 }
 0x452   : > { %v1022_v31 = vmul.f32 %v1021_v29, %v1797_v44 }
 0x453   : > { %v1032_v34 = vpop.permute.xlu0 %1031 }
 0x454   : > { %1024 = vrot.lane.b32.xlu0 %v1022_v31, %s1661_s15  ;;  %v1034_v38 = vmul.f32 %v1032_v34, %v1748_v19 }
 0x456   : > { %v1035_v41 = vmul.f32 %v1034_v38, %v1807_v49 }
 0x45e   : > { %v780_v33 = vpop.xlane.xlu1 %779 }
 0x45f   : > { %1638 = vrcp.f32 %v780_v33 }
 0x462   : > { %v1006_v35 = vpop.permute.xlu1 %1005 }
 0x463   : > { %v1008_v36 = vmul.f32 %v1006_v35, %v1748_v19 }
 0x465   : > { %v1009_v39 = vmul.f32 %v1008_v36, %v1790_v40 }
 0x467   : > { %1011 = vrot.lane.b32.xlu1 %v1009_v39, %s1661_s15 }
 0x469   : > { %v1639_v42 = vpop.eup %1638 }
 0x46a   : > { %v782_v43 = vmul.f32 %v1639_v42, %v1637_v62 }
 0x46b   : > { %1037 = vrot.lane.b32.xlu1 %v1035_v41, %s1661_s15 }
 0x46c   : > { %v783_v45 = vpack.c.bf16 %v782_v43, %v782_v43 }
 0x46e   : > { %1577 = vmatmul.mubr.msk.bf16.vlgmr.msra.gmra.mrb[8].mxu1 %vm496_vm13, %v783_v45 }
 0x46f   : > { %1587 = vmatpush3.bf16.xpose.msra.mxu1 %v858_v61  ;;  %1588 = vmatprep.mubr.msk.bf16.mxu1 %vm1657_vm0, %v1656_v1 }
 0x470   : > { %1598 = vmatprep.subr.bf16.mxu1 %v1656_v1 }
 0x476   : > { %1589 = vmatmul.mubr.msk.bf16.vlgmr.msra.gmra.mrb[12].mxu1 %vm324_vm1, %v907_v2 }
 0x477   : > { %1600 = vmatprep.mubr.msk.bf16.mxu1 %vm1657_vm0, %v1656_v1 }
 0x4a8   : > { %v894_v48 = vpop.f32.mrb[12].mxu0 }
 0x4a9   : > { %v1584_v15 = vpop.f32.mrb[13].mxu0  ;;  %v951_v8 = vsel %vm303_vm3, %v894_v48, 0.0 }
 0x4aa   : > { %v897_v51 = vpop.f32.mrb[14].mxu0 }
 0x4ab   : > { %v1585_v50 = vpop.f32.mrb[15].mxu0 }
 0x4b6   : > { %v960_v52 = vpop.permute.xlu0 %959 }
 0x4b7   : > { %v962_v53 = vsel %vm324_vm1, %v960_v52, 0.0 }
 0x4b8   : > { %963 = vadd.xlane.f32.xlu0 %v962_v53 }
 0x4ba   : > { %v973_v54 = vpop.permute.xlu0 %972 }
 0x4bb   : > { %v975_v60 = vsel %vm324_vm1, %v973_v54, 0.0 }
 0x4bc   : > { %976 = vadd.xlane.f32.xlu1 %v975_v60 }
 0x4be   : > { %v986_v55 = vpop.permute.xlu1 %985 }
 0x4bf   : > { %v988_v56 = vsel %vm324_vm1, %v986_v55, 0.0 }
 0x4c0   : > { %989 = vadd.xlane.f32.xlu0 %v988_v56 }
 0x4c2   : > { %v999_v57 = vpop.permute.xlu0 %998 }
 0x4c3   : > { %v1001_v59 = vsel %vm324_vm1, %v999_v57, 0.0 }
 0x4c4   : > { %1002 = vadd.xlane.f32.xlu0 %v1001_v59 }
 0x4c6   : > { %v1025_v61 = vpop.permute.xlu0 %1024 }
 0x4c7   : > { %v1027_v62 = vsel %vm324_vm1, %v1025_v61, 0.0 }
 0x4c8   : > { %1028 = vadd.xlane.f32.xlu0 %v1027_v62 }
 0x4d9   : > { %v1012_v63 = vpop.permute.xlu1 %1011 }
 0x4da   : > { %v1014_v0 = vsel %vm324_vm1, %v1012_v63, 0.0 }
 0x4db   : > { %1015 = vadd.xlane.f32.xlu1 %v1014_v0 }
 0x4dd   : > { %v1038_v2 = vpop.permute.xlu1 %1037 }
 0x4de   : > { %v1040_v3 = vsel %vm324_vm1, %v1038_v2, 0.0 }
 0x4df   : > { %1041 = vadd.xlane.f32.xlu1 %v1040_v3 }
 0x4f0   : > { %1114 = vrot.lane.b32.xlu1 %v1733_v12, %s1660_s11 }
 0x541   : > { %v2048_v4 = vpop.f32.mrb[8].mxu1 }
 0x542   : > { %v1578_v5 = vpop.f32.mrb[9].mxu1 }
 0x543   : > { %v832_v6 = vpop.f32.mrb[10].mxu1 }
 0x544   : > { %v1579_v7 = vpop.f32.mrb[11].mxu1 }
 0x545   : > { %v964_v26 = vpop.xlane.xlu0 %963 }
 0x549   : > { %v945_v9 = vpop.f32.mrb[12].mxu1  ;;  %v977_v29 = vpop.xlane.xlu1 %976 }
 0x54a   : > { %v952_v10 = vsel %vm304_vm4, %v945_v9, %v951_v8  ;;  %v1590_v11 = vpop.f32.mrb[13].mxu1 }
 0x54b   : > { %v948_v14 = vpop.f32.mrb[14].mxu1  ;;  %v965_v12 = vsel %vm306_vm5, %v964_v26, %v952_v10 }
 0x54c   : > { %v1591_v21 = vpop.f32.mrb[15].mxu1  ;;  %v978_v31 = vsel %vm308_vm6, %v977_v29, %v965_v12 }
 0x54d   : > { %v990_v27 = vpop.xlane.xlu0 %989 }
 0x54e   : > { %v991_v34 = vsel %vm310_vm7, %v990_v27, %v978_v31 }
 0x551   : > { %v1003_v33 = vpop.xlane.xlu0 %1002 }
 0x552   : > { %v1004_v35 = vsel %vm311_vm8, %v1003_v33, %v991_v34 }
 0x555   : > { %v1029_v39 = vpop.xlane.xlu0 %1028 }
 0x568   : > { %v1016_v36 = vpop.xlane.xlu1 %1015 }
 0x569   : > { %v1017_v38 = vsel %vm313_vm9, %v1016_v36, %v1004_v35 }
 0x56a   : > { %v1030_v41 = vsel %vm315_vm10, %v1029_v39, %v1017_v38 }
 0x56c   : > { %v1042_v42 = vpop.xlane.xlu1 %1041 }
 0x56d   : > { %v1043_v43 = vsel %vm317_vm11, %v1042_v42, %v1030_v41 }
 0x56e   : > { %v1044_v45 = vsel %vm1854_vm12, %v1043_v43, -1e+30 }
 0x56f   : > { %v1045_v48 = vsel %vm496_vm13, %v1044_v45, -inf }
 0x570   : > { %1046 = vmax.xlane.f32.xlu0 %v1045_v48  ;;  %v1115_v15 = vpop.permute.xlu1 %1114 }
 0x571   : > { %v1117_v51 = vmul.f32 %v1115_v15, %v1748_v19  ;;  %v1517_v15 = vpack.c.bf16 %v2048_v4, %v2048_v4 }
 0x573   : > { %v1118_v50 = vpack.c.bf16 %v1117_v51, %v1117_v51 }
 0x586   : > { %1170 = vrot.lane.b32.xlu0 %v1742_v16, %s1660_s11 }
 0x58a   : > { %1057 = vrot.lane.b32.xlu0 %v1979_v47, %s1661_s15 }
 0x58e   : > { %1122 = vrot.lane.b32.xlu0 %v1868_v46, %s1658_s6 }
 0x592   : > { %1120 = vrot.lane.b32.xlu0 %v1118_v50, %s1658_s6 }
 0x5fd   : > { %v1047_v52 = vpop.xlane.xlu0 %1046 }
 0x5fe   : > { %v1048_v53 = vsub.f32 %v1044_v45, %v1047_v52 }
 0x600   : > { %v1049_v54 = vmul.f32 1.442695, %v1048_v53 }
 0x601   : > { %v1171_v60 = vpop.permute.xlu0 %1170 }
 0x602   : > { %1640 = vpow2.f32 %v1049_v54  ;;  %v1173_v55 = vmul.f32 %v1171_v60, %v1748_v19 }
 0x604   : > { %v1174_v16 = vpack.c.bf16 %v1173_v55, %v1173_v55 }
 0x605   : > { %v1058_v56 = vpop.permute.xlu0 %1057 }
 0x606   : > { %1176 = vrot.lane.b32.xlu0 %v1174_v16, %s1658_s6  ;;  %v1063_v57 = vsel %vm512_vm14, %v1058_v56, 0 }
 0x607   : > { %1593 = vmatpush3.bf16.msra.mxu0 %v1063_v57 }
 0x608   : > { %1604 = vmatprep.subr.bf16.mxu0 %v1656_v1 }
 0x609   : > { %v1123_v59 = vpop.permute.xlu0 %1122 }
 0x60a   : > { %1223 = vrot.lane.b32.xlu0 %v1735_v13, %s1660_s11  ;;  %v1128_v46 = vsel %vm324_vm1, %v1123_v59, 0 }
 0x60b   : > { %1599 = vmatpush3.bf16.xpose.msra.mxu1 %v1128_v46 }
 0x60c   : > { %v1641_v61 = vpop.eup %1640  ;;  %1610 = vmatprep.subr.bf16.mxu1 %v1656_v1 }
 0x60d   : > { %v1051_v62 = vsel %vm496_vm13, %v1641_v61, 0.0  ;;  %v1121_v63 = vpop.permute.xlu0 %1120 }
 0x60e   : > { %1052 = vadd.xlane.f32.xlu1 %v1051_v62  ;;  %1236 = vrot.lane.b32.xlu0 %v1746_v18, %s1660_s11 }
 0x612   : > { %1249 = vrot.lane.b32.xlu0 %v1744_v17, %s1660_s11  ;;  %1601 = vmatmul.mubr.msk.bf16.vlgmr.msra.gmra.mrb[16].mxu1 %vm324_vm1, %v1121_v63 }
 0x613   : > { %1612 = vmatprep.mubr.msk.bf16.mxu1 %vm1657_vm0, %v1656_v1 }
 0x616   : > { %1262 = vrot.lane.b32.xlu0 %v1755_v22, %s1660_s11 }
 0x61a   : > { %1288 = vrot.lane.b32.xlu0 %v1759_v24, %s1660_s11 }
 0x61e   : > { %1301 = vrot.lane.b32.xlu0 %v1761_v25, %s1660_s11 }
 0x61f   : > { %1275 = vrot.lane.b32.xlu1 %v1757_v23, %s1660_s11 }
 0x678   : > { %v1177_v13 = vpop.permute.xlu0 %1176 }
 0x67c   : > { %v1224_v18 = vpop.permute.xlu0 %1223 }
 0x67d   : > { %v1226_v17 = vmul.f32 %v1224_v18, %v1748_v19 }
 0x67f   : > { %v1227_v0 = vmul.f32 %v1226_v17, %v1768_v28 }
 0x680   : > { %v1237_v2 = vpop.permute.xlu0 %1236 }
 0x681   : > { %v1239_v3 = vmul.f32 %v1237_v2, %v1748_v19  ;;  %1229 = vrot.lane.b32.xlu0 %v1227_v0, %s1658_s6 }
 0x683   : > { %v1240_v22 = vmul.f32 %v1239_v3, %v1780_v32 }
 0x684   : > { %v1250_v24 = vpop.permute.xlu0 %1249 }
 0x685   : > { %v1252_v5 = vmul.f32 %v1250_v24, %v1748_v19  ;;  %1242 = vrot.lane.b32.xlu0 %v1240_v22, %s1658_s6 }
 0x687   : > { %v1253_v23 = vmul.f32 %v1252_v5, %v1775_v30 }
 0x688   : > { %v1263_v25 = vpop.permute.xlu0 %1262 }
 0x689   : > { %v1265_v6 = vmul.f32 %v1263_v25, %v1748_v19  ;;  %1255 = vrot.lane.b32.xlu1 %v1253_v23, %s1658_s6 }
 0x68b   : > { %v1266_v28 = vmul.f32 %v1265_v6, %v1751_v20 }
 0x68c   : > { %v1289_v7 = vpop.permute.xlu0 %1288 }
 0x68d   : > { %1268 = vrot.lane.b32.xlu0 %v1266_v28, %s1658_s6  ;;  %v1291_v8 = vmul.f32 %v1289_v7, %v1748_v19 }
 0x68f   : > { %v1292_v32 = vmul.f32 %v1291_v8, %v1797_v44 }
 0x690   : > { %v1302_v10 = vpop.permute.xlu0 %1301 }
 0x691   : > { %1294 = vrot.lane.b32.xlu0 %v1292_v32, %s1658_s6  ;;  %v1304_v14 = vmul.f32 %v1302_v10, %v1748_v19 }
 0x693   : > { %v1305_v20 = vmul.f32 %v1304_v14, %v1807_v49 }
 0x69b   : > { %v1053_v9 = vpop.xlane.xlu1 %1052 }
 0x69c   : > { %1642 = vrcp.f32 %v1053_v9 }
 0x69f   : > { %v1276_v30 = vpop.permute.xlu1 %1275 }
 0x6a0   : > { %v1278_v11 = vmul.f32 %v1276_v30, %v1748_v19 }
 0x6a2   : > { %v1279_v21 = vmul.f32 %v1278_v11, %v1790_v40 }
 0x6a4   : > { %1281 = vrot.lane.b32.xlu1 %v1279_v21, %s1658_s6 }
 0x6a6   : > { %v1643_v26 = vpop.eup %1642 }
 0x6a7   : > { %v1055_v27 = vmul.f32 %v1643_v26, %v1641_v61 }
 0x6a8   : > { %1307 = vrot.lane.b32.xlu1 %v1305_v20, %s1658_s6 }
 0x6a9   : > { %v1056_v44 = vpack.c.bf16 %v1055_v27, %v1055_v27 }
 0x6ab   : > { %1595 = vmatmul.mubr.msk.bf16.vlgmr.msra.gmra.mrb[16].mxu0 %vm496_vm13, %v1056_v44 }
 0x6ac   : > { %1605 = vmatpush3.bf16.xpose.msra.mxu0 %v1128_v46  ;;  %1606 = vmatprep.mubr.msk.bf16.mxu0 %vm1657_vm0, %v1656_v1  ;;  %vm842_vm0 = vcmask 519424  }
 0x6b3   : > { %1607 = vmatmul.mubr.msk.bf16.vlgmr.msra.gmra.mrb[20].mxu0 %vm324_vm1, %v1177_v13 }
 0x6e5   : > { %v1164_v19 = vpop.f32.mrb[16].mxu1 }
 0x6e6   : > { %v1602_v12 = vpop.f32.mrb[17].mxu1  ;;  %v1221_v54 = vsel %vm303_vm3, %v1164_v19, 0.0 }
 0x6e7   : > { %v1167_v40 = vpop.f32.mrb[18].mxu1 }
 0x6e8   : > { %v1603_v29 = vpop.f32.mrb[19].mxu1 }
 0x6f3   : > { %v1230_v49 = vpop.permute.xlu0 %1229 }
 0x6f4   : > { %v1232_v31 = vsel %vm324_vm1, %v1230_v49, 0.0 }
 0x6f5   : > { %1233 = vadd.xlane.f32.xlu0 %v1232_v31 }
 0x6f7   : > { %v1243_v33 = vpop.permute.xlu0 %1242 }
 0x6f8   : > { %v1245_v34 = vsel %vm324_vm1, %v1243_v33, 0.0 }
 0x6f9   : > { %1246 = vadd.xlane.f32.xlu1 %v1245_v34 }
 0x6fb   : > { %v1256_v35 = vpop.permute.xlu1 %1255 }
 0x6fc   : > { %v1258_v36 = vsel %vm324_vm1, %v1256_v35, 0.0 }
 0x6fd   : > { %1259 = vadd.xlane.f32.xlu0 %v1258_v36 }
 0x6ff   : > { %v1269_v38 = vpop.permute.xlu0 %1268 }
 0x700   : > { %v1271_v1 = vsel %vm324_vm1, %v1269_v38, 0.0 }
 0x701   : > { %1272 = vadd.xlane.f32.xlu0 %v1271_v1 }
 0x703   : > { %v1295_v39 = vpop.permute.xlu0 %1294 }
 0x704   : > { %v1297_v41 = vsel %vm324_vm1, %v1295_v39, 0.0 }
 0x705   : > { %1298 = vadd.xlane.f32.xlu0 %v1297_v41 }
 0x716   : > { %v1282_v42 = vpop.permute.xlu1 %1281 }
 0x717   : > { %v1284_v43 = vsel %vm324_vm1, %v1282_v42, 0.0 }
 0x718   : > { %1285 = vadd.xlane.f32.xlu1 %v1284_v43 }
 0x71a   : > { %v1308_v45 = vpop.permute.xlu1 %1307 }
 0x71b   : > { %v1310_v48 = vsel %vm324_vm1, %v1308_v45, 0.0  ;;  %vm1112_vm1 = vcmask 781824  }
 0x71c   : > { %1311 = vadd.xlane.f32.xlu1 %v1310_v48 }
 0x72d   : > { %839 = vrot.lane.b32.xlu1 %v1517_v15, %s1658_s6 }
 0x731   : > { %1327 = vrot.lane.b32.xlu1 %v1979_v47, %s1658_s6 }
 0x77e   : > { %v1099_v51 = vpop.f32.mrb[16].mxu0 }
 0x77f   : > { %v1596_v50 = vpop.f32.mrb[17].mxu0  ;;  %v1518_v58 = vpack.c.bf16 %v1099_v51, %v1099_v51 }
 0x780   : > { %v1102_v52 = vpop.f32.mrb[18].mxu0 }
 0x781   : > { %v1597_v53 = vpop.f32.mrb[19].mxu0 }
 0x782   : > { %v1234_v4 = vpop.xlane.xlu0 %1233 }
 0x786   : > { %v1215_v60 = vpop.f32.mrb[20].mxu0  ;;  %v1247_v46 = vpop.xlane.xlu1 %1246 }
 0x787   : > { %v1222_v55 = vsel %vm304_vm4, %v1215_v60, %v1221_v54  ;;  %v1608_v16 = vpop.f32.mrb[21].mxu0 }
 0x788   : > { %v1218_v56 = vpop.f32.mrb[22].mxu0  ;;  %v1235_v47 = vsel %vm306_vm5, %v1234_v4, %v1222_v55 }
 0x789   : > { %v1609_v57 = vpop.f32.mrb[23].mxu0  ;;  %v1248_v61 = vsel %vm308_vm6, %v1247_v46, %v1235_v47 }
 0x78a   : > { %v1260_v59 = vpop.xlane.xlu0 %1259 }
 0x78b   : > { %v1261_v63 = vsel %vm310_vm7, %v1260_v59, %v1248_v61 }
 0x78e   : > { %v1273_v62 = vpop.xlane.xlu0 %1272 }
 0x78f   : > { %v1274_v13 = vsel %vm311_vm8, %v1273_v62, %v1261_v63 }
 0x792   : > { %v1299_v0 = vpop.xlane.xlu0 %1298 }
 0x7a5   : > { %v1286_v18 = vpop.xlane.xlu1 %1285 }
 0x7a6   : > { %v1287_v17 = vsel %vm313_vm9, %v1286_v18, %v1274_v13 }
 0x7a7   : > { %v1300_v2 = vsel %vm315_vm10, %v1299_v0, %v1287_v17 }
 0x7a9   : > { %v1312_v3 = vpop.xlane.xlu1 %1311 }
 0x7aa   : > { %v1313_v22 = vsel %vm317_vm11, %v1312_v3, %v1300_v2 }
 0x7ab   : > { %v1314_v24 = vsel %vm1854_vm12, %v1313_v22, -1e+30 }
 0x7ac   : > { %v1315_v5 = vsel %vm496_vm13, %v1314_v24, -inf }
 0x7ad   : > { %v840_v23 = vpop.permute.xlu1 %839  ;;  %1316 = vmax.xlane.f32.xlu0 %v1315_v5 }
 0x7ae   : > { %843 = vst.msk [vmem:[%s1951_s21] sm:$0xf] %vm842_vm0, %v840_v23 }
 0x7b1   : > { %v1328_v32 = vpop.permute.xlu1 %1327 }
 0x7b2   : > { %v1333_v37 = vsel %vm512_vm14, %v1328_v32, 0 }
 0x7b3   : > { %1611 = vmatpush3.bf16.msra.mxu1 %v1333_v37 }
 0x83a   : > { %v1317_v25 = vpop.xlane.xlu0 %1316 }
 0x83b   : > { %v1318_v6 = vsub.f32 %v1314_v24, %v1317_v25 }
 0x83d   : > { %v1319_v28 = vmul.f32 1.442695, %v1318_v6 }
 0x83f   : > { %1644 = vpow2.f32 %v1319_v28 }
 0x849   : > { %v1645_v7 = vpop.eup %1644 }
 0x84a   : > { %v1321_v8 = vsel %vm496_vm13, %v1645_v7, 0.0 }
 0x84b   : > { %1322 = vadd.xlane.f32.xlu0 %v1321_v8 }
 0x861   : > { %1109 = vrot.lane.b32.xlu0 %v1518_v58, %s1661_s15 }
 0x8d8   : > { %v1323_v9 = vpop.xlane.xlu0 %1322 }
 0x8d9   : > { %1646 = vrcp.f32 %v1323_v9 }
 0x8dc   : > { %v1110_v10 = vpop.permute.xlu0 %1109 }
 0x8dd   : > { %1113 = vst.msk [vmem:[%s1951_s21] sm:$0xf] %vm1112_vm1, %v1110_v10 }
 0x8e3   : > { %v1647_v30 = vpop.eup %1646 }
 0x8e4   : > { %v1325_v11 = vmul.f32 %v1647_v30, %v1645_v7 }
 0x8e6   : > { %v1326_v14 = vpack.c.bf16 %v1325_v11, %v1325_v11 }
 0x8e8   : > { %1613 = vmatmul.mubr.msk.bf16.vlgmr.msra.gmra.mrb[20].mxu1 %vm496_vm13, %v1326_v14 }
 0x9bb   : > { %v1369_v21 = vpop.f32.mrb[20].mxu1 }
 0x9bc   : > { %v1519_v20 = vpack.c.bf16 %v1369_v21, %v1369_v21  ;;  %v1614_v26 = vpop.f32.mrb[21].mxu1 }
 0x9bd   : > { %v1372_v27 = vpop.f32.mrb[22].mxu1 }
 0x9be   : > { %1379 = vrot.lane.b32.xlu1 %v1519_v20, %s1660_s11  ;;  %v1615_v44 = vpop.f32.mrb[23].mxu1 }
 0xa30   : > { %v1380_v19 = vpop.permute.xlu1 %1379 }
 0xa31   : > { %1383 = vst.msk [vmem:[%s1951_s21] sm:$0xf] %vm1382_vm2, %v1380_v19 }
 0xa32 PF: > { %s15_s18 = sadd.s32 1, %s1654_s18  }
 0xa33   : > { %p12_p4 = scmp.ge.s32.totalorder %s15_s18, 4  }
 0xa35   :  { %14 = sbr.rel (!%p12_p4) target bundleno = 1 (0x1), region = 79 }

// kernel: forward_train.59
= control target key start
LH: loop header
LB: loop body
LE: loop exit
PB: predicated region body
PF: predicated region fallthrough
CT: control target
= control target key end

     0   :  { %s1681_s18 = smov 0   ;;  %s2167_s0 = inlined_call_operand.vmem [shape: bf16[2,8,128], index: 0, kind: input, shape index: {}]   ;;  %s2168_s1 = inlined_call_operand.vmem [shape: bf16[2,8,256], index: 1, kind: input, shape index: {}, may-alias: {1,2}]   ;;  %s2169_s2 = inlined_call_operand.vmem [shape: bf16[2,8,256], index: 2, kind: input, shape index: {}, may-alias: {1,2}]   ;;  %s2170_s3 = inlined_call_operand.vmem [shape: f32[9,32], index: 3, kind: input, shape index: {}]   ;;  %s2171_s4 = inlined_call_operand.vmem [shape: s8[2,1,8], index: 4, kind: input, shape index: {}]   ;;  %s2172_s5 = inlined_call_operand.vmem [shape: bf16[2,8,128], index: 5, kind: output, shape index: {}]  }
   0x1 LB: > { %s1473_s19 = sadd.s32 4294967295, %s1643_s18   ;;  %p1477_p0 = scmp.ge.s32.totalorder %s1643_s18, 1  ;;  %s1643_s18 = sphi %s1681_s18, %s15_s18  }
   0x2   : > { %p215_p1 = scmp.lt.s32.totalorder %s1643_s18, 3 }
   0x4   : > { %p216_p2 = pnand %p1477_p0, %p215_p1 }
   0x5   : > { %p255_p3 = scmp.lt.s32.totalorder (!%p216_p2), %s1473_s19, 1  ;;  %v289_v0 = vlaneseq (!%p216_p2)  ;;  %v1645_v1 = vmov (!%p216_p2), 0.0   ;;  %vm1646_vm0 = vmmov (!%p216_p2), 0   ;;  %vm315_vm1 = vcmask (!%p216_p2), 261120   ;;  %v285_v3 = vld [vmem:[%s2170_s3] sm:$0xff] (!%p216_p2)  ;;  %s1647_s7 = smov (!%p216_p2), 32  }
   0x6   : > { %219 = sbr.rel (%p216_p2) target bundleno = 2610 (0xa32), region = 40  ;;  %1534 = vmatprep.subr.bf16.mxu0 (!%p216_p2), %v1645_v1  ;;  %1540 = vmatprep.subr.bf16.mxu1 (!%p216_p2), %v1645_v1  ;;  %v1732_v15 = vld [vmem:[%s2170_s3 + $0x8] ss:$0 sm:$0xff] (!%p216_p2)  ;;  %v1648_v61 = vmov (!%p216_p2), 0   ;;  %vm493_vm14 = vcmask (!%p216_p2), 64512   ;;  %s1649_s11 = smov (!%p216_p2), 96  }
   0x7   : > { %1536 = vmatprep.mubr.msk.bf16.mxu0 (!%p216_p2), %vm1646_vm0, %v1645_v1  ;;  %1542 = vmatprep.mubr.msk.bf16.mxu1 (!%p216_p2), %vm1646_vm0, %v1645_v1  ;;  %v1698_v2 = vshrl.u32 (!%p216_p2), %v289_v0, 7  ;;  %v292_v57 = vand.u32 (!%p216_p2), 127, %v289_v0  ;;  %vm509_vm15 = vcmask (!%p216_p2), 1043456   ;;  %s1650_s15 = smov (!%p216_p2), 64  }
   0x9   : > { %v311_v4 = vsub.s32 (!%p216_p2), 0, %v1698_v2  ;;  %v415_v5 = vsub.s32 (!%p216_p2), 1, %v1698_v2  ;;  %v435_v6 = vsub.s32 (!%p216_p2), 3, %v1698_v2  ;;  %v425_v7 = vsub.s32 (!%p216_p2), 2, %v1698_v2 }
   0xa   : > { %v445_v8 = vsub.s32 (!%p216_p2), 4, %v1698_v2  ;;  %v455_v9 = vsub.s32 (!%p216_p2), 5, %v1698_v2  ;;  %v465_v10 = vsub.s32 (!%p216_p2), 6, %v1698_v2  ;;  %v475_v11 = vsub.s32 (!%p216_p2), 7, %v1698_v2 }
   0xb   : > { %v1727_v14 = vrot.slane (!%p216_p2), %v285_v3, %v311_v4  ;;  %v1734_v16 = vrot.slane (!%p216_p2), %v285_v3, %v415_v5  ;;  %v1736_v17 = vrot.slane (!%p216_p2), %v285_v3, %v435_v6  ;;  %v1738_v18 = vrot.slane (!%p216_p2), %v285_v3, %v425_v7 }
   0xc   : > { %v1747_v22 = vrot.slane (!%p216_p2), %v285_v3, %v445_v8  ;;  %v1749_v23 = vrot.slane (!%p216_p2), %v285_v3, %v455_v9  ;;  %v1751_v24 = vrot.slane (!%p216_p2), %v285_v3, %v465_v10  ;;  %v1753_v25 = vrot.slane (!%p216_p2), %v285_v3, %v475_v11 }
   0xd   : > { %s2174_s19 = smov (!%p255_p3, %s1473_s19), 1  ;;  %v1815_v58 = vsub.s32 %v1698_v2, %v292_v57 }
   0xe   : > { %s1478_s22 = sshll.u32 %s2174_s19, 2  ;;  %s1505_s23 = sshll.u32 %s2174_s19, 3 }
   0xf   : > { %s258_s26 = scalar_lea.vmem %s2167_s0, %s1478_s22  ;;  %s263_s29 = scalar_lea.vmem %s2168_s1, %s1505_s23  ;;  %vm294_vm4 = vcmp.le.s32.totalorder %v1815_v58, 4294967292  ;;  %vm295_vm5 = vcmp.ge.s32.totalorder %v1815_v58, 4  ;;  %vm297_vm6 = vcmp.eq.s32.totalorder %v1815_v58, 4294967293  ;;  %vm299_vm7 = vcmp.eq.s32.totalorder %v1815_v58, 4294967294 }
  0x10   : > { %v280_v12 = vld [vmem:[%s258_s26] sm:$0xf]  ;;  %s272_s10 = scalar_lea.vmem %s2171_s4, %s2174_s19  ;;  %vm301_vm8 = vcmp.eq.s32.totalorder %v1815_v58, 4294967295  ;;  %vm302_vm9 = vcmp.eq.s32.totalorder %v1815_v58, 0  ;;  %vm304_vm10 = vcmp.eq.s32.totalorder %v1815_v58, 1  ;;  %vm306_vm11 = vcmp.eq.s32.totalorder %v1815_v58, 2  ;;  %s1426_s14 = scalar_lea.vmem %s2169_s2, %s1505_s23 }
  0x11   : > { %v1723_v13 = vld [vmem:[%s263_s29] sm:$0xf]  ;;  %v1740_v19 = vunpack.c.l.bf16 %v280_v12  ;;  %vm308_vm12 = vcmp.eq.s32.totalorder %v1815_v58, 3  ;;  %s1946_s20 = scalar_lea.vmem %s2172_s5, %s1478_s22 }
  0x12   : > { %v1743_v20 = vunpack.c.l.bf16 %v1723_v13  ;;  %v320_v21 = vsel %vm315_vm1, %v1723_v13, 0  ;;  %v287_v59 = vld [vmem:[%s272_s10] sm:$0x1] }
  0x13   : > { %1535 = vmatpush3.bf16.xpose.msra.mxu0 %v320_v21  ;;  %1541 = vmatpush3.bf16.xpose.msra.mxu1 %v320_v21  ;;  %v313_v26 = vmul.f32 %v1727_v14, %v1740_v19  ;;  %v366_v27 = vmul.f32 %v1732_v15, %v1740_v19  ;;  %v417_v29 = vmul.f32 %v1734_v16, %v1740_v19 }
  0x14   : > { %v1760_v28 = vrot.slane %v1743_v20, 3  ;;  %1552 = vmatprep.subr.bf16.mxu1 %v1645_v1  ;;  %1546 = vmatprep.subr.bf16.mxu0 %v1645_v1  ;;  %v1767_v30 = vrot.slane %v1743_v20, 1  ;;  %v437_v31 = vmul.f32 %v1736_v17, %v1740_v19  ;;  %v1772_v32 = vrot.slane %v1743_v20, 2 }
  0x15   : > { %v427_v33 = vmul.f32 %v1738_v18, %v1740_v19  ;;  %v314_v34 = vpack.c.bf16 %v313_v26, %v313_v26  ;;  %v367_v35 = vpack.c.bf16 %v366_v27, %v366_v27  ;;  %v447_v37 = vmul.f32 %v1747_v22, %v1740_v19 }
  0x16   : > { %v418_v36 = vmul.f32 %v417_v29, %v1760_v28  ;;  %v438_v38 = vmul.f32 %v437_v31, %v1767_v30  ;;  %v1782_v40 = vrot.slane %v1743_v20, 7  ;;  %v457_v41 = vmul.f32 %v1749_v23, %v1740_v19 }
  0x17   : > { %v428_v39 = vmul.f32 %v427_v33, %v1772_v32  ;;  %v448_v43 = vmul.f32 %v447_v37, %v1743_v20  ;;  %v1789_v44 = vrot.slane %v1743_v20, 6  ;;  %v467_v45 = vmul.f32 %v1751_v24, %v1740_v19 }
  0x18   : > { %v419_v42 = vsel %vm315_vm1, %v418_v36, 0.0  ;;  %v439_v46 = vsel %vm315_vm1, %v438_v38, 0.0  ;;  %v458_v48 = vmul.f32 %v457_v41, %v1782_v40  ;;  %v1799_v49 = vrot.slane %v1743_v20, 5 }
  0x19   : > { %420 = vadd.xlane.f32.xlu0 %v419_v42  ;;  %v429_v47 = vsel %vm315_vm1, %v428_v39, 0.0  ;;  %v477_v50 = vmul.f32 %v1753_v25, %v1740_v19  ;;  %440 = vadd.xlane.f32.xlu1 %v439_v46  ;;  %v449_v51 = vsel %vm315_vm1, %v448_v43, 0.0  ;;  %v468_v52 = vmul.f32 %v467_v45, %v1789_v44 }
  0x1a   : > { %1537 = vmatmul.mubr.msk.bf16.vlgmr.msra.gmra.mrb[0].mxu0 %vm315_vm1, %v314_v34  ;;  %1543 = vmatmul.mubr.msk.bf16.vlgmr.msra.gmra.mrb[0].mxu1 %vm315_vm1, %v367_v35  ;;  %v459_v53 = vsel %vm315_vm1, %v458_v48, 0.0  ;;  %vm288_vm2 = vnez %v287_v59 }
  0x1b   : > { %1554 = vmatprep.mubr.msk.bf16.mxu1 %vm1646_vm0, %v1645_v1  ;;  %1548 = vmatprep.mubr.msk.bf16.mxu0 %vm1646_vm0, %v1645_v1  ;;  %v478_v54 = vmul.f32 %v477_v50, %v1799_v49  ;;  %v469_v55 = vsel %vm315_vm1, %v468_v52, 0.0  ;;  %v483_v62 = vsel %vm288_vm2, 16843009, %v1648_v61  ;;  %vm554_vm2 = vcmask 257024  }
  0x1c   : > { %v484_v5 = vunpack.c.0.s8 %v483_v62 }
  0x1d   : > { %430 = vadd.xlane.f32.xlu0 %v429_v47  ;;  %450 = vadd.xlane.f32.xlu1 %v449_v51  ;;  %v479_v56 = vsel %vm315_vm1, %v478_v54, 0.0  ;;  %v1861_v47 = vcombine.low %v1723_v13, %v1723_v13 }
  0x1e   : > { %vm485_vm3 = vcmp.ne.s32.totalorder %v484_v5, 0 }
  0x1f   : > { %v486_v9 = vsel %vm485_vm3, 1, %v1648_v61  ;;  %v1898_v61 = vld [vmem:[%s1426_s14 + $0x4] sm:$0xf]  ;;  %vm1379_vm3 = vcmask 1044224  }
  0x20   : > { %v1837_v34 = vrot.slane %v486_v9, %v311_v4  ;;  %v511_v62 = vsel %vm509_vm15, %v1898_v61, 0 }
  0x21   : > { %460 = vadd.xlane.f32.xlu0 %v459_v53  ;;  %470 = vadd.xlane.f32.xlu1 %v469_v55 }
  0x22   : > { %vm491_vm13 = vcmp.eq.s32.totalorder %v1837_v34, 1  ;;  %1547 = vmatpush3.bf16.msra.mxu0 %v511_v62 }
  0x23   : > { %1558 = vmatprep.subr.bf16.mxu0 %v1645_v1 }
  0x25   : > { %480 = vadd.xlane.f32.xlu0 %v479_v56 }
  0x3b   : > { %557 = vrot.lane.b32.xlu0 %v1727_v14, %s1647_s7 }
  0x3f   : > { %568 = vrot.lane.b32.xlu0 %v1861_v47, %s1649_s11 }
  0xa6   : > { %v421_v60 = vpop.xlane.xlu0 %420  ;;  %v441_v63 = vpop.xlane.xlu1 %440 }
  0xaa   : > { %v431_v3 = vpop.xlane.xlu0 %430  ;;  %v451_v0 = vpop.xlane.xlu1 %450 }
  0xae   : > { %v461_v6 = vpop.xlane.xlu0 %460  ;;  %v471_v37 = vpop.xlane.xlu1 %470 }
  0xb2   : > { %v481_v39 = vpop.xlane.xlu0 %480 }
  0xb6   : > { %v558_v45 = vpop.permute.xlu0 %557 }
  0xb7   : > { %v560_v46 = vmul.f32 %v558_v45, %v1740_v19 }
  0xb9   : > { %v561_v48 = vpack.c.bf16 %v560_v46, %v560_v46 }
  0xba   : > { %v569_v50 = vpop.permute.xlu0 %568 }
  0xbb   : > { %563 = vrot.lane.b32.xlu0 %v561_v48, %s1649_s11  ;;  %v1869_v51 = vsel %vm315_vm1, %v569_v50, 0 }
  0xbc   : > { %1553 = vmatpush3.bf16.xpose.msra.mxu1 %v1869_v51 }
  0xbd   : > { %1564 = vmatprep.subr.bf16.mxu1 %v1645_v1 }
  0xed   : > { %v356_v7 = vpop.f32.mrb[0].mxu0  ;;  %v405_v8 = vpop.f32.mrb[0].mxu1 }
  0xee   : > { %v411_v10 = vsel %vm294_vm4, %v356_v7, 0.0  ;;  %v1538_v11 = vpop.f32.mrb[1].mxu0  ;;  %v1544_v12 = vpop.f32.mrb[1].mxu1 }
  0xef   : > { %v412_v21 = vsel %vm295_vm5, %v405_v8, %v411_v10  ;;  %v359_v26 = vpop.f32.mrb[2].mxu0  ;;  %v408_v27 = vpop.f32.mrb[2].mxu1 }
  0xf0   : > { %v422_v29 = vsel %vm297_vm6, %v421_v60, %v412_v21  ;;  %v1539_v31 = vpop.f32.mrb[3].mxu0  ;;  %v1545_v33 = vpop.f32.mrb[3].mxu1 }
  0xf1   : > { %v432_v35 = vsel %vm299_vm7, %v431_v3, %v422_v29 }
  0xf2   : > { %v442_v36 = vsel %vm301_vm8, %v441_v63, %v432_v35 }
  0xf3   : > { %v452_v38 = vsel %vm302_vm9, %v451_v0, %v442_v36 }
  0xf4   : > { %v462_v2 = vsel %vm304_vm10, %v461_v6, %v452_v38 }
  0xf5   : > { %v472_v4 = vsel %vm306_vm11, %v471_v37, %v462_v2 }
  0xf6   : > { %v482_v41 = vsel %vm308_vm12, %v481_v39, %v472_v4 }
  0xf7   : > { %v492_v42 = vsel %vm491_vm13, %v482_v41, -1e+30 }
  0xf8   : > { %v494_v43 = vsel %vm493_vm14, %v492_v42, -inf }
  0xf9   : > { %495 = vmax.xlane.f32.xlu1 %v494_v43 }
 0x10a   : > { %617 = vrot.lane.b32.xlu1 %v1732_v15, %s1647_s7 }
 0x12d   : > { %v564_v13 = vpop.permute.xlu0 %563 }
 0x12e   : > { %1555 = vmatmul.mubr.msk.bf16.vlgmr.msra.gmra.mrb[4].mxu1 %vm315_vm1, %v564_v13 }
 0x12f   : > { %1566 = vmatprep.mubr.msk.bf16.mxu1 %vm1646_vm0, %v1645_v1 }
 0x186   : > { %v496_v52 = vpop.xlane.xlu1 %495 }
 0x187   : > { %v497_v53 = vsub.f32 %v492_v42, %v496_v52 }
 0x189   : > { %v498_v54 = vmul.f32 1.442695, %v497_v53 }
 0x18a   : > { %v618_v55 = vpop.permute.xlu1 %617 }
 0x18b   : > { %1621 = vpow2.f32 %v498_v54  ;;  %v620_v56 = vmul.f32 %v618_v55, %v1740_v19 }
 0x18d   : > { %v621_v57 = vpack.c.bf16 %v620_v56, %v620_v56 }
 0x18f   : > { %623 = vrot.lane.b32.xlu0 %v621_v57, %s1649_s11 }
 0x193   : > { %671 = vrot.lane.b32.xlu0 %v1734_v16, %s1647_s7 }
 0x195   : > { %v1622_v59 = vpop.eup %1621 }
 0x196   : > { %v500_v60 = vsel %vm493_vm14, %v1622_v59, 0.0 }
 0x197   : > { %501 = vadd.xlane.f32.xlu1 %v500_v60  ;;  %685 = vrot.lane.b32.xlu0 %v1738_v18, %s1647_s7 }
 0x19b   : > { %699 = vrot.lane.b32.xlu0 %v1736_v17, %s1647_s7 }
 0x19f   : > { %713 = vrot.lane.b32.xlu0 %v1747_v22, %s1647_s7 }
 0x1a3   : > { %727 = vrot.lane.b32.xlu0 %v1749_v23, %s1647_s7 }
 0x1a7   : > { %755 = vrot.lane.b32.xlu0 %v1753_v25, %s1647_s7 }
 0x1a8   : > { %741 = vrot.lane.b32.xlu1 %v1751_v24, %s1647_s7 }
 0x201   : > { %v624_v63 = vpop.permute.xlu0 %623  ;;  %v610_v43 = vpop.f32.mrb[4].mxu1 }
 0x202   : > { %v1556_v45 = vpop.f32.mrb[5].mxu1 }
 0x203   : > { %v613_v46 = vpop.f32.mrb[6].mxu1 }
 0x204   : > { %v1557_v48 = vpop.f32.mrb[7].mxu1 }
 0x205   : > { %v672_v3 = vpop.permute.xlu0 %671  ;;  %v1974_v48 = vcombine.low %v1898_v61, %v1898_v61 }
 0x206   : > { %v674_v5 = vmul.f32 %v672_v3, %v1740_v19 }
 0x208   : > { %v675_v0 = vmul.f32 %v674_v5, %v1760_v28 }
 0x209   : > { %v686_v6 = vpop.permute.xlu0 %685 }
 0x20a   : > { %v688_v7 = vmul.f32 %v686_v6, %v1740_v19  ;;  %677 = vrot.lane.b32.xlu0 %v675_v0, %s1649_s11 }
 0x20c   : > { %v689_v8 = vmul.f32 %v688_v7, %v1772_v32 }
 0x20d   : > { %v700_v9 = vpop.permute.xlu0 %699 }
 0x20e   : > { %v702_v10 = vmul.f32 %v700_v9, %v1740_v19  ;;  %691 = vrot.lane.b32.xlu0 %v689_v8, %s1649_s11  ;;  %v668_v9 = vsel %vm294_vm4, %v610_v43, 0.0 }
 0x210   : > { %v703_v11 = vmul.f32 %v702_v10, %v1767_v30 }
 0x211   : > { %v714_v12 = vpop.permute.xlu0 %713 }
 0x212   : > { %v716_v21 = vmul.f32 %v714_v12, %v1740_v19  ;;  %705 = vrot.lane.b32.xlu0 %v703_v11, %s1649_s11 }
 0x214   : > { %v717_v26 = vmul.f32 %v716_v21, %v1743_v20 }
 0x215   : > { %v728_v27 = vpop.permute.xlu0 %727 }
 0x216   : > { %v730_v29 = vmul.f32 %v728_v27, %v1740_v19  ;;  %719 = vrot.lane.b32.xlu0 %v717_v26, %s1649_s11 }
 0x218   : > { %v731_v31 = vmul.f32 %v730_v29, %v1782_v40 }
 0x219   : > { %v756_v33 = vpop.permute.xlu0 %755 }
 0x21a   : > { %733 = vrot.lane.b32.xlu1 %v731_v31, %s1649_s11  ;;  %v758_v35 = vmul.f32 %v756_v33, %v1740_v19 }
 0x21c   : > { %v759_v36 = vmul.f32 %v758_v35, %v1799_v49 }
 0x21e   : > { %761 = vrot.lane.b32.xlu1 %v759_v36, %s1649_s11 }
 0x224   : > { %v502_v37 = vpop.xlane.xlu1 %501 }
 0x225   : > { %1623 = vrcp.f32 %v502_v37 }
 0x228   : > { %v742_v38 = vpop.permute.xlu1 %741 }
 0x229   : > { %v744_v39 = vmul.f32 %v742_v38, %v1740_v19 }
 0x22b   : > { %v745_v2 = vmul.f32 %v744_v39, %v1789_v44 }
 0x22d   : > { %747 = vrot.lane.b32.xlu0 %v745_v2, %s1649_s11 }
 0x22f   : > { %v1624_v4 = vpop.eup %1623 }
 0x230   : > { %v504_v41 = vmul.f32 %v1624_v4, %v1622_v59 }
 0x232   : > { %v505_v42 = vpack.c.bf16 %v504_v41, %v504_v41 }
 0x234   : > { %1549 = vmatmul.mubr.msk.bf16.vlgmr.msra.gmra.mrb[4].mxu0 %vm493_vm14, %v505_v42 }
 0x235   : > { %1559 = vmatpush3.bf16.xpose.msra.mxu0 %v1869_v51  ;;  %1560 = vmatprep.mubr.msk.bf16.mxu0 %vm1646_vm0, %v1645_v1 }
 0x236   : > { %1570 = vmatprep.subr.bf16.mxu0 %v1645_v1 }
 0x23c   : > { %1561 = vmatmul.mubr.msk.bf16.vlgmr.msra.gmra.mrb[8].mxu0 %vm315_vm1, %v624_v63 }
 0x23d   : > { %1572 = vmatprep.mubr.msk.bf16.mxu0 %vm1646_vm0, %v1645_v1 }
 0x27c   : > { %v678_v50 = vpop.permute.xlu0 %677 }
 0x27d   : > { %v680_v13 = vsel %vm315_vm1, %v678_v50, 0.0 }
 0x27e   : > { %681 = vadd.xlane.f32.xlu0 %v680_v13 }
 0x280   : > { %v692_v52 = vpop.permute.xlu0 %691 }
 0x281   : > { %v694_v51 = vsel %vm315_vm1, %v692_v52, 0.0 }
 0x282   : > { %695 = vadd.xlane.f32.xlu1 %v694_v51 }
 0x284   : > { %v706_v53 = vpop.permute.xlu0 %705 }
 0x285   : > { %v708_v54 = vsel %vm315_vm1, %v706_v53, 0.0 }
 0x286   : > { %709 = vadd.xlane.f32.xlu0 %v708_v54 }
 0x288   : > { %v720_v55 = vpop.permute.xlu0 %719 }
 0x289   : > { %v722_v56 = vsel %vm315_vm1, %v720_v55, 0.0 }
 0x28a   : > { %723 = vadd.xlane.f32.xlu0 %v722_v56 }
 0x28c   : > { %v734_v57 = vpop.permute.xlu1 %733 }
 0x28d   : > { %v736_v59 = vsel %vm315_vm1, %v734_v57, 0.0 }
 0x28e   : > { %737 = vadd.xlane.f32.xlu1 %v736_v59 }
 0x290   : > { %v762_v60 = vpop.permute.xlu1 %761 }
 0x291   : > { %v764_v62 = vsel %vm315_vm1, %v762_v60, 0.0 }
 0x292   : > { %765 = vadd.xlane.f32.xlu1 %v764_v62 }
 0x29f   : > { %v748_v63 = vpop.permute.xlu0 %747 }
 0x2a0   : > { %v750_v3 = vsel %vm315_vm1, %v748_v63, 0.0 }
 0x2a1   : > { %751 = vadd.xlane.f32.xlu0 %v750_v3 }
 0x2a3   : > { %841 = vrot.lane.b32.xlu1 %v1727_v14, %s1650_s15 }
 0x307   : > { %v547_v5 = vpop.f32.mrb[4].mxu0 }
 0x308   : > { %v553_v0 = vpack.c.bf16 %v547_v5, %v547_v5  ;;  %v1550_v6 = vpop.f32.mrb[5].mxu0 }
 0x309   : > { %v550_v7 = vpop.f32.mrb[6].mxu0 }
 0x30a   : > { %555 = vst.msk [vmem:[%s1946_s20] sm:$0xf] %vm554_vm2, %v553_v0  ;;  %v1551_v8 = vpop.f32.mrb[7].mxu0 }
 0x30b   : > { %v682_v27 = vpop.xlane.xlu0 %681 }
 0x30f   : > { %v662_v10 = vpop.f32.mrb[8].mxu0  ;;  %v696_v31 = vpop.xlane.xlu1 %695 }
 0x310   : > { %v669_v11 = vsel %vm295_vm5, %v662_v10, %v668_v9  ;;  %v1562_v12 = vpop.f32.mrb[9].mxu0 }
 0x311   : > { %v665_v21 = vpop.f32.mrb[10].mxu0  ;;  %v683_v33 = vsel %vm297_vm6, %v682_v27, %v669_v11 }
 0x312   : > { %v1563_v26 = vpop.f32.mrb[11].mxu0  ;;  %v697_v35 = vsel %vm299_vm7, %v696_v31, %v683_v33 }
 0x313   : > { %v710_v29 = vpop.xlane.xlu0 %709 }
 0x314   : > { %v711_v38 = vsel %vm301_vm8, %v710_v29, %v697_v35 }
 0x317   : > { %v724_v37 = vpop.xlane.xlu0 %723 }
 0x318   : > { %v725_v39 = vsel %vm302_vm9, %v724_v37, %v711_v38 }
 0x31b   : > { %v738_v36 = vpop.xlane.xlu1 %737 }
 0x31c   : > { %v739_v4 = vsel %vm304_vm10, %v738_v36, %v725_v39 }
 0x31f   : > { %v766_v2 = vpop.xlane.xlu1 %765 }
 0x323   : > { %v842_v50 = vpop.permute.xlu1 %841 }
 0x324   : > { %v844_v13 = vmul.f32 %v842_v50, %v1740_v19 }
 0x326   : > { %v845_v52 = vpack.c.bf16 %v844_v13, %v844_v13 }
 0x32e   : > { %v752_v41 = vpop.xlane.xlu0 %751 }
 0x32f   : > { %v753_v42 = vsel %vm306_vm11, %v752_v41, %v739_v4 }
 0x330   : > { %v767_v43 = vsel %vm308_vm12, %v766_v2, %v753_v42 }
 0x331   : > { %v768_v45 = vsel %vm491_vm13, %v767_v43, -1e+30 }
 0x332   : > { %v769_v46 = vsel %vm493_vm14, %v768_v45, -inf }
 0x333   : > { %770 = vmax.xlane.f32.xlu0 %v769_v46 }
 0x349   : > { %897 = vrot.lane.b32.xlu0 %v1732_v15, %s1650_s15 }
 0x34d   : > { %784 = vrot.lane.b32.xlu0 %v1974_v48, %s1649_s11 }
 0x351   : > { %849 = vrot.lane.b32.xlu0 %v1861_v47, %s1650_s15 }
 0x355   : > { %847 = vrot.lane.b32.xlu0 %v845_v52, %s1650_s15 }
 0x3c0   : > { %v771_v51 = vpop.xlane.xlu0 %770 }
 0x3c1   : > { %v772_v53 = vsub.f32 %v768_v45, %v771_v51 }
 0x3c3   : > { %v773_v54 = vmul.f32 1.442695, %v772_v53 }
 0x3c4   : > { %v898_v55 = vpop.permute.xlu0 %897 }
 0x3c5   : > { %1625 = vpow2.f32 %v773_v54  ;;  %v900_v61 = vmul.f32 %v898_v55, %v1740_v19 }
 0x3c7   : > { %v901_v56 = vpack.c.bf16 %v900_v61, %v900_v61 }
 0x3c8   : > { %v785_v57 = vpop.permute.xlu0 %784 }
 0x3c9   : > { %903 = vrot.lane.b32.xlu0 %v901_v56, %s1650_s15  ;;  %v790_v59 = vsel %vm509_vm15, %v785_v57, 0 }
 0x3ca   : > { %1565 = vmatpush3.bf16.msra.mxu1 %v790_v59 }
 0x3cb   : > { %1576 = vmatprep.subr.bf16.mxu1 %v1645_v1 }
 0x3cc   : > { %v850_v60 = vpop.permute.xlu0 %849 }
 0x3cd   : > { %950 = vrot.lane.b32.xlu0 %v1734_v16, %s1650_s15  ;;  %v855_v62 = vsel %vm315_vm1, %v850_v60, 0 }
 0x3ce   : > { %1571 = vmatpush3.bf16.xpose.msra.mxu0 %v855_v62 }
 0x3cf   : > { %v1626_v63 = vpop.eup %1625  ;;  %1582 = vmatprep.subr.bf16.mxu0 %v1645_v1 }
 0x3d0   : > { %v775_v3 = vsel %vm493_vm14, %v1626_v63, 0.0  ;;  %v848_v5 = vpop.permute.xlu0 %847 }
 0x3d1   : > { %776 = vadd.xlane.f32.xlu1 %v775_v3  ;;  %963 = vrot.lane.b32.xlu0 %v1738_v18, %s1650_s15 }
 0x3d5   : > { %976 = vrot.lane.b32.xlu0 %v1736_v17, %s1650_s15  ;;  %1573 = vmatmul.mubr.msk.bf16.vlgmr.msra.gmra.mrb[12].mxu0 %vm315_vm1, %v848_v5 }
 0x3d6   : > { %1584 = vmatprep.mubr.msk.bf16.mxu0 %vm1646_vm0, %v1645_v1 }
 0x3d9   : > { %989 = vrot.lane.b32.xlu0 %v1747_v22, %s1650_s15 }
 0x3dd   : > { %1015 = vrot.lane.b32.xlu0 %v1751_v24, %s1650_s15 }
 0x3e1   : > { %1028 = vrot.lane.b32.xlu0 %v1753_v25, %s1650_s15 }
 0x3e2   : > { %1002 = vrot.lane.b32.xlu1 %v1749_v23, %s1650_s15 }
 0x43b   : > { %v904_v0 = vpop.permute.xlu0 %903 }
 0x43f   : > { %v951_v6 = vpop.permute.xlu0 %950 }
 0x440   : > { %v953_v7 = vmul.f32 %v951_v6, %v1740_v19 }
 0x442   : > { %v954_v8 = vmul.f32 %v953_v7, %v1760_v28 }
 0x443   : > { %v964_v9 = vpop.permute.xlu0 %963 }
 0x444   : > { %v966_v10 = vmul.f32 %v964_v9, %v1740_v19  ;;  %956 = vrot.lane.b32.xlu0 %v954_v8, %s1650_s15 }
 0x446   : > { %v967_v11 = vmul.f32 %v966_v10, %v1772_v32 }
 0x447   : > { %v977_v12 = vpop.permute.xlu0 %976 }
 0x448   : > { %v979_v21 = vmul.f32 %v977_v12, %v1740_v19  ;;  %969 = vrot.lane.b32.xlu0 %v967_v11, %s1650_s15 }
 0x44a   : > { %v980_v26 = vmul.f32 %v979_v21, %v1767_v30 }
 0x44b   : > { %v990_v27 = vpop.permute.xlu0 %989 }
 0x44c   : > { %v992_v29 = vmul.f32 %v990_v27, %v1740_v19  ;;  %982 = vrot.lane.b32.xlu1 %v980_v26, %s1650_s15 }
 0x44e   : > { %v993_v31 = vmul.f32 %v992_v29, %v1743_v20 }
 0x44f   : > { %v1016_v33 = vpop.permute.xlu0 %1015 }
 0x450   : > { %995 = vrot.lane.b32.xlu0 %v993_v31, %s1650_s15  ;;  %v1018_v35 = vmul.f32 %v1016_v33, %v1740_v19 }
 0x452   : > { %v1019_v36 = vmul.f32 %v1018_v35, %v1789_v44 }
 0x453   : > { %v1029_v38 = vpop.permute.xlu0 %1028 }
 0x454   : > { %1021 = vrot.lane.b32.xlu0 %v1019_v36, %s1650_s15  ;;  %v1031_v4 = vmul.f32 %v1029_v38, %v1740_v19 }
 0x456   : > { %v1032_v42 = vmul.f32 %v1031_v4, %v1799_v49 }
 0x45e   : > { %v777_v37 = vpop.xlane.xlu1 %776 }
 0x45f   : > { %1627 = vrcp.f32 %v777_v37 }
 0x462   : > { %v1003_v39 = vpop.permute.xlu1 %1002 }
 0x463   : > { %v1005_v2 = vmul.f32 %v1003_v39, %v1740_v19 }
 0x465   : > { %v1006_v41 = vmul.f32 %v1005_v2, %v1782_v40 }
 0x467   : > { %1008 = vrot.lane.b32.xlu1 %v1006_v41, %s1650_s15 }
 0x469   : > { %v1628_v43 = vpop.eup %1627 }
 0x46a   : > { %v779_v45 = vmul.f32 %v1628_v43, %v1626_v63 }
 0x46b   : > { %1034 = vrot.lane.b32.xlu1 %v1032_v42, %s1650_s15 }
 0x46c   : > { %v780_v46 = vpack.c.bf16 %v779_v45, %v779_v45 }
 0x46e   : > { %1567 = vmatmul.mubr.msk.bf16.vlgmr.msra.gmra.mrb[8].mxu1 %vm493_vm14, %v780_v46 }
 0x46f   : > { %1577 = vmatpush3.bf16.xpose.msra.mxu1 %v855_v62  ;;  %1578 = vmatprep.mubr.msk.bf16.mxu1 %vm1646_vm0, %v1645_v1 }
 0x470   : > { %1588 = vmatprep.subr.bf16.mxu1 %v1645_v1 }
 0x476   : > { %1579 = vmatmul.mubr.msk.bf16.vlgmr.msra.gmra.mrb[12].mxu1 %vm315_vm1, %v904_v0 }
 0x477   : > { %1590 = vmatprep.mubr.msk.bf16.mxu1 %vm1646_vm0, %v1645_v1 }
 0x4a8   : > { %v891_v50 = vpop.f32.mrb[12].mxu0 }
 0x4a9   : > { %v1574_v13 = vpop.f32.mrb[13].mxu0  ;;  %v948_v11 = vsel %vm294_vm4, %v891_v50, 0.0 }
 0x4aa   : > { %v894_v52 = vpop.f32.mrb[14].mxu0 }
 0x4ab   : > { %v1575_v51 = vpop.f32.mrb[15].mxu0 }
 0x4b6   : > { %v957_v53 = vpop.permute.xlu0 %956 }
 0x4b7   : > { %v959_v54 = vsel %vm315_vm1, %v957_v53, 0.0 }
 0x4b8   : > { %960 = vadd.xlane.f32.xlu0 %v959_v54 }
 0x4ba   : > { %v970_v55 = vpop.permute.xlu0 %969 }
 0x4bb   : > { %v972_v61 = vsel %vm315_vm1, %v970_v55, 0.0 }
 0x4bc   : > { %973 = vadd.xlane.f32.xlu1 %v972_v61 }
 0x4be   : > { %v983_v56 = vpop.permute.xlu1 %982 }
 0x4bf   : > { %v985_v57 = vsel %vm315_vm1, %v983_v56, 0.0 }
 0x4c0   : > { %986 = vadd.xlane.f32.xlu0 %v985_v57 }
 0x4c2   : > { %v996_v59 = vpop.permute.xlu0 %995 }
 0x4c3   : > { %v998_v60 = vsel %vm315_vm1, %v996_v59, 0.0 }
 0x4c4   : > { %999 = vadd.xlane.f32.xlu0 %v998_v60 }
 0x4c6   : > { %v1022_v62 = vpop.permute.xlu0 %1021 }
 0x4c7   : > { %v1024_v63 = vsel %vm315_vm1, %v1022_v62, 0.0 }
 0x4c8   : > { %1025 = vadd.xlane.f32.xlu0 %v1024_v63 }
 0x4d9   : > { %v1009_v3 = vpop.permute.xlu1 %1008 }
 0x4da   : > { %v1011_v5 = vsel %vm315_vm1, %v1009_v3, 0.0 }
 0x4db   : > { %1012 = vadd.xlane.f32.xlu1 %v1011_v5 }
 0x4dd   : > { %v1035_v0 = vpop.permute.xlu1 %1034 }
 0x4de   : > { %v1037_v6 = vsel %vm315_vm1, %v1035_v0, 0.0 }
 0x4df   : > { %1038 = vadd.xlane.f32.xlu1 %v1037_v6 }
 0x4f0   : > { %1111 = vrot.lane.b32.xlu1 %v1727_v14, %s1649_s11 }
 0x541   : > { %v2043_v7 = vpop.f32.mrb[8].mxu1 }
 0x542   : > { %v1568_v8 = vpop.f32.mrb[9].mxu1 }
 0x543   : > { %v829_v9 = vpop.f32.mrb[10].mxu1 }
 0x544   : > { %v1569_v10 = vpop.f32.mrb[11].mxu1 }
 0x545   : > { %v961_v31 = vpop.xlane.xlu0 %960 }
 0x549   : > { %v942_v12 = vpop.f32.mrb[12].mxu1  ;;  %v974_v35 = vpop.xlane.xlu1 %973 }
 0x54a   : > { %v949_v21 = vsel %vm295_vm5, %v942_v12, %v948_v11  ;;  %v1580_v26 = vpop.f32.mrb[13].mxu1 }
 0x54b   : > { %v945_v27 = vpop.f32.mrb[14].mxu1  ;;  %v962_v14 = vsel %vm297_vm6, %v961_v31, %v949_v21 }
 0x54c   : > { %v1581_v29 = vpop.f32.mrb[15].mxu1  ;;  %v975_v36 = vsel %vm299_vm7, %v974_v35, %v962_v14 }
 0x54d   : > { %v987_v33 = vpop.xlane.xlu0 %986 }
 0x54e   : > { %v988_v38 = vsel %vm301_vm8, %v987_v33, %v975_v36 }
 0x551   : > { %v1000_v37 = vpop.xlane.xlu0 %999 }
 0x552   : > { %v1001_v39 = vsel %vm302_vm9, %v1000_v37, %v988_v38 }
 0x555   : > { %v1026_v41 = vpop.xlane.xlu0 %1025 }
 0x568   : > { %v1013_v2 = vpop.xlane.xlu1 %1012 }
 0x569   : > { %v1014_v4 = vsel %vm304_vm10, %v1013_v2, %v1001_v39 }
 0x56a   : > { %v1027_v42 = vsel %vm306_vm11, %v1026_v41, %v1014_v4 }
 0x56c   : > { %v1039_v43 = vpop.xlane.xlu1 %1038 }
 0x56d   : > { %v1040_v45 = vsel %vm308_vm12, %v1039_v43, %v1027_v42 }
 0x56e   : > { %v1041_v46 = vsel %vm491_vm13, %v1040_v45, -1e+30 }
 0x56f   : > { %v1042_v50 = vsel %vm493_vm14, %v1041_v46, -inf }
 0x570   : > { %1043 = vmax.xlane.f32.xlu0 %v1042_v50  ;;  %v1112_v13 = vpop.permute.xlu1 %1111 }
 0x571   : > { %v1114_v52 = vmul.f32 %v1112_v13, %v1740_v19  ;;  %v1507_v13 = vpack.c.bf16 %v2043_v7, %v2043_v7 }
 0x573   : > { %v1115_v51 = vpack.c.bf16 %v1114_v52, %v1114_v52 }
 0x586   : > { %1167 = vrot.lane.b32.xlu0 %v1732_v15, %s1649_s11 }
 0x58a   : > { %1054 = vrot.lane.b32.xlu0 %v1974_v48, %s1650_s15 }
 0x58e   : > { %1119 = vrot.lane.b32.xlu0 %v1861_v47, %s1647_s7 }
 0x592   : > { %1117 = vrot.lane.b32.xlu0 %v1115_v51, %s1647_s7 }
 0x5fd   : > { %v1044_v53 = vpop.xlane.xlu0 %1043 }
 0x5fe   : > { %v1045_v54 = vsub.f32 %v1041_v46, %v1044_v53 }
 0x600   : > { %v1046_v55 = vmul.f32 1.442695, %v1045_v54 }
 0x601   : > { %v1168_v61 = vpop.permute.xlu0 %1167 }
 0x602   : > { %1629 = vpow2.f32 %v1046_v55  ;;  %v1170_v56 = vmul.f32 %v1168_v61, %v1740_v19 }
 0x604   : > { %v1171_v15 = vpack.c.bf16 %v1170_v56, %v1170_v56 }
 0x605   : > { %v1055_v57 = vpop.permute.xlu0 %1054 }
 0x606   : > { %1173 = vrot.lane.b32.xlu0 %v1171_v15, %s1647_s7  ;;  %v1060_v59 = vsel %vm509_vm15, %v1055_v57, 0 }
 0x607   : > { %1583 = vmatpush3.bf16.msra.mxu0 %v1060_v59 }
 0x608   : > { %1594 = vmatprep.subr.bf16.mxu0 %v1645_v1 }
 0x609   : > { %v1120_v60 = vpop.permute.xlu0 %1119 }
 0x60a   : > { %1220 = vrot.lane.b32.xlu0 %v1734_v16, %s1649_s11  ;;  %v1125_v47 = vsel %vm315_vm1, %v1120_v60, 0 }
 0x60b   : > { %1589 = vmatpush3.bf16.xpose.msra.mxu1 %v1125_v47 }
 0x60c   : > { %v1630_v62 = vpop.eup %1629  ;;  %1600 = vmatprep.subr.bf16.mxu1 %v1645_v1 }
 0x60d   : > { %v1048_v63 = vsel %vm493_vm14, %v1630_v62, 0.0  ;;  %v1118_v3 = vpop.permute.xlu0 %1117 }
 0x60e   : > { %1049 = vadd.xlane.f32.xlu1 %v1048_v63  ;;  %1233 = vrot.lane.b32.xlu0 %v1738_v18, %s1649_s11 }
 0x612   : > { %1246 = vrot.lane.b32.xlu0 %v1736_v17, %s1649_s11  ;;  %1591 = vmatmul.mubr.msk.bf16.vlgmr.msra.gmra.mrb[16].mxu1 %vm315_vm1, %v1118_v3 }
 0x613   : > { %1602 = vmatprep.mubr.msk.bf16.mxu1 %vm1646_vm0, %v1645_v1 }
 0x616   : > { %1259 = vrot.lane.b32.xlu0 %v1747_v22, %s1649_s11 }
 0x61a   : > { %1285 = vrot.lane.b32.xlu0 %v1751_v24, %s1649_s11 }
 0x61e   : > { %1298 = vrot.lane.b32.xlu0 %v1753_v25, %s1649_s11 }
 0x61f   : > { %1272 = vrot.lane.b32.xlu1 %v1749_v23, %s1649_s11 }
 0x678   : > { %v1174_v16 = vpop.permute.xlu0 %1173 }
 0x67c   : > { %v1221_v18 = vpop.permute.xlu0 %1220 }
 0x67d   : > { %v1223_v17 = vmul.f32 %v1221_v18, %v1740_v19 }
 0x67f   : > { %v1224_v5 = vmul.f32 %v1223_v17, %v1760_v28 }
 0x680   : > { %v1234_v0 = vpop.permute.xlu0 %1233 }
 0x681   : > { %v1236_v6 = vmul.f32 %v1234_v0, %v1740_v19  ;;  %1226 = vrot.lane.b32.xlu0 %v1224_v5, %s1647_s7 }
 0x683   : > { %v1237_v22 = vmul.f32 %v1236_v6, %v1772_v32 }
 0x684   : > { %v1247_v24 = vpop.permute.xlu0 %1246 }
 0x685   : > { %v1249_v8 = vmul.f32 %v1247_v24, %v1740_v19  ;;  %1239 = vrot.lane.b32.xlu0 %v1237_v22, %s1647_s7 }
 0x687   : > { %v1250_v23 = vmul.f32 %v1249_v8, %v1767_v30 }
 0x688   : > { %v1260_v25 = vpop.permute.xlu0 %1259 }
 0x689   : > { %v1262_v9 = vmul.f32 %v1260_v25, %v1740_v19  ;;  %1252 = vrot.lane.b32.xlu1 %v1250_v23, %s1647_s7 }
 0x68b   : > { %v1263_v28 = vmul.f32 %v1262_v9, %v1743_v20 }
 0x68c   : > { %v1286_v10 = vpop.permute.xlu0 %1285 }
 0x68d   : > { %1265 = vrot.lane.b32.xlu0 %v1263_v28, %s1647_s7  ;;  %v1288_v11 = vmul.f32 %v1286_v10, %v1740_v19 }
 0x68f   : > { %v1289_v32 = vmul.f32 %v1288_v11, %v1789_v44 }
 0x690   : > { %v1299_v21 = vpop.permute.xlu0 %1298 }
 0x691   : > { %1291 = vrot.lane.b32.xlu0 %v1289_v32, %s1647_s7  ;;  %v1301_v27 = vmul.f32 %v1299_v21, %v1740_v19 }
 0x693   : > { %v1302_v20 = vmul.f32 %v1301_v27, %v1799_v49 }
 0x69b   : > { %v1050_v12 = vpop.xlane.xlu1 %1049 }
 0x69c   : > { %1631 = vrcp.f32 %v1050_v12 }
 0x69f   : > { %v1273_v30 = vpop.permute.xlu1 %1272 }
 0x6a0   : > { %v1275_v26 = vmul.f32 %v1273_v30, %v1740_v19 }
 0x6a2   : > { %v1276_v29 = vmul.f32 %v1275_v26, %v1782_v40 }
 0x6a4   : > { %1278 = vrot.lane.b32.xlu1 %v1276_v29, %s1647_s7 }
 0x6a6   : > { %v1632_v31 = vpop.eup %1631 }
 0x6a7   : > { %v1052_v33 = vmul.f32 %v1632_v31, %v1630_v62 }
 0x6a8   : > { %1304 = vrot.lane.b32.xlu1 %v1302_v20, %s1647_s7 }
 0x6a9   : > { %v1053_v44 = vpack.c.bf16 %v1052_v33, %v1052_v33 }
 0x6ab   : > { %1585 = vmatmul.mubr.msk.bf16.vlgmr.msra.gmra.mrb[16].mxu0 %vm493_vm14, %v1053_v44 }
 0x6ac   : > { %1595 = vmatpush3.bf16.xpose.msra.mxu0 %v1125_v47  ;;  %1596 = vmatprep.mubr.msk.bf16.mxu0 %vm1646_vm0, %v1645_v1  ;;  %vm839_vm0 = vcmask 519424  }
 0x6b3   : > { %1597 = vmatmul.mubr.msk.bf16.vlgmr.msra.gmra.mrb[20].mxu0 %vm315_vm1, %v1174_v16 }
 0x6e5   : > { %v1161_v19 = vpop.f32.mrb[16].mxu1 }
 0x6e6   : > { %v1592_v14 = vpop.f32.mrb[17].mxu1  ;;  %v1218_v55 = vsel %vm294_vm4, %v1161_v19, 0.0 }
 0x6e7   : > { %v1164_v40 = vpop.f32.mrb[18].mxu1 }
 0x6e8   : > { %v1593_v35 = vpop.f32.mrb[19].mxu1 }
 0x6f3   : > { %v1227_v49 = vpop.permute.xlu0 %1226 }
 0x6f4   : > { %v1229_v36 = vsel %vm315_vm1, %v1227_v49, 0.0 }
 0x6f5   : > { %1230 = vadd.xlane.f32.xlu0 %v1229_v36 }
 0x6f7   : > { %v1240_v37 = vpop.permute.xlu0 %1239 }
 0x6f8   : > { %v1242_v38 = vsel %vm315_vm1, %v1240_v37, 0.0 }
 0x6f9   : > { %1243 = vadd.xlane.f32.xlu1 %v1242_v38 }
 0x6fb   : > { %v1253_v39 = vpop.permute.xlu1 %1252 }
 0x6fc   : > { %v1255_v2 = vsel %vm315_vm1, %v1253_v39, 0.0 }
 0x6fd   : > { %1256 = vadd.xlane.f32.xlu0 %v1255_v2 }
 0x6ff   : > { %v1266_v4 = vpop.permute.xlu0 %1265 }
 0x700   : > { %v1268_v1 = vsel %vm315_vm1, %v1266_v4, 0.0 }
 0x701   : > { %1269 = vadd.xlane.f32.xlu0 %v1268_v1 }
 0x703   : > { %v1292_v41 = vpop.permute.xlu0 %1291 }
 0x704   : > { %v1294_v42 = vsel %vm315_vm1, %v1292_v41, 0.0 }
 0x705   : > { %1295 = vadd.xlane.f32.xlu0 %v1294_v42 }
 0x716   : > { %v1279_v43 = vpop.permute.xlu1 %1278 }
 0x717   : > { %v1281_v45 = vsel %vm315_vm1, %v1279_v43, 0.0 }
 0x718   : > { %1282 = vadd.xlane.f32.xlu1 %v1281_v45 }
 0x71a   : > { %v1305_v46 = vpop.permute.xlu1 %1304 }
 0x71b   : > { %v1307_v50 = vsel %vm315_vm1, %v1305_v46, 0.0  ;;  %vm1109_vm1 = vcmask 781824  }
 0x71c   : > { %1308 = vadd.xlane.f32.xlu1 %v1307_v50 }
 0x72d   : > { %836 = vrot.lane.b32.xlu1 %v1507_v13, %s1647_s7 }
 0x731   : > { %1324 = vrot.lane.b32.xlu1 %v1974_v48, %s1647_s7 }
 0x77e   : > { %v1096_v52 = vpop.f32.mrb[16].mxu0 }
 0x77f   : > { %v1586_v51 = vpop.f32.mrb[17].mxu0  ;;  %v1508_v58 = vpack.c.bf16 %v1096_v52, %v1096_v52 }
 0x780   : > { %v1099_v53 = vpop.f32.mrb[18].mxu0 }
 0x781   : > { %v1587_v54 = vpop.f32.mrb[19].mxu0 }
 0x782   : > { %v1231_v7 = vpop.xlane.xlu0 %1230 }
 0x786   : > { %v1212_v61 = vpop.f32.mrb[20].mxu0  ;;  %v1244_v47 = vpop.xlane.xlu1 %1243 }
 0x787   : > { %v1219_v56 = vsel %vm295_vm5, %v1212_v61, %v1218_v55  ;;  %v1598_v15 = vpop.f32.mrb[21].mxu0 }
 0x788   : > { %v1215_v57 = vpop.f32.mrb[22].mxu0  ;;  %v1232_v48 = vsel %vm297_vm6, %v1231_v7, %v1219_v56 }
 0x789   : > { %v1599_v59 = vpop.f32.mrb[23].mxu0  ;;  %v1245_v62 = vsel %vm299_vm7, %v1244_v47, %v1232_v48 }
 0x78a   : > { %v1257_v60 = vpop.xlane.xlu0 %1256 }
 0x78b   : > { %v1258_v3 = vsel %vm301_vm8, %v1257_v60, %v1245_v62 }
 0x78e   : > { %v1270_v63 = vpop.xlane.xlu0 %1269 }
 0x78f   : > { %v1271_v16 = vsel %vm302_vm9, %v1270_v63, %v1258_v3 }
 0x792   : > { %v1296_v5 = vpop.xlane.xlu0 %1295 }
 0x7a5   : > { %v1283_v18 = vpop.xlane.xlu1 %1282 }
 0x7a6   : > { %v1284_v17 = vsel %vm304_vm10, %v1283_v18, %v1271_v16 }
 0x7a7   : > { %v1297_v0 = vsel %vm306_vm11, %v1296_v5, %v1284_v17 }
 0x7a9   : > { %v1309_v6 = vpop.xlane.xlu1 %1308 }
 0x7aa   : > { %v1310_v22 = vsel %vm308_vm12, %v1309_v6, %v1297_v0 }
 0x7ab   : > { %v1311_v24 = vsel %vm491_vm13, %v1310_v22, -1e+30 }
 0x7ac   : > { %v1312_v8 = vsel %vm493_vm14, %v1311_v24, -inf }
 0x7ad   : > { %v837_v23 = vpop.permute.xlu1 %836  ;;  %1313 = vmax.xlane.f32.xlu0 %v1312_v8 }
 0x7ae   : > { %840 = vst.msk [vmem:[%s1946_s20] sm:$0xf] %vm839_vm0, %v837_v23 }
 0x7b1   : > { %v1325_v32 = vpop.permute.xlu1 %1324 }
 0x7b2   : > { %v1330_v34 = vsel %vm509_vm15, %v1325_v32, 0 }
 0x7b3   : > { %1601 = vmatpush3.bf16.msra.mxu1 %v1330_v34 }
 0x83a   : > { %v1314_v25 = vpop.xlane.xlu0 %1313 }
 0x83b   : > { %v1315_v9 = vsub.f32 %v1311_v24, %v1314_v25 }
 0x83d   : > { %v1316_v28 = vmul.f32 1.442695, %v1315_v9 }
 0x83f   : > { %1633 = vpow2.f32 %v1316_v28 }
 0x849   : > { %v1634_v10 = vpop.eup %1633 }
 0x84a   : > { %v1318_v11 = vsel %vm493_vm14, %v1634_v10, 0.0 }
 0x84b   : > { %1319 = vadd.xlane.f32.xlu0 %v1318_v11 }
 0x861   : > { %1106 = vrot.lane.b32.xlu0 %v1508_v58, %s1650_s15 }
 0x8d8   : > { %v1320_v12 = vpop.xlane.xlu0 %1319 }
 0x8d9   : > { %1635 = vrcp.f32 %v1320_v12 }
 0x8dc   : > { %v1107_v21 = vpop.permute.xlu0 %1106 }
 0x8dd   : > { %1110 = vst.msk [vmem:[%s1946_s20] sm:$0xf] %vm1109_vm1, %v1107_v21 }
 0x8e3   : > { %v1636_v30 = vpop.eup %1635 }
 0x8e4   : > { %v1322_v26 = vmul.f32 %v1636_v30, %v1634_v10 }
 0x8e6   : > { %v1323_v27 = vpack.c.bf16 %v1322_v26, %v1322_v26 }
 0x8e8   : > { %1603 = vmatmul.mubr.msk.bf16.vlgmr.msra.gmra.mrb[20].mxu1 %vm493_vm14, %v1323_v27 }
 0x9bb   : > { %v1366_v29 = vpop.f32.mrb[20].mxu1 }
 0x9bc   : > { %v1509_v20 = vpack.c.bf16 %v1366_v29, %v1366_v29  ;;  %v1604_v31 = vpop.f32.mrb[21].mxu1 }
 0x9bd   : > { %v1369_v33 = vpop.f32.mrb[22].mxu1 }
 0x9be   : > { %1376 = vrot.lane.b32.xlu1 %v1509_v20, %s1649_s11  ;;  %v1605_v44 = vpop.f32.mrb[23].mxu1 }
 0xa30   : > { %v1377_v19 = vpop.permute.xlu1 %1376 }
 0xa31   : > { %1380 = vst.msk [vmem:[%s1946_s20] sm:$0xf] %vm1379_vm3, %v1377_v19 }
 0xa32 PF: > { %s15_s18 = sadd.s32 1, %s1643_s18  }
 0xa33   : > { %p12_p4 = scmp.ge.s32.totalorder %s15_s18, 4  }
 0xa35   :  { %14 = sbr.rel (!%p12_p4) target bundleno = 1 (0x1), region = 79 }

</bundles_post_ra>
